<compile_context>
chip_gen: v7x
topology: tpu7x:2x2x1
jax: 0.10.0
libtpu: 0.0.40
codegen_flags: <defaults>
</compile_context>

<pallas_src>
import math
import functools

import jax
import jax.numpy as jnp
from jax import lax
from jax.experimental import pallas as pl
from jax.experimental.pallas import tpu as pltpu

LN_EPS = 1e-5          # nn.Transformer default layer_norm_eps
NEG_INF = -1e30        # mask value (exp underflows to exactly 0)


# ------------------------------------------------------------------
# In-kernel helpers
# ------------------------------------------------------------------

def _ln(x):
    mean = jnp.mean(x, axis=-1, keepdims=True)
    xc = x - mean
    var = jnp.mean(xc * xc, axis=-1, keepdims=True)
    return xc * lax.rsqrt(var + LN_EPS)


# ------------------------------------------------------------------
# Single fused forward kernel
# ------------------------------------------------------------------

def _saint_fwd_kernel(scal_ref, enc_in_ref, dec_in_ref, pe_ref,
                      enc_pw_ref, dec_pw_ref, misc_ref,
                      e_qkvw_ref, e_ab_ref, e_wo_ref,
                      e_w1_ref, e_c1_ref, e_w2_ref, e_vec_ref,
                      d_qkvw_ref, d_ab_ref, d_wo_ref,
                      d_w1_ref, d_c1_ref, d_w2_ref, d_vec_ref,
                      out_ref, *, n_layers, n_heads):
    Bt, S, K1 = enc_in_ref.shape
    K2 = dec_in_ref.shape[-1]
    D = pe_ref.shape[-1]
    dh = e_qkvw_ref.shape[-1]
    M = Bt * S
    scale = 1.0 / math.sqrt(dh)

    # causal mask, built once and shared by every attention block in the stack
    row = lax.broadcasted_iota(jnp.int32, (S, S), 0)
    col = lax.broadcasted_iota(jnp.int32, (S, S), 1)
    causal = col > row

    def mha(x_q, x_kv, w_ref, b_ref, wo_ref, qkv_base, wo_base, bo):
        """MHA with per-head stacked weights (no lane slices / concat / transposes)."""
        xq = x_q.astype(jnp.bfloat16)
        xk = x_kv.astype(jnp.bfloat16)
        out = jnp.zeros((M, D), jnp.float32)
        for h in range(n_heads):                       # static, fully unrolled
            iq = qkv_base + h
            ik = qkv_base + n_heads + h
            iv = qkv_base + 2 * n_heads + h
            q = jnp.dot(xq, w_ref[iq], preferred_element_type=jnp.float32) + b_ref[iq]
            k = jnp.dot(xk, w_ref[ik], preferred_element_type=jnp.float32) + b_ref[ik]
            v = jnp.dot(xk, w_ref[iv], preferred_element_type=jnp.float32) + b_ref[iv]
            # leading-dim splits only (S is a multiple of 8) -> no relayout
            q3 = q.reshape(Bt, S, dh).astype(jnp.bfloat16)
            k3 = k.reshape(Bt, S, dh).astype(jnp.bfloat16)
            v3 = v.reshape(Bt, S, dh).astype(jnp.bfloat16)
            s = jnp.einsum('bqd,bkd->bqk', q3, k3,
                           preferred_element_type=jnp.float32)
            s = jnp.where(causal, NEG_INF, s * scale)
            m = jnp.max(s, axis=-1, keepdims=True)
            p = jnp.exp(s - m)
            p = p * pl.reciprocal(jnp.sum(p, axis=-1, keepdims=True), approx=False)
            ctx = jnp.einsum('bqk,bkd->bqd', p.astype(jnp.bfloat16), v3,
                             preferred_element_type=jnp.float32)
            out = out + jnp.dot(ctx.reshape(M, dh).astype(jnp.bfloat16),
                                wo_ref[wo_base + h],
                                preferred_element_type=jnp.float32)
        return out + bo

    def enc_layer(x, l):
        vec = e_vec_ref[l]                                   # (6, D) f32
        bo, g1, b1, c2, g2, b2 = [vec[i:i + 1, :] for i in range(6)]
        a = mha(x, x, e_qkvw_ref, e_ab_ref, e_wo_ref,
                l * 3 * n_heads, l * n_heads, bo)
        h = _ln(x + a) * g1 + b1
        f = jnp.maximum(
            jnp.dot(h.astype(jnp.bfloat16), e_w1_ref[l],
                    preferred_element_type=jnp.float32) + e_c1_ref[l], 0.0)
        f = jnp.dot(f.astype(jnp.bfloat16), e_w2_ref[l],
                    preferred_element_type=jnp.float32) + c2
        return _ln(h + f) * g2 + b2

    def dec_layer(x, mem, l):
        vec = d_vec_ref[l]                                   # (9, D) f32
        sa_bo, g1, b1, ca_bo, g2, b2, c2, g3, b3 = \
            [vec[i:i + 1, :] for i in range(9)]
        a = mha(x, x, d_qkvw_ref, d_ab_ref, d_wo_ref,
                (2 * l) * 3 * n_heads, (2 * l) * n_heads, sa_bo)
        x2 = _ln(x + a) * g1 + b1
        c = mha(x2, mem, d_qkvw_ref, d_ab_ref, d_wo_ref,
                (2 * l + 1) * 3 * n_heads, (2 * l + 1) * n_heads, ca_bo)
        x3 = _ln(x2 + c) * g2 + b2
        f = jnp.maximum(
            jnp.dot(x3.astype(jnp.bfloat16), d_w1_ref[l],
                    preferred_element_type=jnp.float32) + d_c1_ref[l], 0.0)
        f = jnp.dot(f.astype(jnp.bfloat16), d_w2_ref[l],
                    preferred_element_type=jnp.float32) + c2
        return _ln(x3 + f) * g3 + b3

    misc = misc_ref[...]                                     # (8, D) f32
    enc_pb, dec_pb, enc_ng, enc_nb, dec_ng, dec_nb, fc_w = \
        [misc[i:i + 1, :] for i in range(7)]
    pe = pe_ref[...]

    # --- embedding projections + scaled positional encoding (fused) ---
    enc_x = enc_in_ref[...].reshape(M, K1).astype(jnp.bfloat16)
    mem = jnp.dot(enc_x, enc_pw_ref[...],
                  preferred_element_type=jnp.float32) + enc_pb
    mem = (mem.reshape(Bt, S, D) + scal_ref[0] * pe).reshape(M, D)

    dec_x = dec_in_ref[...].reshape(M, K2).astype(jnp.bfloat16)
    x = jnp.dot(dec_x, dec_pw_ref[...],
                preferred_element_type=jnp.float32) + dec_pb
    x = (x.reshape(Bt, S, D) + scal_ref[1] * pe).reshape(M, D)

    # --- encoder stack + final encoder norm ---
    for l in range(n_layers):
        mem = enc_layer(mem, l)
    mem = _ln(mem) * enc_ng + enc_nb

    # --- decoder stack (masked self-attn + causal cross-attn + FFN) ---
    for l in range(n_layers):
        x = dec_layer(x, mem, l)

    # --- final decoder norm + fc(D->1) row-reduction + stable sigmoid ---
    xn = _ln(x) * dec_ng + dec_nb
    z = jnp.sum(xn.reshape(Bt, S, D) * fc_w, axis=-1) + scal_ref[2]   # (Bt, S)
    ez = jnp.exp(-jnp.abs(z))
    out_ref[0] = jnp.where(z >= 0.0, 1.0 / (1.0 + ez), ez / (1.0 + ez))


# ------------------------------------------------------------------
# Wrapper
# ------------------------------------------------------------------

def saint_forward(p, test, question, tag, elapsed_question, interaction,
                  *, n_heads, n_layers):
    B, S = interaction.shape

    # embeddings (XLA gather); dropout = identity (eval semantics)
    e_test = p["emb_test"][test]
    e_question = p["emb_question"][question]
    e_tag = p["emb_tag"][tag]
    e_elapsed = p["emb_elapsed"][elapsed_question]
    e_inter = p["emb_interaction"][interaction]

    enc_in = jnp.concatenate([e_test, e_question, e_tag, e_elapsed], axis=-1)
    dec_in = jnp.concatenate([e_test, e_question, e_tag, e_elapsed, e_inter],
                             axis=-1)

    D = p["pe"].shape[-1]
    assert D % n_heads == 0
    K1 = enc_in.shape[-1]
    K2 = dec_in.shape[-1]
    pe = p["pe"][:S]

    # batch tiling: keep >=2 parallel grid steps (v7x has 2 TensorCores)
    n_tiles = 2 if (B >= 2 and B % 2 == 0) else 1
    Bt = B // n_tiles

    def bcast(shape):
        return pl.BlockSpec(tuple(shape), lambda b: (0,) * len(shape))

    weight_ops = [pe, p["enc_proj_w"], p["dec_proj_w"], p["misc_vecs"],
                  p["enc_qkv_w"], p["enc_qkv_b"], p["enc_wo"],
                  p["enc_w1"], p["enc_c1"], p["enc_w2"], p["enc_vecs"],
                  p["dec_qkv_w"], p["dec_qkv_b"], p["dec_wo"],
                  p["dec_w1"], p["dec_c1"], p["dec_w2"], p["dec_vecs"]]

    in_specs = ([pl.BlockSpec(memory_space=pltpu.MemorySpace.SMEM),   # scalars
                 pl.BlockSpec((Bt, S, K1), lambda b: (b, 0, 0)),
                 pl.BlockSpec((Bt, S, K2), lambda b: (b, 0, 0))]
                + [bcast(w.shape) for w in weight_ops])

    kern = functools.partial(_saint_fwd_kernel,
                             n_layers=n_layers, n_heads=n_heads)

    out = pl.pallas_call(
        kern,
        out_shape=jax.ShapeDtypeStruct((n_tiles, Bt, S), jnp.float32),
        grid=(n_tiles,),
        in_specs=in_specs,
        out_specs=pl.BlockSpec((1, Bt, S), lambda b: (b, 0, 0)),
        compiler_params=pltpu.CompilerParams(
            dimension_semantics=("parallel",)),
    )(p["scalars"], enc_in, dec_in, *weight_ops)

    return out.reshape(B, S)


# ------------------------------------------------------------------
# Parameter init (deterministic synthetic weights in packed layout)
# ------------------------------------------------------------------

def sinusoidal_pe(max_len, d_model):
    pos = jnp.arange(max_len, dtype=jnp.float32)[:, None]
    div = jnp.exp(jnp.arange(0, d_model, 2, dtype=jnp.float32)
                  * (-math.log(10000.0) / d_model))
    pe = jnp.zeros((max_len, d_model), jnp.float32)
    pe = pe.at[:, 0::2].set(jnp.sin(pos * div))
    pe = pe.at[:, 1::2].set(jnp.cos(pos * div))
    return pe


def init_params(key, hd, n_heads, n_layers, max_seq_len,
                n_test, n_questions, n_tag, n_elapsed):
    intd = hd // 3
    dh = hd // n_heads
    F = hd                         # dim_feedforward == hidden_dim in the spec
    state = [key]

    def nxt():
        state[0], sub = jax.random.split(state[0])
        return sub

    def rnd(shape, s=0.05):
        return jax.random.normal(nxt(), shape, jnp.float32) * s

    # full-shape weights in x@W orientation (equivalent to the PyTorch module),
    # then packed into per-head / stacked layouts for the fused kernel.
    def attn_block():
        return dict(wq=rnd((hd, hd)), wk=rnd((hd, hd)), wv=rnd((hd, hd)),
                    wo=rnd((hd, hd)),
                    bq=rnd((hd,)), bk=rnd((hd,)), bv=rnd((hd,)), bo=rnd((hd,)))

    def ffn_block():
        return dict(w1=rnd((hd, F)), c1=rnd((F,)), w2=rnd((F, hd)), c2=rnd((hd,)))

    def ln():
        return dict(g=jnp.ones((hd,), jnp.float32),
                    b=jnp.zeros((hd,), jnp.float32))

    enc_layers = [dict(sa=attn_block(), ff=ffn_block(), ln1=ln(), ln2=ln())
                  for _ in range(n_layers)]
    dec_layers = [dict(sa=attn_block(), ca=attn_block(), ff=ffn_block(),
                       ln1=ln(), ln2=ln(), ln3=ln()) for _ in range(n_layers)]

    def heads_qkv(blk):
        ws, bs = [], []
        for w, b in ((blk["wq"], blk["bq"]),
                     (blk["wk"], blk["bk"]),
                     (blk["wv"], blk["bv"])):
            for h in range(n_heads):
                ws.append(w[:, h * dh:(h + 1) * dh])            # (D, dh)
                bs.append(b[h * dh:(h + 1) * dh].reshape(1, dh))  # (1, dh)
        return ws, bs

    def heads_o(blk):
        return [blk["wo"][h * dh:(h + 1) * dh, :] for h in range(n_heads)]

    e_qkv_w, e_qkv_b, e_wo = [], [], []
    for lp in enc_layers:
        ws, bs = heads_qkv(lp["sa"])
        e_qkv_w += ws; e_qkv_b += bs; e_wo += heads_o(lp["sa"])

    d_qkv_w, d_qkv_b, d_wo = [], [], []
    for lp in dec_layers:
        for blk in (lp["sa"], lp["ca"]):
            ws, bs = heads_qkv(blk)
            d_qkv_w += ws; d_qkv_b += bs; d_wo += heads_o(blk)

    enc_vecs = jnp.stack([jnp.stack([lp["sa"]["bo"], lp["ln1"]["g"], lp["ln1"]["b"],
                                     lp["ff"]["c2"], lp["ln2"]["g"], lp["ln2"]["b"]])
                          for lp in enc_layers])                 # (L, 6, D)
    dec_vecs = jnp.stack([jnp.stack([lp["sa"]["bo"], lp["ln1"]["g"], lp["ln1"]["b"],
                                     lp["ca"]["bo"], lp["ln2"]["g"], lp["ln2"]["b"],
                                     lp["ff"]["c2"], lp["ln3"]["g"], lp["ln3"]["b"]])
                          for lp in dec_layers])                 # (L, 9, D)

    enc_proj_b = rnd((hd,)); dec_proj_b = rnd((hd,))
    enc_norm = ln(); dec_norm = ln()
    fc_w = rnd((hd,)); fc_b = rnd((1,))
    enc_scale = jnp.ones((1,), jnp.float32)
    dec_scale = jnp.ones((1,), jnp.float32)

    misc_vecs = jnp.stack([enc_proj_b, dec_proj_b,
                           enc_norm["g"], enc_norm["b"],
                           dec_norm["g"], dec_norm["b"],
                           fc_w, jnp.zeros((hd,), jnp.float32)])   # (8, D)

    bf = lambda a: a.astype(jnp.bfloat16)

    return dict(
        emb_test=rnd((n_test + 1, intd), 1.0),
        emb_question=rnd((n_questions + 1, intd), 1.0),
        emb_tag=rnd((n_tag + 1, intd), 1.0),
        emb_elapsed=rnd((n_elapsed + 1, intd), 1.0),
        emb_interaction=rnd((3, intd), 1.0),
        enc_proj_w=bf(rnd((intd * 4, hd))),
        dec_proj_w=bf(rnd((intd * 5, hd))),
        pe=sinusoidal_pe(max_seq_len, hd),
        scalars=jnp.concatenate([enc_scale, dec_scale, fc_b]),     # SMEM (3,)
        misc_vecs=misc_vecs,
        enc_qkv_w=bf(jnp.stack(e_qkv_w)),      # (L*3*H, D, dh)
        enc_qkv_b=jnp.stack(e_qkv_b),          # (L*3*H, 1, dh) f32
        enc_wo=bf(jnp.stack(e_wo)),            # (L*H, dh, D)
        enc_w1=bf(jnp.stack([lp["ff"]["w1"] for lp in enc_layers])),
        enc_c1=jnp.stack([lp["ff"]["c1"].reshape(1, F) for lp in enc_layers]),
        enc_w2=bf(jnp.stack([lp["ff"]["w2"] for lp in enc_layers])),
        enc_vecs=enc_vecs,
        dec_qkv_w=bf(jnp.stack(d_qkv_w)),      # (L*2*3*H, D, dh)
        dec_qkv_b=jnp.stack(d_qkv_b),          # (L*2*3*H, 1, dh) f32
        dec_wo=bf(jnp.stack(d_wo)),            # (L*2*H, dh, D)
        dec_w1=bf(jnp.stack([lp["ff"]["w1"] for lp in dec_layers])),
        dec_c1=jnp.stack([lp["ff"]["c1"].reshape(1, F) for lp in dec_layers]),
        dec_w2=bf(jnp.stack([lp["ff"]["w2"] for lp in dec_layers])),
        dec_vecs=dec_vecs,
    )


# ------------------------------------------------------------------
# Main
# ------------------------------------------------------------------

if __name__ == "__main__":
    B, S = 2, 8
    HIDDEN_DIM = 32
    N_HEADS = 4
    N_LAYERS = 2
    MAX_SEQ_LEN = 16
    N_TEST, N_QUESTIONS, N_TAG, N_ELAPSED = 10, 20, 5, 7

    key = jax.random.PRNGKey(0)
    k_in = jax.random.split(key, 5)
    test = jax.random.randint(k_in[0], (B, S), 0, N_TEST + 1, dtype=jnp.int32)
    question = jax.random.randint(k_in[1], (B, S), 0, N_QUESTIONS + 1, dtype=jnp.int32)
    tag = jax.random.randint(k_in[2], (B, S), 0, N_TAG + 1, dtype=jnp.int32)
    elapsed_question = jax.random.randint(k_in[3], (B, S), 0, N_ELAPSED + 1,
                                          dtype=jnp.int32)
    interaction = jax.random.randint(k_in[4], (B, S), 0, 3, dtype=jnp.int32)

    params = init_params(jax.random.PRNGKey(1), HIDDEN_DIM, N_HEADS, N_LAYERS,
                         MAX_SEQ_LEN, N_TEST, N_QUESTIONS, N_TAG, N_ELAPSED)

    forward = jax.jit(functools.partial(saint_forward,
                                        n_heads=N_HEADS, n_layers=N_LAYERS))
    preds = jax.block_until_ready(
        forward(params, test, question, tag, elapsed_question, interaction))

    assert preds.shape == (B, S)
    assert bool(jnp.all(jnp.isfinite(preds)))
    assert bool(jnp.all((preds >= 0.0) & (preds <= 1.0)))
    print("KERNEL_OK")
</pallas_src>

<mosaic_0001>
module attributes {stable_mosaic.version = 11 : i64} {
  func.func @_saint_fwd_kernel(%arg0: i32, %arg1: memref<3xf32, #tpu.memory_space<smem>>, %arg2: memref<1x8x40xf32, #tpu.memory_space<vmem>>, %arg3: memref<1x8x50xf32, #tpu.memory_space<vmem>>, %arg4: memref<8x32xf32, #tpu.memory_space<vmem>>, %arg5: memref<40x32xbf16, #tpu.memory_space<vmem>>, %arg6: memref<50x32xbf16, #tpu.memory_space<vmem>>, %arg7: memref<8x32xf32, #tpu.memory_space<vmem>>, %arg8: memref<24x32x8xbf16, #tpu.memory_space<vmem>>, %arg9: memref<24x1x8xf32, #tpu.memory_space<vmem>>, %arg10: memref<8x8x32xbf16, #tpu.memory_space<vmem>>, %arg11: memref<2x32x32xbf16, #tpu.memory_space<vmem>>, %arg12: memref<2x1x32xf32, #tpu.memory_space<vmem>>, %arg13: memref<2x32x32xbf16, #tpu.memory_space<vmem>>, %arg14: memref<2x6x32xf32, #tpu.memory_space<vmem>>, %arg15: memref<48x32x8xbf16, #tpu.memory_space<vmem>>, %arg16: memref<48x1x8xf32, #tpu.memory_space<vmem>>, %arg17: memref<16x8x32xbf16, #tpu.memory_space<vmem>>, %arg18: memref<2x32x32xbf16, #tpu.memory_space<vmem>>, %arg19: memref<2x1x32xf32, #tpu.memory_space<vmem>>, %arg20: memref<2x32x32xbf16, #tpu.memory_space<vmem>>, %arg21: memref<2x9x32xf32, #tpu.memory_space<vmem>>, %arg22: memref<1x1x8xf32, #tpu.memory_space<vmem>>) attributes {dimension_semantics = [#tpu.dimension_semantics<parallel>], iteration_bounds = array<i64: 2>, scalar_prefetch = 0 : i64, scratch_operands = 0 : i64, tpu.core_type = #tpu.core_type<tc>, window_params = [{transform_indices = @transform_0, window_bounds = array<i64: 3>}, {transform_indices = @transform_1, window_bounds = array<i64: 1, 8, 40>}, {transform_indices = @transform_2, window_bounds = array<i64: 1, 8, 50>}, {pipeline_mode = #tpu.pipeline_mode<synchronous>, transform_indices = @transform_3, window_bounds = array<i64: 8, 32>}, {pipeline_mode = #tpu.pipeline_mode<synchronous>, transform_indices = @transform_4, window_bounds = array<i64: 40, 32>}, {pipeline_mode = #tpu.pipeline_mode<synchronous>, transform_indices = @transform_5, window_bounds = array<i64: 50, 32>}, {pipeline_mode = #tpu.pipeline_mode<synchronous>, transform_indices = @transform_6, window_bounds = array<i64: 8, 32>}, {pipeline_mode = #tpu.pipeline_mode<synchronous>, transform_indices = @transform_7, window_bounds = array<i64: 24, 32, 8>}, {pipeline_mode = #tpu.pipeline_mode<synchronous>, transform_indices = @transform_8, window_bounds = array<i64: 24, 1, 8>}, {pipeline_mode = #tpu.pipeline_mode<synchronous>, transform_indices = @transform_9, window_bounds = array<i64: 8, 8, 32>}, {pipeline_mode = #tpu.pipeline_mode<synchronous>, transform_indices = @transform_10, window_bounds = array<i64: 2, 32, 32>}, {pipeline_mode = #tpu.pipeline_mode<synchronous>, transform_indices = @transform_11, window_bounds = array<i64: 2, 1, 32>}, {pipeline_mode = #tpu.pipeline_mode<synchronous>, transform_indices = @transform_12, window_bounds = array<i64: 2, 32, 32>}, {pipeline_mode = #tpu.pipeline_mode<synchronous>, transform_indices = @transform_13, window_bounds = array<i64: 2, 6, 32>}, {pipeline_mode = #tpu.pipeline_mode<synchronous>, transform_indices = @transform_14, window_bounds = array<i64: 48, 32, 8>}, {pipeline_mode = #tpu.pipeline_mode<synchronous>, transform_indices = @transform_15, window_bounds = array<i64: 48, 1, 8>}, {pipeline_mode = #tpu.pipeline_mode<synchronous>, transform_indices = @transform_16, window_bounds = array<i64: 16, 8, 32>}, {pipeline_mode = #tpu.pipeline_mode<synchronous>, transform_indices = @transform_17, window_bounds = array<i64: 2, 32, 32>}, {pipeline_mode = #tpu.pipeline_mode<synchronous>, transform_indices = @transform_18, window_bounds = array<i64: 2, 1, 32>}, {pipeline_mode = #tpu.pipeline_mode<synchronous>, transform_indices = @transform_19, window_bounds = array<i64: 2, 32, 32>}, {pipeline_mode = #tpu.pipeline_mode<synchronous>, transform_indices = @transform_20, window_bounds = array<i64: 2, 9, 32>}, {transform_indices = @transform_21, window_bounds = array<i64: 1, 1, 8>}]} {
    %0 = tpu.iota {dimensions = array<i32: 0>} : vector<8x8xi32>
    %1 = tpu.iota {dimensions = array<i32: 1>} : vector<8x8xi32>
    %2 = arith.cmpi sgt, %1, %0 : vector<8x8xi32>
    %c0 = arith.constant 0 : index
    %c0_0 = arith.constant 0 : index
    %3 = vector.load %arg7[%c0, %c0_0] : memref<8x32xf32, #tpu.memory_space<vmem>>, vector<8x32xf32>
    %4 = vector.extract_strided_slice %3 {offsets = [0, 0], sizes = [1, 32], strides = [1, 1]} : vector<8x32xf32> to vector<1x32xf32>
    %5 = vector.extract_strided_slice %3 {offsets = [1, 0], sizes = [1, 32], strides = [1, 1]} : vector<8x32xf32> to vector<1x32xf32>
    %6 = vector.extract_strided_slice %3 {offsets = [2, 0], sizes = [1, 32], strides = [1, 1]} : vector<8x32xf32> to vector<1x32xf32>
    %7 = vector.extract_strided_slice %3 {offsets = [3, 0], sizes = [1, 32], strides = [1, 1]} : vector<8x32xf32> to vector<1x32xf32>
    %8 = vector.extract_strided_slice %3 {offsets = [4, 0], sizes = [1, 32], strides = [1, 1]} : vector<8x32xf32> to vector<1x32xf32>
    %9 = vector.extract_strided_slice %3 {offsets = [5, 0], sizes = [1, 32], strides = [1, 1]} : vector<8x32xf32> to vector<1x32xf32>
    %10 = vector.extract_strided_slice %3 {offsets = [6, 0], sizes = [1, 32], strides = [1, 1]} : vector<8x32xf32> to vector<1x32xf32>
    %c0_1 = arith.constant 0 : index
    %c0_2 = arith.constant 0 : index
    %11 = vector.load %arg4[%c0_1, %c0_2] : memref<8x32xf32, #tpu.memory_space<vmem>>, vector<8x32xf32>
    %c0_3 = arith.constant 0 : index
    %c0_4 = arith.constant 0 : index
    %c0_5 = arith.constant 0 : index
    %12 = vector.load %arg2[%c0_3, %c0_4, %c0_5] : memref<1x8x40xf32, #tpu.memory_space<vmem>>, vector<1x8x40xf32>
    %13 = vector.shape_cast %12 : vector<1x8x40xf32> to vector<8x40xf32>
    %14 = arith.truncf %13 : vector<8x40xf32> to vector<8x40xbf16>
    %c0_6 = arith.constant 0 : index
    %c0_7 = arith.constant 0 : index
    %15 = vector.load %arg5[%c0_6, %c0_7] : memref<40x32xbf16, #tpu.memory_space<vmem>>, vector<40x32xbf16>
    %cst = arith.constant dense<0.000000e+00> : vector<8x32xf32>
    %16 = tpu.matmul %14, %15, %cst {dimension_numbers = #tpu.dot_dimension_numbers<[1], [0], [0], [1], [0, 0, 1, 1], [], []>} : vector<8x40xbf16>, vector<40x32xbf16>, vector<8x32xf32> -> vector<8x32xf32>
    %17 = vector.broadcast %4 : vector<1x32xf32> to vector<8x32xf32>
    %18 = arith.addf %16, %17 : vector<8x32xf32>
    %19 = vector.shape_cast %18 : vector<8x32xf32> to vector<1x8x32xf32>
    %c0_8 = arith.constant 0 : index
    %20 = memref.load %arg1[%c0_8] : memref<3xf32, #tpu.memory_space<smem>>
    %21 = vector.broadcast %20 : f32 to vector<8x32xf32>
    %22 = arith.mulf %21, %11 : vector<8x32xf32>
    %23 = vector.shape_cast %22 : vector<8x32xf32> to vector<1x8x32xf32>
    %24 = arith.addf %19, %23 : vector<1x8x32xf32>
    %25 = vector.shape_cast %24 : vector<1x8x32xf32> to vector<8x32xf32>
    %c0_9 = arith.constant 0 : index
    %c0_10 = arith.constant 0 : index
    %c0_11 = arith.constant 0 : index
    %26 = vector.load %arg3[%c0_9, %c0_10, %c0_11] : memref<1x8x50xf32, #tpu.memory_space<vmem>>, vector<1x8x50xf32>
    %27 = vector.shape_cast %26 : vector<1x8x50xf32> to vector<8x50xf32>
    %28 = arith.truncf %27 : vector<8x50xf32> to vector<8x50xbf16>
    %c0_12 = arith.constant 0 : index
    %c0_13 = arith.constant 0 : index
    %29 = vector.load %arg6[%c0_12, %c0_13] : memref<50x32xbf16, #tpu.memory_space<vmem>>, vector<50x32xbf16>
    %cst_14 = arith.constant dense<0.000000e+00> : vector<8x32xf32>
    %30 = tpu.matmul %28, %29, %cst_14 {dimension_numbers = #tpu.dot_dimension_numbers<[1], [0], [0], [1], [0, 0, 1, 1], [], []>} : vector<8x50xbf16>, vector<50x32xbf16>, vector<8x32xf32> -> vector<8x32xf32>
    %31 = vector.broadcast %5 : vector<1x32xf32> to vector<8x32xf32>
    %32 = arith.addf %30, %31 : vector<8x32xf32>
    %33 = vector.shape_cast %32 : vector<8x32xf32> to vector<1x8x32xf32>
    %c1 = arith.constant 1 : index
    %34 = memref.load %arg1[%c1] : memref<3xf32, #tpu.memory_space<smem>>
    %35 = vector.broadcast %34 : f32 to vector<8x32xf32>
    %36 = arith.mulf %35, %11 : vector<8x32xf32>
    %37 = vector.shape_cast %36 : vector<8x32xf32> to vector<1x8x32xf32>
    %38 = arith.addf %33, %37 : vector<1x8x32xf32>
    %39 = vector.shape_cast %38 : vector<1x8x32xf32> to vector<8x32xf32>
    %c0_15 = arith.constant 0 : index
    %c0_16 = arith.constant 0 : index
    %c0_17 = arith.constant 0 : index
    %40 = vector.load %arg14[%c0_15, %c0_16, %c0_17] : memref<2x6x32xf32, #tpu.memory_space<vmem>>, vector<1x6x32xf32>
    %41 = vector.shape_cast %40 : vector<1x6x32xf32> to vector<6x32xf32>
    %42 = vector.extract_strided_slice %41 {offsets = [0, 0], sizes = [1, 32], strides = [1, 1]} : vector<6x32xf32> to vector<1x32xf32>
    %43 = vector.extract_strided_slice %41 {offsets = [1, 0], sizes = [1, 32], strides = [1, 1]} : vector<6x32xf32> to vector<1x32xf32>
    %44 = vector.extract_strided_slice %41 {offsets = [2, 0], sizes = [1, 32], strides = [1, 1]} : vector<6x32xf32> to vector<1x32xf32>
    %45 = vector.extract_strided_slice %41 {offsets = [3, 0], sizes = [1, 32], strides = [1, 1]} : vector<6x32xf32> to vector<1x32xf32>
    %46 = vector.extract_strided_slice %41 {offsets = [4, 0], sizes = [1, 32], strides = [1, 1]} : vector<6x32xf32> to vector<1x32xf32>
    %47 = vector.extract_strided_slice %41 {offsets = [5, 0], sizes = [1, 32], strides = [1, 1]} : vector<6x32xf32> to vector<1x32xf32>
    %48 = arith.truncf %25 : vector<8x32xf32> to vector<8x32xbf16>
    %49 = arith.truncf %25 : vector<8x32xf32> to vector<8x32xbf16>
    %cst_18 = arith.constant 0.000000e+00 : f32
    %50 = vector.broadcast %cst_18 : f32 to vector<8x32xf32>
    %c0_19 = arith.constant 0 : index
    %c0_20 = arith.constant 0 : index
    %c0_21 = arith.constant 0 : index
    %51 = vector.load %arg8[%c0_19, %c0_20, %c0_21] : memref<24x32x8xbf16, #tpu.memory_space<vmem>>, vector<1x32x8xbf16>
    %52 = vector.shape_cast %51 : vector<1x32x8xbf16> to vector<32x8xbf16>
    %cst_22 = arith.constant dense<0.000000e+00> : vector<8x8xf32>
    %53 = tpu.matmul %48, %52, %cst_22 {dimension_numbers = #tpu.dot_dimension_numbers<[1], [0], [0], [1], [0, 0, 1, 1], [], []>} : vector<8x32xbf16>, vector<32x8xbf16>, vector<8x8xf32> -> vector<8x8xf32>
    %c0_23 = arith.constant 0 : index
    %c0_24 = arith.constant 0 : index
    %c0_25 = arith.constant 0 : index
    %54 = vector.load %arg9[%c0_23, %c0_24, %c0_25] : memref<24x1x8xf32, #tpu.memory_space<vmem>>, vector<1x1x8xf32>
    %55 = vector.shape_cast %54 : vector<1x1x8xf32> to vector<1x8xf32>
    %56 = vector.broadcast %55 : vector<1x8xf32> to vector<8x8xf32>
    %57 = arith.addf %53, %56 : vector<8x8xf32>
    %c4 = arith.constant 4 : index
    %c0_26 = arith.constant 0 : index
    %c0_27 = arith.constant 0 : index
    %58 = vector.load %arg8[%c4, %c0_26, %c0_27] : memref<24x32x8xbf16, #tpu.memory_space<vmem>>, vector<1x32x8xbf16>
    %59 = vector.shape_cast %58 : vector<1x32x8xbf16> to vector<32x8xbf16>
    %cst_28 = arith.constant dense<0.000000e+00> : vector<8x8xf32>
    %60 = tpu.matmul %49, %59, %cst_28 {dimension_numbers = #tpu.dot_dimension_numbers<[1], [0], [0], [1], [0, 0, 1, 1], [], []>} : vector<8x32xbf16>, vector<32x8xbf16>, vector<8x8xf32> -> vector<8x8xf32>
    %c4_29 = arith.constant 4 : index
    %c0_30 = arith.constant 0 : index
    %c0_31 = arith.constant 0 : index
    %61 = vector.load %arg9[%c4_29, %c0_30, %c0_31] : memref<24x1x8xf32, #tpu.memory_space<vmem>>, vector<1x1x8xf32>
    %62 = vector.shape_cast %61 : vector<1x1x8xf32> to vector<1x8xf32>
    %63 = vector.broadcast %62 : vector<1x8xf32> to vector<8x8xf32>
    %64 = arith.addf %60, %63 : vector<8x8xf32>
    %c8 = arith.constant 8 : index
    %c0_32 = arith.constant 0 : index
    %c0_33 = arith.constant 0 : index
    %65 = vector.load %arg8[%c8, %c0_32, %c0_33] : memref<24x32x8xbf16, #tpu.memory_space<vmem>>, vector<1x32x8xbf16>
    %66 = vector.shape_cast %65 : vector<1x32x8xbf16> to vector<32x8xbf16>
    %cst_34 = arith.constant dense<0.000000e+00> : vector<8x8xf32>
    %67 = tpu.matmul %49, %66, %cst_34 {dimension_numbers = #tpu.dot_dimension_numbers<[1], [0], [0], [1], [0, 0, 1, 1], [], []>} : vector<8x32xbf16>, vector<32x8xbf16>, vector<8x8xf32> -> vector<8x8xf32>
    %c8_35 = arith.constant 8 : index
    %c0_36 = arith.constant 0 : index
    %c0_37 = arith.constant 0 : index
    %68 = vector.load %arg9[%c8_35, %c0_36, %c0_37] : memref<24x1x8xf32, #tpu.memory_space<vmem>>, vector<1x1x8xf32>
    %69 = vector.shape_cast %68 : vector<1x1x8xf32> to vector<1x8xf32>
    %70 = vector.broadcast %69 : vector<1x8xf32> to vector<8x8xf32>
    %71 = arith.addf %67, %70 : vector<8x8xf32>
    %72 = vector.shape_cast %57 : vector<8x8xf32> to vector<1x8x8xf32>
    %73 = arith.truncf %72 : vector<1x8x8xf32> to vector<1x8x8xbf16>
    %74 = vector.shape_cast %64 : vector<8x8xf32> to vector<1x8x8xf32>
    %75 = arith.truncf %74 : vector<1x8x8xf32> to vector<1x8x8xbf16>
    %76 = vector.shape_cast %71 : vector<8x8xf32> to vector<1x8x8xf32>
    %77 = arith.truncf %76 : vector<1x8x8xf32> to vector<1x8x8xbf16>
    "tpu.trace_start"() <{level = 10 : i32, message = "bqd,bkd->bqk"}> : () -> ()
    %cst_38 = arith.constant dense<0.000000e+00> : vector<1x8x8xf32>
    %78 = tpu.matmul %73, %75, %cst_38 {dimension_numbers = #tpu.dot_dimension_numbers<[2], [2], [1], [1], [0, 0, 0, 1, 1, 1], [0], [0]>} : vector<1x8x8xbf16>, vector<1x8x8xbf16>, vector<1x8x8xf32> -> vector<1x8x8xf32>
    "tpu.trace_stop"() : () -> ()
    %cst_39 = arith.constant 0.353553385 : f32
    %79 = vector.broadcast %cst_39 : f32 to vector<1x8x8xf32>
    %80 = arith.mulf %78, %79 : vector<1x8x8xf32>
    %cst_40 = arith.constant -1.000000e+30 : f32
    %81 = vector.shape_cast %2 : vector<8x8xi1> to vector<1x8x8xi1>
    %82 = vector.broadcast %cst_40 : f32 to vector<1x8x8xf32>
    %83 = arith.select %81, %82, %80 : vector<1x8x8xi1>, vector<1x8x8xf32>
    %cst_41 = arith.constant dense<0xFF800000> : vector<1x8xf32>
    %84 = vector.multi_reduction <maximumf>, %83, %cst_41 [2] : vector<1x8x8xf32> to vector<1x8xf32>
    %85 = vector.shape_cast %84 : vector<1x8xf32> to vector<1x8x1xf32>
    %86 = vector.broadcast %85 : vector<1x8x1xf32> to vector<1x8x8xf32>
    %87 = arith.subf %83, %86 : vector<1x8x8xf32>
    %88 = math.exp %87 : vector<1x8x8xf32>
    %cst_42 = arith.constant dense<0.000000e+00> : vector<1x8xf32>
    %89 = vector.multi_reduction <add>, %88, %cst_42 [2] : vector<1x8x8xf32> to vector<1x8xf32>
    %90 = vector.shape_cast %89 : vector<1x8xf32> to vector<1x8x1xf32>
    %91 = tpu.reciprocal %90 : vector<1x8x1xf32> -> vector<1x8x1xf32>
    %92 = vector.broadcast %91 : vector<1x8x1xf32> to vector<1x8x8xf32>
    %93 = arith.mulf %88, %92 : vector<1x8x8xf32>
    %94 = arith.truncf %93 : vector<1x8x8xf32> to vector<1x8x8xbf16>
    "tpu.trace_start"() <{level = 10 : i32, message = "bqk,bkd->bqd"}> : () -> ()
    %cst_43 = arith.constant dense<0.000000e+00> : vector<1x8x8xf32>
    %95 = tpu.matmul %94, %77, %cst_43 {dimension_numbers = #tpu.dot_dimension_numbers<[2], [1], [1], [2], [0, 0, 0, 1, 1, 2], [0], [0]>} : vector<1x8x8xbf16>, vector<1x8x8xbf16>, vector<1x8x8xf32> -> vector<1x8x8xf32>
    "tpu.trace_stop"() : () -> ()
    %96 = vector.shape_cast %95 : vector<1x8x8xf32> to vector<8x8xf32>
    %97 = arith.truncf %96 : vector<8x8xf32> to vector<8x8xbf16>
    %c0_44 = arith.constant 0 : index
    %c0_45 = arith.constant 0 : index
    %c0_46 = arith.constant 0 : index
    %98 = vector.load %arg10[%c0_44, %c0_45, %c0_46] : memref<8x8x32xbf16, #tpu.memory_space<vmem>>, vector<1x8x32xbf16>
    %99 = vector.shape_cast %98 : vector<1x8x32xbf16> to vector<8x32xbf16>
    %cst_47 = arith.constant dense<0.000000e+00> : vector<8x32xf32>
    %100 = tpu.matmul %97, %99, %cst_47 {dimension_numbers = #tpu.dot_dimension_numbers<[1], [0], [0], [1], [0, 0, 1, 1], [], []>} : vector<8x8xbf16>, vector<8x32xbf16>, vector<8x32xf32> -> vector<8x32xf32>
    %101 = arith.addf %50, %100 : vector<8x32xf32>
    %c1_48 = arith.constant 1 : index
    %c0_49 = arith.constant 0 : index
    %c0_50 = arith.constant 0 : index
    %102 = vector.load %arg8[%c1_48, %c0_49, %c0_50] : memref<24x32x8xbf16, #tpu.memory_space<vmem>>, vector<1x32x8xbf16>
    %103 = vector.shape_cast %102 : vector<1x32x8xbf16> to vector<32x8xbf16>
    %cst_51 = arith.constant dense<0.000000e+00> : vector<8x8xf32>
    %104 = tpu.matmul %48, %103, %cst_51 {dimension_numbers = #tpu.dot_dimension_numbers<[1], [0], [0], [1], [0, 0, 1, 1], [], []>} : vector<8x32xbf16>, vector<32x8xbf16>, vector<8x8xf32> -> vector<8x8xf32>
    %c1_52 = arith.constant 1 : index
    %c0_53 = arith.constant 0 : index
    %c0_54 = arith.constant 0 : index
    %105 = vector.load %arg9[%c1_52, %c0_53, %c0_54] : memref<24x1x8xf32, #tpu.memory_space<vmem>>, vector<1x1x8xf32>
    %106 = vector.shape_cast %105 : vector<1x1x8xf32> to vector<1x8xf32>
    %107 = vector.broadcast %106 : vector<1x8xf32> to vector<8x8xf32>
    %108 = arith.addf %104, %107 : vector<8x8xf32>
    %c5 = arith.constant 5 : index
    %c0_55 = arith.constant 0 : index
    %c0_56 = arith.constant 0 : index
    %109 = vector.load %arg8[%c5, %c0_55, %c0_56] : memref<24x32x8xbf16, #tpu.memory_space<vmem>>, vector<1x32x8xbf16>
    %110 = vector.shape_cast %109 : vector<1x32x8xbf16> to vector<32x8xbf16>
    %cst_57 = arith.constant dense<0.000000e+00> : vector<8x8xf32>
    %111 = tpu.matmul %49, %110, %cst_57 {dimension_numbers = #tpu.dot_dimension_numbers<[1], [0], [0], [1], [0, 0, 1, 1], [], []>} : vector<8x32xbf16>, vector<32x8xbf16>, vector<8x8xf32> -> vector<8x8xf32>
    %c5_58 = arith.constant 5 : index
    %c0_59 = arith.constant 0 : index
    %c0_60 = arith.constant 0 : index
    %112 = vector.load %arg9[%c5_58, %c0_59, %c0_60] : memref<24x1x8xf32, #tpu.memory_space<vmem>>, vector<1x1x8xf32>
    %113 = vector.shape_cast %112 : vector<1x1x8xf32> to vector<1x8xf32>
    %114 = vector.broadcast %113 : vector<1x8xf32> to vector<8x8xf32>
    %115 = arith.addf %111, %114 : vector<8x8xf32>
    %c9 = arith.constant 9 : index
    %c0_61 = arith.constant 0 : index
    %c0_62 = arith.constant 0 : index
    %116 = vector.load %arg8[%c9, %c0_61, %c0_62] : memref<24x32x8xbf16, #tpu.memory_space<vmem>>, vector<1x32x8xbf16>
    %117 = vector.shape_cast %116 : vector<1x32x8xbf16> to vector<32x8xbf16>
    %cst_63 = arith.constant dense<0.000000e+00> : vector<8x8xf32>
    %118 = tpu.matmul %49, %117, %cst_63 {dimension_numbers = #tpu.dot_dimension_numbers<[1], [0], [0], [1], [0, 0, 1, 1], [], []>} : vector<8x32xbf16>, vector<32x8xbf16>, vector<8x8xf32> -> vector<8x8xf32>
    %c9_64 = arith.constant 9 : index
    %c0_65 = arith.constant 0 : index
    %c0_66 = arith.constant 0 : index
    %119 = vector.load %arg9[%c9_64, %c0_65, %c0_66] : memref<24x1x8xf32, #tpu.memory_space<vmem>>, vector<1x1x8xf32>
    %120 = vector.shape_cast %119 : vector<1x1x8xf32> to vector<1x8xf32>
    %121 = vector.broadcast %120 : vector<1x8xf32> to vector<8x8xf32>
    %122 = arith.addf %118, %121 : vector<8x8xf32>
    %123 = vector.shape_cast %108 : vector<8x8xf32> to vector<1x8x8xf32>
    %124 = arith.truncf %123 : vector<1x8x8xf32> to vector<1x8x8xbf16>
    %125 = vector.shape_cast %115 : vector<8x8xf32> to vector<1x8x8xf32>
    %126 = arith.truncf %125 : vector<1x8x8xf32> to vector<1x8x8xbf16>
    %127 = vector.shape_cast %122 : vector<8x8xf32> to vector<1x8x8xf32>
    %128 = arith.truncf %127 : vector<1x8x8xf32> to vector<1x8x8xbf16>
    "tpu.trace_start"() <{level = 10 : i32, message = "bqd,bkd->bqk"}> : () -> ()
    %cst_67 = arith.constant dense<0.000000e+00> : vector<1x8x8xf32>
    %129 = tpu.matmul %124, %126, %cst_67 {dimension_numbers = #tpu.dot_dimension_numbers<[2], [2], [1], [1], [0, 0, 0, 1, 1, 1], [0], [0]>} : vector<1x8x8xbf16>, vector<1x8x8xbf16>, vector<1x8x8xf32> -> vector<1x8x8xf32>
    "tpu.trace_stop"() : () -> ()
    %cst_68 = arith.constant 0.353553385 : f32
    %130 = vector.broadcast %cst_68 : f32 to vector<1x8x8xf32>
    %131 = arith.mulf %129, %130 : vector<1x8x8xf32>
    %cst_69 = arith.constant -1.000000e+30 : f32
    %132 = vector.shape_cast %2 : vector<8x8xi1> to vector<1x8x8xi1>
    %133 = vector.broadcast %cst_69 : f32 to vector<1x8x8xf32>
    %134 = arith.select %132, %133, %131 : vector<1x8x8xi1>, vector<1x8x8xf32>
    %cst_70 = arith.constant dense<0xFF800000> : vector<1x8xf32>
    %135 = vector.multi_reduction <maximumf>, %134, %cst_70 [2] : vector<1x8x8xf32> to vector<1x8xf32>
    %136 = vector.shape_cast %135 : vector<1x8xf32> to vector<1x8x1xf32>
    %137 = vector.broadcast %136 : vector<1x8x1xf32> to vector<1x8x8xf32>
    %138 = arith.subf %134, %137 : vector<1x8x8xf32>
    %139 = math.exp %138 : vector<1x8x8xf32>
    %cst_71 = arith.constant dense<0.000000e+00> : vector<1x8xf32>
    %140 = vector.multi_reduction <add>, %139, %cst_71 [2] : vector<1x8x8xf32> to vector<1x8xf32>
    %141 = vector.shape_cast %140 : vector<1x8xf32> to vector<1x8x1xf32>
    %142 = tpu.reciprocal %141 : vector<1x8x1xf32> -> vector<1x8x1xf32>
    %143 = vector.broadcast %142 : vector<1x8x1xf32> to vector<1x8x8xf32>
    %144 = arith.mulf %139, %143 : vector<1x8x8xf32>
    %145 = arith.truncf %144 : vector<1x8x8xf32> to vector<1x8x8xbf16>
    "tpu.trace_start"() <{level = 10 : i32, message = "bqk,bkd->bqd"}> : () -> ()
    %cst_72 = arith.constant dense<0.000000e+00> : vector<1x8x8xf32>
    %146 = tpu.matmul %145, %128, %cst_72 {dimension_numbers = #tpu.dot_dimension_numbers<[2], [1], [1], [2], [0, 0, 0, 1, 1, 2], [0], [0]>} : vector<1x8x8xbf16>, vector<1x8x8xbf16>, vector<1x8x8xf32> -> vector<1x8x8xf32>
    "tpu.trace_stop"() : () -> ()
    %147 = vector.shape_cast %146 : vector<1x8x8xf32> to vector<8x8xf32>
    %148 = arith.truncf %147 : vector<8x8xf32> to vector<8x8xbf16>
    %c1_73 = arith.constant 1 : index
    %c0_74 = arith.constant 0 : index
    %c0_75 = arith.constant 0 : index
    %149 = vector.load %arg10[%c1_73, %c0_74, %c0_75] : memref<8x8x32xbf16, #tpu.memory_space<vmem>>, vector<1x8x32xbf16>
    %150 = vector.shape_cast %149 : vector<1x8x32xbf16> to vector<8x32xbf16>
    %cst_76 = arith.constant dense<0.000000e+00> : vector<8x32xf32>
    %151 = tpu.matmul %148, %150, %cst_76 {dimension_numbers = #tpu.dot_dimension_numbers<[1], [0], [0], [1], [0, 0, 1, 1], [], []>} : vector<8x8xbf16>, vector<8x32xbf16>, vector<8x32xf32> -> vector<8x32xf32>
    %152 = arith.addf %101, %151 : vector<8x32xf32>
    %c2 = arith.constant 2 : index
    %c0_77 = arith.constant 0 : index
    %c0_78 = arith.constant 0 : index
    %153 = vector.load %arg8[%c2, %c0_77, %c0_78] : memref<24x32x8xbf16, #tpu.memory_space<vmem>>, vector<1x32x8xbf16>
    %154 = vector.shape_cast %153 : vector<1x32x8xbf16> to vector<32x8xbf16>
    %cst_79 = arith.constant dense<0.000000e+00> : vector<8x8xf32>
    %155 = tpu.matmul %48, %154, %cst_79 {dimension_numbers = #tpu.dot_dimension_numbers<[1], [0], [0], [1], [0, 0, 1, 1], [], []>} : vector<8x32xbf16>, vector<32x8xbf16>, vector<8x8xf32> -> vector<8x8xf32>
    %c2_80 = arith.constant 2 : index
    %c0_81 = arith.constant 0 : index
    %c0_82 = arith.constant 0 : index
    %156 = vector.load %arg9[%c2_80, %c0_81, %c0_82] : memref<24x1x8xf32, #tpu.memory_space<vmem>>, vector<1x1x8xf32>
    %157 = vector.shape_cast %156 : vector<1x1x8xf32> to vector<1x8xf32>
    %158 = vector.broadcast %157 : vector<1x8xf32> to vector<8x8xf32>
    %159 = arith.addf %155, %158 : vector<8x8xf32>
    %c6 = arith.constant 6 : index
    %c0_83 = arith.constant 0 : index
    %c0_84 = arith.constant 0 : index
    %160 = vector.load %arg8[%c6, %c0_83, %c0_84] : memref<24x32x8xbf16, #tpu.memory_space<vmem>>, vector<1x32x8xbf16>
    %161 = vector.shape_cast %160 : vector<1x32x8xbf16> to vector<32x8xbf16>
    %cst_85 = arith.constant dense<0.000000e+00> : vector<8x8xf32>
    %162 = tpu.matmul %49, %161, %cst_85 {dimension_numbers = #tpu.dot_dimension_numbers<[1], [0], [0], [1], [0, 0, 1, 1], [], []>} : vector<8x32xbf16>, vector<32x8xbf16>, vector<8x8xf32> -> vector<8x8xf32>
    %c6_86 = arith.constant 6 : index
    %c0_87 = arith.constant 0 : index
    %c0_88 = arith.constant 0 : index
    %163 = vector.load %arg9[%c6_86, %c0_87, %c0_88] : memref<24x1x8xf32, #tpu.memory_space<vmem>>, vector<1x1x8xf32>
    %164 = vector.shape_cast %163 : vector<1x1x8xf32> to vector<1x8xf32>
    %165 = vector.broadcast %164 : vector<1x8xf32> to vector<8x8xf32>
    %166 = arith.addf %162, %165 : vector<8x8xf32>
    %c10 = arith.constant 10 : index
    %c0_89 = arith.constant 0 : index
    %c0_90 = arith.constant 0 : index
    %167 = vector.load %arg8[%c10, %c0_89, %c0_90] : memref<24x32x8xbf16, #tpu.memory_space<vmem>>, vector<1x32x8xbf16>
    %168 = vector.shape_cast %167 : vector<1x32x8xbf16> to vector<32x8xbf16>
    %cst_91 = arith.constant dense<0.000000e+00> : vector<8x8xf32>
    %169 = tpu.matmul %49, %168, %cst_91 {dimension_numbers = #tpu.dot_dimension_numbers<[1], [0], [0], [1], [0, 0, 1, 1], [], []>} : vector<8x32xbf16>, vector<32x8xbf16>, vector<8x8xf32> -> vector<8x8xf32>
    %c10_92 = arith.constant 10 : index
    %c0_93 = arith.constant 0 : index
    %c0_94 = arith.constant 0 : index
    %170 = vector.load %arg9[%c10_92, %c0_93, %c0_94] : memref<24x1x8xf32, #tpu.memory_space<vmem>>, vector<1x1x8xf32>
    %171 = vector.shape_cast %170 : vector<1x1x8xf32> to vector<1x8xf32>
    %172 = vector.broadcast %171 : vector<1x8xf32> to vector<8x8xf32>
    %173 = arith.addf %169, %172 : vector<8x8xf32>
    %174 = vector.shape_cast %159 : vector<8x8xf32> to vector<1x8x8xf32>
    %175 = arith.truncf %174 : vector<1x8x8xf32> to vector<1x8x8xbf16>
    %176 = vector.shape_cast %166 : vector<8x8xf32> to vector<1x8x8xf32>
    %177 = arith.truncf %176 : vector<1x8x8xf32> to vector<1x8x8xbf16>
    %178 = vector.shape_cast %173 : vector<8x8xf32> to vector<1x8x8xf32>
    %179 = arith.truncf %178 : vector<1x8x8xf32> to vector<1x8x8xbf16>
    "tpu.trace_start"() <{level = 10 : i32, message = "bqd,bkd->bqk"}> : () -> ()
    %cst_95 = arith.constant dense<0.000000e+00> : vector<1x8x8xf32>
    %180 = tpu.matmul %175, %177, %cst_95 {dimension_numbers = #tpu.dot_dimension_numbers<[2], [2], [1], [1], [0, 0, 0, 1, 1, 1], [0], [0]>} : vector<1x8x8xbf16>, vector<1x8x8xbf16>, vector<1x8x8xf32> -> vector<1x8x8xf32>
    "tpu.trace_stop"() : () -> ()
    %cst_96 = arith.constant 0.353553385 : f32
    %181 = vector.broadcast %cst_96 : f32 to vector<1x8x8xf32>
    %182 = arith.mulf %180, %181 : vector<1x8x8xf32>
    %cst_97 = arith.constant -1.000000e+30 : f32
    %183 = vector.shape_cast %2 : vector<8x8xi1> to vector<1x8x8xi1>
    %184 = vector.broadcast %cst_97 : f32 to vector<1x8x8xf32>
    %185 = arith.select %183, %184, %182 : vector<1x8x8xi1>, vector<1x8x8xf32>
    %cst_98 = arith.constant dense<0xFF800000> : vector<1x8xf32>
    %186 = vector.multi_reduction <maximumf>, %185, %cst_98 [2] : vector<1x8x8xf32> to vector<1x8xf32>
    %187 = vector.shape_cast %186 : vector<1x8xf32> to vector<1x8x1xf32>
    %188 = vector.broadcast %187 : vector<1x8x1xf32> to vector<1x8x8xf32>
    %189 = arith.subf %185, %188 : vector<1x8x8xf32>
    %190 = math.exp %189 : vector<1x8x8xf32>
    %cst_99 = arith.constant dense<0.000000e+00> : vector<1x8xf32>
    %191 = vector.multi_reduction <add>, %190, %cst_99 [2] : vector<1x8x8xf32> to vector<1x8xf32>
    %192 = vector.shape_cast %191 : vector<1x8xf32> to vector<1x8x1xf32>
    %193 = tpu.reciprocal %192 : vector<1x8x1xf32> -> vector<1x8x1xf32>
    %194 = vector.broadcast %193 : vector<1x8x1xf32> to vector<1x8x8xf32>
    %195 = arith.mulf %190, %194 : vector<1x8x8xf32>
    %196 = arith.truncf %195 : vector<1x8x8xf32> to vector<1x8x8xbf16>
    "tpu.trace_start"() <{level = 10 : i32, message = "bqk,bkd->bqd"}> : () -> ()
    %cst_100 = arith.constant dense<0.000000e+00> : vector<1x8x8xf32>
    %197 = tpu.matmul %196, %179, %cst_100 {dimension_numbers = #tpu.dot_dimension_numbers<[2], [1], [1], [2], [0, 0, 0, 1, 1, 2], [0], [0]>} : vector<1x8x8xbf16>, vector<1x8x8xbf16>, vector<1x8x8xf32> -> vector<1x8x8xf32>
    "tpu.trace_stop"() : () -> ()
    %198 = vector.shape_cast %197 : vector<1x8x8xf32> to vector<8x8xf32>
    %199 = arith.truncf %198 : vector<8x8xf32> to vector<8x8xbf16>
    %c2_101 = arith.constant 2 : index
    %c0_102 = arith.constant 0 : index
    %c0_103 = arith.constant 0 : index
    %200 = vector.load %arg10[%c2_101, %c0_102, %c0_103] : memref<8x8x32xbf16, #tpu.memory_space<vmem>>, vector<1x8x32xbf16>
    %201 = vector.shape_cast %200 : vector<1x8x32xbf16> to vector<8x32xbf16>
    %cst_104 = arith.constant dense<0.000000e+00> : vector<8x32xf32>
    %202 = tpu.matmul %199, %201, %cst_104 {dimension_numbers = #tpu.dot_dimension_numbers<[1], [0], [0], [1], [0, 0, 1, 1], [], []>} : vector<8x8xbf16>, vector<8x32xbf16>, vector<8x32xf32> -> vector<8x32xf32>
    %203 = arith.addf %152, %202 : vector<8x32xf32>
    %c3 = arith.constant 3 : index
    %c0_105 = arith.constant 0 : index
    %c0_106 = arith.constant 0 : index
    %204 = vector.load %arg8[%c3, %c0_105, %c0_106] : memref<24x32x8xbf16, #tpu.memory_space<vmem>>, vector<1x32x8xbf16>
    %205 = vector.shape_cast %204 : vector<1x32x8xbf16> to vector<32x8xbf16>
    %cst_107 = arith.constant dense<0.000000e+00> : vector<8x8xf32>
    %206 = tpu.matmul %48, %205, %cst_107 {dimension_numbers = #tpu.dot_dimension_numbers<[1], [0], [0], [1], [0, 0, 1, 1], [], []>} : vector<8x32xbf16>, vector<32x8xbf16>, vector<8x8xf32> -> vector<8x8xf32>
    %c3_108 = arith.constant 3 : index
    %c0_109 = arith.constant 0 : index
    %c0_110 = arith.constant 0 : index
    %207 = vector.load %arg9[%c3_108, %c0_109, %c0_110] : memref<24x1x8xf32, #tpu.memory_space<vmem>>, vector<1x1x8xf32>
    %208 = vector.shape_cast %207 : vector<1x1x8xf32> to vector<1x8xf32>
    %209 = vector.broadcast %208 : vector<1x8xf32> to vector<8x8xf32>
    %210 = arith.addf %206, %209 : vector<8x8xf32>
    %c7 = arith.constant 7 : index
    %c0_111 = arith.constant 0 : index
    %c0_112 = arith.constant 0 : index
    %211 = vector.load %arg8[%c7, %c0_111, %c0_112] : memref<24x32x8xbf16, #tpu.memory_space<vmem>>, vector<1x32x8xbf16>
    %212 = vector.shape_cast %211 : vector<1x32x8xbf16> to vector<32x8xbf16>
    %cst_113 = arith.constant dense<0.000000e+00> : vector<8x8xf32>
    %213 = tpu.matmul %49, %212, %cst_113 {dimension_numbers = #tpu.dot_dimension_numbers<[1], [0], [0], [1], [0, 0, 1, 1], [], []>} : vector<8x32xbf16>, vector<32x8xbf16>, vector<8x8xf32> -> vector<8x8xf32>
    %c7_114 = arith.constant 7 : index
    %c0_115 = arith.constant 0 : index
    %c0_116 = arith.constant 0 : index
    %214 = vector.load %arg9[%c7_114, %c0_115, %c0_116] : memref<24x1x8xf32, #tpu.memory_space<vmem>>, vector<1x1x8xf32>
    %215 = vector.shape_cast %214 : vector<1x1x8xf32> to vector<1x8xf32>
    %216 = vector.broadcast %215 : vector<1x8xf32> to vector<8x8xf32>
    %217 = arith.addf %213, %216 : vector<8x8xf32>
    %c11 = arith.constant 11 : index
    %c0_117 = arith.constant 0 : index
    %c0_118 = arith.constant 0 : index
    %218 = vector.load %arg8[%c11, %c0_117, %c0_118] : memref<24x32x8xbf16, #tpu.memory_space<vmem>>, vector<1x32x8xbf16>
    %219 = vector.shape_cast %218 : vector<1x32x8xbf16> to vector<32x8xbf16>
    %cst_119 = arith.constant dense<0.000000e+00> : vector<8x8xf32>
    %220 = tpu.matmul %49, %219, %cst_119 {dimension_numbers = #tpu.dot_dimension_numbers<[1], [0], [0], [1], [0, 0, 1, 1], [], []>} : vector<8x32xbf16>, vector<32x8xbf16>, vector<8x8xf32> -> vector<8x8xf32>
    %c11_120 = arith.constant 11 : index
    %c0_121 = arith.constant 0 : index
    %c0_122 = arith.constant 0 : index
    %221 = vector.load %arg9[%c11_120, %c0_121, %c0_122] : memref<24x1x8xf32, #tpu.memory_space<vmem>>, vector<1x1x8xf32>
    %222 = vector.shape_cast %221 : vector<1x1x8xf32> to vector<1x8xf32>
    %223 = vector.broadcast %222 : vector<1x8xf32> to vector<8x8xf32>
    %224 = arith.addf %220, %223 : vector<8x8xf32>
    %225 = vector.shape_cast %210 : vector<8x8xf32> to vector<1x8x8xf32>
    %226 = arith.truncf %225 : vector<1x8x8xf32> to vector<1x8x8xbf16>
    %227 = vector.shape_cast %217 : vector<8x8xf32> to vector<1x8x8xf32>
    %228 = arith.truncf %227 : vector<1x8x8xf32> to vector<1x8x8xbf16>
    %229 = vector.shape_cast %224 : vector<8x8xf32> to vector<1x8x8xf32>
    %230 = arith.truncf %229 : vector<1x8x8xf32> to vector<1x8x8xbf16>
    "tpu.trace_start"() <{level = 10 : i32, message = "bqd,bkd->bqk"}> : () -> ()
    %cst_123 = arith.constant dense<0.000000e+00> : vector<1x8x8xf32>
    %231 = tpu.matmul %226, %228, %cst_123 {dimension_numbers = #tpu.dot_dimension_numbers<[2], [2], [1], [1], [0, 0, 0, 1, 1, 1], [0], [0]>} : vector<1x8x8xbf16>, vector<1x8x8xbf16>, vector<1x8x8xf32> -> vector<1x8x8xf32>
    "tpu.trace_stop"() : () -> ()
    %cst_124 = arith.constant 0.353553385 : f32
    %232 = vector.broadcast %cst_124 : f32 to vector<1x8x8xf32>
    %233 = arith.mulf %231, %232 : vector<1x8x8xf32>
    %cst_125 = arith.constant -1.000000e+30 : f32
    %234 = vector.shape_cast %2 : vector<8x8xi1> to vector<1x8x8xi1>
    %235 = vector.broadcast %cst_125 : f32 to vector<1x8x8xf32>
    %236 = arith.select %234, %235, %233 : vector<1x8x8xi1>, vector<1x8x8xf32>
    %cst_126 = arith.constant dense<0xFF800000> : vector<1x8xf32>
    %237 = vector.multi_reduction <maximumf>, %236, %cst_126 [2] : vector<1x8x8xf32> to vector<1x8xf32>
    %238 = vector.shape_cast %237 : vector<1x8xf32> to vector<1x8x1xf32>
    %239 = vector.broadcast %238 : vector<1x8x1xf32> to vector<1x8x8xf32>
    %240 = arith.subf %236, %239 : vector<1x8x8xf32>
    %241 = math.exp %240 : vector<1x8x8xf32>
    %cst_127 = arith.constant dense<0.000000e+00> : vector<1x8xf32>
    %242 = vector.multi_reduction <add>, %241, %cst_127 [2] : vector<1x8x8xf32> to vector<1x8xf32>
    %243 = vector.shape_cast %242 : vector<1x8xf32> to vector<1x8x1xf32>
    %244 = tpu.reciprocal %243 : vector<1x8x1xf32> -> vector<1x8x1xf32>
    %245 = vector.broadcast %244 : vector<1x8x1xf32> to vector<1x8x8xf32>
    %246 = arith.mulf %241, %245 : vector<1x8x8xf32>
    %247 = arith.truncf %246 : vector<1x8x8xf32> to vector<1x8x8xbf16>
    "tpu.trace_start"() <{level = 10 : i32, message = "bqk,bkd->bqd"}> : () -> ()
    %cst_128 = arith.constant dense<0.000000e+00> : vector<1x8x8xf32>
    %248 = tpu.matmul %247, %230, %cst_128 {dimension_numbers = #tpu.dot_dimension_numbers<[2], [1], [1], [2], [0, 0, 0, 1, 1, 2], [0], [0]>} : vector<1x8x8xbf16>, vector<1x8x8xbf16>, vector<1x8x8xf32> -> vector<1x8x8xf32>
    "tpu.trace_stop"() : () -> ()
    %249 = vector.shape_cast %248 : vector<1x8x8xf32> to vector<8x8xf32>
    %250 = arith.truncf %249 : vector<8x8xf32> to vector<8x8xbf16>
    %c3_129 = arith.constant 3 : index
    %c0_130 = arith.constant 0 : index
    %c0_131 = arith.constant 0 : index
    %251 = vector.load %arg10[%c3_129, %c0_130, %c0_131] : memref<8x8x32xbf16, #tpu.memory_space<vmem>>, vector<1x8x32xbf16>
    %252 = vector.shape_cast %251 : vector<1x8x32xbf16> to vector<8x32xbf16>
    %cst_132 = arith.constant dense<0.000000e+00> : vector<8x32xf32>
    %253 = tpu.matmul %250, %252, %cst_132 {dimension_numbers = #tpu.dot_dimension_numbers<[1], [0], [0], [1], [0, 0, 1, 1], [], []>} : vector<8x8xbf16>, vector<8x32xbf16>, vector<8x32xf32> -> vector<8x32xf32>
    %254 = arith.addf %203, %253 : vector<8x32xf32>
    %255 = vector.broadcast %42 : vector<1x32xf32> to vector<8x32xf32>
    %256 = arith.addf %254, %255 : vector<8x32xf32>
    %257 = arith.addf %25, %256 : vector<8x32xf32>
    %cst_133 = arith.constant dense<0.000000e+00> : vector<8xf32>
    %258 = vector.multi_reduction <add>, %257, %cst_133 [1] : vector<8x32xf32> to vector<8xf32>
    %259 = vector.shape_cast %258 : vector<8xf32> to vector<8x1xf32>
    %cst_134 = arith.constant 3.200000e+01 : f32
    %260 = vector.broadcast %cst_134 : f32 to vector<8x1xf32>
    %261 = arith.divf %259, %260 : vector<8x1xf32>
    %262 = vector.broadcast %261 : vector<8x1xf32> to vector<8x32xf32>
    %263 = arith.subf %257, %262 : vector<8x32xf32>
    %264 = arith.mulf %263, %263 : vector<8x32xf32>
    %cst_135 = arith.constant dense<0.000000e+00> : vector<8xf32>
    %265 = vector.multi_reduction <add>, %264, %cst_135 [1] : vector<8x32xf32> to vector<8xf32>
    %266 = vector.shape_cast %265 : vector<8xf32> to vector<8x1xf32>
    %cst_136 = arith.constant 3.200000e+01 : f32
    %267 = vector.broadcast %cst_136 : f32 to vector<8x1xf32>
    %268 = arith.divf %266, %267 : vector<8x1xf32>
    %cst_137 = arith.constant 9.99999974E-6 : f32
    %269 = vector.broadcast %cst_137 : f32 to vector<8x1xf32>
    %270 = arith.addf %268, %269 : vector<8x1xf32>
    %271 = math.rsqrt %270 : vector<8x1xf32>
    %272 = vector.broadcast %271 : vector<8x1xf32> to vector<8x32xf32>
    %273 = arith.mulf %263, %272 : vector<8x32xf32>
    %274 = vector.broadcast %43 : vector<1x32xf32> to vector<8x32xf32>
    %275 = arith.mulf %273, %274 : vector<8x32xf32>
    %276 = vector.broadcast %44 : vector<1x32xf32> to vector<8x32xf32>
    %277 = arith.addf %275, %276 : vector<8x32xf32>
    %278 = arith.truncf %277 : vector<8x32xf32> to vector<8x32xbf16>
    %c0_138 = arith.constant 0 : index
    %c0_139 = arith.constant 0 : index
    %c0_140 = arith.constant 0 : index
    %279 = vector.load %arg11[%c0_138, %c0_139, %c0_140] : memref<2x32x32xbf16, #tpu.memory_space<vmem>>, vector<1x32x32xbf16>
    %280 = vector.shape_cast %279 : vector<1x32x32xbf16> to vector<32x32xbf16>
    %cst_141 = arith.constant dense<0.000000e+00> : vector<8x32xf32>
    %281 = tpu.matmul %278, %280, %cst_141 {dimension_numbers = #tpu.dot_dimension_numbers<[1], [0], [0], [1], [0, 0, 1, 1], [], []>} : vector<8x32xbf16>, vector<32x32xbf16>, vector<8x32xf32> -> vector<8x32xf32>
    %c0_142 = arith.constant 0 : index
    %c0_143 = arith.constant 0 : index
    %c0_144 = arith.constant 0 : index
    %282 = vector.load %arg12[%c0_142, %c0_143, %c0_144] : memref<2x1x32xf32, #tpu.memory_space<vmem>>, vector<1x1x32xf32>
    %283 = vector.shape_cast %282 : vector<1x1x32xf32> to vector<1x32xf32>
    %284 = vector.broadcast %283 : vector<1x32xf32> to vector<8x32xf32>
    %285 = arith.addf %281, %284 : vector<8x32xf32>
    %cst_145 = arith.constant 0.000000e+00 : f32
    %286 = vector.broadcast %cst_145 : f32 to vector<8x32xf32>
    %287 = arith.maximumf %285, %286 : vector<8x32xf32>
    %288 = arith.truncf %287 : vector<8x32xf32> to vector<8x32xbf16>
    %c0_146 = arith.constant 0 : index
    %c0_147 = arith.constant 0 : index
    %c0_148 = arith.constant 0 : index
    %289 = vector.load %arg13[%c0_146, %c0_147, %c0_148] : memref<2x32x32xbf16, #tpu.memory_space<vmem>>, vector<1x32x32xbf16>
    %290 = vector.shape_cast %289 : vector<1x32x32xbf16> to vector<32x32xbf16>
    %cst_149 = arith.constant dense<0.000000e+00> : vector<8x32xf32>
    %291 = tpu.matmul %288, %290, %cst_149 {dimension_numbers = #tpu.dot_dimension_numbers<[1], [0], [0], [1], [0, 0, 1, 1], [], []>} : vector<8x32xbf16>, vector<32x32xbf16>, vector<8x32xf32> -> vector<8x32xf32>
    %292 = vector.broadcast %45 : vector<1x32xf32> to vector<8x32xf32>
    %293 = arith.addf %291, %292 : vector<8x32xf32>
    %294 = arith.addf %277, %293 : vector<8x32xf32>
    %cst_150 = arith.constant dense<0.000000e+00> : vector<8xf32>
    %295 = vector.multi_reduction <add>, %294, %cst_150 [1] : vector<8x32xf32> to vector<8xf32>
    %296 = vector.shape_cast %295 : vector<8xf32> to vector<8x1xf32>
    %cst_151 = arith.constant 3.200000e+01 : f32
    %297 = vector.broadcast %cst_151 : f32 to vector<8x1xf32>
    %298 = arith.divf %296, %297 : vector<8x1xf32>
    %299 = vector.broadcast %298 : vector<8x1xf32> to vector<8x32xf32>
    %300 = arith.subf %294, %299 : vector<8x32xf32>
    %301 = arith.mulf %300, %300 : vector<8x32xf32>
    %cst_152 = arith.constant dense<0.000000e+00> : vector<8xf32>
    %302 = vector.multi_reduction <add>, %301, %cst_152 [1] : vector<8x32xf32> to vector<8xf32>
    %303 = vector.shape_cast %302 : vector<8xf32> to vector<8x1xf32>
    %cst_153 = arith.constant 3.200000e+01 : f32
    %304 = vector.broadcast %cst_153 : f32 to vector<8x1xf32>
    %305 = arith.divf %303, %304 : vector<8x1xf32>
    %cst_154 = arith.constant 9.99999974E-6 : f32
    %306 = vector.broadcast %cst_154 : f32 to vector<8x1xf32>
    %307 = arith.addf %305, %306 : vector<8x1xf32>
    %308 = math.rsqrt %307 : vector<8x1xf32>
    %309 = vector.broadcast %308 : vector<8x1xf32> to vector<8x32xf32>
    %310 = arith.mulf %300, %309 : vector<8x32xf32>
    %311 = vector.broadcast %46 : vector<1x32xf32> to vector<8x32xf32>
    %312 = arith.mulf %310, %311 : vector<8x32xf32>
    %313 = vector.broadcast %47 : vector<1x32xf32> to vector<8x32xf32>
    %314 = arith.addf %312, %313 : vector<8x32xf32>
    %c1_155 = arith.constant 1 : index
    %c0_156 = arith.constant 0 : index
    %c0_157 = arith.constant 0 : index
    %315 = vector.load %arg14[%c1_155, %c0_156, %c0_157] : memref<2x6x32xf32, #tpu.memory_space<vmem>>, vector<1x6x32xf32>
    %316 = vector.shape_cast %315 : vector<1x6x32xf32> to vector<6x32xf32>
    %317 = vector.extract_strided_slice %316 {offsets = [0, 0], sizes = [1, 32], strides = [1, 1]} : vector<6x32xf32> to vector<1x32xf32>
    %318 = vector.extract_strided_slice %316 {offsets = [1, 0], sizes = [1, 32], strides = [1, 1]} : vector<6x32xf32> to vector<1x32xf32>
    %319 = vector.extract_strided_slice %316 {offsets = [2, 0], sizes = [1, 32], strides = [1, 1]} : vector<6x32xf32> to vector<1x32xf32>
    %320 = vector.extract_strided_slice %316 {offsets = [3, 0], sizes = [1, 32], strides = [1, 1]} : vector<6x32xf32> to vector<1x32xf32>
    %321 = vector.extract_strided_slice %316 {offsets = [4, 0], sizes = [1, 32], strides = [1, 1]} : vector<6x32xf32> to vector<1x32xf32>
    %322 = vector.extract_strided_slice %316 {offsets = [5, 0], sizes = [1, 32], strides = [1, 1]} : vector<6x32xf32> to vector<1x32xf32>
    %323 = arith.truncf %314 : vector<8x32xf32> to vector<8x32xbf16>
    %324 = arith.truncf %314 : vector<8x32xf32> to vector<8x32xbf16>
    %cst_158 = arith.constant 0.000000e+00 : f32
    %325 = vector.broadcast %cst_158 : f32 to vector<8x32xf32>
    %c12 = arith.constant 12 : index
    %c0_159 = arith.constant 0 : index
    %c0_160 = arith.constant 0 : index
    %326 = vector.load %arg8[%c12, %c0_159, %c0_160] : memref<24x32x8xbf16, #tpu.memory_space<vmem>>, vector<1x32x8xbf16>
    %327 = vector.shape_cast %326 : vector<1x32x8xbf16> to vector<32x8xbf16>
    %cst_161 = arith.constant dense<0.000000e+00> : vector<8x8xf32>
    %328 = tpu.matmul %323, %327, %cst_161 {dimension_numbers = #tpu.dot_dimension_numbers<[1], [0], [0], [1], [0, 0, 1, 1], [], []>} : vector<8x32xbf16>, vector<32x8xbf16>, vector<8x8xf32> -> vector<8x8xf32>
    %c12_162 = arith.constant 12 : index
    %c0_163 = arith.constant 0 : index
    %c0_164 = arith.constant 0 : index
    %329 = vector.load %arg9[%c12_162, %c0_163, %c0_164] : memref<24x1x8xf32, #tpu.memory_space<vmem>>, vector<1x1x8xf32>
    %330 = vector.shape_cast %329 : vector<1x1x8xf32> to vector<1x8xf32>
    %331 = vector.broadcast %330 : vector<1x8xf32> to vector<8x8xf32>
    %332 = arith.addf %328, %331 : vector<8x8xf32>
    %c16 = arith.constant 16 : index
    %c0_165 = arith.constant 0 : index
    %c0_166 = arith.constant 0 : index
    %333 = vector.load %arg8[%c16, %c0_165, %c0_166] : memref<24x32x8xbf16, #tpu.memory_space<vmem>>, vector<1x32x8xbf16>
    %334 = vector.shape_cast %333 : vector<1x32x8xbf16> to vector<32x8xbf16>
    %cst_167 = arith.constant dense<0.000000e+00> : vector<8x8xf32>
    %335 = tpu.matmul %324, %334, %cst_167 {dimension_numbers = #tpu.dot_dimension_numbers<[1], [0], [0], [1], [0, 0, 1, 1], [], []>} : vector<8x32xbf16>, vector<32x8xbf16>, vector<8x8xf32> -> vector<8x8xf32>
    %c16_168 = arith.constant 16 : index
    %c0_169 = arith.constant 0 : index
    %c0_170 = arith.constant 0 : index
    %336 = vector.load %arg9[%c16_168, %c0_169, %c0_170] : memref<24x1x8xf32, #tpu.memory_space<vmem>>, vector<1x1x8xf32>
    %337 = vector.shape_cast %336 : vector<1x1x8xf32> to vector<1x8xf32>
    %338 = vector.broadcast %337 : vector<1x8xf32> to vector<8x8xf32>
    %339 = arith.addf %335, %338 : vector<8x8xf32>
    %c20 = arith.constant 20 : index
    %c0_171 = arith.constant 0 : index
    %c0_172 = arith.constant 0 : index
    %340 = vector.load %arg8[%c20, %c0_171, %c0_172] : memref<24x32x8xbf16, #tpu.memory_space<vmem>>, vector<1x32x8xbf16>
    %341 = vector.shape_cast %340 : vector<1x32x8xbf16> to vector<32x8xbf16>
    %cst_173 = arith.constant dense<0.000000e+00> : vector<8x8xf32>
    %342 = tpu.matmul %324, %341, %cst_173 {dimension_numbers = #tpu.dot_dimension_numbers<[1], [0], [0], [1], [0, 0, 1, 1], [], []>} : vector<8x32xbf16>, vector<32x8xbf16>, vector<8x8xf32> -> vector<8x8xf32>
    %c20_174 = arith.constant 20 : index
    %c0_175 = arith.constant 0 : index
    %c0_176 = arith.constant 0 : index
    %343 = vector.load %arg9[%c20_174, %c0_175, %c0_176] : memref<24x1x8xf32, #tpu.memory_space<vmem>>, vector<1x1x8xf32>
    %344 = vector.shape_cast %343 : vector<1x1x8xf32> to vector<1x8xf32>
    %345 = vector.broadcast %344 : vector<1x8xf32> to vector<8x8xf32>
    %346 = arith.addf %342, %345 : vector<8x8xf32>
    %347 = vector.shape_cast %332 : vector<8x8xf32> to vector<1x8x8xf32>
    %348 = arith.truncf %347 : vector<1x8x8xf32> to vector<1x8x8xbf16>
    %349 = vector.shape_cast %339 : vector<8x8xf32> to vector<1x8x8xf32>
    %350 = arith.truncf %349 : vector<1x8x8xf32> to vector<1x8x8xbf16>
    %351 = vector.shape_cast %346 : vector<8x8xf32> to vector<1x8x8xf32>
    %352 = arith.truncf %351 : vector<1x8x8xf32> to vector<1x8x8xbf16>
    "tpu.trace_start"() <{level = 10 : i32, message = "bqd,bkd->bqk"}> : () -> ()
    %cst_177 = arith.constant dense<0.000000e+00> : vector<1x8x8xf32>
    %353 = tpu.matmul %348, %350, %cst_177 {dimension_numbers = #tpu.dot_dimension_numbers<[2], [2], [1], [1], [0, 0, 0, 1, 1, 1], [0], [0]>} : vector<1x8x8xbf16>, vector<1x8x8xbf16>, vector<1x8x8xf32> -> vector<1x8x8xf32>
    "tpu.trace_stop"() : () -> ()
    %cst_178 = arith.constant 0.353553385 : f32
    %354 = vector.broadcast %cst_178 : f32 to vector<1x8x8xf32>
    %355 = arith.mulf %353, %354 : vector<1x8x8xf32>
    %cst_179 = arith.constant -1.000000e+30 : f32
    %356 = vector.shape_cast %2 : vector<8x8xi1> to vector<1x8x8xi1>
    %357 = vector.broadcast %cst_179 : f32 to vector<1x8x8xf32>
    %358 = arith.select %356, %357, %355 : vector<1x8x8xi1>, vector<1x8x8xf32>
    %cst_180 = arith.constant dense<0xFF800000> : vector<1x8xf32>
    %359 = vector.multi_reduction <maximumf>, %358, %cst_180 [2] : vector<1x8x8xf32> to vector<1x8xf32>
    %360 = vector.shape_cast %359 : vector<1x8xf32> to vector<1x8x1xf32>
    %361 = vector.broadcast %360 : vector<1x8x1xf32> to vector<1x8x8xf32>
    %362 = arith.subf %358, %361 : vector<1x8x8xf32>
    %363 = math.exp %362 : vector<1x8x8xf32>
    %cst_181 = arith.constant dense<0.000000e+00> : vector<1x8xf32>
    %364 = vector.multi_reduction <add>, %363, %cst_181 [2] : vector<1x8x8xf32> to vector<1x8xf32>
    %365 = vector.shape_cast %364 : vector<1x8xf32> to vector<1x8x1xf32>
    %366 = tpu.reciprocal %365 : vector<1x8x1xf32> -> vector<1x8x1xf32>
    %367 = vector.broadcast %366 : vector<1x8x1xf32> to vector<1x8x8xf32>
    %368 = arith.mulf %363, %367 : vector<1x8x8xf32>
    %369 = arith.truncf %368 : vector<1x8x8xf32> to vector<1x8x8xbf16>
    "tpu.trace_start"() <{level = 10 : i32, message = "bqk,bkd->bqd"}> : () -> ()
    %cst_182 = arith.constant dense<0.000000e+00> : vector<1x8x8xf32>
    %370 = tpu.matmul %369, %352, %cst_182 {dimension_numbers = #tpu.dot_dimension_numbers<[2], [1], [1], [2], [0, 0, 0, 1, 1, 2], [0], [0]>} : vector<1x8x8xbf16>, vector<1x8x8xbf16>, vector<1x8x8xf32> -> vector<1x8x8xf32>
    "tpu.trace_stop"() : () -> ()
    %371 = vector.shape_cast %370 : vector<1x8x8xf32> to vector<8x8xf32>
    %372 = arith.truncf %371 : vector<8x8xf32> to vector<8x8xbf16>
    %c4_183 = arith.constant 4 : index
    %c0_184 = arith.constant 0 : index
    %c0_185 = arith.constant 0 : index
    %373 = vector.load %arg10[%c4_183, %c0_184, %c0_185] : memref<8x8x32xbf16, #tpu.memory_space<vmem>>, vector<1x8x32xbf16>
    %374 = vector.shape_cast %373 : vector<1x8x32xbf16> to vector<8x32xbf16>
    %cst_186 = arith.constant dense<0.000000e+00> : vector<8x32xf32>
    %375 = tpu.matmul %372, %374, %cst_186 {dimension_numbers = #tpu.dot_dimension_numbers<[1], [0], [0], [1], [0, 0, 1, 1], [], []>} : vector<8x8xbf16>, vector<8x32xbf16>, vector<8x32xf32> -> vector<8x32xf32>
    %376 = arith.addf %325, %375 : vector<8x32xf32>
    %c13 = arith.constant 13 : index
    %c0_187 = arith.constant 0 : index
    %c0_188 = arith.constant 0 : index
    %377 = vector.load %arg8[%c13, %c0_187, %c0_188] : memref<24x32x8xbf16, #tpu.memory_space<vmem>>, vector<1x32x8xbf16>
    %378 = vector.shape_cast %377 : vector<1x32x8xbf16> to vector<32x8xbf16>
    %cst_189 = arith.constant dense<0.000000e+00> : vector<8x8xf32>
    %379 = tpu.matmul %323, %378, %cst_189 {dimension_numbers = #tpu.dot_dimension_numbers<[1], [0], [0], [1], [0, 0, 1, 1], [], []>} : vector<8x32xbf16>, vector<32x8xbf16>, vector<8x8xf32> -> vector<8x8xf32>
    %c13_190 = arith.constant 13 : index
    %c0_191 = arith.constant 0 : index
    %c0_192 = arith.constant 0 : index
    %380 = vector.load %arg9[%c13_190, %c0_191, %c0_192] : memref<24x1x8xf32, #tpu.memory_space<vmem>>, vector<1x1x8xf32>
    %381 = vector.shape_cast %380 : vector<1x1x8xf32> to vector<1x8xf32>
    %382 = vector.broadcast %381 : vector<1x8xf32> to vector<8x8xf32>
    %383 = arith.addf %379, %382 : vector<8x8xf32>
    %c17 = arith.constant 17 : index
    %c0_193 = arith.constant 0 : index
    %c0_194 = arith.constant 0 : index
    %384 = vector.load %arg8[%c17, %c0_193, %c0_194] : memref<24x32x8xbf16, #tpu.memory_space<vmem>>, vector<1x32x8xbf16>
    %385 = vector.shape_cast %384 : vector<1x32x8xbf16> to vector<32x8xbf16>
    %cst_195 = arith.constant dense<0.000000e+00> : vector<8x8xf32>
    %386 = tpu.matmul %324, %385, %cst_195 {dimension_numbers = #tpu.dot_dimension_numbers<[1], [0], [0], [1], [0, 0, 1, 1], [], []>} : vector<8x32xbf16>, vector<32x8xbf16>, vector<8x8xf32> -> vector<8x8xf32>
    %c17_196 = arith.constant 17 : index
    %c0_197 = arith.constant 0 : index
    %c0_198 = arith.constant 0 : index
    %387 = vector.load %arg9[%c17_196, %c0_197, %c0_198] : memref<24x1x8xf32, #tpu.memory_space<vmem>>, vector<1x1x8xf32>
    %388 = vector.shape_cast %387 : vector<1x1x8xf32> to vector<1x8xf32>
    %389 = vector.broadcast %388 : vector<1x8xf32> to vector<8x8xf32>
    %390 = arith.addf %386, %389 : vector<8x8xf32>
    %c21 = arith.constant 21 : index
    %c0_199 = arith.constant 0 : index
    %c0_200 = arith.constant 0 : index
    %391 = vector.load %arg8[%c21, %c0_199, %c0_200] : memref<24x32x8xbf16, #tpu.memory_space<vmem>>, vector<1x32x8xbf16>
    %392 = vector.shape_cast %391 : vector<1x32x8xbf16> to vector<32x8xbf16>
    %cst_201 = arith.constant dense<0.000000e+00> : vector<8x8xf32>
    %393 = tpu.matmul %324, %392, %cst_201 {dimension_numbers = #tpu.dot_dimension_numbers<[1], [0], [0], [1], [0, 0, 1, 1], [], []>} : vector<8x32xbf16>, vector<32x8xbf16>, vector<8x8xf32> -> vector<8x8xf32>
    %c21_202 = arith.constant 21 : index
    %c0_203 = arith.constant 0 : index
    %c0_204 = arith.constant 0 : index
    %394 = vector.load %arg9[%c21_202, %c0_203, %c0_204] : memref<24x1x8xf32, #tpu.memory_space<vmem>>, vector<1x1x8xf32>
    %395 = vector.shape_cast %394 : vector<1x1x8xf32> to vector<1x8xf32>
    %396 = vector.broadcast %395 : vector<1x8xf32> to vector<8x8xf32>
    %397 = arith.addf %393, %396 : vector<8x8xf32>
    %398 = vector.shape_cast %383 : vector<8x8xf32> to vector<1x8x8xf32>
    %399 = arith.truncf %398 : vector<1x8x8xf32> to vector<1x8x8xbf16>
    %400 = vector.shape_cast %390 : vector<8x8xf32> to vector<1x8x8xf32>
    %401 = arith.truncf %400 : vector<1x8x8xf32> to vector<1x8x8xbf16>
    %402 = vector.shape_cast %397 : vector<8x8xf32> to vector<1x8x8xf32>
    %403 = arith.truncf %402 : vector<1x8x8xf32> to vector<1x8x8xbf16>
    "tpu.trace_start"() <{level = 10 : i32, message = "bqd,bkd->bqk"}> : () -> ()
    %cst_205 = arith.constant dense<0.000000e+00> : vector<1x8x8xf32>
    %404 = tpu.matmul %399, %401, %cst_205 {dimension_numbers = #tpu.dot_dimension_numbers<[2], [2], [1], [1], [0, 0, 0, 1, 1, 1], [0], [0]>} : vector<1x8x8xbf16>, vector<1x8x8xbf16>, vector<1x8x8xf32> -> vector<1x8x8xf32>
    "tpu.trace_stop"() : () -> ()
    %cst_206 = arith.constant 0.353553385 : f32
    %405 = vector.broadcast %cst_206 : f32 to vector<1x8x8xf32>
    %406 = arith.mulf %404, %405 : vector<1x8x8xf32>
    %cst_207 = arith.constant -1.000000e+30 : f32
    %407 = vector.shape_cast %2 : vector<8x8xi1> to vector<1x8x8xi1>
    %408 = vector.broadcast %cst_207 : f32 to vector<1x8x8xf32>
    %409 = arith.select %407, %408, %406 : vector<1x8x8xi1>, vector<1x8x8xf32>
    %cst_208 = arith.constant dense<0xFF800000> : vector<1x8xf32>
    %410 = vector.multi_reduction <maximumf>, %409, %cst_208 [2] : vector<1x8x8xf32> to vector<1x8xf32>
    %411 = vector.shape_cast %410 : vector<1x8xf32> to vector<1x8x1xf32>
    %412 = vector.broadcast %411 : vector<1x8x1xf32> to vector<1x8x8xf32>
    %413 = arith.subf %409, %412 : vector<1x8x8xf32>
    %414 = math.exp %413 : vector<1x8x8xf32>
    %cst_209 = arith.constant dense<0.000000e+00> : vector<1x8xf32>
    %415 = vector.multi_reduction <add>, %414, %cst_209 [2] : vector<1x8x8xf32> to vector<1x8xf32>
    %416 = vector.shape_cast %415 : vector<1x8xf32> to vector<1x8x1xf32>
    %417 = tpu.reciprocal %416 : vector<1x8x1xf32> -> vector<1x8x1xf32>
    %418 = vector.broadcast %417 : vector<1x8x1xf32> to vector<1x8x8xf32>
    %419 = arith.mulf %414, %418 : vector<1x8x8xf32>
    %420 = arith.truncf %419 : vector<1x8x8xf32> to vector<1x8x8xbf16>
    "tpu.trace_start"() <{level = 10 : i32, message = "bqk,bkd->bqd"}> : () -> ()
    %cst_210 = arith.constant dense<0.000000e+00> : vector<1x8x8xf32>
    %421 = tpu.matmul %420, %403, %cst_210 {dimension_numbers = #tpu.dot_dimension_numbers<[2], [1], [1], [2], [0, 0, 0, 1, 1, 2], [0], [0]>} : vector<1x8x8xbf16>, vector<1x8x8xbf16>, vector<1x8x8xf32> -> vector<1x8x8xf32>
    "tpu.trace_stop"() : () -> ()
    %422 = vector.shape_cast %421 : vector<1x8x8xf32> to vector<8x8xf32>
    %423 = arith.truncf %422 : vector<8x8xf32> to vector<8x8xbf16>
    %c5_211 = arith.constant 5 : index
    %c0_212 = arith.constant 0 : index
    %c0_213 = arith.constant 0 : index
    %424 = vector.load %arg10[%c5_211, %c0_212, %c0_213] : memref<8x8x32xbf16, #tpu.memory_space<vmem>>, vector<1x8x32xbf16>
    %425 = vector.shape_cast %424 : vector<1x8x32xbf16> to vector<8x32xbf16>
    %cst_214 = arith.constant dense<0.000000e+00> : vector<8x32xf32>
    %426 = tpu.matmul %423, %425, %cst_214 {dimension_numbers = #tpu.dot_dimension_numbers<[1], [0], [0], [1], [0, 0, 1, 1], [], []>} : vector<8x8xbf16>, vector<8x32xbf16>, vector<8x32xf32> -> vector<8x32xf32>
    %427 = arith.addf %376, %426 : vector<8x32xf32>
    %c14 = arith.constant 14 : index
    %c0_215 = arith.constant 0 : index
    %c0_216 = arith.constant 0 : index
    %428 = vector.load %arg8[%c14, %c0_215, %c0_216] : memref<24x32x8xbf16, #tpu.memory_space<vmem>>, vector<1x32x8xbf16>
    %429 = vector.shape_cast %428 : vector<1x32x8xbf16> to vector<32x8xbf16>
    %cst_217 = arith.constant dense<0.000000e+00> : vector<8x8xf32>
    %430 = tpu.matmul %323, %429, %cst_217 {dimension_numbers = #tpu.dot_dimension_numbers<[1], [0], [0], [1], [0, 0, 1, 1], [], []>} : vector<8x32xbf16>, vector<32x8xbf16>, vector<8x8xf32> -> vector<8x8xf32>
    %c14_218 = arith.constant 14 : index
    %c0_219 = arith.constant 0 : index
    %c0_220 = arith.constant 0 : index
    %431 = vector.load %arg9[%c14_218, %c0_219, %c0_220] : memref<24x1x8xf32, #tpu.memory_space<vmem>>, vector<1x1x8xf32>
    %432 = vector.shape_cast %431 : vector<1x1x8xf32> to vector<1x8xf32>
    %433 = vector.broadcast %432 : vector<1x8xf32> to vector<8x8xf32>
    %434 = arith.addf %430, %433 : vector<8x8xf32>
    %c18 = arith.constant 18 : index
    %c0_221 = arith.constant 0 : index
    %c0_222 = arith.constant 0 : index
    %435 = vector.load %arg8[%c18, %c0_221, %c0_222] : memref<24x32x8xbf16, #tpu.memory_space<vmem>>, vector<1x32x8xbf16>
    %436 = vector.shape_cast %435 : vector<1x32x8xbf16> to vector<32x8xbf16>
    %cst_223 = arith.constant dense<0.000000e+00> : vector<8x8xf32>
    %437 = tpu.matmul %324, %436, %cst_223 {dimension_numbers = #tpu.dot_dimension_numbers<[1], [0], [0], [1], [0, 0, 1, 1], [], []>} : vector<8x32xbf16>, vector<32x8xbf16>, vector<8x8xf32> -> vector<8x8xf32>
    %c18_224 = arith.constant 18 : index
    %c0_225 = arith.constant 0 : index
    %c0_226 = arith.constant 0 : index
    %438 = vector.load %arg9[%c18_224, %c0_225, %c0_226] : memref<24x1x8xf32, #tpu.memory_space<vmem>>, vector<1x1x8xf32>
    %439 = vector.shape_cast %438 : vector<1x1x8xf32> to vector<1x8xf32>
    %440 = vector.broadcast %439 : vector<1x8xf32> to vector<8x8xf32>
    %441 = arith.addf %437, %440 : vector<8x8xf32>
    %c22 = arith.constant 22 : index
    %c0_227 = arith.constant 0 : index
    %c0_228 = arith.constant 0 : index
    %442 = vector.load %arg8[%c22, %c0_227, %c0_228] : memref<24x32x8xbf16, #tpu.memory_space<vmem>>, vector<1x32x8xbf16>
    %443 = vector.shape_cast %442 : vector<1x32x8xbf16> to vector<32x8xbf16>
    %cst_229 = arith.constant dense<0.000000e+00> : vector<8x8xf32>
    %444 = tpu.matmul %324, %443, %cst_229 {dimension_numbers = #tpu.dot_dimension_numbers<[1], [0], [0], [1], [0, 0, 1, 1], [], []>} : vector<8x32xbf16>, vector<32x8xbf16>, vector<8x8xf32> -> vector<8x8xf32>
    %c22_230 = arith.constant 22 : index
    %c0_231 = arith.constant 0 : index
    %c0_232 = arith.constant 0 : index
    %445 = vector.load %arg9[%c22_230, %c0_231, %c0_232] : memref<24x1x8xf32, #tpu.memory_space<vmem>>, vector<1x1x8xf32>
    %446 = vector.shape_cast %445 : vector<1x1x8xf32> to vector<1x8xf32>
    %447 = vector.broadcast %446 : vector<1x8xf32> to vector<8x8xf32>
    %448 = arith.addf %444, %447 : vector<8x8xf32>
    %449 = vector.shape_cast %434 : vector<8x8xf32> to vector<1x8x8xf32>
    %450 = arith.truncf %449 : vector<1x8x8xf32> to vector<1x8x8xbf16>
    %451 = vector.shape_cast %441 : vector<8x8xf32> to vector<1x8x8xf32>
    %452 = arith.truncf %451 : vector<1x8x8xf32> to vector<1x8x8xbf16>
    %453 = vector.shape_cast %448 : vector<8x8xf32> to vector<1x8x8xf32>
    %454 = arith.truncf %453 : vector<1x8x8xf32> to vector<1x8x8xbf16>
    "tpu.trace_start"() <{level = 10 : i32, message = "bqd,bkd->bqk"}> : () -> ()
    %cst_233 = arith.constant dense<0.000000e+00> : vector<1x8x8xf32>
    %455 = tpu.matmul %450, %452, %cst_233 {dimension_numbers = #tpu.dot_dimension_numbers<[2], [2], [1], [1], [0, 0, 0, 1, 1, 1], [0], [0]>} : vector<1x8x8xbf16>, vector<1x8x8xbf16>, vector<1x8x8xf32> -> vector<1x8x8xf32>
    "tpu.trace_stop"() : () -> ()
    %cst_234 = arith.constant 0.353553385 : f32
    %456 = vector.broadcast %cst_234 : f32 to vector<1x8x8xf32>
    %457 = arith.mulf %455, %456 : vector<1x8x8xf32>
    %cst_235 = arith.constant -1.000000e+30 : f32
    %458 = vector.shape_cast %2 : vector<8x8xi1> to vector<1x8x8xi1>
    %459 = vector.broadcast %cst_235 : f32 to vector<1x8x8xf32>
    %460 = arith.select %458, %459, %457 : vector<1x8x8xi1>, vector<1x8x8xf32>
    %cst_236 = arith.constant dense<0xFF800000> : vector<1x8xf32>
    %461 = vector.multi_reduction <maximumf>, %460, %cst_236 [2] : vector<1x8x8xf32> to vector<1x8xf32>
    %462 = vector.shape_cast %461 : vector<1x8xf32> to vector<1x8x1xf32>
    %463 = vector.broadcast %462 : vector<1x8x1xf32> to vector<1x8x8xf32>
    %464 = arith.subf %460, %463 : vector<1x8x8xf32>
    %465 = math.exp %464 : vector<1x8x8xf32>
    %cst_237 = arith.constant dense<0.000000e+00> : vector<1x8xf32>
    %466 = vector.multi_reduction <add>, %465, %cst_237 [2] : vector<1x8x8xf32> to vector<1x8xf32>
    %467 = vector.shape_cast %466 : vector<1x8xf32> to vector<1x8x1xf32>
    %468 = tpu.reciprocal %467 : vector<1x8x1xf32> -> vector<1x8x1xf32>
    %469 = vector.broadcast %468 : vector<1x8x1xf32> to vector<1x8x8xf32>
    %470 = arith.mulf %465, %469 : vector<1x8x8xf32>
    %471 = arith.truncf %470 : vector<1x8x8xf32> to vector<1x8x8xbf16>
    "tpu.trace_start"() <{level = 10 : i32, message = "bqk,bkd->bqd"}> : () -> ()
    %cst_238 = arith.constant dense<0.000000e+00> : vector<1x8x8xf32>
    %472 = tpu.matmul %471, %454, %cst_238 {dimension_numbers = #tpu.dot_dimension_numbers<[2], [1], [1], [2], [0, 0, 0, 1, 1, 2], [0], [0]>} : vector<1x8x8xbf16>, vector<1x8x8xbf16>, vector<1x8x8xf32> -> vector<1x8x8xf32>
    "tpu.trace_stop"() : () -> ()
    %473 = vector.shape_cast %472 : vector<1x8x8xf32> to vector<8x8xf32>
    %474 = arith.truncf %473 : vector<8x8xf32> to vector<8x8xbf16>
    %c6_239 = arith.constant 6 : index
    %c0_240 = arith.constant 0 : index
    %c0_241 = arith.constant 0 : index
    %475 = vector.load %arg10[%c6_239, %c0_240, %c0_241] : memref<8x8x32xbf16, #tpu.memory_space<vmem>>, vector<1x8x32xbf16>
    %476 = vector.shape_cast %475 : vector<1x8x32xbf16> to vector<8x32xbf16>
    %cst_242 = arith.constant dense<0.000000e+00> : vector<8x32xf32>
    %477 = tpu.matmul %474, %476, %cst_242 {dimension_numbers = #tpu.dot_dimension_numbers<[1], [0], [0], [1], [0, 0, 1, 1], [], []>} : vector<8x8xbf16>, vector<8x32xbf16>, vector<8x32xf32> -> vector<8x32xf32>
    %478 = arith.addf %427, %477 : vector<8x32xf32>
    %c15 = arith.constant 15 : index
    %c0_243 = arith.constant 0 : index
    %c0_244 = arith.constant 0 : index
    %479 = vector.load %arg8[%c15, %c0_243, %c0_244] : memref<24x32x8xbf16, #tpu.memory_space<vmem>>, vector<1x32x8xbf16>
    %480 = vector.shape_cast %479 : vector<1x32x8xbf16> to vector<32x8xbf16>
    %cst_245 = arith.constant dense<0.000000e+00> : vector<8x8xf32>
    %481 = tpu.matmul %323, %480, %cst_245 {dimension_numbers = #tpu.dot_dimension_numbers<[1], [0], [0], [1], [0, 0, 1, 1], [], []>} : vector<8x32xbf16>, vector<32x8xbf16>, vector<8x8xf32> -> vector<8x8xf32>
    %c15_246 = arith.constant 15 : index
    %c0_247 = arith.constant 0 : index
    %c0_248 = arith.constant 0 : index
    %482 = vector.load %arg9[%c15_246, %c0_247, %c0_248] : memref<24x1x8xf32, #tpu.memory_space<vmem>>, vector<1x1x8xf32>
    %483 = vector.shape_cast %482 : vector<1x1x8xf32> to vector<1x8xf32>
    %484 = vector.broadcast %483 : vector<1x8xf32> to vector<8x8xf32>
    %485 = arith.addf %481, %484 : vector<8x8xf32>
    %c19 = arith.constant 19 : index
    %c0_249 = arith.constant 0 : index
    %c0_250 = arith.constant 0 : index
    %486 = vector.load %arg8[%c19, %c0_249, %c0_250] : memref<24x32x8xbf16, #tpu.memory_space<vmem>>, vector<1x32x8xbf16>
    %487 = vector.shape_cast %486 : vector<1x32x8xbf16> to vector<32x8xbf16>
    %cst_251 = arith.constant dense<0.000000e+00> : vector<8x8xf32>
    %488 = tpu.matmul %324, %487, %cst_251 {dimension_numbers = #tpu.dot_dimension_numbers<[1], [0], [0], [1], [0, 0, 1, 1], [], []>} : vector<8x32xbf16>, vector<32x8xbf16>, vector<8x8xf32> -> vector<8x8xf32>
    %c19_252 = arith.constant 19 : index
    %c0_253 = arith.constant 0 : index
    %c0_254 = arith.constant 0 : index
    %489 = vector.load %arg9[%c19_252, %c0_253, %c0_254] : memref<24x1x8xf32, #tpu.memory_space<vmem>>, vector<1x1x8xf32>
    %490 = vector.shape_cast %489 : vector<1x1x8xf32> to vector<1x8xf32>
    %491 = vector.broadcast %490 : vector<1x8xf32> to vector<8x8xf32>
    %492 = arith.addf %488, %491 : vector<8x8xf32>
    %c23 = arith.constant 23 : index
    %c0_255 = arith.constant 0 : index
    %c0_256 = arith.constant 0 : index
    %493 = vector.load %arg8[%c23, %c0_255, %c0_256] : memref<24x32x8xbf16, #tpu.memory_space<vmem>>, vector<1x32x8xbf16>
    %494 = vector.shape_cast %493 : vector<1x32x8xbf16> to vector<32x8xbf16>
    %cst_257 = arith.constant dense<0.000000e+00> : vector<8x8xf32>
    %495 = tpu.matmul %324, %494, %cst_257 {dimension_numbers = #tpu.dot_dimension_numbers<[1], [0], [0], [1], [0, 0, 1, 1], [], []>} : vector<8x32xbf16>, vector<32x8xbf16>, vector<8x8xf32> -> vector<8x8xf32>
    %c23_258 = arith.constant 23 : index
    %c0_259 = arith.constant 0 : index
    %c0_260 = arith.constant 0 : index
    %496 = vector.load %arg9[%c23_258, %c0_259, %c0_260] : memref<24x1x8xf32, #tpu.memory_space<vmem>>, vector<1x1x8xf32>
    %497 = vector.shape_cast %496 : vector<1x1x8xf32> to vector<1x8xf32>
    %498 = vector.broadcast %497 : vector<1x8xf32> to vector<8x8xf32>
    %499 = arith.addf %495, %498 : vector<8x8xf32>
    %500 = vector.shape_cast %485 : vector<8x8xf32> to vector<1x8x8xf32>
    %501 = arith.truncf %500 : vector<1x8x8xf32> to vector<1x8x8xbf16>
    %502 = vector.shape_cast %492 : vector<8x8xf32> to vector<1x8x8xf32>
    %503 = arith.truncf %502 : vector<1x8x8xf32> to vector<1x8x8xbf16>
    %504 = vector.shape_cast %499 : vector<8x8xf32> to vector<1x8x8xf32>
    %505 = arith.truncf %504 : vector<1x8x8xf32> to vector<1x8x8xbf16>
    "tpu.trace_start"() <{level = 10 : i32, message = "bqd,bkd->bqk"}> : () -> ()
    %cst_261 = arith.constant dense<0.000000e+00> : vector<1x8x8xf32>
    %506 = tpu.matmul %501, %503, %cst_261 {dimension_numbers = #tpu.dot_dimension_numbers<[2], [2], [1], [1], [0, 0, 0, 1, 1, 1], [0], [0]>} : vector<1x8x8xbf16>, vector<1x8x8xbf16>, vector<1x8x8xf32> -> vector<1x8x8xf32>
    "tpu.trace_stop"() : () -> ()
    %cst_262 = arith.constant 0.353553385 : f32
    %507 = vector.broadcast %cst_262 : f32 to vector<1x8x8xf32>
    %508 = arith.mulf %506, %507 : vector<1x8x8xf32>
    %cst_263 = arith.constant -1.000000e+30 : f32
    %509 = vector.shape_cast %2 : vector<8x8xi1> to vector<1x8x8xi1>
    %510 = vector.broadcast %cst_263 : f32 to vector<1x8x8xf32>
    %511 = arith.select %509, %510, %508 : vector<1x8x8xi1>, vector<1x8x8xf32>
    %cst_264 = arith.constant dense<0xFF800000> : vector<1x8xf32>
    %512 = vector.multi_reduction <maximumf>, %511, %cst_264 [2] : vector<1x8x8xf32> to vector<1x8xf32>
    %513 = vector.shape_cast %512 : vector<1x8xf32> to vector<1x8x1xf32>
    %514 = vector.broadcast %513 : vector<1x8x1xf32> to vector<1x8x8xf32>
    %515 = arith.subf %511, %514 : vector<1x8x8xf32>
    %516 = math.exp %515 : vector<1x8x8xf32>
    %cst_265 = arith.constant dense<0.000000e+00> : vector<1x8xf32>
    %517 = vector.multi_reduction <add>, %516, %cst_265 [2] : vector<1x8x8xf32> to vector<1x8xf32>
    %518 = vector.shape_cast %517 : vector<1x8xf32> to vector<1x8x1xf32>
    %519 = tpu.reciprocal %518 : vector<1x8x1xf32> -> vector<1x8x1xf32>
    %520 = vector.broadcast %519 : vector<1x8x1xf32> to vector<1x8x8xf32>
    %521 = arith.mulf %516, %520 : vector<1x8x8xf32>
    %522 = arith.truncf %521 : vector<1x8x8xf32> to vector<1x8x8xbf16>
    "tpu.trace_start"() <{level = 10 : i32, message = "bqk,bkd->bqd"}> : () -> ()
    %cst_266 = arith.constant dense<0.000000e+00> : vector<1x8x8xf32>
    %523 = tpu.matmul %522, %505, %cst_266 {dimension_numbers = #tpu.dot_dimension_numbers<[2], [1], [1], [2], [0, 0, 0, 1, 1, 2], [0], [0]>} : vector<1x8x8xbf16>, vector<1x8x8xbf16>, vector<1x8x8xf32> -> vector<1x8x8xf32>
    "tpu.trace_stop"() : () -> ()
    %524 = vector.shape_cast %523 : vector<1x8x8xf32> to vector<8x8xf32>
    %525 = arith.truncf %524 : vector<8x8xf32> to vector<8x8xbf16>
    %c7_267 = arith.constant 7 : index
    %c0_268 = arith.constant 0 : index
    %c0_269 = arith.constant 0 : index
    %526 = vector.load %arg10[%c7_267, %c0_268, %c0_269] : memref<8x8x32xbf16, #tpu.memory_space<vmem>>, vector<1x8x32xbf16>
    %527 = vector.shape_cast %526 : vector<1x8x32xbf16> to vector<8x32xbf16>
    %cst_270 = arith.constant dense<0.000000e+00> : vector<8x32xf32>
    %528 = tpu.matmul %525, %527, %cst_270 {dimension_numbers = #tpu.dot_dimension_numbers<[1], [0], [0], [1], [0, 0, 1, 1], [], []>} : vector<8x8xbf16>, vector<8x32xbf16>, vector<8x32xf32> -> vector<8x32xf32>
    %529 = arith.addf %478, %528 : vector<8x32xf32>
    %530 = vector.broadcast %317 : vector<1x32xf32> to vector<8x32xf32>
    %531 = arith.addf %529, %530 : vector<8x32xf32>
    %532 = arith.addf %314, %531 : vector<8x32xf32>
    %cst_271 = arith.constant dense<0.000000e+00> : vector<8xf32>
    %533 = vector.multi_reduction <add>, %532, %cst_271 [1] : vector<8x32xf32> to vector<8xf32>
    %534 = vector.shape_cast %533 : vector<8xf32> to vector<8x1xf32>
    %cst_272 = arith.constant 3.200000e+01 : f32
    %535 = vector.broadcast %cst_272 : f32 to vector<8x1xf32>
    %536 = arith.divf %534, %535 : vector<8x1xf32>
    %537 = vector.broadcast %536 : vector<8x1xf32> to vector<8x32xf32>
    %538 = arith.subf %532, %537 : vector<8x32xf32>
    %539 = arith.mulf %538, %538 : vector<8x32xf32>
    %cst_273 = arith.constant dense<0.000000e+00> : vector<8xf32>
    %540 = vector.multi_reduction <add>, %539, %cst_273 [1] : vector<8x32xf32> to vector<8xf32>
    %541 = vector.shape_cast %540 : vector<8xf32> to vector<8x1xf32>
    %cst_274 = arith.constant 3.200000e+01 : f32
    %542 = vector.broadcast %cst_274 : f32 to vector<8x1xf32>
    %543 = arith.divf %541, %542 : vector<8x1xf32>
    %cst_275 = arith.constant 9.99999974E-6 : f32
    %544 = vector.broadcast %cst_275 : f32 to vector<8x1xf32>
    %545 = arith.addf %543, %544 : vector<8x1xf32>
    %546 = math.rsqrt %545 : vector<8x1xf32>
    %547 = vector.broadcast %546 : vector<8x1xf32> to vector<8x32xf32>
    %548 = arith.mulf %538, %547 : vector<8x32xf32>
    %549 = vector.broadcast %318 : vector<1x32xf32> to vector<8x32xf32>
    %550 = arith.mulf %548, %549 : vector<8x32xf32>
    %551 = vector.broadcast %319 : vector<1x32xf32> to vector<8x32xf32>
    %552 = arith.addf %550, %551 : vector<8x32xf32>
    %553 = arith.truncf %552 : vector<8x32xf32> to vector<8x32xbf16>
    %c1_276 = arith.constant 1 : index
    %c0_277 = arith.constant 0 : index
    %c0_278 = arith.constant 0 : index
    %554 = vector.load %arg11[%c1_276, %c0_277, %c0_278] : memref<2x32x32xbf16, #tpu.memory_space<vmem>>, vector<1x32x32xbf16>
    %555 = vector.shape_cast %554 : vector<1x32x32xbf16> to vector<32x32xbf16>
    %cst_279 = arith.constant dense<0.000000e+00> : vector<8x32xf32>
    %556 = tpu.matmul %553, %555, %cst_279 {dimension_numbers = #tpu.dot_dimension_numbers<[1], [0], [0], [1], [0, 0, 1, 1], [], []>} : vector<8x32xbf16>, vector<32x32xbf16>, vector<8x32xf32> -> vector<8x32xf32>
    %c1_280 = arith.constant 1 : index
    %c0_281 = arith.constant 0 : index
    %c0_282 = arith.constant 0 : index
    %557 = vector.load %arg12[%c1_280, %c0_281, %c0_282] : memref<2x1x32xf32, #tpu.memory_space<vmem>>, vector<1x1x32xf32>
    %558 = vector.shape_cast %557 : vector<1x1x32xf32> to vector<1x32xf32>
    %559 = vector.broadcast %558 : vector<1x32xf32> to vector<8x32xf32>
    %560 = arith.addf %556, %559 : vector<8x32xf32>
    %cst_283 = arith.constant 0.000000e+00 : f32
    %561 = vector.broadcast %cst_283 : f32 to vector<8x32xf32>
    %562 = arith.maximumf %560, %561 : vector<8x32xf32>
    %563 = arith.truncf %562 : vector<8x32xf32> to vector<8x32xbf16>
    %c1_284 = arith.constant 1 : index
    %c0_285 = arith.constant 0 : index
    %c0_286 = arith.constant 0 : index
    %564 = vector.load %arg13[%c1_284, %c0_285, %c0_286] : memref<2x32x32xbf16, #tpu.memory_space<vmem>>, vector<1x32x32xbf16>
    %565 = vector.shape_cast %564 : vector<1x32x32xbf16> to vector<32x32xbf16>
    %cst_287 = arith.constant dense<0.000000e+00> : vector<8x32xf32>
    %566 = tpu.matmul %563, %565, %cst_287 {dimension_numbers = #tpu.dot_dimension_numbers<[1], [0], [0], [1], [0, 0, 1, 1], [], []>} : vector<8x32xbf16>, vector<32x32xbf16>, vector<8x32xf32> -> vector<8x32xf32>
    %567 = vector.broadcast %320 : vector<1x32xf32> to vector<8x32xf32>
    %568 = arith.addf %566, %567 : vector<8x32xf32>
    %569 = arith.addf %552, %568 : vector<8x32xf32>
    %cst_288 = arith.constant dense<0.000000e+00> : vector<8xf32>
    %570 = vector.multi_reduction <add>, %569, %cst_288 [1] : vector<8x32xf32> to vector<8xf32>
    %571 = vector.shape_cast %570 : vector<8xf32> to vector<8x1xf32>
    %cst_289 = arith.constant 3.200000e+01 : f32
    %572 = vector.broadcast %cst_289 : f32 to vector<8x1xf32>
    %573 = arith.divf %571, %572 : vector<8x1xf32>
    %574 = vector.broadcast %573 : vector<8x1xf32> to vector<8x32xf32>
    %575 = arith.subf %569, %574 : vector<8x32xf32>
    %576 = arith.mulf %575, %575 : vector<8x32xf32>
    %cst_290 = arith.constant dense<0.000000e+00> : vector<8xf32>
    %577 = vector.multi_reduction <add>, %576, %cst_290 [1] : vector<8x32xf32> to vector<8xf32>
    %578 = vector.shape_cast %577 : vector<8xf32> to vector<8x1xf32>
    %cst_291 = arith.constant 3.200000e+01 : f32
    %579 = vector.broadcast %cst_291 : f32 to vector<8x1xf32>
    %580 = arith.divf %578, %579 : vector<8x1xf32>
    %cst_292 = arith.constant 9.99999974E-6 : f32
    %581 = vector.broadcast %cst_292 : f32 to vector<8x1xf32>
    %582 = arith.addf %580, %581 : vector<8x1xf32>
    %583 = math.rsqrt %582 : vector<8x1xf32>
    %584 = vector.broadcast %583 : vector<8x1xf32> to vector<8x32xf32>
    %585 = arith.mulf %575, %584 : vector<8x32xf32>
    %586 = vector.broadcast %321 : vector<1x32xf32> to vector<8x32xf32>
    %587 = arith.mulf %585, %586 : vector<8x32xf32>
    %588 = vector.broadcast %322 : vector<1x32xf32> to vector<8x32xf32>
    %589 = arith.addf %587, %588 : vector<8x32xf32>
    %cst_293 = arith.constant dense<0.000000e+00> : vector<8xf32>
    %590 = vector.multi_reduction <add>, %589, %cst_293 [1] : vector<8x32xf32> to vector<8xf32>
    %591 = vector.shape_cast %590 : vector<8xf32> to vector<8x1xf32>
    %cst_294 = arith.constant 3.200000e+01 : f32
    %592 = vector.broadcast %cst_294 : f32 to vector<8x1xf32>
    %593 = arith.divf %591, %592 : vector<8x1xf32>
    %594 = vector.broadcast %593 : vector<8x1xf32> to vector<8x32xf32>
    %595 = arith.subf %589, %594 : vector<8x32xf32>
    %596 = arith.mulf %595, %595 : vector<8x32xf32>
    %cst_295 = arith.constant dense<0.000000e+00> : vector<8xf32>
    %597 = vector.multi_reduction <add>, %596, %cst_295 [1] : vector<8x32xf32> to vector<8xf32>
    %598 = vector.shape_cast %597 : vector<8xf32> to vector<8x1xf32>
    %cst_296 = arith.constant 3.200000e+01 : f32
    %599 = vector.broadcast %cst_296 : f32 to vector<8x1xf32>
    %600 = arith.divf %598, %599 : vector<8x1xf32>
    %cst_297 = arith.constant 9.99999974E-6 : f32
    %601 = vector.broadcast %cst_297 : f32 to vector<8x1xf32>
    %602 = arith.addf %600, %601 : vector<8x1xf32>
    %603 = math.rsqrt %602 : vector<8x1xf32>
    %604 = vector.broadcast %603 : vector<8x1xf32> to vector<8x32xf32>
    %605 = arith.mulf %595, %604 : vector<8x32xf32>
    %606 = vector.broadcast %6 : vector<1x32xf32> to vector<8x32xf32>
    %607 = arith.mulf %605, %606 : vector<8x32xf32>
    %608 = vector.broadcast %7 : vector<1x32xf32> to vector<8x32xf32>
    %609 = arith.addf %607, %608 : vector<8x32xf32>
    %c0_298 = arith.constant 0 : index
    %c0_299 = arith.constant 0 : index
    %c0_300 = arith.constant 0 : index
    %610 = vector.load %arg21[%c0_298, %c0_299, %c0_300] : memref<2x9x32xf32, #tpu.memory_space<vmem>>, vector<1x9x32xf32>
    %611 = vector.shape_cast %610 : vector<1x9x32xf32> to vector<9x32xf32>
    %612 = vector.extract_strided_slice %611 {offsets = [0, 0], sizes = [1, 32], strides = [1, 1]} : vector<9x32xf32> to vector<1x32xf32>
    %613 = vector.extract_strided_slice %611 {offsets = [1, 0], sizes = [1, 32], strides = [1, 1]} : vector<9x32xf32> to vector<1x32xf32>
    %614 = vector.extract_strided_slice %611 {offsets = [2, 0], sizes = [1, 32], strides = [1, 1]} : vector<9x32xf32> to vector<1x32xf32>
    %615 = vector.extract_strided_slice %611 {offsets = [3, 0], sizes = [1, 32], strides = [1, 1]} : vector<9x32xf32> to vector<1x32xf32>
    %616 = vector.extract_strided_slice %611 {offsets = [4, 0], sizes = [1, 32], strides = [1, 1]} : vector<9x32xf32> to vector<1x32xf32>
    %617 = vector.extract_strided_slice %611 {offsets = [5, 0], sizes = [1, 32], strides = [1, 1]} : vector<9x32xf32> to vector<1x32xf32>
    %618 = vector.extract_strided_slice %611 {offsets = [6, 0], sizes = [1, 32], strides = [1, 1]} : vector<9x32xf32> to vector<1x32xf32>
    %619 = vector.extract_strided_slice %611 {offsets = [7, 0], sizes = [1, 32], strides = [1, 1]} : vector<9x32xf32> to vector<1x32xf32>
    %620 = vector.extract_strided_slice %611 {offsets = [8, 0], sizes = [1, 32], strides = [1, 1]} : vector<9x32xf32> to vector<1x32xf32>
    %621 = arith.truncf %39 : vector<8x32xf32> to vector<8x32xbf16>
    %622 = arith.truncf %39 : vector<8x32xf32> to vector<8x32xbf16>
    %cst_301 = arith.constant 0.000000e+00 : f32
    %623 = vector.broadcast %cst_301 : f32 to vector<8x32xf32>
    %c0_302 = arith.constant 0 : index
    %c0_303 = arith.constant 0 : index
    %c0_304 = arith.constant 0 : index
    %624 = vector.load %arg15[%c0_302, %c0_303, %c0_304] : memref<48x32x8xbf16, #tpu.memory_space<vmem>>, vector<1x32x8xbf16>
    %625 = vector.shape_cast %624 : vector<1x32x8xbf16> to vector<32x8xbf16>
    %cst_305 = arith.constant dense<0.000000e+00> : vector<8x8xf32>
    %626 = tpu.matmul %621, %625, %cst_305 {dimension_numbers = #tpu.dot_dimension_numbers<[1], [0], [0], [1], [0, 0, 1, 1], [], []>} : vector<8x32xbf16>, vector<32x8xbf16>, vector<8x8xf32> -> vector<8x8xf32>
    %c0_306 = arith.constant 0 : index
    %c0_307 = arith.constant 0 : index
    %c0_308 = arith.constant 0 : index
    %627 = vector.load %arg16[%c0_306, %c0_307, %c0_308] : memref<48x1x8xf32, #tpu.memory_space<vmem>>, vector<1x1x8xf32>
    %628 = vector.shape_cast %627 : vector<1x1x8xf32> to vector<1x8xf32>
    %629 = vector.broadcast %628 : vector<1x8xf32> to vector<8x8xf32>
    %630 = arith.addf %626, %629 : vector<8x8xf32>
    %c4_309 = arith.constant 4 : index
    %c0_310 = arith.constant 0 : index
    %c0_311 = arith.constant 0 : index
    %631 = vector.load %arg15[%c4_309, %c0_310, %c0_311] : memref<48x32x8xbf16, #tpu.memory_space<vmem>>, vector<1x32x8xbf16>
    %632 = vector.shape_cast %631 : vector<1x32x8xbf16> to vector<32x8xbf16>
    %cst_312 = arith.constant dense<0.000000e+00> : vector<8x8xf32>
    %633 = tpu.matmul %622, %632, %cst_312 {dimension_numbers = #tpu.dot_dimension_numbers<[1], [0], [0], [1], [0, 0, 1, 1], [], []>} : vector<8x32xbf16>, vector<32x8xbf16>, vector<8x8xf32> -> vector<8x8xf32>
    %c4_313 = arith.constant 4 : index
    %c0_314 = arith.constant 0 : index
    %c0_315 = arith.constant 0 : index
    %634 = vector.load %arg16[%c4_313, %c0_314, %c0_315] : memref<48x1x8xf32, #tpu.memory_space<vmem>>, vector<1x1x8xf32>
    %635 = vector.shape_cast %634 : vector<1x1x8xf32> to vector<1x8xf32>
    %636 = vector.broadcast %635 : vector<1x8xf32> to vector<8x8xf32>
    %637 = arith.addf %633, %636 : vector<8x8xf32>
    %c8_316 = arith.constant 8 : index
    %c0_317 = arith.constant 0 : index
    %c0_318 = arith.constant 0 : index
    %638 = vector.load %arg15[%c8_316, %c0_317, %c0_318] : memref<48x32x8xbf16, #tpu.memory_space<vmem>>, vector<1x32x8xbf16>
    %639 = vector.shape_cast %638 : vector<1x32x8xbf16> to vector<32x8xbf16>
    %cst_319 = arith.constant dense<0.000000e+00> : vector<8x8xf32>
    %640 = tpu.matmul %622, %639, %cst_319 {dimension_numbers = #tpu.dot_dimension_numbers<[1], [0], [0], [1], [0, 0, 1, 1], [], []>} : vector<8x32xbf16>, vector<32x8xbf16>, vector<8x8xf32> -> vector<8x8xf32>
    %c8_320 = arith.constant 8 : index
    %c0_321 = arith.constant 0 : index
    %c0_322 = arith.constant 0 : index
    %641 = vector.load %arg16[%c8_320, %c0_321, %c0_322] : memref<48x1x8xf32, #tpu.memory_space<vmem>>, vector<1x1x8xf32>
    %642 = vector.shape_cast %641 : vector<1x1x8xf32> to vector<1x8xf32>
    %643 = vector.broadcast %642 : vector<1x8xf32> to vector<8x8xf32>
    %644 = arith.addf %640, %643 : vector<8x8xf32>
    %645 = vector.shape_cast %630 : vector<8x8xf32> to vector<1x8x8xf32>
    %646 = arith.truncf %645 : vector<1x8x8xf32> to vector<1x8x8xbf16>
    %647 = vector.shape_cast %637 : vector<8x8xf32> to vector<1x8x8xf32>
    %648 = arith.truncf %647 : vector<1x8x8xf32> to vector<1x8x8xbf16>
    %649 = vector.shape_cast %644 : vector<8x8xf32> to vector<1x8x8xf32>
    %650 = arith.truncf %649 : vector<1x8x8xf32> to vector<1x8x8xbf16>
    "tpu.trace_start"() <{level = 10 : i32, message = "bqd,bkd->bqk"}> : () -> ()
    %cst_323 = arith.constant dense<0.000000e+00> : vector<1x8x8xf32>
    %651 = tpu.matmul %646, %648, %cst_323 {dimension_numbers = #tpu.dot_dimension_numbers<[2], [2], [1], [1], [0, 0, 0, 1, 1, 1], [0], [0]>} : vector<1x8x8xbf16>, vector<1x8x8xbf16>, vector<1x8x8xf32> -> vector<1x8x8xf32>
    "tpu.trace_stop"() : () -> ()
    %cst_324 = arith.constant 0.353553385 : f32
    %652 = vector.broadcast %cst_324 : f32 to vector<1x8x8xf32>
    %653 = arith.mulf %651, %652 : vector<1x8x8xf32>
    %cst_325 = arith.constant -1.000000e+30 : f32
    %654 = vector.shape_cast %2 : vector<8x8xi1> to vector<1x8x8xi1>
    %655 = vector.broadcast %cst_325 : f32 to vector<1x8x8xf32>
    %656 = arith.select %654, %655, %653 : vector<1x8x8xi1>, vector<1x8x8xf32>
    %cst_326 = arith.constant dense<0xFF800000> : vector<1x8xf32>
    %657 = vector.multi_reduction <maximumf>, %656, %cst_326 [2] : vector<1x8x8xf32> to vector<1x8xf32>
    %658 = vector.shape_cast %657 : vector<1x8xf32> to vector<1x8x1xf32>
    %659 = vector.broadcast %658 : vector<1x8x1xf32> to vector<1x8x8xf32>
    %660 = arith.subf %656, %659 : vector<1x8x8xf32>
    %661 = math.exp %660 : vector<1x8x8xf32>
    %cst_327 = arith.constant dense<0.000000e+00> : vector<1x8xf32>
    %662 = vector.multi_reduction <add>, %661, %cst_327 [2] : vector<1x8x8xf32> to vector<1x8xf32>
    %663 = vector.shape_cast %662 : vector<1x8xf32> to vector<1x8x1xf32>
    %664 = tpu.reciprocal %663 : vector<1x8x1xf32> -> vector<1x8x1xf32>
    %665 = vector.broadcast %664 : vector<1x8x1xf32> to vector<1x8x8xf32>
    %666 = arith.mulf %661, %665 : vector<1x8x8xf32>
    %667 = arith.truncf %666 : vector<1x8x8xf32> to vector<1x8x8xbf16>
    "tpu.trace_start"() <{level = 10 : i32, message = "bqk,bkd->bqd"}> : () -> ()
    %cst_328 = arith.constant dense<0.000000e+00> : vector<1x8x8xf32>
    %668 = tpu.matmul %667, %650, %cst_328 {dimension_numbers = #tpu.dot_dimension_numbers<[2], [1], [1], [2], [0, 0, 0, 1, 1, 2], [0], [0]>} : vector<1x8x8xbf16>, vector<1x8x8xbf16>, vector<1x8x8xf32> -> vector<1x8x8xf32>
    "tpu.trace_stop"() : () -> ()
    %669 = vector.shape_cast %668 : vector<1x8x8xf32> to vector<8x8xf32>
    %670 = arith.truncf %669 : vector<8x8xf32> to vector<8x8xbf16>
    %c0_329 = arith.constant 0 : index
    %c0_330 = arith.constant 0 : index
    %c0_331 = arith.constant 0 : index
    %671 = vector.load %arg17[%c0_329, %c0_330, %c0_331] : memref<16x8x32xbf16, #tpu.memory_space<vmem>>, vector<1x8x32xbf16>
    %672 = vector.shape_cast %671 : vector<1x8x32xbf16> to vector<8x32xbf16>
    %cst_332 = arith.constant dense<0.000000e+00> : vector<8x32xf32>
    %673 = tpu.matmul %670, %672, %cst_332 {dimension_numbers = #tpu.dot_dimension_numbers<[1], [0], [0], [1], [0, 0, 1, 1], [], []>} : vector<8x8xbf16>, vector<8x32xbf16>, vector<8x32xf32> -> vector<8x32xf32>
    %674 = arith.addf %623, %673 : vector<8x32xf32>
    %c1_333 = arith.constant 1 : index
    %c0_334 = arith.constant 0 : index
    %c0_335 = arith.constant 0 : index
    %675 = vector.load %arg15[%c1_333, %c0_334, %c0_335] : memref<48x32x8xbf16, #tpu.memory_space<vmem>>, vector<1x32x8xbf16>
    %676 = vector.shape_cast %675 : vector<1x32x8xbf16> to vector<32x8xbf16>
    %cst_336 = arith.constant dense<0.000000e+00> : vector<8x8xf32>
    %677 = tpu.matmul %621, %676, %cst_336 {dimension_numbers = #tpu.dot_dimension_numbers<[1], [0], [0], [1], [0, 0, 1, 1], [], []>} : vector<8x32xbf16>, vector<32x8xbf16>, vector<8x8xf32> -> vector<8x8xf32>
    %c1_337 = arith.constant 1 : index
    %c0_338 = arith.constant 0 : index
    %c0_339 = arith.constant 0 : index
    %678 = vector.load %arg16[%c1_337, %c0_338, %c0_339] : memref<48x1x8xf32, #tpu.memory_space<vmem>>, vector<1x1x8xf32>
    %679 = vector.shape_cast %678 : vector<1x1x8xf32> to vector<1x8xf32>
    %680 = vector.broadcast %679 : vector<1x8xf32> to vector<8x8xf32>
    %681 = arith.addf %677, %680 : vector<8x8xf32>
    %c5_340 = arith.constant 5 : index
    %c0_341 = arith.constant 0 : index
    %c0_342 = arith.constant 0 : index
    %682 = vector.load %arg15[%c5_340, %c0_341, %c0_342] : memref<48x32x8xbf16, #tpu.memory_space<vmem>>, vector<1x32x8xbf16>
    %683 = vector.shape_cast %682 : vector<1x32x8xbf16> to vector<32x8xbf16>
    %cst_343 = arith.constant dense<0.000000e+00> : vector<8x8xf32>
    %684 = tpu.matmul %622, %683, %cst_343 {dimension_numbers = #tpu.dot_dimension_numbers<[1], [0], [0], [1], [0, 0, 1, 1], [], []>} : vector<8x32xbf16>, vector<32x8xbf16>, vector<8x8xf32> -> vector<8x8xf32>
    %c5_344 = arith.constant 5 : index
    %c0_345 = arith.constant 0 : index
    %c0_346 = arith.constant 0 : index
    %685 = vector.load %arg16[%c5_344, %c0_345, %c0_346] : memref<48x1x8xf32, #tpu.memory_space<vmem>>, vector<1x1x8xf32>
    %686 = vector.shape_cast %685 : vector<1x1x8xf32> to vector<1x8xf32>
    %687 = vector.broadcast %686 : vector<1x8xf32> to vector<8x8xf32>
    %688 = arith.addf %684, %687 : vector<8x8xf32>
    %c9_347 = arith.constant 9 : index
    %c0_348 = arith.constant 0 : index
    %c0_349 = arith.constant 0 : index
    %689 = vector.load %arg15[%c9_347, %c0_348, %c0_349] : memref<48x32x8xbf16, #tpu.memory_space<vmem>>, vector<1x32x8xbf16>
    %690 = vector.shape_cast %689 : vector<1x32x8xbf16> to vector<32x8xbf16>
    %cst_350 = arith.constant dense<0.000000e+00> : vector<8x8xf32>
    %691 = tpu.matmul %622, %690, %cst_350 {dimension_numbers = #tpu.dot_dimension_numbers<[1], [0], [0], [1], [0, 0, 1, 1], [], []>} : vector<8x32xbf16>, vector<32x8xbf16>, vector<8x8xf32> -> vector<8x8xf32>
    %c9_351 = arith.constant 9 : index
    %c0_352 = arith.constant 0 : index
    %c0_353 = arith.constant 0 : index
    %692 = vector.load %arg16[%c9_351, %c0_352, %c0_353] : memref<48x1x8xf32, #tpu.memory_space<vmem>>, vector<1x1x8xf32>
    %693 = vector.shape_cast %692 : vector<1x1x8xf32> to vector<1x8xf32>
    %694 = vector.broadcast %693 : vector<1x8xf32> to vector<8x8xf32>
    %695 = arith.addf %691, %694 : vector<8x8xf32>
    %696 = vector.shape_cast %681 : vector<8x8xf32> to vector<1x8x8xf32>
    %697 = arith.truncf %696 : vector<1x8x8xf32> to vector<1x8x8xbf16>
    %698 = vector.shape_cast %688 : vector<8x8xf32> to vector<1x8x8xf32>
    %699 = arith.truncf %698 : vector<1x8x8xf32> to vector<1x8x8xbf16>
    %700 = vector.shape_cast %695 : vector<8x8xf32> to vector<1x8x8xf32>
    %701 = arith.truncf %700 : vector<1x8x8xf32> to vector<1x8x8xbf16>
    "tpu.trace_start"() <{level = 10 : i32, message = "bqd,bkd->bqk"}> : () -> ()
    %cst_354 = arith.constant dense<0.000000e+00> : vector<1x8x8xf32>
    %702 = tpu.matmul %697, %699, %cst_354 {dimension_numbers = #tpu.dot_dimension_numbers<[2], [2], [1], [1], [0, 0, 0, 1, 1, 1], [0], [0]>} : vector<1x8x8xbf16>, vector<1x8x8xbf16>, vector<1x8x8xf32> -> vector<1x8x8xf32>
    "tpu.trace_stop"() : () -> ()
    %cst_355 = arith.constant 0.353553385 : f32
    %703 = vector.broadcast %cst_355 : f32 to vector<1x8x8xf32>
    %704 = arith.mulf %702, %703 : vector<1x8x8xf32>
    %cst_356 = arith.constant -1.000000e+30 : f32
    %705 = vector.shape_cast %2 : vector<8x8xi1> to vector<1x8x8xi1>
    %706 = vector.broadcast %cst_356 : f32 to vector<1x8x8xf32>
    %707 = arith.select %705, %706, %704 : vector<1x8x8xi1>, vector<1x8x8xf32>
    %cst_357 = arith.constant dense<0xFF800000> : vector<1x8xf32>
    %708 = vector.multi_reduction <maximumf>, %707, %cst_357 [2] : vector<1x8x8xf32> to vector<1x8xf32>
    %709 = vector.shape_cast %708 : vector<1x8xf32> to vector<1x8x1xf32>
    %710 = vector.broadcast %709 : vector<1x8x1xf32> to vector<1x8x8xf32>
    %711 = arith.subf %707, %710 : vector<1x8x8xf32>
    %712 = math.exp %711 : vector<1x8x8xf32>
    %cst_358 = arith.constant dense<0.000000e+00> : vector<1x8xf32>
    %713 = vector.multi_reduction <add>, %712, %cst_358 [2] : vector<1x8x8xf32> to vector<1x8xf32>
    %714 = vector.shape_cast %713 : vector<1x8xf32> to vector<1x8x1xf32>
    %715 = tpu.reciprocal %714 : vector<1x8x1xf32> -> vector<1x8x1xf32>
    %716 = vector.broadcast %715 : vector<1x8x1xf32> to vector<1x8x8xf32>
    %717 = arith.mulf %712, %716 : vector<1x8x8xf32>
    %718 = arith.truncf %717 : vector<1x8x8xf32> to vector<1x8x8xbf16>
    "tpu.trace_start"() <{level = 10 : i32, message = "bqk,bkd->bqd"}> : () -> ()
    %cst_359 = arith.constant dense<0.000000e+00> : vector<1x8x8xf32>
    %719 = tpu.matmul %718, %701, %cst_359 {dimension_numbers = #tpu.dot_dimension_numbers<[2], [1], [1], [2], [0, 0, 0, 1, 1, 2], [0], [0]>} : vector<1x8x8xbf16>, vector<1x8x8xbf16>, vector<1x8x8xf32> -> vector<1x8x8xf32>
    "tpu.trace_stop"() : () -> ()
    %720 = vector.shape_cast %719 : vector<1x8x8xf32> to vector<8x8xf32>
    %721 = arith.truncf %720 : vector<8x8xf32> to vector<8x8xbf16>
    %c1_360 = arith.constant 1 : index
    %c0_361 = arith.constant 0 : index
    %c0_362 = arith.constant 0 : index
    %722 = vector.load %arg17[%c1_360, %c0_361, %c0_362] : memref<16x8x32xbf16, #tpu.memory_space<vmem>>, vector<1x8x32xbf16>
    %723 = vector.shape_cast %722 : vector<1x8x32xbf16> to vector<8x32xbf16>
    %cst_363 = arith.constant dense<0.000000e+00> : vector<8x32xf32>
    %724 = tpu.matmul %721, %723, %cst_363 {dimension_numbers = #tpu.dot_dimension_numbers<[1], [0], [0], [1], [0, 0, 1, 1], [], []>} : vector<8x8xbf16>, vector<8x32xbf16>, vector<8x32xf32> -> vector<8x32xf32>
    %725 = arith.addf %674, %724 : vector<8x32xf32>
    %c2_364 = arith.constant 2 : index
    %c0_365 = arith.constant 0 : index
    %c0_366 = arith.constant 0 : index
    %726 = vector.load %arg15[%c2_364, %c0_365, %c0_366] : memref<48x32x8xbf16, #tpu.memory_space<vmem>>, vector<1x32x8xbf16>
    %727 = vector.shape_cast %726 : vector<1x32x8xbf16> to vector<32x8xbf16>
    %cst_367 = arith.constant dense<0.000000e+00> : vector<8x8xf32>
    %728 = tpu.matmul %621, %727, %cst_367 {dimension_numbers = #tpu.dot_dimension_numbers<[1], [0], [0], [1], [0, 0, 1, 1], [], []>} : vector<8x32xbf16>, vector<32x8xbf16>, vector<8x8xf32> -> vector<8x8xf32>
    %c2_368 = arith.constant 2 : index
    %c0_369 = arith.constant 0 : index
    %c0_370 = arith.constant 0 : index
    %729 = vector.load %arg16[%c2_368, %c0_369, %c0_370] : memref<48x1x8xf32, #tpu.memory_space<vmem>>, vector<1x1x8xf32>
    %730 = vector.shape_cast %729 : vector<1x1x8xf32> to vector<1x8xf32>
    %731 = vector.broadcast %730 : vector<1x8xf32> to vector<8x8xf32>
    %732 = arith.addf %728, %731 : vector<8x8xf32>
    %c6_371 = arith.constant 6 : index
    %c0_372 = arith.constant 0 : index
    %c0_373 = arith.constant 0 : index
    %733 = vector.load %arg15[%c6_371, %c0_372, %c0_373] : memref<48x32x8xbf16, #tpu.memory_space<vmem>>, vector<1x32x8xbf16>
    %734 = vector.shape_cast %733 : vector<1x32x8xbf16> to vector<32x8xbf16>
    %cst_374 = arith.constant dense<0.000000e+00> : vector<8x8xf32>
    %735 = tpu.matmul %622, %734, %cst_374 {dimension_numbers = #tpu.dot_dimension_numbers<[1], [0], [0], [1], [0, 0, 1, 1], [], []>} : vector<8x32xbf16>, vector<32x8xbf16>, vector<8x8xf32> -> vector<8x8xf32>
    %c6_375 = arith.constant 6 : index
    %c0_376 = arith.constant 0 : index
    %c0_377 = arith.constant 0 : index
    %736 = vector.load %arg16[%c6_375, %c0_376, %c0_377] : memref<48x1x8xf32, #tpu.memory_space<vmem>>, vector<1x1x8xf32>
    %737 = vector.shape_cast %736 : vector<1x1x8xf32> to vector<1x8xf32>
    %738 = vector.broadcast %737 : vector<1x8xf32> to vector<8x8xf32>
    %739 = arith.addf %735, %738 : vector<8x8xf32>
    %c10_378 = arith.constant 10 : index
    %c0_379 = arith.constant 0 : index
    %c0_380 = arith.constant 0 : index
    %740 = vector.load %arg15[%c10_378, %c0_379, %c0_380] : memref<48x32x8xbf16, #tpu.memory_space<vmem>>, vector<1x32x8xbf16>
    %741 = vector.shape_cast %740 : vector<1x32x8xbf16> to vector<32x8xbf16>
    %cst_381 = arith.constant dense<0.000000e+00> : vector<8x8xf32>
    %742 = tpu.matmul %622, %741, %cst_381 {dimension_numbers = #tpu.dot_dimension_numbers<[1], [0], [0], [1], [0, 0, 1, 1], [], []>} : vector<8x32xbf16>, vector<32x8xbf16>, vector<8x8xf32> -> vector<8x8xf32>
    %c10_382 = arith.constant 10 : index
    %c0_383 = arith.constant 0 : index
    %c0_384 = arith.constant 0 : index
    %743 = vector.load %arg16[%c10_382, %c0_383, %c0_384] : memref<48x1x8xf32, #tpu.memory_space<vmem>>, vector<1x1x8xf32>
    %744 = vector.shape_cast %743 : vector<1x1x8xf32> to vector<1x8xf32>
    %745 = vector.broadcast %744 : vector<1x8xf32> to vector<8x8xf32>
    %746 = arith.addf %742, %745 : vector<8x8xf32>
    %747 = vector.shape_cast %732 : vector<8x8xf32> to vector<1x8x8xf32>
    %748 = arith.truncf %747 : vector<1x8x8xf32> to vector<1x8x8xbf16>
    %749 = vector.shape_cast %739 : vector<8x8xf32> to vector<1x8x8xf32>
    %750 = arith.truncf %749 : vector<1x8x8xf32> to vector<1x8x8xbf16>
    %751 = vector.shape_cast %746 : vector<8x8xf32> to vector<1x8x8xf32>
    %752 = arith.truncf %751 : vector<1x8x8xf32> to vector<1x8x8xbf16>
    "tpu.trace_start"() <{level = 10 : i32, message = "bqd,bkd->bqk"}> : () -> ()
    %cst_385 = arith.constant dense<0.000000e+00> : vector<1x8x8xf32>
    %753 = tpu.matmul %748, %750, %cst_385 {dimension_numbers = #tpu.dot_dimension_numbers<[2], [2], [1], [1], [0, 0, 0, 1, 1, 1], [0], [0]>} : vector<1x8x8xbf16>, vector<1x8x8xbf16>, vector<1x8x8xf32> -> vector<1x8x8xf32>
    "tpu.trace_stop"() : () -> ()
    %cst_386 = arith.constant 0.353553385 : f32
    %754 = vector.broadcast %cst_386 : f32 to vector<1x8x8xf32>
    %755 = arith.mulf %753, %754 : vector<1x8x8xf32>
    %cst_387 = arith.constant -1.000000e+30 : f32
    %756 = vector.shape_cast %2 : vector<8x8xi1> to vector<1x8x8xi1>
    %757 = vector.broadcast %cst_387 : f32 to vector<1x8x8xf32>
    %758 = arith.select %756, %757, %755 : vector<1x8x8xi1>, vector<1x8x8xf32>
    %cst_388 = arith.constant dense<0xFF800000> : vector<1x8xf32>
    %759 = vector.multi_reduction <maximumf>, %758, %cst_388 [2] : vector<1x8x8xf32> to vector<1x8xf32>
    %760 = vector.shape_cast %759 : vector<1x8xf32> to vector<1x8x1xf32>
    %761 = vector.broadcast %760 : vector<1x8x1xf32> to vector<1x8x8xf32>
    %762 = arith.subf %758, %761 : vector<1x8x8xf32>
    %763 = math.exp %762 : vector<1x8x8xf32>
    %cst_389 = arith.constant dense<0.000000e+00> : vector<1x8xf32>
    %764 = vector.multi_reduction <add>, %763, %cst_389 [2] : vector<1x8x8xf32> to vector<1x8xf32>
    %765 = vector.shape_cast %764 : vector<1x8xf32> to vector<1x8x1xf32>
    %766 = tpu.reciprocal %765 : vector<1x8x1xf32> -> vector<1x8x1xf32>
    %767 = vector.broadcast %766 : vector<1x8x1xf32> to vector<1x8x8xf32>
    %768 = arith.mulf %763, %767 : vector<1x8x8xf32>
    %769 = arith.truncf %768 : vector<1x8x8xf32> to vector<1x8x8xbf16>
    "tpu.trace_start"() <{level = 10 : i32, message = "bqk,bkd->bqd"}> : () -> ()
    %cst_390 = arith.constant dense<0.000000e+00> : vector<1x8x8xf32>
    %770 = tpu.matmul %769, %752, %cst_390 {dimension_numbers = #tpu.dot_dimension_numbers<[2], [1], [1], [2], [0, 0, 0, 1, 1, 2], [0], [0]>} : vector<1x8x8xbf16>, vector<1x8x8xbf16>, vector<1x8x8xf32> -> vector<1x8x8xf32>
    "tpu.trace_stop"() : () -> ()
    %771 = vector.shape_cast %770 : vector<1x8x8xf32> to vector<8x8xf32>
    %772 = arith.truncf %771 : vector<8x8xf32> to vector<8x8xbf16>
    %c2_391 = arith.constant 2 : index
    %c0_392 = arith.constant 0 : index
    %c0_393 = arith.constant 0 : index
    %773 = vector.load %arg17[%c2_391, %c0_392, %c0_393] : memref<16x8x32xbf16, #tpu.memory_space<vmem>>, vector<1x8x32xbf16>
    %774 = vector.shape_cast %773 : vector<1x8x32xbf16> to vector<8x32xbf16>
    %cst_394 = arith.constant dense<0.000000e+00> : vector<8x32xf32>
    %775 = tpu.matmul %772, %774, %cst_394 {dimension_numbers = #tpu.dot_dimension_numbers<[1], [0], [0], [1], [0, 0, 1, 1], [], []>} : vector<8x8xbf16>, vector<8x32xbf16>, vector<8x32xf32> -> vector<8x32xf32>
    %776 = arith.addf %725, %775 : vector<8x32xf32>
    %c3_395 = arith.constant 3 : index
    %c0_396 = arith.constant 0 : index
    %c0_397 = arith.constant 0 : index
    %777 = vector.load %arg15[%c3_395, %c0_396, %c0_397] : memref<48x32x8xbf16, #tpu.memory_space<vmem>>, vector<1x32x8xbf16>
    %778 = vector.shape_cast %777 : vector<1x32x8xbf16> to vector<32x8xbf16>
    %cst_398 = arith.constant dense<0.000000e+00> : vector<8x8xf32>
    %779 = tpu.matmul %621, %778, %cst_398 {dimension_numbers = #tpu.dot_dimension_numbers<[1], [0], [0], [1], [0, 0, 1, 1], [], []>} : vector<8x32xbf16>, vector<32x8xbf16>, vector<8x8xf32> -> vector<8x8xf32>
    %c3_399 = arith.constant 3 : index
    %c0_400 = arith.constant 0 : index
    %c0_401 = arith.constant 0 : index
    %780 = vector.load %arg16[%c3_399, %c0_400, %c0_401] : memref<48x1x8xf32, #tpu.memory_space<vmem>>, vector<1x1x8xf32>
    %781 = vector.shape_cast %780 : vector<1x1x8xf32> to vector<1x8xf32>
    %782 = vector.broadcast %781 : vector<1x8xf32> to vector<8x8xf32>
    %783 = arith.addf %779, %782 : vector<8x8xf32>
    %c7_402 = arith.constant 7 : index
    %c0_403 = arith.constant 0 : index
    %c0_404 = arith.constant 0 : index
    %784 = vector.load %arg15[%c7_402, %c0_403, %c0_404] : memref<48x32x8xbf16, #tpu.memory_space<vmem>>, vector<1x32x8xbf16>
    %785 = vector.shape_cast %784 : vector<1x32x8xbf16> to vector<32x8xbf16>
    %cst_405 = arith.constant dense<0.000000e+00> : vector<8x8xf32>
    %786 = tpu.matmul %622, %785, %cst_405 {dimension_numbers = #tpu.dot_dimension_numbers<[1], [0], [0], [1], [0, 0, 1, 1], [], []>} : vector<8x32xbf16>, vector<32x8xbf16>, vector<8x8xf32> -> vector<8x8xf32>
    %c7_406 = arith.constant 7 : index
    %c0_407 = arith.constant 0 : index
    %c0_408 = arith.constant 0 : index
    %787 = vector.load %arg16[%c7_406, %c0_407, %c0_408] : memref<48x1x8xf32, #tpu.memory_space<vmem>>, vector<1x1x8xf32>
    %788 = vector.shape_cast %787 : vector<1x1x8xf32> to vector<1x8xf32>
    %789 = vector.broadcast %788 : vector<1x8xf32> to vector<8x8xf32>
    %790 = arith.addf %786, %789 : vector<8x8xf32>
    %c11_409 = arith.constant 11 : index
    %c0_410 = arith.constant 0 : index
    %c0_411 = arith.constant 0 : index
    %791 = vector.load %arg15[%c11_409, %c0_410, %c0_411] : memref<48x32x8xbf16, #tpu.memory_space<vmem>>, vector<1x32x8xbf16>
    %792 = vector.shape_cast %791 : vector<1x32x8xbf16> to vector<32x8xbf16>
    %cst_412 = arith.constant dense<0.000000e+00> : vector<8x8xf32>
    %793 = tpu.matmul %622, %792, %cst_412 {dimension_numbers = #tpu.dot_dimension_numbers<[1], [0], [0], [1], [0, 0, 1, 1], [], []>} : vector<8x32xbf16>, vector<32x8xbf16>, vector<8x8xf32> -> vector<8x8xf32>
    %c11_413 = arith.constant 11 : index
    %c0_414 = arith.constant 0 : index
    %c0_415 = arith.constant 0 : index
    %794 = vector.load %arg16[%c11_413, %c0_414, %c0_415] : memref<48x1x8xf32, #tpu.memory_space<vmem>>, vector<1x1x8xf32>
    %795 = vector.shape_cast %794 : vector<1x1x8xf32> to vector<1x8xf32>
    %796 = vector.broadcast %795 : vector<1x8xf32> to vector<8x8xf32>
    %797 = arith.addf %793, %796 : vector<8x8xf32>
    %798 = vector.shape_cast %783 : vector<8x8xf32> to vector<1x8x8xf32>
    %799 = arith.truncf %798 : vector<1x8x8xf32> to vector<1x8x8xbf16>
    %800 = vector.shape_cast %790 : vector<8x8xf32> to vector<1x8x8xf32>
    %801 = arith.truncf %800 : vector<1x8x8xf32> to vector<1x8x8xbf16>
    %802 = vector.shape_cast %797 : vector<8x8xf32> to vector<1x8x8xf32>
    %803 = arith.truncf %802 : vector<1x8x8xf32> to vector<1x8x8xbf16>
    "tpu.trace_start"() <{level = 10 : i32, message = "bqd,bkd->bqk"}> : () -> ()
    %cst_416 = arith.constant dense<0.000000e+00> : vector<1x8x8xf32>
    %804 = tpu.matmul %799, %801, %cst_416 {dimension_numbers = #tpu.dot_dimension_numbers<[2], [2], [1], [1], [0, 0, 0, 1, 1, 1], [0], [0]>} : vector<1x8x8xbf16>, vector<1x8x8xbf16>, vector<1x8x8xf32> -> vector<1x8x8xf32>
    "tpu.trace_stop"() : () -> ()
    %cst_417 = arith.constant 0.353553385 : f32
    %805 = vector.broadcast %cst_417 : f32 to vector<1x8x8xf32>
    %806 = arith.mulf %804, %805 : vector<1x8x8xf32>
    %cst_418 = arith.constant -1.000000e+30 : f32
    %807 = vector.shape_cast %2 : vector<8x8xi1> to vector<1x8x8xi1>
    %808 = vector.broadcast %cst_418 : f32 to vector<1x8x8xf32>
    %809 = arith.select %807, %808, %806 : vector<1x8x8xi1>, vector<1x8x8xf32>
    %cst_419 = arith.constant dense<0xFF800000> : vector<1x8xf32>
    %810 = vector.multi_reduction <maximumf>, %809, %cst_419 [2] : vector<1x8x8xf32> to vector<1x8xf32>
    %811 = vector.shape_cast %810 : vector<1x8xf32> to vector<1x8x1xf32>
    %812 = vector.broadcast %811 : vector<1x8x1xf32> to vector<1x8x8xf32>
    %813 = arith.subf %809, %812 : vector<1x8x8xf32>
    %814 = math.exp %813 : vector<1x8x8xf32>
    %cst_420 = arith.constant dense<0.000000e+00> : vector<1x8xf32>
    %815 = vector.multi_reduction <add>, %814, %cst_420 [2] : vector<1x8x8xf32> to vector<1x8xf32>
    %816 = vector.shape_cast %815 : vector<1x8xf32> to vector<1x8x1xf32>
    %817 = tpu.reciprocal %816 : vector<1x8x1xf32> -> vector<1x8x1xf32>
    %818 = vector.broadcast %817 : vector<1x8x1xf32> to vector<1x8x8xf32>
    %819 = arith.mulf %814, %818 : vector<1x8x8xf32>
    %820 = arith.truncf %819 : vector<1x8x8xf32> to vector<1x8x8xbf16>
    "tpu.trace_start"() <{level = 10 : i32, message = "bqk,bkd->bqd"}> : () -> ()
    %cst_421 = arith.constant dense<0.000000e+00> : vector<1x8x8xf32>
    %821 = tpu.matmul %820, %803, %cst_421 {dimension_numbers = #tpu.dot_dimension_numbers<[2], [1], [1], [2], [0, 0, 0, 1, 1, 2], [0], [0]>} : vector<1x8x8xbf16>, vector<1x8x8xbf16>, vector<1x8x8xf32> -> vector<1x8x8xf32>
    "tpu.trace_stop"() : () -> ()
    %822 = vector.shape_cast %821 : vector<1x8x8xf32> to vector<8x8xf32>
    %823 = arith.truncf %822 : vector<8x8xf32> to vector<8x8xbf16>
    %c3_422 = arith.constant 3 : index
    %c0_423 = arith.constant 0 : index
    %c0_424 = arith.constant 0 : index
    %824 = vector.load %arg17[%c3_422, %c0_423, %c0_424] : memref<16x8x32xbf16, #tpu.memory_space<vmem>>, vector<1x8x32xbf16>
    %825 = vector.shape_cast %824 : vector<1x8x32xbf16> to vector<8x32xbf16>
    %cst_425 = arith.constant dense<0.000000e+00> : vector<8x32xf32>
    %826 = tpu.matmul %823, %825, %cst_425 {dimension_numbers = #tpu.dot_dimension_numbers<[1], [0], [0], [1], [0, 0, 1, 1], [], []>} : vector<8x8xbf16>, vector<8x32xbf16>, vector<8x32xf32> -> vector<8x32xf32>
    %827 = arith.addf %776, %826 : vector<8x32xf32>
    %828 = vector.broadcast %612 : vector<1x32xf32> to vector<8x32xf32>
    %829 = arith.addf %827, %828 : vector<8x32xf32>
    %830 = arith.addf %39, %829 : vector<8x32xf32>
    %cst_426 = arith.constant dense<0.000000e+00> : vector<8xf32>
    %831 = vector.multi_reduction <add>, %830, %cst_426 [1] : vector<8x32xf32> to vector<8xf32>
    %832 = vector.shape_cast %831 : vector<8xf32> to vector<8x1xf32>
    %cst_427 = arith.constant 3.200000e+01 : f32
    %833 = vector.broadcast %cst_427 : f32 to vector<8x1xf32>
    %834 = arith.divf %832, %833 : vector<8x1xf32>
    %835 = vector.broadcast %834 : vector<8x1xf32> to vector<8x32xf32>
    %836 = arith.subf %830, %835 : vector<8x32xf32>
    %837 = arith.mulf %836, %836 : vector<8x32xf32>
    %cst_428 = arith.constant dense<0.000000e+00> : vector<8xf32>
    %838 = vector.multi_reduction <add>, %837, %cst_428 [1] : vector<8x32xf32> to vector<8xf32>
    %839 = vector.shape_cast %838 : vector<8xf32> to vector<8x1xf32>
    %cst_429 = arith.constant 3.200000e+01 : f32
    %840 = vector.broadcast %cst_429 : f32 to vector<8x1xf32>
    %841 = arith.divf %839, %840 : vector<8x1xf32>
    %cst_430 = arith.constant 9.99999974E-6 : f32
    %842 = vector.broadcast %cst_430 : f32 to vector<8x1xf32>
    %843 = arith.addf %841, %842 : vector<8x1xf32>
    %844 = math.rsqrt %843 : vector<8x1xf32>
    %845 = vector.broadcast %844 : vector<8x1xf32> to vector<8x32xf32>
    %846 = arith.mulf %836, %845 : vector<8x32xf32>
    %847 = vector.broadcast %613 : vector<1x32xf32> to vector<8x32xf32>
    %848 = arith.mulf %846, %847 : vector<8x32xf32>
    %849 = vector.broadcast %614 : vector<1x32xf32> to vector<8x32xf32>
    %850 = arith.addf %848, %849 : vector<8x32xf32>
    %851 = arith.truncf %850 : vector<8x32xf32> to vector<8x32xbf16>
    %852 = arith.truncf %609 : vector<8x32xf32> to vector<8x32xbf16>
    %cst_431 = arith.constant 0.000000e+00 : f32
    %853 = vector.broadcast %cst_431 : f32 to vector<8x32xf32>
    %c12_432 = arith.constant 12 : index
    %c0_433 = arith.constant 0 : index
    %c0_434 = arith.constant 0 : index
    %854 = vector.load %arg15[%c12_432, %c0_433, %c0_434] : memref<48x32x8xbf16, #tpu.memory_space<vmem>>, vector<1x32x8xbf16>
    %855 = vector.shape_cast %854 : vector<1x32x8xbf16> to vector<32x8xbf16>
    %cst_435 = arith.constant dense<0.000000e+00> : vector<8x8xf32>
    %856 = tpu.matmul %851, %855, %cst_435 {dimension_numbers = #tpu.dot_dimension_numbers<[1], [0], [0], [1], [0, 0, 1, 1], [], []>} : vector<8x32xbf16>, vector<32x8xbf16>, vector<8x8xf32> -> vector<8x8xf32>
    %c12_436 = arith.constant 12 : index
    %c0_437 = arith.constant 0 : index
    %c0_438 = arith.constant 0 : index
    %857 = vector.load %arg16[%c12_436, %c0_437, %c0_438] : memref<48x1x8xf32, #tpu.memory_space<vmem>>, vector<1x1x8xf32>
    %858 = vector.shape_cast %857 : vector<1x1x8xf32> to vector<1x8xf32>
    %859 = vector.broadcast %858 : vector<1x8xf32> to vector<8x8xf32>
    %860 = arith.addf %856, %859 : vector<8x8xf32>
    %c16_439 = arith.constant 16 : index
    %c0_440 = arith.constant 0 : index
    %c0_441 = arith.constant 0 : index
    %861 = vector.load %arg15[%c16_439, %c0_440, %c0_441] : memref<48x32x8xbf16, #tpu.memory_space<vmem>>, vector<1x32x8xbf16>
    %862 = vector.shape_cast %861 : vector<1x32x8xbf16> to vector<32x8xbf16>
    %cst_442 = arith.constant dense<0.000000e+00> : vector<8x8xf32>
    %863 = tpu.matmul %852, %862, %cst_442 {dimension_numbers = #tpu.dot_dimension_numbers<[1], [0], [0], [1], [0, 0, 1, 1], [], []>} : vector<8x32xbf16>, vector<32x8xbf16>, vector<8x8xf32> -> vector<8x8xf32>
    %c16_443 = arith.constant 16 : index
    %c0_444 = arith.constant 0 : index
    %c0_445 = arith.constant 0 : index
    %864 = vector.load %arg16[%c16_443, %c0_444, %c0_445] : memref<48x1x8xf32, #tpu.memory_space<vmem>>, vector<1x1x8xf32>
    %865 = vector.shape_cast %864 : vector<1x1x8xf32> to vector<1x8xf32>
    %866 = vector.broadcast %865 : vector<1x8xf32> to vector<8x8xf32>
    %867 = arith.addf %863, %866 : vector<8x8xf32>
    %c20_446 = arith.constant 20 : index
    %c0_447 = arith.constant 0 : index
    %c0_448 = arith.constant 0 : index
    %868 = vector.load %arg15[%c20_446, %c0_447, %c0_448] : memref<48x32x8xbf16, #tpu.memory_space<vmem>>, vector<1x32x8xbf16>
    %869 = vector.shape_cast %868 : vector<1x32x8xbf16> to vector<32x8xbf16>
    %cst_449 = arith.constant dense<0.000000e+00> : vector<8x8xf32>
    %870 = tpu.matmul %852, %869, %cst_449 {dimension_numbers = #tpu.dot_dimension_numbers<[1], [0], [0], [1], [0, 0, 1, 1], [], []>} : vector<8x32xbf16>, vector<32x8xbf16>, vector<8x8xf32> -> vector<8x8xf32>
    %c20_450 = arith.constant 20 : index
    %c0_451 = arith.constant 0 : index
    %c0_452 = arith.constant 0 : index
    %871 = vector.load %arg16[%c20_450, %c0_451, %c0_452] : memref<48x1x8xf32, #tpu.memory_space<vmem>>, vector<1x1x8xf32>
    %872 = vector.shape_cast %871 : vector<1x1x8xf32> to vector<1x8xf32>
    %873 = vector.broadcast %872 : vector<1x8xf32> to vector<8x8xf32>
    %874 = arith.addf %870, %873 : vector<8x8xf32>
    %875 = vector.shape_cast %860 : vector<8x8xf32> to vector<1x8x8xf32>
    %876 = arith.truncf %875 : vector<1x8x8xf32> to vector<1x8x8xbf16>
    %877 = vector.shape_cast %867 : vector<8x8xf32> to vector<1x8x8xf32>
    %878 = arith.truncf %877 : vector<1x8x8xf32> to vector<1x8x8xbf16>
    %879 = vector.shape_cast %874 : vector<8x8xf32> to vector<1x8x8xf32>
    %880 = arith.truncf %879 : vector<1x8x8xf32> to vector<1x8x8xbf16>
    "tpu.trace_start"() <{level = 10 : i32, message = "bqd,bkd->bqk"}> : () -> ()
    %cst_453 = arith.constant dense<0.000000e+00> : vector<1x8x8xf32>
    %881 = tpu.matmul %876, %878, %cst_453 {dimension_numbers = #tpu.dot_dimension_numbers<[2], [2], [1], [1], [0, 0, 0, 1, 1, 1], [0], [0]>} : vector<1x8x8xbf16>, vector<1x8x8xbf16>, vector<1x8x8xf32> -> vector<1x8x8xf32>
    "tpu.trace_stop"() : () -> ()
    %cst_454 = arith.constant 0.353553385 : f32
    %882 = vector.broadcast %cst_454 : f32 to vector<1x8x8xf32>
    %883 = arith.mulf %881, %882 : vector<1x8x8xf32>
    %cst_455 = arith.constant -1.000000e+30 : f32
    %884 = vector.shape_cast %2 : vector<8x8xi1> to vector<1x8x8xi1>
    %885 = vector.broadcast %cst_455 : f32 to vector<1x8x8xf32>
    %886 = arith.select %884, %885, %883 : vector<1x8x8xi1>, vector<1x8x8xf32>
    %cst_456 = arith.constant dense<0xFF800000> : vector<1x8xf32>
    %887 = vector.multi_reduction <maximumf>, %886, %cst_456 [2] : vector<1x8x8xf32> to vector<1x8xf32>
    %888 = vector.shape_cast %887 : vector<1x8xf32> to vector<1x8x1xf32>
    %889 = vector.broadcast %888 : vector<1x8x1xf32> to vector<1x8x8xf32>
    %890 = arith.subf %886, %889 : vector<1x8x8xf32>
    %891 = math.exp %890 : vector<1x8x8xf32>
    %cst_457 = arith.constant dense<0.000000e+00> : vector<1x8xf32>
    %892 = vector.multi_reduction <add>, %891, %cst_457 [2] : vector<1x8x8xf32> to vector<1x8xf32>
    %893 = vector.shape_cast %892 : vector<1x8xf32> to vector<1x8x1xf32>
    %894 = tpu.reciprocal %893 : vector<1x8x1xf32> -> vector<1x8x1xf32>
    %895 = vector.broadcast %894 : vector<1x8x1xf32> to vector<1x8x8xf32>
    %896 = arith.mulf %891, %895 : vector<1x8x8xf32>
    %897 = arith.truncf %896 : vector<1x8x8xf32> to vector<1x8x8xbf16>
    "tpu.trace_start"() <{level = 10 : i32, message = "bqk,bkd->bqd"}> : () -> ()
    %cst_458 = arith.constant dense<0.000000e+00> : vector<1x8x8xf32>
    %898 = tpu.matmul %897, %880, %cst_458 {dimension_numbers = #tpu.dot_dimension_numbers<[2], [1], [1], [2], [0, 0, 0, 1, 1, 2], [0], [0]>} : vector<1x8x8xbf16>, vector<1x8x8xbf16>, vector<1x8x8xf32> -> vector<1x8x8xf32>
    "tpu.trace_stop"() : () -> ()
    %899 = vector.shape_cast %898 : vector<1x8x8xf32> to vector<8x8xf32>
    %900 = arith.truncf %899 : vector<8x8xf32> to vector<8x8xbf16>
    %c4_459 = arith.constant 4 : index
    %c0_460 = arith.constant 0 : index
    %c0_461 = arith.constant 0 : index
    %901 = vector.load %arg17[%c4_459, %c0_460, %c0_461] : memref<16x8x32xbf16, #tpu.memory_space<vmem>>, vector<1x8x32xbf16>
    %902 = vector.shape_cast %901 : vector<1x8x32xbf16> to vector<8x32xbf16>
    %cst_462 = arith.constant dense<0.000000e+00> : vector<8x32xf32>
    %903 = tpu.matmul %900, %902, %cst_462 {dimension_numbers = #tpu.dot_dimension_numbers<[1], [0], [0], [1], [0, 0, 1, 1], [], []>} : vector<8x8xbf16>, vector<8x32xbf16>, vector<8x32xf32> -> vector<8x32xf32>
    %904 = arith.addf %853, %903 : vector<8x32xf32>
    %c13_463 = arith.constant 13 : index
    %c0_464 = arith.constant 0 : index
    %c0_465 = arith.constant 0 : index
    %905 = vector.load %arg15[%c13_463, %c0_464, %c0_465] : memref<48x32x8xbf16, #tpu.memory_space<vmem>>, vector<1x32x8xbf16>
    %906 = vector.shape_cast %905 : vector<1x32x8xbf16> to vector<32x8xbf16>
    %cst_466 = arith.constant dense<0.000000e+00> : vector<8x8xf32>
    %907 = tpu.matmul %851, %906, %cst_466 {dimension_numbers = #tpu.dot_dimension_numbers<[1], [0], [0], [1], [0, 0, 1, 1], [], []>} : vector<8x32xbf16>, vector<32x8xbf16>, vector<8x8xf32> -> vector<8x8xf32>
    %c13_467 = arith.constant 13 : index
    %c0_468 = arith.constant 0 : index
    %c0_469 = arith.constant 0 : index
    %908 = vector.load %arg16[%c13_467, %c0_468, %c0_469] : memref<48x1x8xf32, #tpu.memory_space<vmem>>, vector<1x1x8xf32>
    %909 = vector.shape_cast %908 : vector<1x1x8xf32> to vector<1x8xf32>
    %910 = vector.broadcast %909 : vector<1x8xf32> to vector<8x8xf32>
    %911 = arith.addf %907, %910 : vector<8x8xf32>
    %c17_470 = arith.constant 17 : index
    %c0_471 = arith.constant 0 : index
    %c0_472 = arith.constant 0 : index
    %912 = vector.load %arg15[%c17_470, %c0_471, %c0_472] : memref<48x32x8xbf16, #tpu.memory_space<vmem>>, vector<1x32x8xbf16>
    %913 = vector.shape_cast %912 : vector<1x32x8xbf16> to vector<32x8xbf16>
    %cst_473 = arith.constant dense<0.000000e+00> : vector<8x8xf32>
    %914 = tpu.matmul %852, %913, %cst_473 {dimension_numbers = #tpu.dot_dimension_numbers<[1], [0], [0], [1], [0, 0, 1, 1], [], []>} : vector<8x32xbf16>, vector<32x8xbf16>, vector<8x8xf32> -> vector<8x8xf32>
    %c17_474 = arith.constant 17 : index
    %c0_475 = arith.constant 0 : index
    %c0_476 = arith.constant 0 : index
    %915 = vector.load %arg16[%c17_474, %c0_475, %c0_476] : memref<48x1x8xf32, #tpu.memory_space<vmem>>, vector<1x1x8xf32>
    %916 = vector.shape_cast %915 : vector<1x1x8xf32> to vector<1x8xf32>
    %917 = vector.broadcast %916 : vector<1x8xf32> to vector<8x8xf32>
    %918 = arith.addf %914, %917 : vector<8x8xf32>
    %c21_477 = arith.constant 21 : index
    %c0_478 = arith.constant 0 : index
    %c0_479 = arith.constant 0 : index
    %919 = vector.load %arg15[%c21_477, %c0_478, %c0_479] : memref<48x32x8xbf16, #tpu.memory_space<vmem>>, vector<1x32x8xbf16>
    %920 = vector.shape_cast %919 : vector<1x32x8xbf16> to vector<32x8xbf16>
    %cst_480 = arith.constant dense<0.000000e+00> : vector<8x8xf32>
    %921 = tpu.matmul %852, %920, %cst_480 {dimension_numbers = #tpu.dot_dimension_numbers<[1], [0], [0], [1], [0, 0, 1, 1], [], []>} : vector<8x32xbf16>, vector<32x8xbf16>, vector<8x8xf32> -> vector<8x8xf32>
    %c21_481 = arith.constant 21 : index
    %c0_482 = arith.constant 0 : index
    %c0_483 = arith.constant 0 : index
    %922 = vector.load %arg16[%c21_481, %c0_482, %c0_483] : memref<48x1x8xf32, #tpu.memory_space<vmem>>, vector<1x1x8xf32>
    %923 = vector.shape_cast %922 : vector<1x1x8xf32> to vector<1x8xf32>
    %924 = vector.broadcast %923 : vector<1x8xf32> to vector<8x8xf32>
    %925 = arith.addf %921, %924 : vector<8x8xf32>
    %926 = vector.shape_cast %911 : vector<8x8xf32> to vector<1x8x8xf32>
    %927 = arith.truncf %926 : vector<1x8x8xf32> to vector<1x8x8xbf16>
    %928 = vector.shape_cast %918 : vector<8x8xf32> to vector<1x8x8xf32>
    %929 = arith.truncf %928 : vector<1x8x8xf32> to vector<1x8x8xbf16>
    %930 = vector.shape_cast %925 : vector<8x8xf32> to vector<1x8x8xf32>
    %931 = arith.truncf %930 : vector<1x8x8xf32> to vector<1x8x8xbf16>
    "tpu.trace_start"() <{level = 10 : i32, message = "bqd,bkd->bqk"}> : () -> ()
    %cst_484 = arith.constant dense<0.000000e+00> : vector<1x8x8xf32>
    %932 = tpu.matmul %927, %929, %cst_484 {dimension_numbers = #tpu.dot_dimension_numbers<[2], [2], [1], [1], [0, 0, 0, 1, 1, 1], [0], [0]>} : vector<1x8x8xbf16>, vector<1x8x8xbf16>, vector<1x8x8xf32> -> vector<1x8x8xf32>
    "tpu.trace_stop"() : () -> ()
    %cst_485 = arith.constant 0.353553385 : f32
    %933 = vector.broadcast %cst_485 : f32 to vector<1x8x8xf32>
    %934 = arith.mulf %932, %933 : vector<1x8x8xf32>
    %cst_486 = arith.constant -1.000000e+30 : f32
    %935 = vector.shape_cast %2 : vector<8x8xi1> to vector<1x8x8xi1>
    %936 = vector.broadcast %cst_486 : f32 to vector<1x8x8xf32>
    %937 = arith.select %935, %936, %934 : vector<1x8x8xi1>, vector<1x8x8xf32>
    %cst_487 = arith.constant dense<0xFF800000> : vector<1x8xf32>
    %938 = vector.multi_reduction <maximumf>, %937, %cst_487 [2] : vector<1x8x8xf32> to vector<1x8xf32>
    %939 = vector.shape_cast %938 : vector<1x8xf32> to vector<1x8x1xf32>
    %940 = vector.broadcast %939 : vector<1x8x1xf32> to vector<1x8x8xf32>
    %941 = arith.subf %937, %940 : vector<1x8x8xf32>
    %942 = math.exp %941 : vector<1x8x8xf32>
    %cst_488 = arith.constant dense<0.000000e+00> : vector<1x8xf32>
    %943 = vector.multi_reduction <add>, %942, %cst_488 [2] : vector<1x8x8xf32> to vector<1x8xf32>
    %944 = vector.shape_cast %943 : vector<1x8xf32> to vector<1x8x1xf32>
    %945 = tpu.reciprocal %944 : vector<1x8x1xf32> -> vector<1x8x1xf32>
    %946 = vector.broadcast %945 : vector<1x8x1xf32> to vector<1x8x8xf32>
    %947 = arith.mulf %942, %946 : vector<1x8x8xf32>
    %948 = arith.truncf %947 : vector<1x8x8xf32> to vector<1x8x8xbf16>
    "tpu.trace_start"() <{level = 10 : i32, message = "bqk,bkd->bqd"}> : () -> ()
    %cst_489 = arith.constant dense<0.000000e+00> : vector<1x8x8xf32>
    %949 = tpu.matmul %948, %931, %cst_489 {dimension_numbers = #tpu.dot_dimension_numbers<[2], [1], [1], [2], [0, 0, 0, 1, 1, 2], [0], [0]>} : vector<1x8x8xbf16>, vector<1x8x8xbf16>, vector<1x8x8xf32> -> vector<1x8x8xf32>
    "tpu.trace_stop"() : () -> ()
    %950 = vector.shape_cast %949 : vector<1x8x8xf32> to vector<8x8xf32>
    %951 = arith.truncf %950 : vector<8x8xf32> to vector<8x8xbf16>
    %c5_490 = arith.constant 5 : index
    %c0_491 = arith.constant 0 : index
    %c0_492 = arith.constant 0 : index
    %952 = vector.load %arg17[%c5_490, %c0_491, %c0_492] : memref<16x8x32xbf16, #tpu.memory_space<vmem>>, vector<1x8x32xbf16>
    %953 = vector.shape_cast %952 : vector<1x8x32xbf16> to vector<8x32xbf16>
    %cst_493 = arith.constant dense<0.000000e+00> : vector<8x32xf32>
    %954 = tpu.matmul %951, %953, %cst_493 {dimension_numbers = #tpu.dot_dimension_numbers<[1], [0], [0], [1], [0, 0, 1, 1], [], []>} : vector<8x8xbf16>, vector<8x32xbf16>, vector<8x32xf32> -> vector<8x32xf32>
    %955 = arith.addf %904, %954 : vector<8x32xf32>
    %c14_494 = arith.constant 14 : index
    %c0_495 = arith.constant 0 : index
    %c0_496 = arith.constant 0 : index
    %956 = vector.load %arg15[%c14_494, %c0_495, %c0_496] : memref<48x32x8xbf16, #tpu.memory_space<vmem>>, vector<1x32x8xbf16>
    %957 = vector.shape_cast %956 : vector<1x32x8xbf16> to vector<32x8xbf16>
    %cst_497 = arith.constant dense<0.000000e+00> : vector<8x8xf32>
    %958 = tpu.matmul %851, %957, %cst_497 {dimension_numbers = #tpu.dot_dimension_numbers<[1], [0], [0], [1], [0, 0, 1, 1], [], []>} : vector<8x32xbf16>, vector<32x8xbf16>, vector<8x8xf32> -> vector<8x8xf32>
    %c14_498 = arith.constant 14 : index
    %c0_499 = arith.constant 0 : index
    %c0_500 = arith.constant 0 : index
    %959 = vector.load %arg16[%c14_498, %c0_499, %c0_500] : memref<48x1x8xf32, #tpu.memory_space<vmem>>, vector<1x1x8xf32>
    %960 = vector.shape_cast %959 : vector<1x1x8xf32> to vector<1x8xf32>
    %961 = vector.broadcast %960 : vector<1x8xf32> to vector<8x8xf32>
    %962 = arith.addf %958, %961 : vector<8x8xf32>
    %c18_501 = arith.constant 18 : index
    %c0_502 = arith.constant 0 : index
    %c0_503 = arith.constant 0 : index
    %963 = vector.load %arg15[%c18_501, %c0_502, %c0_503] : memref<48x32x8xbf16, #tpu.memory_space<vmem>>, vector<1x32x8xbf16>
    %964 = vector.shape_cast %963 : vector<1x32x8xbf16> to vector<32x8xbf16>
    %cst_504 = arith.constant dense<0.000000e+00> : vector<8x8xf32>
    %965 = tpu.matmul %852, %964, %cst_504 {dimension_numbers = #tpu.dot_dimension_numbers<[1], [0], [0], [1], [0, 0, 1, 1], [], []>} : vector<8x32xbf16>, vector<32x8xbf16>, vector<8x8xf32> -> vector<8x8xf32>
    %c18_505 = arith.constant 18 : index
    %c0_506 = arith.constant 0 : index
    %c0_507 = arith.constant 0 : index
    %966 = vector.load %arg16[%c18_505, %c0_506, %c0_507] : memref<48x1x8xf32, #tpu.memory_space<vmem>>, vector<1x1x8xf32>
    %967 = vector.shape_cast %966 : vector<1x1x8xf32> to vector<1x8xf32>
    %968 = vector.broadcast %967 : vector<1x8xf32> to vector<8x8xf32>
    %969 = arith.addf %965, %968 : vector<8x8xf32>
    %c22_508 = arith.constant 22 : index
    %c0_509 = arith.constant 0 : index
    %c0_510 = arith.constant 0 : index
    %970 = vector.load %arg15[%c22_508, %c0_509, %c0_510] : memref<48x32x8xbf16, #tpu.memory_space<vmem>>, vector<1x32x8xbf16>
    %971 = vector.shape_cast %970 : vector<1x32x8xbf16> to vector<32x8xbf16>
    %cst_511 = arith.constant dense<0.000000e+00> : vector<8x8xf32>
    %972 = tpu.matmul %852, %971, %cst_511 {dimension_numbers = #tpu.dot_dimension_numbers<[1], [0], [0], [1], [0, 0, 1, 1], [], []>} : vector<8x32xbf16>, vector<32x8xbf16>, vector<8x8xf32> -> vector<8x8xf32>
    %c22_512 = arith.constant 22 : index
    %c0_513 = arith.constant 0 : index
    %c0_514 = arith.constant 0 : index
    %973 = vector.load %arg16[%c22_512, %c0_513, %c0_514] : memref<48x1x8xf32, #tpu.memory_space<vmem>>, vector<1x1x8xf32>
    %974 = vector.shape_cast %973 : vector<1x1x8xf32> to vector<1x8xf32>
    %975 = vector.broadcast %974 : vector<1x8xf32> to vector<8x8xf32>
    %976 = arith.addf %972, %975 : vector<8x8xf32>
    %977 = vector.shape_cast %962 : vector<8x8xf32> to vector<1x8x8xf32>
    %978 = arith.truncf %977 : vector<1x8x8xf32> to vector<1x8x8xbf16>
    %979 = vector.shape_cast %969 : vector<8x8xf32> to vector<1x8x8xf32>
    %980 = arith.truncf %979 : vector<1x8x8xf32> to vector<1x8x8xbf16>
    %981 = vector.shape_cast %976 : vector<8x8xf32> to vector<1x8x8xf32>
    %982 = arith.truncf %981 : vector<1x8x8xf32> to vector<1x8x8xbf16>
    "tpu.trace_start"() <{level = 10 : i32, message = "bqd,bkd->bqk"}> : () -> ()
    %cst_515 = arith.constant dense<0.000000e+00> : vector<1x8x8xf32>
    %983 = tpu.matmul %978, %980, %cst_515 {dimension_numbers = #tpu.dot_dimension_numbers<[2], [2], [1], [1], [0, 0, 0, 1, 1, 1], [0], [0]>} : vector<1x8x8xbf16>, vector<1x8x8xbf16>, vector<1x8x8xf32> -> vector<1x8x8xf32>
    "tpu.trace_stop"() : () -> ()
    %cst_516 = arith.constant 0.353553385 : f32
    %984 = vector.broadcast %cst_516 : f32 to vector<1x8x8xf32>
    %985 = arith.mulf %983, %984 : vector<1x8x8xf32>
    %cst_517 = arith.constant -1.000000e+30 : f32
    %986 = vector.shape_cast %2 : vector<8x8xi1> to vector<1x8x8xi1>
    %987 = vector.broadcast %cst_517 : f32 to vector<1x8x8xf32>
    %988 = arith.select %986, %987, %985 : vector<1x8x8xi1>, vector<1x8x8xf32>
    %cst_518 = arith.constant dense<0xFF800000> : vector<1x8xf32>
    %989 = vector.multi_reduction <maximumf>, %988, %cst_518 [2] : vector<1x8x8xf32> to vector<1x8xf32>
    %990 = vector.shape_cast %989 : vector<1x8xf32> to vector<1x8x1xf32>
    %991 = vector.broadcast %990 : vector<1x8x1xf32> to vector<1x8x8xf32>
    %992 = arith.subf %988, %991 : vector<1x8x8xf32>
    %993 = math.exp %992 : vector<1x8x8xf32>
    %cst_519 = arith.constant dense<0.000000e+00> : vector<1x8xf32>
    %994 = vector.multi_reduction <add>, %993, %cst_519 [2] : vector<1x8x8xf32> to vector<1x8xf32>
    %995 = vector.shape_cast %994 : vector<1x8xf32> to vector<1x8x1xf32>
    %996 = tpu.reciprocal %995 : vector<1x8x1xf32> -> vector<1x8x1xf32>
    %997 = vector.broadcast %996 : vector<1x8x1xf32> to vector<1x8x8xf32>
    %998 = arith.mulf %993, %997 : vector<1x8x8xf32>
    %999 = arith.truncf %998 : vector<1x8x8xf32> to vector<1x8x8xbf16>
    "tpu.trace_start"() <{level = 10 : i32, message = "bqk,bkd->bqd"}> : () -> ()
    %cst_520 = arith.constant dense<0.000000e+00> : vector<1x8x8xf32>
    %1000 = tpu.matmul %999, %982, %cst_520 {dimension_numbers = #tpu.dot_dimension_numbers<[2], [1], [1], [2], [0, 0, 0, 1, 1, 2], [0], [0]>} : vector<1x8x8xbf16>, vector<1x8x8xbf16>, vector<1x8x8xf32> -> vector<1x8x8xf32>
    "tpu.trace_stop"() : () -> ()
    %1001 = vector.shape_cast %1000 : vector<1x8x8xf32> to vector<8x8xf32>
    %1002 = arith.truncf %1001 : vector<8x8xf32> to vector<8x8xbf16>
    %c6_521 = arith.constant 6 : index
    %c0_522 = arith.constant 0 : index
    %c0_523 = arith.constant 0 : index
    %1003 = vector.load %arg17[%c6_521, %c0_522, %c0_523] : memref<16x8x32xbf16, #tpu.memory_space<vmem>>, vector<1x8x32xbf16>
    %1004 = vector.shape_cast %1003 : vector<1x8x32xbf16> to vector<8x32xbf16>
    %cst_524 = arith.constant dense<0.000000e+00> : vector<8x32xf32>
    %1005 = tpu.matmul %1002, %1004, %cst_524 {dimension_numbers = #tpu.dot_dimension_numbers<[1], [0], [0], [1], [0, 0, 1, 1], [], []>} : vector<8x8xbf16>, vector<8x32xbf16>, vector<8x32xf32> -> vector<8x32xf32>
    %1006 = arith.addf %955, %1005 : vector<8x32xf32>
    %c15_525 = arith.constant 15 : index
    %c0_526 = arith.constant 0 : index
    %c0_527 = arith.constant 0 : index
    %1007 = vector.load %arg15[%c15_525, %c0_526, %c0_527] : memref<48x32x8xbf16, #tpu.memory_space<vmem>>, vector<1x32x8xbf16>
    %1008 = vector.shape_cast %1007 : vector<1x32x8xbf16> to vector<32x8xbf16>
    %cst_528 = arith.constant dense<0.000000e+00> : vector<8x8xf32>
    %1009 = tpu.matmul %851, %1008, %cst_528 {dimension_numbers = #tpu.dot_dimension_numbers<[1], [0], [0], [1], [0, 0, 1, 1], [], []>} : vector<8x32xbf16>, vector<32x8xbf16>, vector<8x8xf32> -> vector<8x8xf32>
    %c15_529 = arith.constant 15 : index
    %c0_530 = arith.constant 0 : index
    %c0_531 = arith.constant 0 : index
    %1010 = vector.load %arg16[%c15_529, %c0_530, %c0_531] : memref<48x1x8xf32, #tpu.memory_space<vmem>>, vector<1x1x8xf32>
    %1011 = vector.shape_cast %1010 : vector<1x1x8xf32> to vector<1x8xf32>
    %1012 = vector.broadcast %1011 : vector<1x8xf32> to vector<8x8xf32>
    %1013 = arith.addf %1009, %1012 : vector<8x8xf32>
    %c19_532 = arith.constant 19 : index
    %c0_533 = arith.constant 0 : index
    %c0_534 = arith.constant 0 : index
    %1014 = vector.load %arg15[%c19_532, %c0_533, %c0_534] : memref<48x32x8xbf16, #tpu.memory_space<vmem>>, vector<1x32x8xbf16>
    %1015 = vector.shape_cast %1014 : vector<1x32x8xbf16> to vector<32x8xbf16>
    %cst_535 = arith.constant dense<0.000000e+00> : vector<8x8xf32>
    %1016 = tpu.matmul %852, %1015, %cst_535 {dimension_numbers = #tpu.dot_dimension_numbers<[1], [0], [0], [1], [0, 0, 1, 1], [], []>} : vector<8x32xbf16>, vector<32x8xbf16>, vector<8x8xf32> -> vector<8x8xf32>
    %c19_536 = arith.constant 19 : index
    %c0_537 = arith.constant 0 : index
    %c0_538 = arith.constant 0 : index
    %1017 = vector.load %arg16[%c19_536, %c0_537, %c0_538] : memref<48x1x8xf32, #tpu.memory_space<vmem>>, vector<1x1x8xf32>
    %1018 = vector.shape_cast %1017 : vector<1x1x8xf32> to vector<1x8xf32>
    %1019 = vector.broadcast %1018 : vector<1x8xf32> to vector<8x8xf32>
    %1020 = arith.addf %1016, %1019 : vector<8x8xf32>
    %c23_539 = arith.constant 23 : index
    %c0_540 = arith.constant 0 : index
    %c0_541 = arith.constant 0 : index
    %1021 = vector.load %arg15[%c23_539, %c0_540, %c0_541] : memref<48x32x8xbf16, #tpu.memory_space<vmem>>, vector<1x32x8xbf16>
    %1022 = vector.shape_cast %1021 : vector<1x32x8xbf16> to vector<32x8xbf16>
    %cst_542 = arith.constant dense<0.000000e+00> : vector<8x8xf32>
    %1023 = tpu.matmul %852, %1022, %cst_542 {dimension_numbers = #tpu.dot_dimension_numbers<[1], [0], [0], [1], [0, 0, 1, 1], [], []>} : vector<8x32xbf16>, vector<32x8xbf16>, vector<8x8xf32> -> vector<8x8xf32>
    %c23_543 = arith.constant 23 : index
    %c0_544 = arith.constant 0 : index
    %c0_545 = arith.constant 0 : index
    %1024 = vector.load %arg16[%c23_543, %c0_544, %c0_545] : memref<48x1x8xf32, #tpu.memory_space<vmem>>, vector<1x1x8xf32>
    %1025 = vector.shape_cast %1024 : vector<1x1x8xf32> to vector<1x8xf32>
    %1026 = vector.broadcast %1025 : vector<1x8xf32> to vector<8x8xf32>
    %1027 = arith.addf %1023, %1026 : vector<8x8xf32>
    %1028 = vector.shape_cast %1013 : vector<8x8xf32> to vector<1x8x8xf32>
    %1029 = arith.truncf %1028 : vector<1x8x8xf32> to vector<1x8x8xbf16>
    %1030 = vector.shape_cast %1020 : vector<8x8xf32> to vector<1x8x8xf32>
    %1031 = arith.truncf %1030 : vector<1x8x8xf32> to vector<1x8x8xbf16>
    %1032 = vector.shape_cast %1027 : vector<8x8xf32> to vector<1x8x8xf32>
    %1033 = arith.truncf %1032 : vector<1x8x8xf32> to vector<1x8x8xbf16>
    "tpu.trace_start"() <{level = 10 : i32, message = "bqd,bkd->bqk"}> : () -> ()
    %cst_546 = arith.constant dense<0.000000e+00> : vector<1x8x8xf32>
    %1034 = tpu.matmul %1029, %1031, %cst_546 {dimension_numbers = #tpu.dot_dimension_numbers<[2], [2], [1], [1], [0, 0, 0, 1, 1, 1], [0], [0]>} : vector<1x8x8xbf16>, vector<1x8x8xbf16>, vector<1x8x8xf32> -> vector<1x8x8xf32>
    "tpu.trace_stop"() : () -> ()
    %cst_547 = arith.constant 0.353553385 : f32
    %1035 = vector.broadcast %cst_547 : f32 to vector<1x8x8xf32>
    %1036 = arith.mulf %1034, %1035 : vector<1x8x8xf32>
    %cst_548 = arith.constant -1.000000e+30 : f32
    %1037 = vector.shape_cast %2 : vector<8x8xi1> to vector<1x8x8xi1>
    %1038 = vector.broadcast %cst_548 : f32 to vector<1x8x8xf32>
    %1039 = arith.select %1037, %1038, %1036 : vector<1x8x8xi1>, vector<1x8x8xf32>
    %cst_549 = arith.constant dense<0xFF800000> : vector<1x8xf32>
    %1040 = vector.multi_reduction <maximumf>, %1039, %cst_549 [2] : vector<1x8x8xf32> to vector<1x8xf32>
    %1041 = vector.shape_cast %1040 : vector<1x8xf32> to vector<1x8x1xf32>
    %1042 = vector.broadcast %1041 : vector<1x8x1xf32> to vector<1x8x8xf32>
    %1043 = arith.subf %1039, %1042 : vector<1x8x8xf32>
    %1044 = math.exp %1043 : vector<1x8x8xf32>
    %cst_550 = arith.constant dense<0.000000e+00> : vector<1x8xf32>
    %1045 = vector.multi_reduction <add>, %1044, %cst_550 [2] : vector<1x8x8xf32> to vector<1x8xf32>
    %1046 = vector.shape_cast %1045 : vector<1x8xf32> to vector<1x8x1xf32>
    %1047 = tpu.reciprocal %1046 : vector<1x8x1xf32> -> vector<1x8x1xf32>
    %1048 = vector.broadcast %1047 : vector<1x8x1xf32> to vector<1x8x8xf32>
    %1049 = arith.mulf %1044, %1048 : vector<1x8x8xf32>
    %1050 = arith.truncf %1049 : vector<1x8x8xf32> to vector<1x8x8xbf16>
    "tpu.trace_start"() <{level = 10 : i32, message = "bqk,bkd->bqd"}> : () -> ()
    %cst_551 = arith.constant dense<0.000000e+00> : vector<1x8x8xf32>
    %1051 = tpu.matmul %1050, %1033, %cst_551 {dimension_numbers = #tpu.dot_dimension_numbers<[2], [1], [1], [2], [0, 0, 0, 1, 1, 2], [0], [0]>} : vector<1x8x8xbf16>, vector<1x8x8xbf16>, vector<1x8x8xf32> -> vector<1x8x8xf32>
    "tpu.trace_stop"() : () -> ()
    %1052 = vector.shape_cast %1051 : vector<1x8x8xf32> to vector<8x8xf32>
    %1053 = arith.truncf %1052 : vector<8x8xf32> to vector<8x8xbf16>
    %c7_552 = arith.constant 7 : index
    %c0_553 = arith.constant 0 : index
    %c0_554 = arith.constant 0 : index
    %1054 = vector.load %arg17[%c7_552, %c0_553, %c0_554] : memref<16x8x32xbf16, #tpu.memory_space<vmem>>, vector<1x8x32xbf16>
    %1055 = vector.shape_cast %1054 : vector<1x8x32xbf16> to vector<8x32xbf16>
    %cst_555 = arith.constant dense<0.000000e+00> : vector<8x32xf32>
    %1056 = tpu.matmul %1053, %1055, %cst_555 {dimension_numbers = #tpu.dot_dimension_numbers<[1], [0], [0], [1], [0, 0, 1, 1], [], []>} : vector<8x8xbf16>, vector<8x32xbf16>, vector<8x32xf32> -> vector<8x32xf32>
    %1057 = arith.addf %1006, %1056 : vector<8x32xf32>
    %1058 = vector.broadcast %615 : vector<1x32xf32> to vector<8x32xf32>
    %1059 = arith.addf %1057, %1058 : vector<8x32xf32>
    %1060 = arith.addf %850, %1059 : vector<8x32xf32>
    %cst_556 = arith.constant dense<0.000000e+00> : vector<8xf32>
    %1061 = vector.multi_reduction <add>, %1060, %cst_556 [1] : vector<8x32xf32> to vector<8xf32>
    %1062 = vector.shape_cast %1061 : vector<8xf32> to vector<8x1xf32>
    %cst_557 = arith.constant 3.200000e+01 : f32
    %1063 = vector.broadcast %cst_557 : f32 to vector<8x1xf32>
    %1064 = arith.divf %1062, %1063 : vector<8x1xf32>
    %1065 = vector.broadcast %1064 : vector<8x1xf32> to vector<8x32xf32>
    %1066 = arith.subf %1060, %1065 : vector<8x32xf32>
    %1067 = arith.mulf %1066, %1066 : vector<8x32xf32>
    %cst_558 = arith.constant dense<0.000000e+00> : vector<8xf32>
    %1068 = vector.multi_reduction <add>, %1067, %cst_558 [1] : vector<8x32xf32> to vector<8xf32>
    %1069 = vector.shape_cast %1068 : vector<8xf32> to vector<8x1xf32>
    %cst_559 = arith.constant 3.200000e+01 : f32
    %1070 = vector.broadcast %cst_559 : f32 to vector<8x1xf32>
    %1071 = arith.divf %1069, %1070 : vector<8x1xf32>
    %cst_560 = arith.constant 9.99999974E-6 : f32
    %1072 = vector.broadcast %cst_560 : f32 to vector<8x1xf32>
    %1073 = arith.addf %1071, %1072 : vector<8x1xf32>
    %1074 = math.rsqrt %1073 : vector<8x1xf32>
    %1075 = vector.broadcast %1074 : vector<8x1xf32> to vector<8x32xf32>
    %1076 = arith.mulf %1066, %1075 : vector<8x32xf32>
    %1077 = vector.broadcast %616 : vector<1x32xf32> to vector<8x32xf32>
    %1078 = arith.mulf %1076, %1077 : vector<8x32xf32>
    %1079 = vector.broadcast %617 : vector<1x32xf32> to vector<8x32xf32>
    %1080 = arith.addf %1078, %1079 : vector<8x32xf32>
    %1081 = arith.truncf %1080 : vector<8x32xf32> to vector<8x32xbf16>
    %c0_561 = arith.constant 0 : index
    %c0_562 = arith.constant 0 : index
    %c0_563 = arith.constant 0 : index
    %1082 = vector.load %arg18[%c0_561, %c0_562, %c0_563] : memref<2x32x32xbf16, #tpu.memory_space<vmem>>, vector<1x32x32xbf16>
    %1083 = vector.shape_cast %1082 : vector<1x32x32xbf16> to vector<32x32xbf16>
    %cst_564 = arith.constant dense<0.000000e+00> : vector<8x32xf32>
    %1084 = tpu.matmul %1081, %1083, %cst_564 {dimension_numbers = #tpu.dot_dimension_numbers<[1], [0], [0], [1], [0, 0, 1, 1], [], []>} : vector<8x32xbf16>, vector<32x32xbf16>, vector<8x32xf32> -> vector<8x32xf32>
    %c0_565 = arith.constant 0 : index
    %c0_566 = arith.constant 0 : index
    %c0_567 = arith.constant 0 : index
    %1085 = vector.load %arg19[%c0_565, %c0_566, %c0_567] : memref<2x1x32xf32, #tpu.memory_space<vmem>>, vector<1x1x32xf32>
    %1086 = vector.shape_cast %1085 : vector<1x1x32xf32> to vector<1x32xf32>
    %1087 = vector.broadcast %1086 : vector<1x32xf32> to vector<8x32xf32>
    %1088 = arith.addf %1084, %1087 : vector<8x32xf32>
    %cst_568 = arith.constant 0.000000e+00 : f32
    %1089 = vector.broadcast %cst_568 : f32 to vector<8x32xf32>
    %1090 = arith.maximumf %1088, %1089 : vector<8x32xf32>
    %1091 = arith.truncf %1090 : vector<8x32xf32> to vector<8x32xbf16>
    %c0_569 = arith.constant 0 : index
    %c0_570 = arith.constant 0 : index
    %c0_571 = arith.constant 0 : index
    %1092 = vector.load %arg20[%c0_569, %c0_570, %c0_571] : memref<2x32x32xbf16, #tpu.memory_space<vmem>>, vector<1x32x32xbf16>
    %1093 = vector.shape_cast %1092 : vector<1x32x32xbf16> to vector<32x32xbf16>
    %cst_572 = arith.constant dense<0.000000e+00> : vector<8x32xf32>
    %1094 = tpu.matmul %1091, %1093, %cst_572 {dimension_numbers = #tpu.dot_dimension_numbers<[1], [0], [0], [1], [0, 0, 1, 1], [], []>} : vector<8x32xbf16>, vector<32x32xbf16>, vector<8x32xf32> -> vector<8x32xf32>
    %1095 = vector.broadcast %618 : vector<1x32xf32> to vector<8x32xf32>
    %1096 = arith.addf %1094, %1095 : vector<8x32xf32>
    %1097 = arith.addf %1080, %1096 : vector<8x32xf32>
    %cst_573 = arith.constant dense<0.000000e+00> : vector<8xf32>
    %1098 = vector.multi_reduction <add>, %1097, %cst_573 [1] : vector<8x32xf32> to vector<8xf32>
    %1099 = vector.shape_cast %1098 : vector<8xf32> to vector<8x1xf32>
    %cst_574 = arith.constant 3.200000e+01 : f32
    %1100 = vector.broadcast %cst_574 : f32 to vector<8x1xf32>
    %1101 = arith.divf %1099, %1100 : vector<8x1xf32>
    %1102 = vector.broadcast %1101 : vector<8x1xf32> to vector<8x32xf32>
    %1103 = arith.subf %1097, %1102 : vector<8x32xf32>
    %1104 = arith.mulf %1103, %1103 : vector<8x32xf32>
    %cst_575 = arith.constant dense<0.000000e+00> : vector<8xf32>
    %1105 = vector.multi_reduction <add>, %1104, %cst_575 [1] : vector<8x32xf32> to vector<8xf32>
    %1106 = vector.shape_cast %1105 : vector<8xf32> to vector<8x1xf32>
    %cst_576 = arith.constant 3.200000e+01 : f32
    %1107 = vector.broadcast %cst_576 : f32 to vector<8x1xf32>
    %1108 = arith.divf %1106, %1107 : vector<8x1xf32>
    %cst_577 = arith.constant 9.99999974E-6 : f32
    %1109 = vector.broadcast %cst_577 : f32 to vector<8x1xf32>
    %1110 = arith.addf %1108, %1109 : vector<8x1xf32>
    %1111 = math.rsqrt %1110 : vector<8x1xf32>
    %1112 = vector.broadcast %1111 : vector<8x1xf32> to vector<8x32xf32>
    %1113 = arith.mulf %1103, %1112 : vector<8x32xf32>
    %1114 = vector.broadcast %619 : vector<1x32xf32> to vector<8x32xf32>
    %1115 = arith.mulf %1113, %1114 : vector<8x32xf32>
    %1116 = vector.broadcast %620 : vector<1x32xf32> to vector<8x32xf32>
    %1117 = arith.addf %1115, %1116 : vector<8x32xf32>
    %c1_578 = arith.constant 1 : index
    %c0_579 = arith.constant 0 : index
    %c0_580 = arith.constant 0 : index
    %1118 = vector.load %arg21[%c1_578, %c0_579, %c0_580] : memref<2x9x32xf32, #tpu.memory_space<vmem>>, vector<1x9x32xf32>
    %1119 = vector.shape_cast %1118 : vector<1x9x32xf32> to vector<9x32xf32>
    %1120 = vector.extract_strided_slice %1119 {offsets = [0, 0], sizes = [1, 32], strides = [1, 1]} : vector<9x32xf32> to vector<1x32xf32>
    %1121 = vector.extract_strided_slice %1119 {offsets = [1, 0], sizes = [1, 32], strides = [1, 1]} : vector<9x32xf32> to vector<1x32xf32>
    %1122 = vector.extract_strided_slice %1119 {offsets = [2, 0], sizes = [1, 32], strides = [1, 1]} : vector<9x32xf32> to vector<1x32xf32>
    %1123 = vector.extract_strided_slice %1119 {offsets = [3, 0], sizes = [1, 32], strides = [1, 1]} : vector<9x32xf32> to vector<1x32xf32>
    %1124 = vector.extract_strided_slice %1119 {offsets = [4, 0], sizes = [1, 32], strides = [1, 1]} : vector<9x32xf32> to vector<1x32xf32>
    %1125 = vector.extract_strided_slice %1119 {offsets = [5, 0], sizes = [1, 32], strides = [1, 1]} : vector<9x32xf32> to vector<1x32xf32>
    %1126 = vector.extract_strided_slice %1119 {offsets = [6, 0], sizes = [1, 32], strides = [1, 1]} : vector<9x32xf32> to vector<1x32xf32>
    %1127 = vector.extract_strided_slice %1119 {offsets = [7, 0], sizes = [1, 32], strides = [1, 1]} : vector<9x32xf32> to vector<1x32xf32>
    %1128 = vector.extract_strided_slice %1119 {offsets = [8, 0], sizes = [1, 32], strides = [1, 1]} : vector<9x32xf32> to vector<1x32xf32>
    %1129 = arith.truncf %1117 : vector<8x32xf32> to vector<8x32xbf16>
    %1130 = arith.truncf %1117 : vector<8x32xf32> to vector<8x32xbf16>
    %cst_581 = arith.constant 0.000000e+00 : f32
    %1131 = vector.broadcast %cst_581 : f32 to vector<8x32xf32>
    %c24 = arith.constant 24 : index
    %c0_582 = arith.constant 0 : index
    %c0_583 = arith.constant 0 : index
    %1132 = vector.load %arg15[%c24, %c0_582, %c0_583] : memref<48x32x8xbf16, #tpu.memory_space<vmem>>, vector<1x32x8xbf16>
    %1133 = vector.shape_cast %1132 : vector<1x32x8xbf16> to vector<32x8xbf16>
    %cst_584 = arith.constant dense<0.000000e+00> : vector<8x8xf32>
    %1134 = tpu.matmul %1129, %1133, %cst_584 {dimension_numbers = #tpu.dot_dimension_numbers<[1], [0], [0], [1], [0, 0, 1, 1], [], []>} : vector<8x32xbf16>, vector<32x8xbf16>, vector<8x8xf32> -> vector<8x8xf32>
    %c24_585 = arith.constant 24 : index
    %c0_586 = arith.constant 0 : index
    %c0_587 = arith.constant 0 : index
    %1135 = vector.load %arg16[%c24_585, %c0_586, %c0_587] : memref<48x1x8xf32, #tpu.memory_space<vmem>>, vector<1x1x8xf32>
    %1136 = vector.shape_cast %1135 : vector<1x1x8xf32> to vector<1x8xf32>
    %1137 = vector.broadcast %1136 : vector<1x8xf32> to vector<8x8xf32>
    %1138 = arith.addf %1134, %1137 : vector<8x8xf32>
    %c28 = arith.constant 28 : index
    %c0_588 = arith.constant 0 : index
    %c0_589 = arith.constant 0 : index
    %1139 = vector.load %arg15[%c28, %c0_588, %c0_589] : memref<48x32x8xbf16, #tpu.memory_space<vmem>>, vector<1x32x8xbf16>
    %1140 = vector.shape_cast %1139 : vector<1x32x8xbf16> to vector<32x8xbf16>
    %cst_590 = arith.constant dense<0.000000e+00> : vector<8x8xf32>
    %1141 = tpu.matmul %1130, %1140, %cst_590 {dimension_numbers = #tpu.dot_dimension_numbers<[1], [0], [0], [1], [0, 0, 1, 1], [], []>} : vector<8x32xbf16>, vector<32x8xbf16>, vector<8x8xf32> -> vector<8x8xf32>
    %c28_591 = arith.constant 28 : index
    %c0_592 = arith.constant 0 : index
    %c0_593 = arith.constant 0 : index
    %1142 = vector.load %arg16[%c28_591, %c0_592, %c0_593] : memref<48x1x8xf32, #tpu.memory_space<vmem>>, vector<1x1x8xf32>
    %1143 = vector.shape_cast %1142 : vector<1x1x8xf32> to vector<1x8xf32>
    %1144 = vector.broadcast %1143 : vector<1x8xf32> to vector<8x8xf32>
    %1145 = arith.addf %1141, %1144 : vector<8x8xf32>
    %c32 = arith.constant 32 : index
    %c0_594 = arith.constant 0 : index
    %c0_595 = arith.constant 0 : index
    %1146 = vector.load %arg15[%c32, %c0_594, %c0_595] : memref<48x32x8xbf16, #tpu.memory_space<vmem>>, vector<1x32x8xbf16>
    %1147 = vector.shape_cast %1146 : vector<1x32x8xbf16> to vector<32x8xbf16>
    %cst_596 = arith.constant dense<0.000000e+00> : vector<8x8xf32>
    %1148 = tpu.matmul %1130, %1147, %cst_596 {dimension_numbers = #tpu.dot_dimension_numbers<[1], [0], [0], [1], [0, 0, 1, 1], [], []>} : vector<8x32xbf16>, vector<32x8xbf16>, vector<8x8xf32> -> vector<8x8xf32>
    %c32_597 = arith.constant 32 : index
    %c0_598 = arith.constant 0 : index
    %c0_599 = arith.constant 0 : index
    %1149 = vector.load %arg16[%c32_597, %c0_598, %c0_599] : memref<48x1x8xf32, #tpu.memory_space<vmem>>, vector<1x1x8xf32>
    %1150 = vector.shape_cast %1149 : vector<1x1x8xf32> to vector<1x8xf32>
    %1151 = vector.broadcast %1150 : vector<1x8xf32> to vector<8x8xf32>
    %1152 = arith.addf %1148, %1151 : vector<8x8xf32>
    %1153 = vector.shape_cast %1138 : vector<8x8xf32> to vector<1x8x8xf32>
    %1154 = arith.truncf %1153 : vector<1x8x8xf32> to vector<1x8x8xbf16>
    %1155 = vector.shape_cast %1145 : vector<8x8xf32> to vector<1x8x8xf32>
    %1156 = arith.truncf %1155 : vector<1x8x8xf32> to vector<1x8x8xbf16>
    %1157 = vector.shape_cast %1152 : vector<8x8xf32> to vector<1x8x8xf32>
    %1158 = arith.truncf %1157 : vector<1x8x8xf32> to vector<1x8x8xbf16>
    "tpu.trace_start"() <{level = 10 : i32, message = "bqd,bkd->bqk"}> : () -> ()
    %cst_600 = arith.constant dense<0.000000e+00> : vector<1x8x8xf32>
    %1159 = tpu.matmul %1154, %1156, %cst_600 {dimension_numbers = #tpu.dot_dimension_numbers<[2], [2], [1], [1], [0, 0, 0, 1, 1, 1], [0], [0]>} : vector<1x8x8xbf16>, vector<1x8x8xbf16>, vector<1x8x8xf32> -> vector<1x8x8xf32>
    "tpu.trace_stop"() : () -> ()
    %cst_601 = arith.constant 0.353553385 : f32
    %1160 = vector.broadcast %cst_601 : f32 to vector<1x8x8xf32>
    %1161 = arith.mulf %1159, %1160 : vector<1x8x8xf32>
    %cst_602 = arith.constant -1.000000e+30 : f32
    %1162 = vector.shape_cast %2 : vector<8x8xi1> to vector<1x8x8xi1>
    %1163 = vector.broadcast %cst_602 : f32 to vector<1x8x8xf32>
    %1164 = arith.select %1162, %1163, %1161 : vector<1x8x8xi1>, vector<1x8x8xf32>
    %cst_603 = arith.constant dense<0xFF800000> : vector<1x8xf32>
    %1165 = vector.multi_reduction <maximumf>, %1164, %cst_603 [2] : vector<1x8x8xf32> to vector<1x8xf32>
    %1166 = vector.shape_cast %1165 : vector<1x8xf32> to vector<1x8x1xf32>
    %1167 = vector.broadcast %1166 : vector<1x8x1xf32> to vector<1x8x8xf32>
    %1168 = arith.subf %1164, %1167 : vector<1x8x8xf32>
    %1169 = math.exp %1168 : vector<1x8x8xf32>
    %cst_604 = arith.constant dense<0.000000e+00> : vector<1x8xf32>
    %1170 = vector.multi_reduction <add>, %1169, %cst_604 [2] : vector<1x8x8xf32> to vector<1x8xf32>
    %1171 = vector.shape_cast %1170 : vector<1x8xf32> to vector<1x8x1xf32>
    %1172 = tpu.reciprocal %1171 : vector<1x8x1xf32> -> vector<1x8x1xf32>
    %1173 = vector.broadcast %1172 : vector<1x8x1xf32> to vector<1x8x8xf32>
    %1174 = arith.mulf %1169, %1173 : vector<1x8x8xf32>
    %1175 = arith.truncf %1174 : vector<1x8x8xf32> to vector<1x8x8xbf16>
    "tpu.trace_start"() <{level = 10 : i32, message = "bqk,bkd->bqd"}> : () -> ()
    %cst_605 = arith.constant dense<0.000000e+00> : vector<1x8x8xf32>
    %1176 = tpu.matmul %1175, %1158, %cst_605 {dimension_numbers = #tpu.dot_dimension_numbers<[2], [1], [1], [2], [0, 0, 0, 1, 1, 2], [0], [0]>} : vector<1x8x8xbf16>, vector<1x8x8xbf16>, vector<1x8x8xf32> -> vector<1x8x8xf32>
    "tpu.trace_stop"() : () -> ()
    %1177 = vector.shape_cast %1176 : vector<1x8x8xf32> to vector<8x8xf32>
    %1178 = arith.truncf %1177 : vector<8x8xf32> to vector<8x8xbf16>
    %c8_606 = arith.constant 8 : index
    %c0_607 = arith.constant 0 : index
    %c0_608 = arith.constant 0 : index
    %1179 = vector.load %arg17[%c8_606, %c0_607, %c0_608] : memref<16x8x32xbf16, #tpu.memory_space<vmem>>, vector<1x8x32xbf16>
    %1180 = vector.shape_cast %1179 : vector<1x8x32xbf16> to vector<8x32xbf16>
    %cst_609 = arith.constant dense<0.000000e+00> : vector<8x32xf32>
    %1181 = tpu.matmul %1178, %1180, %cst_609 {dimension_numbers = #tpu.dot_dimension_numbers<[1], [0], [0], [1], [0, 0, 1, 1], [], []>} : vector<8x8xbf16>, vector<8x32xbf16>, vector<8x32xf32> -> vector<8x32xf32>
    %1182 = arith.addf %1131, %1181 : vector<8x32xf32>
    %c25 = arith.constant 25 : index
    %c0_610 = arith.constant 0 : index
    %c0_611 = arith.constant 0 : index
    %1183 = vector.load %arg15[%c25, %c0_610, %c0_611] : memref<48x32x8xbf16, #tpu.memory_space<vmem>>, vector<1x32x8xbf16>
    %1184 = vector.shape_cast %1183 : vector<1x32x8xbf16> to vector<32x8xbf16>
    %cst_612 = arith.constant dense<0.000000e+00> : vector<8x8xf32>
    %1185 = tpu.matmul %1129, %1184, %cst_612 {dimension_numbers = #tpu.dot_dimension_numbers<[1], [0], [0], [1], [0, 0, 1, 1], [], []>} : vector<8x32xbf16>, vector<32x8xbf16>, vector<8x8xf32> -> vector<8x8xf32>
    %c25_613 = arith.constant 25 : index
    %c0_614 = arith.constant 0 : index
    %c0_615 = arith.constant 0 : index
    %1186 = vector.load %arg16[%c25_613, %c0_614, %c0_615] : memref<48x1x8xf32, #tpu.memory_space<vmem>>, vector<1x1x8xf32>
    %1187 = vector.shape_cast %1186 : vector<1x1x8xf32> to vector<1x8xf32>
    %1188 = vector.broadcast %1187 : vector<1x8xf32> to vector<8x8xf32>
    %1189 = arith.addf %1185, %1188 : vector<8x8xf32>
    %c29 = arith.constant 29 : index
    %c0_616 = arith.constant 0 : index
    %c0_617 = arith.constant 0 : index
    %1190 = vector.load %arg15[%c29, %c0_616, %c0_617] : memref<48x32x8xbf16, #tpu.memory_space<vmem>>, vector<1x32x8xbf16>
    %1191 = vector.shape_cast %1190 : vector<1x32x8xbf16> to vector<32x8xbf16>
    %cst_618 = arith.constant dense<0.000000e+00> : vector<8x8xf32>
    %1192 = tpu.matmul %1130, %1191, %cst_618 {dimension_numbers = #tpu.dot_dimension_numbers<[1], [0], [0], [1], [0, 0, 1, 1], [], []>} : vector<8x32xbf16>, vector<32x8xbf16>, vector<8x8xf32> -> vector<8x8xf32>
    %c29_619 = arith.constant 29 : index
    %c0_620 = arith.constant 0 : index
    %c0_621 = arith.constant 0 : index
    %1193 = vector.load %arg16[%c29_619, %c0_620, %c0_621] : memref<48x1x8xf32, #tpu.memory_space<vmem>>, vector<1x1x8xf32>
    %1194 = vector.shape_cast %1193 : vector<1x1x8xf32> to vector<1x8xf32>
    %1195 = vector.broadcast %1194 : vector<1x8xf32> to vector<8x8xf32>
    %1196 = arith.addf %1192, %1195 : vector<8x8xf32>
    %c33 = arith.constant 33 : index
    %c0_622 = arith.constant 0 : index
    %c0_623 = arith.constant 0 : index
    %1197 = vector.load %arg15[%c33, %c0_622, %c0_623] : memref<48x32x8xbf16, #tpu.memory_space<vmem>>, vector<1x32x8xbf16>
    %1198 = vector.shape_cast %1197 : vector<1x32x8xbf16> to vector<32x8xbf16>
    %cst_624 = arith.constant dense<0.000000e+00> : vector<8x8xf32>
    %1199 = tpu.matmul %1130, %1198, %cst_624 {dimension_numbers = #tpu.dot_dimension_numbers<[1], [0], [0], [1], [0, 0, 1, 1], [], []>} : vector<8x32xbf16>, vector<32x8xbf16>, vector<8x8xf32> -> vector<8x8xf32>
    %c33_625 = arith.constant 33 : index
    %c0_626 = arith.constant 0 : index
    %c0_627 = arith.constant 0 : index
    %1200 = vector.load %arg16[%c33_625, %c0_626, %c0_627] : memref<48x1x8xf32, #tpu.memory_space<vmem>>, vector<1x1x8xf32>
    %1201 = vector.shape_cast %1200 : vector<1x1x8xf32> to vector<1x8xf32>
    %1202 = vector.broadcast %1201 : vector<1x8xf32> to vector<8x8xf32>
    %1203 = arith.addf %1199, %1202 : vector<8x8xf32>
    %1204 = vector.shape_cast %1189 : vector<8x8xf32> to vector<1x8x8xf32>
    %1205 = arith.truncf %1204 : vector<1x8x8xf32> to vector<1x8x8xbf16>
    %1206 = vector.shape_cast %1196 : vector<8x8xf32> to vector<1x8x8xf32>
    %1207 = arith.truncf %1206 : vector<1x8x8xf32> to vector<1x8x8xbf16>
    %1208 = vector.shape_cast %1203 : vector<8x8xf32> to vector<1x8x8xf32>
    %1209 = arith.truncf %1208 : vector<1x8x8xf32> to vector<1x8x8xbf16>
    "tpu.trace_start"() <{level = 10 : i32, message = "bqd,bkd->bqk"}> : () -> ()
    %cst_628 = arith.constant dense<0.000000e+00> : vector<1x8x8xf32>
    %1210 = tpu.matmul %1205, %1207, %cst_628 {dimension_numbers = #tpu.dot_dimension_numbers<[2], [2], [1], [1], [0, 0, 0, 1, 1, 1], [0], [0]>} : vector<1x8x8xbf16>, vector<1x8x8xbf16>, vector<1x8x8xf32> -> vector<1x8x8xf32>
    "tpu.trace_stop"() : () -> ()
    %cst_629 = arith.constant 0.353553385 : f32
    %1211 = vector.broadcast %cst_629 : f32 to vector<1x8x8xf32>
    %1212 = arith.mulf %1210, %1211 : vector<1x8x8xf32>
    %cst_630 = arith.constant -1.000000e+30 : f32
    %1213 = vector.shape_cast %2 : vector<8x8xi1> to vector<1x8x8xi1>
    %1214 = vector.broadcast %cst_630 : f32 to vector<1x8x8xf32>
    %1215 = arith.select %1213, %1214, %1212 : vector<1x8x8xi1>, vector<1x8x8xf32>
    %cst_631 = arith.constant dense<0xFF800000> : vector<1x8xf32>
    %1216 = vector.multi_reduction <maximumf>, %1215, %cst_631 [2] : vector<1x8x8xf32> to vector<1x8xf32>
    %1217 = vector.shape_cast %1216 : vector<1x8xf32> to vector<1x8x1xf32>
    %1218 = vector.broadcast %1217 : vector<1x8x1xf32> to vector<1x8x8xf32>
    %1219 = arith.subf %1215, %1218 : vector<1x8x8xf32>
    %1220 = math.exp %1219 : vector<1x8x8xf32>
    %cst_632 = arith.constant dense<0.000000e+00> : vector<1x8xf32>
    %1221 = vector.multi_reduction <add>, %1220, %cst_632 [2] : vector<1x8x8xf32> to vector<1x8xf32>
    %1222 = vector.shape_cast %1221 : vector<1x8xf32> to vector<1x8x1xf32>
    %1223 = tpu.reciprocal %1222 : vector<1x8x1xf32> -> vector<1x8x1xf32>
    %1224 = vector.broadcast %1223 : vector<1x8x1xf32> to vector<1x8x8xf32>
    %1225 = arith.mulf %1220, %1224 : vector<1x8x8xf32>
    %1226 = arith.truncf %1225 : vector<1x8x8xf32> to vector<1x8x8xbf16>
    "tpu.trace_start"() <{level = 10 : i32, message = "bqk,bkd->bqd"}> : () -> ()
    %cst_633 = arith.constant dense<0.000000e+00> : vector<1x8x8xf32>
    %1227 = tpu.matmul %1226, %1209, %cst_633 {dimension_numbers = #tpu.dot_dimension_numbers<[2], [1], [1], [2], [0, 0, 0, 1, 1, 2], [0], [0]>} : vector<1x8x8xbf16>, vector<1x8x8xbf16>, vector<1x8x8xf32> -> vector<1x8x8xf32>
    "tpu.trace_stop"() : () -> ()
    %1228 = vector.shape_cast %1227 : vector<1x8x8xf32> to vector<8x8xf32>
    %1229 = arith.truncf %1228 : vector<8x8xf32> to vector<8x8xbf16>
    %c9_634 = arith.constant 9 : index
    %c0_635 = arith.constant 0 : index
    %c0_636 = arith.constant 0 : index
    %1230 = vector.load %arg17[%c9_634, %c0_635, %c0_636] : memref<16x8x32xbf16, #tpu.memory_space<vmem>>, vector<1x8x32xbf16>
    %1231 = vector.shape_cast %1230 : vector<1x8x32xbf16> to vector<8x32xbf16>
    %cst_637 = arith.constant dense<0.000000e+00> : vector<8x32xf32>
    %1232 = tpu.matmul %1229, %1231, %cst_637 {dimension_numbers = #tpu.dot_dimension_numbers<[1], [0], [0], [1], [0, 0, 1, 1], [], []>} : vector<8x8xbf16>, vector<8x32xbf16>, vector<8x32xf32> -> vector<8x32xf32>
    %1233 = arith.addf %1182, %1232 : vector<8x32xf32>
    %c26 = arith.constant 26 : index
    %c0_638 = arith.constant 0 : index
    %c0_639 = arith.constant 0 : index
    %1234 = vector.load %arg15[%c26, %c0_638, %c0_639] : memref<48x32x8xbf16, #tpu.memory_space<vmem>>, vector<1x32x8xbf16>
    %1235 = vector.shape_cast %1234 : vector<1x32x8xbf16> to vector<32x8xbf16>
    %cst_640 = arith.constant dense<0.000000e+00> : vector<8x8xf32>
    %1236 = tpu.matmul %1129, %1235, %cst_640 {dimension_numbers = #tpu.dot_dimension_numbers<[1], [0], [0], [1], [0, 0, 1, 1], [], []>} : vector<8x32xbf16>, vector<32x8xbf16>, vector<8x8xf32> -> vector<8x8xf32>
    %c26_641 = arith.constant 26 : index
    %c0_642 = arith.constant 0 : index
    %c0_643 = arith.constant 0 : index
    %1237 = vector.load %arg16[%c26_641, %c0_642, %c0_643] : memref<48x1x8xf32, #tpu.memory_space<vmem>>, vector<1x1x8xf32>
    %1238 = vector.shape_cast %1237 : vector<1x1x8xf32> to vector<1x8xf32>
    %1239 = vector.broadcast %1238 : vector<1x8xf32> to vector<8x8xf32>
    %1240 = arith.addf %1236, %1239 : vector<8x8xf32>
    %c30 = arith.constant 30 : index
    %c0_644 = arith.constant 0 : index
    %c0_645 = arith.constant 0 : index
    %1241 = vector.load %arg15[%c30, %c0_644, %c0_645] : memref<48x32x8xbf16, #tpu.memory_space<vmem>>, vector<1x32x8xbf16>
    %1242 = vector.shape_cast %1241 : vector<1x32x8xbf16> to vector<32x8xbf16>
    %cst_646 = arith.constant dense<0.000000e+00> : vector<8x8xf32>
    %1243 = tpu.matmul %1130, %1242, %cst_646 {dimension_numbers = #tpu.dot_dimension_numbers<[1], [0], [0], [1], [0, 0, 1, 1], [], []>} : vector<8x32xbf16>, vector<32x8xbf16>, vector<8x8xf32> -> vector<8x8xf32>
    %c30_647 = arith.constant 30 : index
    %c0_648 = arith.constant 0 : index
    %c0_649 = arith.constant 0 : index
    %1244 = vector.load %arg16[%c30_647, %c0_648, %c0_649] : memref<48x1x8xf32, #tpu.memory_space<vmem>>, vector<1x1x8xf32>
    %1245 = vector.shape_cast %1244 : vector<1x1x8xf32> to vector<1x8xf32>
    %1246 = vector.broadcast %1245 : vector<1x8xf32> to vector<8x8xf32>
    %1247 = arith.addf %1243, %1246 : vector<8x8xf32>
    %c34 = arith.constant 34 : index
    %c0_650 = arith.constant 0 : index
    %c0_651 = arith.constant 0 : index
    %1248 = vector.load %arg15[%c34, %c0_650, %c0_651] : memref<48x32x8xbf16, #tpu.memory_space<vmem>>, vector<1x32x8xbf16>
    %1249 = vector.shape_cast %1248 : vector<1x32x8xbf16> to vector<32x8xbf16>
    %cst_652 = arith.constant dense<0.000000e+00> : vector<8x8xf32>
    %1250 = tpu.matmul %1130, %1249, %cst_652 {dimension_numbers = #tpu.dot_dimension_numbers<[1], [0], [0], [1], [0, 0, 1, 1], [], []>} : vector<8x32xbf16>, vector<32x8xbf16>, vector<8x8xf32> -> vector<8x8xf32>
    %c34_653 = arith.constant 34 : index
    %c0_654 = arith.constant 0 : index
    %c0_655 = arith.constant 0 : index
    %1251 = vector.load %arg16[%c34_653, %c0_654, %c0_655] : memref<48x1x8xf32, #tpu.memory_space<vmem>>, vector<1x1x8xf32>
    %1252 = vector.shape_cast %1251 : vector<1x1x8xf32> to vector<1x8xf32>
    %1253 = vector.broadcast %1252 : vector<1x8xf32> to vector<8x8xf32>
    %1254 = arith.addf %1250, %1253 : vector<8x8xf32>
    %1255 = vector.shape_cast %1240 : vector<8x8xf32> to vector<1x8x8xf32>
    %1256 = arith.truncf %1255 : vector<1x8x8xf32> to vector<1x8x8xbf16>
    %1257 = vector.shape_cast %1247 : vector<8x8xf32> to vector<1x8x8xf32>
    %1258 = arith.truncf %1257 : vector<1x8x8xf32> to vector<1x8x8xbf16>
    %1259 = vector.shape_cast %1254 : vector<8x8xf32> to vector<1x8x8xf32>
    %1260 = arith.truncf %1259 : vector<1x8x8xf32> to vector<1x8x8xbf16>
    "tpu.trace_start"() <{level = 10 : i32, message = "bqd,bkd->bqk"}> : () -> ()
    %cst_656 = arith.constant dense<0.000000e+00> : vector<1x8x8xf32>
    %1261 = tpu.matmul %1256, %1258, %cst_656 {dimension_numbers = #tpu.dot_dimension_numbers<[2], [2], [1], [1], [0, 0, 0, 1, 1, 1], [0], [0]>} : vector<1x8x8xbf16>, vector<1x8x8xbf16>, vector<1x8x8xf32> -> vector<1x8x8xf32>
    "tpu.trace_stop"() : () -> ()
    %cst_657 = arith.constant 0.353553385 : f32
    %1262 = vector.broadcast %cst_657 : f32 to vector<1x8x8xf32>
    %1263 = arith.mulf %1261, %1262 : vector<1x8x8xf32>
    %cst_658 = arith.constant -1.000000e+30 : f32
    %1264 = vector.shape_cast %2 : vector<8x8xi1> to vector<1x8x8xi1>
    %1265 = vector.broadcast %cst_658 : f32 to vector<1x8x8xf32>
    %1266 = arith.select %1264, %1265, %1263 : vector<1x8x8xi1>, vector<1x8x8xf32>
    %cst_659 = arith.constant dense<0xFF800000> : vector<1x8xf32>
    %1267 = vector.multi_reduction <maximumf>, %1266, %cst_659 [2] : vector<1x8x8xf32> to vector<1x8xf32>
    %1268 = vector.shape_cast %1267 : vector<1x8xf32> to vector<1x8x1xf32>
    %1269 = vector.broadcast %1268 : vector<1x8x1xf32> to vector<1x8x8xf32>
    %1270 = arith.subf %1266, %1269 : vector<1x8x8xf32>
    %1271 = math.exp %1270 : vector<1x8x8xf32>
    %cst_660 = arith.constant dense<0.000000e+00> : vector<1x8xf32>
    %1272 = vector.multi_reduction <add>, %1271, %cst_660 [2] : vector<1x8x8xf32> to vector<1x8xf32>
    %1273 = vector.shape_cast %1272 : vector<1x8xf32> to vector<1x8x1xf32>
    %1274 = tpu.reciprocal %1273 : vector<1x8x1xf32> -> vector<1x8x1xf32>
    %1275 = vector.broadcast %1274 : vector<1x8x1xf32> to vector<1x8x8xf32>
    %1276 = arith.mulf %1271, %1275 : vector<1x8x8xf32>
    %1277 = arith.truncf %1276 : vector<1x8x8xf32> to vector<1x8x8xbf16>
    "tpu.trace_start"() <{level = 10 : i32, message = "bqk,bkd->bqd"}> : () -> ()
    %cst_661 = arith.constant dense<0.000000e+00> : vector<1x8x8xf32>
    %1278 = tpu.matmul %1277, %1260, %cst_661 {dimension_numbers = #tpu.dot_dimension_numbers<[2], [1], [1], [2], [0, 0, 0, 1, 1, 2], [0], [0]>} : vector<1x8x8xbf16>, vector<1x8x8xbf16>, vector<1x8x8xf32> -> vector<1x8x8xf32>
    "tpu.trace_stop"() : () -> ()
    %1279 = vector.shape_cast %1278 : vector<1x8x8xf32> to vector<8x8xf32>
    %1280 = arith.truncf %1279 : vector<8x8xf32> to vector<8x8xbf16>
    %c10_662 = arith.constant 10 : index
    %c0_663 = arith.constant 0 : index
    %c0_664 = arith.constant 0 : index
    %1281 = vector.load %arg17[%c10_662, %c0_663, %c0_664] : memref<16x8x32xbf16, #tpu.memory_space<vmem>>, vector<1x8x32xbf16>
    %1282 = vector.shape_cast %1281 : vector<1x8x32xbf16> to vector<8x32xbf16>
    %cst_665 = arith.constant dense<0.000000e+00> : vector<8x32xf32>
    %1283 = tpu.matmul %1280, %1282, %cst_665 {dimension_numbers = #tpu.dot_dimension_numbers<[1], [0], [0], [1], [0, 0, 1, 1], [], []>} : vector<8x8xbf16>, vector<8x32xbf16>, vector<8x32xf32> -> vector<8x32xf32>
    %1284 = arith.addf %1233, %1283 : vector<8x32xf32>
    %c27 = arith.constant 27 : index
    %c0_666 = arith.constant 0 : index
    %c0_667 = arith.constant 0 : index
    %1285 = vector.load %arg15[%c27, %c0_666, %c0_667] : memref<48x32x8xbf16, #tpu.memory_space<vmem>>, vector<1x32x8xbf16>
    %1286 = vector.shape_cast %1285 : vector<1x32x8xbf16> to vector<32x8xbf16>
    %cst_668 = arith.constant dense<0.000000e+00> : vector<8x8xf32>
    %1287 = tpu.matmul %1129, %1286, %cst_668 {dimension_numbers = #tpu.dot_dimension_numbers<[1], [0], [0], [1], [0, 0, 1, 1], [], []>} : vector<8x32xbf16>, vector<32x8xbf16>, vector<8x8xf32> -> vector<8x8xf32>
    %c27_669 = arith.constant 27 : index
    %c0_670 = arith.constant 0 : index
    %c0_671 = arith.constant 0 : index
    %1288 = vector.load %arg16[%c27_669, %c0_670, %c0_671] : memref<48x1x8xf32, #tpu.memory_space<vmem>>, vector<1x1x8xf32>
    %1289 = vector.shape_cast %1288 : vector<1x1x8xf32> to vector<1x8xf32>
    %1290 = vector.broadcast %1289 : vector<1x8xf32> to vector<8x8xf32>
    %1291 = arith.addf %1287, %1290 : vector<8x8xf32>
    %c31 = arith.constant 31 : index
    %c0_672 = arith.constant 0 : index
    %c0_673 = arith.constant 0 : index
    %1292 = vector.load %arg15[%c31, %c0_672, %c0_673] : memref<48x32x8xbf16, #tpu.memory_space<vmem>>, vector<1x32x8xbf16>
    %1293 = vector.shape_cast %1292 : vector<1x32x8xbf16> to vector<32x8xbf16>
    %cst_674 = arith.constant dense<0.000000e+00> : vector<8x8xf32>
    %1294 = tpu.matmul %1130, %1293, %cst_674 {dimension_numbers = #tpu.dot_dimension_numbers<[1], [0], [0], [1], [0, 0, 1, 1], [], []>} : vector<8x32xbf16>, vector<32x8xbf16>, vector<8x8xf32> -> vector<8x8xf32>
    %c31_675 = arith.constant 31 : index
    %c0_676 = arith.constant 0 : index
    %c0_677 = arith.constant 0 : index
    %1295 = vector.load %arg16[%c31_675, %c0_676, %c0_677] : memref<48x1x8xf32, #tpu.memory_space<vmem>>, vector<1x1x8xf32>
    %1296 = vector.shape_cast %1295 : vector<1x1x8xf32> to vector<1x8xf32>
    %1297 = vector.broadcast %1296 : vector<1x8xf32> to vector<8x8xf32>
    %1298 = arith.addf %1294, %1297 : vector<8x8xf32>
    %c35 = arith.constant 35 : index
    %c0_678 = arith.constant 0 : index
    %c0_679 = arith.constant 0 : index
    %1299 = vector.load %arg15[%c35, %c0_678, %c0_679] : memref<48x32x8xbf16, #tpu.memory_space<vmem>>, vector<1x32x8xbf16>
    %1300 = vector.shape_cast %1299 : vector<1x32x8xbf16> to vector<32x8xbf16>
    %cst_680 = arith.constant dense<0.000000e+00> : vector<8x8xf32>
    %1301 = tpu.matmul %1130, %1300, %cst_680 {dimension_numbers = #tpu.dot_dimension_numbers<[1], [0], [0], [1], [0, 0, 1, 1], [], []>} : vector<8x32xbf16>, vector<32x8xbf16>, vector<8x8xf32> -> vector<8x8xf32>
    %c35_681 = arith.constant 35 : index
    %c0_682 = arith.constant 0 : index
    %c0_683 = arith.constant 0 : index
    %1302 = vector.load %arg16[%c35_681, %c0_682, %c0_683] : memref<48x1x8xf32, #tpu.memory_space<vmem>>, vector<1x1x8xf32>
    %1303 = vector.shape_cast %1302 : vector<1x1x8xf32> to vector<1x8xf32>
    %1304 = vector.broadcast %1303 : vector<1x8xf32> to vector<8x8xf32>
    %1305 = arith.addf %1301, %1304 : vector<8x8xf32>
    %1306 = vector.shape_cast %1291 : vector<8x8xf32> to vector<1x8x8xf32>
    %1307 = arith.truncf %1306 : vector<1x8x8xf32> to vector<1x8x8xbf16>
    %1308 = vector.shape_cast %1298 : vector<8x8xf32> to vector<1x8x8xf32>
    %1309 = arith.truncf %1308 : vector<1x8x8xf32> to vector<1x8x8xbf16>
    %1310 = vector.shape_cast %1305 : vector<8x8xf32> to vector<1x8x8xf32>
    %1311 = arith.truncf %1310 : vector<1x8x8xf32> to vector<1x8x8xbf16>
    "tpu.trace_start"() <{level = 10 : i32, message = "bqd,bkd->bqk"}> : () -> ()
    %cst_684 = arith.constant dense<0.000000e+00> : vector<1x8x8xf32>
    %1312 = tpu.matmul %1307, %1309, %cst_684 {dimension_numbers = #tpu.dot_dimension_numbers<[2], [2], [1], [1], [0, 0, 0, 1, 1, 1], [0], [0]>} : vector<1x8x8xbf16>, vector<1x8x8xbf16>, vector<1x8x8xf32> -> vector<1x8x8xf32>
    "tpu.trace_stop"() : () -> ()
    %cst_685 = arith.constant 0.353553385 : f32
    %1313 = vector.broadcast %cst_685 : f32 to vector<1x8x8xf32>
    %1314 = arith.mulf %1312, %1313 : vector<1x8x8xf32>
    %cst_686 = arith.constant -1.000000e+30 : f32
    %1315 = vector.shape_cast %2 : vector<8x8xi1> to vector<1x8x8xi1>
    %1316 = vector.broadcast %cst_686 : f32 to vector<1x8x8xf32>
    %1317 = arith.select %1315, %1316, %1314 : vector<1x8x8xi1>, vector<1x8x8xf32>
    %cst_687 = arith.constant dense<0xFF800000> : vector<1x8xf32>
    %1318 = vector.multi_reduction <maximumf>, %1317, %cst_687 [2] : vector<1x8x8xf32> to vector<1x8xf32>
    %1319 = vector.shape_cast %1318 : vector<1x8xf32> to vector<1x8x1xf32>
    %1320 = vector.broadcast %1319 : vector<1x8x1xf32> to vector<1x8x8xf32>
    %1321 = arith.subf %1317, %1320 : vector<1x8x8xf32>
    %1322 = math.exp %1321 : vector<1x8x8xf32>
    %cst_688 = arith.constant dense<0.000000e+00> : vector<1x8xf32>
    %1323 = vector.multi_reduction <add>, %1322, %cst_688 [2] : vector<1x8x8xf32> to vector<1x8xf32>
    %1324 = vector.shape_cast %1323 : vector<1x8xf32> to vector<1x8x1xf32>
    %1325 = tpu.reciprocal %1324 : vector<1x8x1xf32> -> vector<1x8x1xf32>
    %1326 = vector.broadcast %1325 : vector<1x8x1xf32> to vector<1x8x8xf32>
    %1327 = arith.mulf %1322, %1326 : vector<1x8x8xf32>
    %1328 = arith.truncf %1327 : vector<1x8x8xf32> to vector<1x8x8xbf16>
    "tpu.trace_start"() <{level = 10 : i32, message = "bqk,bkd->bqd"}> : () -> ()
    %cst_689 = arith.constant dense<0.000000e+00> : vector<1x8x8xf32>
    %1329 = tpu.matmul %1328, %1311, %cst_689 {dimension_numbers = #tpu.dot_dimension_numbers<[2], [1], [1], [2], [0, 0, 0, 1, 1, 2], [0], [0]>} : vector<1x8x8xbf16>, vector<1x8x8xbf16>, vector<1x8x8xf32> -> vector<1x8x8xf32>
    "tpu.trace_stop"() : () -> ()
    %1330 = vector.shape_cast %1329 : vector<1x8x8xf32> to vector<8x8xf32>
    %1331 = arith.truncf %1330 : vector<8x8xf32> to vector<8x8xbf16>
    %c11_690 = arith.constant 11 : index
    %c0_691 = arith.constant 0 : index
    %c0_692 = arith.constant 0 : index
    %1332 = vector.load %arg17[%c11_690, %c0_691, %c0_692] : memref<16x8x32xbf16, #tpu.memory_space<vmem>>, vector<1x8x32xbf16>
    %1333 = vector.shape_cast %1332 : vector<1x8x32xbf16> to vector<8x32xbf16>
    %cst_693 = arith.constant dense<0.000000e+00> : vector<8x32xf32>
    %1334 = tpu.matmul %1331, %1333, %cst_693 {dimension_numbers = #tpu.dot_dimension_numbers<[1], [0], [0], [1], [0, 0, 1, 1], [], []>} : vector<8x8xbf16>, vector<8x32xbf16>, vector<8x32xf32> -> vector<8x32xf32>
    %1335 = arith.addf %1284, %1334 : vector<8x32xf32>
    %1336 = vector.broadcast %1120 : vector<1x32xf32> to vector<8x32xf32>
    %1337 = arith.addf %1335, %1336 : vector<8x32xf32>
    %1338 = arith.addf %1117, %1337 : vector<8x32xf32>
    %cst_694 = arith.constant dense<0.000000e+00> : vector<8xf32>
    %1339 = vector.multi_reduction <add>, %1338, %cst_694 [1] : vector<8x32xf32> to vector<8xf32>
    %1340 = vector.shape_cast %1339 : vector<8xf32> to vector<8x1xf32>
    %cst_695 = arith.constant 3.200000e+01 : f32
    %1341 = vector.broadcast %cst_695 : f32 to vector<8x1xf32>
    %1342 = arith.divf %1340, %1341 : vector<8x1xf32>
    %1343 = vector.broadcast %1342 : vector<8x1xf32> to vector<8x32xf32>
    %1344 = arith.subf %1338, %1343 : vector<8x32xf32>
    %1345 = arith.mulf %1344, %1344 : vector<8x32xf32>
    %cst_696 = arith.constant dense<0.000000e+00> : vector<8xf32>
    %1346 = vector.multi_reduction <add>, %1345, %cst_696 [1] : vector<8x32xf32> to vector<8xf32>
    %1347 = vector.shape_cast %1346 : vector<8xf32> to vector<8x1xf32>
    %cst_697 = arith.constant 3.200000e+01 : f32
    %1348 = vector.broadcast %cst_697 : f32 to vector<8x1xf32>
    %1349 = arith.divf %1347, %1348 : vector<8x1xf32>
    %cst_698 = arith.constant 9.99999974E-6 : f32
    %1350 = vector.broadcast %cst_698 : f32 to vector<8x1xf32>
    %1351 = arith.addf %1349, %1350 : vector<8x1xf32>
    %1352 = math.rsqrt %1351 : vector<8x1xf32>
    %1353 = vector.broadcast %1352 : vector<8x1xf32> to vector<8x32xf32>
    %1354 = arith.mulf %1344, %1353 : vector<8x32xf32>
    %1355 = vector.broadcast %1121 : vector<1x32xf32> to vector<8x32xf32>
    %1356 = arith.mulf %1354, %1355 : vector<8x32xf32>
    %1357 = vector.broadcast %1122 : vector<1x32xf32> to vector<8x32xf32>
    %1358 = arith.addf %1356, %1357 : vector<8x32xf32>
    %1359 = arith.truncf %1358 : vector<8x32xf32> to vector<8x32xbf16>
    %1360 = arith.truncf %609 : vector<8x32xf32> to vector<8x32xbf16>
    %cst_699 = arith.constant 0.000000e+00 : f32
    %1361 = vector.broadcast %cst_699 : f32 to vector<8x32xf32>
    %c36 = arith.constant 36 : index
    %c0_700 = arith.constant 0 : index
    %c0_701 = arith.constant 0 : index
    %1362 = vector.load %arg15[%c36, %c0_700, %c0_701] : memref<48x32x8xbf16, #tpu.memory_space<vmem>>, vector<1x32x8xbf16>
    %1363 = vector.shape_cast %1362 : vector<1x32x8xbf16> to vector<32x8xbf16>
    %cst_702 = arith.constant dense<0.000000e+00> : vector<8x8xf32>
    %1364 = tpu.matmul %1359, %1363, %cst_702 {dimension_numbers = #tpu.dot_dimension_numbers<[1], [0], [0], [1], [0, 0, 1, 1], [], []>} : vector<8x32xbf16>, vector<32x8xbf16>, vector<8x8xf32> -> vector<8x8xf32>
    %c36_703 = arith.constant 36 : index
    %c0_704 = arith.constant 0 : index
    %c0_705 = arith.constant 0 : index
    %1365 = vector.load %arg16[%c36_703, %c0_704, %c0_705] : memref<48x1x8xf32, #tpu.memory_space<vmem>>, vector<1x1x8xf32>
    %1366 = vector.shape_cast %1365 : vector<1x1x8xf32> to vector<1x8xf32>
    %1367 = vector.broadcast %1366 : vector<1x8xf32> to vector<8x8xf32>
    %1368 = arith.addf %1364, %1367 : vector<8x8xf32>
    %c40 = arith.constant 40 : index
    %c0_706 = arith.constant 0 : index
    %c0_707 = arith.constant 0 : index
    %1369 = vector.load %arg15[%c40, %c0_706, %c0_707] : memref<48x32x8xbf16, #tpu.memory_space<vmem>>, vector<1x32x8xbf16>
    %1370 = vector.shape_cast %1369 : vector<1x32x8xbf16> to vector<32x8xbf16>
    %cst_708 = arith.constant dense<0.000000e+00> : vector<8x8xf32>
    %1371 = tpu.matmul %1360, %1370, %cst_708 {dimension_numbers = #tpu.dot_dimension_numbers<[1], [0], [0], [1], [0, 0, 1, 1], [], []>} : vector<8x32xbf16>, vector<32x8xbf16>, vector<8x8xf32> -> vector<8x8xf32>
    %c40_709 = arith.constant 40 : index
    %c0_710 = arith.constant 0 : index
    %c0_711 = arith.constant 0 : index
    %1372 = vector.load %arg16[%c40_709, %c0_710, %c0_711] : memref<48x1x8xf32, #tpu.memory_space<vmem>>, vector<1x1x8xf32>
    %1373 = vector.shape_cast %1372 : vector<1x1x8xf32> to vector<1x8xf32>
    %1374 = vector.broadcast %1373 : vector<1x8xf32> to vector<8x8xf32>
    %1375 = arith.addf %1371, %1374 : vector<8x8xf32>
    %c44 = arith.constant 44 : index
    %c0_712 = arith.constant 0 : index
    %c0_713 = arith.constant 0 : index
    %1376 = vector.load %arg15[%c44, %c0_712, %c0_713] : memref<48x32x8xbf16, #tpu.memory_space<vmem>>, vector<1x32x8xbf16>
    %1377 = vector.shape_cast %1376 : vector<1x32x8xbf16> to vector<32x8xbf16>
    %cst_714 = arith.constant dense<0.000000e+00> : vector<8x8xf32>
    %1378 = tpu.matmul %1360, %1377, %cst_714 {dimension_numbers = #tpu.dot_dimension_numbers<[1], [0], [0], [1], [0, 0, 1, 1], [], []>} : vector<8x32xbf16>, vector<32x8xbf16>, vector<8x8xf32> -> vector<8x8xf32>
    %c44_715 = arith.constant 44 : index
    %c0_716 = arith.constant 0 : index
    %c0_717 = arith.constant 0 : index
    %1379 = vector.load %arg16[%c44_715, %c0_716, %c0_717] : memref<48x1x8xf32, #tpu.memory_space<vmem>>, vector<1x1x8xf32>
    %1380 = vector.shape_cast %1379 : vector<1x1x8xf32> to vector<1x8xf32>
    %1381 = vector.broadcast %1380 : vector<1x8xf32> to vector<8x8xf32>
    %1382 = arith.addf %1378, %1381 : vector<8x8xf32>
    %1383 = vector.shape_cast %1368 : vector<8x8xf32> to vector<1x8x8xf32>
    %1384 = arith.truncf %1383 : vector<1x8x8xf32> to vector<1x8x8xbf16>
    %1385 = vector.shape_cast %1375 : vector<8x8xf32> to vector<1x8x8xf32>
    %1386 = arith.truncf %1385 : vector<1x8x8xf32> to vector<1x8x8xbf16>
    %1387 = vector.shape_cast %1382 : vector<8x8xf32> to vector<1x8x8xf32>
    %1388 = arith.truncf %1387 : vector<1x8x8xf32> to vector<1x8x8xbf16>
    "tpu.trace_start"() <{level = 10 : i32, message = "bqd,bkd->bqk"}> : () -> ()
    %cst_718 = arith.constant dense<0.000000e+00> : vector<1x8x8xf32>
    %1389 = tpu.matmul %1384, %1386, %cst_718 {dimension_numbers = #tpu.dot_dimension_numbers<[2], [2], [1], [1], [0, 0, 0, 1, 1, 1], [0], [0]>} : vector<1x8x8xbf16>, vector<1x8x8xbf16>, vector<1x8x8xf32> -> vector<1x8x8xf32>
    "tpu.trace_stop"() : () -> ()
    %cst_719 = arith.constant 0.353553385 : f32
    %1390 = vector.broadcast %cst_719 : f32 to vector<1x8x8xf32>
    %1391 = arith.mulf %1389, %1390 : vector<1x8x8xf32>
    %cst_720 = arith.constant -1.000000e+30 : f32
    %1392 = vector.shape_cast %2 : vector<8x8xi1> to vector<1x8x8xi1>
    %1393 = vector.broadcast %cst_720 : f32 to vector<1x8x8xf32>
    %1394 = arith.select %1392, %1393, %1391 : vector<1x8x8xi1>, vector<1x8x8xf32>
    %cst_721 = arith.constant dense<0xFF800000> : vector<1x8xf32>
    %1395 = vector.multi_reduction <maximumf>, %1394, %cst_721 [2] : vector<1x8x8xf32> to vector<1x8xf32>
    %1396 = vector.shape_cast %1395 : vector<1x8xf32> to vector<1x8x1xf32>
    %1397 = vector.broadcast %1396 : vector<1x8x1xf32> to vector<1x8x8xf32>
    %1398 = arith.subf %1394, %1397 : vector<1x8x8xf32>
    %1399 = math.exp %1398 : vector<1x8x8xf32>
    %cst_722 = arith.constant dense<0.000000e+00> : vector<1x8xf32>
    %1400 = vector.multi_reduction <add>, %1399, %cst_722 [2] : vector<1x8x8xf32> to vector<1x8xf32>
    %1401 = vector.shape_cast %1400 : vector<1x8xf32> to vector<1x8x1xf32>
    %1402 = tpu.reciprocal %1401 : vector<1x8x1xf32> -> vector<1x8x1xf32>
    %1403 = vector.broadcast %1402 : vector<1x8x1xf32> to vector<1x8x8xf32>
    %1404 = arith.mulf %1399, %1403 : vector<1x8x8xf32>
    %1405 = arith.truncf %1404 : vector<1x8x8xf32> to vector<1x8x8xbf16>
    "tpu.trace_start"() <{level = 10 : i32, message = "bqk,bkd->bqd"}> : () -> ()
    %cst_723 = arith.constant dense<0.000000e+00> : vector<1x8x8xf32>
    %1406 = tpu.matmul %1405, %1388, %cst_723 {dimension_numbers = #tpu.dot_dimension_numbers<[2], [1], [1], [2], [0, 0, 0, 1, 1, 2], [0], [0]>} : vector<1x8x8xbf16>, vector<1x8x8xbf16>, vector<1x8x8xf32> -> vector<1x8x8xf32>
    "tpu.trace_stop"() : () -> ()
    %1407 = vector.shape_cast %1406 : vector<1x8x8xf32> to vector<8x8xf32>
    %1408 = arith.truncf %1407 : vector<8x8xf32> to vector<8x8xbf16>
    %c12_724 = arith.constant 12 : index
    %c0_725 = arith.constant 0 : index
    %c0_726 = arith.constant 0 : index
    %1409 = vector.load %arg17[%c12_724, %c0_725, %c0_726] : memref<16x8x32xbf16, #tpu.memory_space<vmem>>, vector<1x8x32xbf16>
    %1410 = vector.shape_cast %1409 : vector<1x8x32xbf16> to vector<8x32xbf16>
    %cst_727 = arith.constant dense<0.000000e+00> : vector<8x32xf32>
    %1411 = tpu.matmul %1408, %1410, %cst_727 {dimension_numbers = #tpu.dot_dimension_numbers<[1], [0], [0], [1], [0, 0, 1, 1], [], []>} : vector<8x8xbf16>, vector<8x32xbf16>, vector<8x32xf32> -> vector<8x32xf32>
    %1412 = arith.addf %1361, %1411 : vector<8x32xf32>
    %c37 = arith.constant 37 : index
    %c0_728 = arith.constant 0 : index
    %c0_729 = arith.constant 0 : index
    %1413 = vector.load %arg15[%c37, %c0_728, %c0_729] : memref<48x32x8xbf16, #tpu.memory_space<vmem>>, vector<1x32x8xbf16>
    %1414 = vector.shape_cast %1413 : vector<1x32x8xbf16> to vector<32x8xbf16>
    %cst_730 = arith.constant dense<0.000000e+00> : vector<8x8xf32>
    %1415 = tpu.matmul %1359, %1414, %cst_730 {dimension_numbers = #tpu.dot_dimension_numbers<[1], [0], [0], [1], [0, 0, 1, 1], [], []>} : vector<8x32xbf16>, vector<32x8xbf16>, vector<8x8xf32> -> vector<8x8xf32>
    %c37_731 = arith.constant 37 : index
    %c0_732 = arith.constant 0 : index
    %c0_733 = arith.constant 0 : index
    %1416 = vector.load %arg16[%c37_731, %c0_732, %c0_733] : memref<48x1x8xf32, #tpu.memory_space<vmem>>, vector<1x1x8xf32>
    %1417 = vector.shape_cast %1416 : vector<1x1x8xf32> to vector<1x8xf32>
    %1418 = vector.broadcast %1417 : vector<1x8xf32> to vector<8x8xf32>
    %1419 = arith.addf %1415, %1418 : vector<8x8xf32>
    %c41 = arith.constant 41 : index
    %c0_734 = arith.constant 0 : index
    %c0_735 = arith.constant 0 : index
    %1420 = vector.load %arg15[%c41, %c0_734, %c0_735] : memref<48x32x8xbf16, #tpu.memory_space<vmem>>, vector<1x32x8xbf16>
    %1421 = vector.shape_cast %1420 : vector<1x32x8xbf16> to vector<32x8xbf16>
    %cst_736 = arith.constant dense<0.000000e+00> : vector<8x8xf32>
    %1422 = tpu.matmul %1360, %1421, %cst_736 {dimension_numbers = #tpu.dot_dimension_numbers<[1], [0], [0], [1], [0, 0, 1, 1], [], []>} : vector<8x32xbf16>, vector<32x8xbf16>, vector<8x8xf32> -> vector<8x8xf32>
    %c41_737 = arith.constant 41 : index
    %c0_738 = arith.constant 0 : index
    %c0_739 = arith.constant 0 : index
    %1423 = vector.load %arg16[%c41_737, %c0_738, %c0_739] : memref<48x1x8xf32, #tpu.memory_space<vmem>>, vector<1x1x8xf32>
    %1424 = vector.shape_cast %1423 : vector<1x1x8xf32> to vector<1x8xf32>
    %1425 = vector.broadcast %1424 : vector<1x8xf32> to vector<8x8xf32>
    %1426 = arith.addf %1422, %1425 : vector<8x8xf32>
    %c45 = arith.constant 45 : index
    %c0_740 = arith.constant 0 : index
    %c0_741 = arith.constant 0 : index
    %1427 = vector.load %arg15[%c45, %c0_740, %c0_741] : memref<48x32x8xbf16, #tpu.memory_space<vmem>>, vector<1x32x8xbf16>
    %1428 = vector.shape_cast %1427 : vector<1x32x8xbf16> to vector<32x8xbf16>
    %cst_742 = arith.constant dense<0.000000e+00> : vector<8x8xf32>
    %1429 = tpu.matmul %1360, %1428, %cst_742 {dimension_numbers = #tpu.dot_dimension_numbers<[1], [0], [0], [1], [0, 0, 1, 1], [], []>} : vector<8x32xbf16>, vector<32x8xbf16>, vector<8x8xf32> -> vector<8x8xf32>
    %c45_743 = arith.constant 45 : index
    %c0_744 = arith.constant 0 : index
    %c0_745 = arith.constant 0 : index
    %1430 = vector.load %arg16[%c45_743, %c0_744, %c0_745] : memref<48x1x8xf32, #tpu.memory_space<vmem>>, vector<1x1x8xf32>
    %1431 = vector.shape_cast %1430 : vector<1x1x8xf32> to vector<1x8xf32>
    %1432 = vector.broadcast %1431 : vector<1x8xf32> to vector<8x8xf32>
    %1433 = arith.addf %1429, %1432 : vector<8x8xf32>
    %1434 = vector.shape_cast %1419 : vector<8x8xf32> to vector<1x8x8xf32>
    %1435 = arith.truncf %1434 : vector<1x8x8xf32> to vector<1x8x8xbf16>
    %1436 = vector.shape_cast %1426 : vector<8x8xf32> to vector<1x8x8xf32>
    %1437 = arith.truncf %1436 : vector<1x8x8xf32> to vector<1x8x8xbf16>
    %1438 = vector.shape_cast %1433 : vector<8x8xf32> to vector<1x8x8xf32>
    %1439 = arith.truncf %1438 : vector<1x8x8xf32> to vector<1x8x8xbf16>
    "tpu.trace_start"() <{level = 10 : i32, message = "bqd,bkd->bqk"}> : () -> ()
    %cst_746 = arith.constant dense<0.000000e+00> : vector<1x8x8xf32>
    %1440 = tpu.matmul %1435, %1437, %cst_746 {dimension_numbers = #tpu.dot_dimension_numbers<[2], [2], [1], [1], [0, 0, 0, 1, 1, 1], [0], [0]>} : vector<1x8x8xbf16>, vector<1x8x8xbf16>, vector<1x8x8xf32> -> vector<1x8x8xf32>
    "tpu.trace_stop"() : () -> ()
    %cst_747 = arith.constant 0.353553385 : f32
    %1441 = vector.broadcast %cst_747 : f32 to vector<1x8x8xf32>
    %1442 = arith.mulf %1440, %1441 : vector<1x8x8xf32>
    %cst_748 = arith.constant -1.000000e+30 : f32
    %1443 = vector.shape_cast %2 : vector<8x8xi1> to vector<1x8x8xi1>
    %1444 = vector.broadcast %cst_748 : f32 to vector<1x8x8xf32>
    %1445 = arith.select %1443, %1444, %1442 : vector<1x8x8xi1>, vector<1x8x8xf32>
    %cst_749 = arith.constant dense<0xFF800000> : vector<1x8xf32>
    %1446 = vector.multi_reduction <maximumf>, %1445, %cst_749 [2] : vector<1x8x8xf32> to vector<1x8xf32>
    %1447 = vector.shape_cast %1446 : vector<1x8xf32> to vector<1x8x1xf32>
    %1448 = vector.broadcast %1447 : vector<1x8x1xf32> to vector<1x8x8xf32>
    %1449 = arith.subf %1445, %1448 : vector<1x8x8xf32>
    %1450 = math.exp %1449 : vector<1x8x8xf32>
    %cst_750 = arith.constant dense<0.000000e+00> : vector<1x8xf32>
    %1451 = vector.multi_reduction <add>, %1450, %cst_750 [2] : vector<1x8x8xf32> to vector<1x8xf32>
    %1452 = vector.shape_cast %1451 : vector<1x8xf32> to vector<1x8x1xf32>
    %1453 = tpu.reciprocal %1452 : vector<1x8x1xf32> -> vector<1x8x1xf32>
    %1454 = vector.broadcast %1453 : vector<1x8x1xf32> to vector<1x8x8xf32>
    %1455 = arith.mulf %1450, %1454 : vector<1x8x8xf32>
    %1456 = arith.truncf %1455 : vector<1x8x8xf32> to vector<1x8x8xbf16>
    "tpu.trace_start"() <{level = 10 : i32, message = "bqk,bkd->bqd"}> : () -> ()
    %cst_751 = arith.constant dense<0.000000e+00> : vector<1x8x8xf32>
    %1457 = tpu.matmul %1456, %1439, %cst_751 {dimension_numbers = #tpu.dot_dimension_numbers<[2], [1], [1], [2], [0, 0, 0, 1, 1, 2], [0], [0]>} : vector<1x8x8xbf16>, vector<1x8x8xbf16>, vector<1x8x8xf32> -> vector<1x8x8xf32>
    "tpu.trace_stop"() : () -> ()
    %1458 = vector.shape_cast %1457 : vector<1x8x8xf32> to vector<8x8xf32>
    %1459 = arith.truncf %1458 : vector<8x8xf32> to vector<8x8xbf16>
    %c13_752 = arith.constant 13 : index
    %c0_753 = arith.constant 0 : index
    %c0_754 = arith.constant 0 : index
    %1460 = vector.load %arg17[%c13_752, %c0_753, %c0_754] : memref<16x8x32xbf16, #tpu.memory_space<vmem>>, vector<1x8x32xbf16>
    %1461 = vector.shape_cast %1460 : vector<1x8x32xbf16> to vector<8x32xbf16>
    %cst_755 = arith.constant dense<0.000000e+00> : vector<8x32xf32>
    %1462 = tpu.matmul %1459, %1461, %cst_755 {dimension_numbers = #tpu.dot_dimension_numbers<[1], [0], [0], [1], [0, 0, 1, 1], [], []>} : vector<8x8xbf16>, vector<8x32xbf16>, vector<8x32xf32> -> vector<8x32xf32>
    %1463 = arith.addf %1412, %1462 : vector<8x32xf32>
    %c38 = arith.constant 38 : index
    %c0_756 = arith.constant 0 : index
    %c0_757 = arith.constant 0 : index
    %1464 = vector.load %arg15[%c38, %c0_756, %c0_757] : memref<48x32x8xbf16, #tpu.memory_space<vmem>>, vector<1x32x8xbf16>
    %1465 = vector.shape_cast %1464 : vector<1x32x8xbf16> to vector<32x8xbf16>
    %cst_758 = arith.constant dense<0.000000e+00> : vector<8x8xf32>
    %1466 = tpu.matmul %1359, %1465, %cst_758 {dimension_numbers = #tpu.dot_dimension_numbers<[1], [0], [0], [1], [0, 0, 1, 1], [], []>} : vector<8x32xbf16>, vector<32x8xbf16>, vector<8x8xf32> -> vector<8x8xf32>
    %c38_759 = arith.constant 38 : index
    %c0_760 = arith.constant 0 : index
    %c0_761 = arith.constant 0 : index
    %1467 = vector.load %arg16[%c38_759, %c0_760, %c0_761] : memref<48x1x8xf32, #tpu.memory_space<vmem>>, vector<1x1x8xf32>
    %1468 = vector.shape_cast %1467 : vector<1x1x8xf32> to vector<1x8xf32>
    %1469 = vector.broadcast %1468 : vector<1x8xf32> to vector<8x8xf32>
    %1470 = arith.addf %1466, %1469 : vector<8x8xf32>
    %c42 = arith.constant 42 : index
    %c0_762 = arith.constant 0 : index
    %c0_763 = arith.constant 0 : index
    %1471 = vector.load %arg15[%c42, %c0_762, %c0_763] : memref<48x32x8xbf16, #tpu.memory_space<vmem>>, vector<1x32x8xbf16>
    %1472 = vector.shape_cast %1471 : vector<1x32x8xbf16> to vector<32x8xbf16>
    %cst_764 = arith.constant dense<0.000000e+00> : vector<8x8xf32>
    %1473 = tpu.matmul %1360, %1472, %cst_764 {dimension_numbers = #tpu.dot_dimension_numbers<[1], [0], [0], [1], [0, 0, 1, 1], [], []>} : vector<8x32xbf16>, vector<32x8xbf16>, vector<8x8xf32> -> vector<8x8xf32>
    %c42_765 = arith.constant 42 : index
    %c0_766 = arith.constant 0 : index
    %c0_767 = arith.constant 0 : index
    %1474 = vector.load %arg16[%c42_765, %c0_766, %c0_767] : memref<48x1x8xf32, #tpu.memory_space<vmem>>, vector<1x1x8xf32>
    %1475 = vector.shape_cast %1474 : vector<1x1x8xf32> to vector<1x8xf32>
    %1476 = vector.broadcast %1475 : vector<1x8xf32> to vector<8x8xf32>
    %1477 = arith.addf %1473, %1476 : vector<8x8xf32>
    %c46 = arith.constant 46 : index
    %c0_768 = arith.constant 0 : index
    %c0_769 = arith.constant 0 : index
    %1478 = vector.load %arg15[%c46, %c0_768, %c0_769] : memref<48x32x8xbf16, #tpu.memory_space<vmem>>, vector<1x32x8xbf16>
    %1479 = vector.shape_cast %1478 : vector<1x32x8xbf16> to vector<32x8xbf16>
    %cst_770 = arith.constant dense<0.000000e+00> : vector<8x8xf32>
    %1480 = tpu.matmul %1360, %1479, %cst_770 {dimension_numbers = #tpu.dot_dimension_numbers<[1], [0], [0], [1], [0, 0, 1, 1], [], []>} : vector<8x32xbf16>, vector<32x8xbf16>, vector<8x8xf32> -> vector<8x8xf32>
    %c46_771 = arith.constant 46 : index
    %c0_772 = arith.constant 0 : index
    %c0_773 = arith.constant 0 : index
    %1481 = vector.load %arg16[%c46_771, %c0_772, %c0_773] : memref<48x1x8xf32, #tpu.memory_space<vmem>>, vector<1x1x8xf32>
    %1482 = vector.shape_cast %1481 : vector<1x1x8xf32> to vector<1x8xf32>
    %1483 = vector.broadcast %1482 : vector<1x8xf32> to vector<8x8xf32>
    %1484 = arith.addf %1480, %1483 : vector<8x8xf32>
    %1485 = vector.shape_cast %1470 : vector<8x8xf32> to vector<1x8x8xf32>
    %1486 = arith.truncf %1485 : vector<1x8x8xf32> to vector<1x8x8xbf16>
    %1487 = vector.shape_cast %1477 : vector<8x8xf32> to vector<1x8x8xf32>
    %1488 = arith.truncf %1487 : vector<1x8x8xf32> to vector<1x8x8xbf16>
    %1489 = vector.shape_cast %1484 : vector<8x8xf32> to vector<1x8x8xf32>
    %1490 = arith.truncf %1489 : vector<1x8x8xf32> to vector<1x8x8xbf16>
    "tpu.trace_start"() <{level = 10 : i32, message = "bqd,bkd->bqk"}> : () -> ()
    %cst_774 = arith.constant dense<0.000000e+00> : vector<1x8x8xf32>
    %1491 = tpu.matmul %1486, %1488, %cst_774 {dimension_numbers = #tpu.dot_dimension_numbers<[2], [2], [1], [1], [0, 0, 0, 1, 1, 1], [0], [0]>} : vector<1x8x8xbf16>, vector<1x8x8xbf16>, vector<1x8x8xf32> -> vector<1x8x8xf32>
    "tpu.trace_stop"() : () -> ()
    %cst_775 = arith.constant 0.353553385 : f32
    %1492 = vector.broadcast %cst_775 : f32 to vector<1x8x8xf32>
    %1493 = arith.mulf %1491, %1492 : vector<1x8x8xf32>
    %cst_776 = arith.constant -1.000000e+30 : f32
    %1494 = vector.shape_cast %2 : vector<8x8xi1> to vector<1x8x8xi1>
    %1495 = vector.broadcast %cst_776 : f32 to vector<1x8x8xf32>
    %1496 = arith.select %1494, %1495, %1493 : vector<1x8x8xi1>, vector<1x8x8xf32>
    %cst_777 = arith.constant dense<0xFF800000> : vector<1x8xf32>
    %1497 = vector.multi_reduction <maximumf>, %1496, %cst_777 [2] : vector<1x8x8xf32> to vector<1x8xf32>
    %1498 = vector.shape_cast %1497 : vector<1x8xf32> to vector<1x8x1xf32>
    %1499 = vector.broadcast %1498 : vector<1x8x1xf32> to vector<1x8x8xf32>
    %1500 = arith.subf %1496, %1499 : vector<1x8x8xf32>
    %1501 = math.exp %1500 : vector<1x8x8xf32>
    %cst_778 = arith.constant dense<0.000000e+00> : vector<1x8xf32>
    %1502 = vector.multi_reduction <add>, %1501, %cst_778 [2] : vector<1x8x8xf32> to vector<1x8xf32>
    %1503 = vector.shape_cast %1502 : vector<1x8xf32> to vector<1x8x1xf32>
    %1504 = tpu.reciprocal %1503 : vector<1x8x1xf32> -> vector<1x8x1xf32>
    %1505 = vector.broadcast %1504 : vector<1x8x1xf32> to vector<1x8x8xf32>
    %1506 = arith.mulf %1501, %1505 : vector<1x8x8xf32>
    %1507 = arith.truncf %1506 : vector<1x8x8xf32> to vector<1x8x8xbf16>
    "tpu.trace_start"() <{level = 10 : i32, message = "bqk,bkd->bqd"}> : () -> ()
    %cst_779 = arith.constant dense<0.000000e+00> : vector<1x8x8xf32>
    %1508 = tpu.matmul %1507, %1490, %cst_779 {dimension_numbers = #tpu.dot_dimension_numbers<[2], [1], [1], [2], [0, 0, 0, 1, 1, 2], [0], [0]>} : vector<1x8x8xbf16>, vector<1x8x8xbf16>, vector<1x8x8xf32> -> vector<1x8x8xf32>
    "tpu.trace_stop"() : () -> ()
    %1509 = vector.shape_cast %1508 : vector<1x8x8xf32> to vector<8x8xf32>
    %1510 = arith.truncf %1509 : vector<8x8xf32> to vector<8x8xbf16>
    %c14_780 = arith.constant 14 : index
    %c0_781 = arith.constant 0 : index
    %c0_782 = arith.constant 0 : index
    %1511 = vector.load %arg17[%c14_780, %c0_781, %c0_782] : memref<16x8x32xbf16, #tpu.memory_space<vmem>>, vector<1x8x32xbf16>
    %1512 = vector.shape_cast %1511 : vector<1x8x32xbf16> to vector<8x32xbf16>
    %cst_783 = arith.constant dense<0.000000e+00> : vector<8x32xf32>
    %1513 = tpu.matmul %1510, %1512, %cst_783 {dimension_numbers = #tpu.dot_dimension_numbers<[1], [0], [0], [1], [0, 0, 1, 1], [], []>} : vector<8x8xbf16>, vector<8x32xbf16>, vector<8x32xf32> -> vector<8x32xf32>
    %1514 = arith.addf %1463, %1513 : vector<8x32xf32>
    %c39 = arith.constant 39 : index
    %c0_784 = arith.constant 0 : index
    %c0_785 = arith.constant 0 : index
    %1515 = vector.load %arg15[%c39, %c0_784, %c0_785] : memref<48x32x8xbf16, #tpu.memory_space<vmem>>, vector<1x32x8xbf16>
    %1516 = vector.shape_cast %1515 : vector<1x32x8xbf16> to vector<32x8xbf16>
    %cst_786 = arith.constant dense<0.000000e+00> : vector<8x8xf32>
    %1517 = tpu.matmul %1359, %1516, %cst_786 {dimension_numbers = #tpu.dot_dimension_numbers<[1], [0], [0], [1], [0, 0, 1, 1], [], []>} : vector<8x32xbf16>, vector<32x8xbf16>, vector<8x8xf32> -> vector<8x8xf32>
    %c39_787 = arith.constant 39 : index
    %c0_788 = arith.constant 0 : index
    %c0_789 = arith.constant 0 : index
    %1518 = vector.load %arg16[%c39_787, %c0_788, %c0_789] : memref<48x1x8xf32, #tpu.memory_space<vmem>>, vector<1x1x8xf32>
    %1519 = vector.shape_cast %1518 : vector<1x1x8xf32> to vector<1x8xf32>
    %1520 = vector.broadcast %1519 : vector<1x8xf32> to vector<8x8xf32>
    %1521 = arith.addf %1517, %1520 : vector<8x8xf32>
    %c43 = arith.constant 43 : index
    %c0_790 = arith.constant 0 : index
    %c0_791 = arith.constant 0 : index
    %1522 = vector.load %arg15[%c43, %c0_790, %c0_791] : memref<48x32x8xbf16, #tpu.memory_space<vmem>>, vector<1x32x8xbf16>
    %1523 = vector.shape_cast %1522 : vector<1x32x8xbf16> to vector<32x8xbf16>
    %cst_792 = arith.constant dense<0.000000e+00> : vector<8x8xf32>
    %1524 = tpu.matmul %1360, %1523, %cst_792 {dimension_numbers = #tpu.dot_dimension_numbers<[1], [0], [0], [1], [0, 0, 1, 1], [], []>} : vector<8x32xbf16>, vector<32x8xbf16>, vector<8x8xf32> -> vector<8x8xf32>
    %c43_793 = arith.constant 43 : index
    %c0_794 = arith.constant 0 : index
    %c0_795 = arith.constant 0 : index
    %1525 = vector.load %arg16[%c43_793, %c0_794, %c0_795] : memref<48x1x8xf32, #tpu.memory_space<vmem>>, vector<1x1x8xf32>
    %1526 = vector.shape_cast %1525 : vector<1x1x8xf32> to vector<1x8xf32>
    %1527 = vector.broadcast %1526 : vector<1x8xf32> to vector<8x8xf32>
    %1528 = arith.addf %1524, %1527 : vector<8x8xf32>
    %c47 = arith.constant 47 : index
    %c0_796 = arith.constant 0 : index
    %c0_797 = arith.constant 0 : index
    %1529 = vector.load %arg15[%c47, %c0_796, %c0_797] : memref<48x32x8xbf16, #tpu.memory_space<vmem>>, vector<1x32x8xbf16>
    %1530 = vector.shape_cast %1529 : vector<1x32x8xbf16> to vector<32x8xbf16>
    %cst_798 = arith.constant dense<0.000000e+00> : vector<8x8xf32>
    %1531 = tpu.matmul %1360, %1530, %cst_798 {dimension_numbers = #tpu.dot_dimension_numbers<[1], [0], [0], [1], [0, 0, 1, 1], [], []>} : vector<8x32xbf16>, vector<32x8xbf16>, vector<8x8xf32> -> vector<8x8xf32>
    %c47_799 = arith.constant 47 : index
    %c0_800 = arith.constant 0 : index
    %c0_801 = arith.constant 0 : index
    %1532 = vector.load %arg16[%c47_799, %c0_800, %c0_801] : memref<48x1x8xf32, #tpu.memory_space<vmem>>, vector<1x1x8xf32>
    %1533 = vector.shape_cast %1532 : vector<1x1x8xf32> to vector<1x8xf32>
    %1534 = vector.broadcast %1533 : vector<1x8xf32> to vector<8x8xf32>
    %1535 = arith.addf %1531, %1534 : vector<8x8xf32>
    %1536 = vector.shape_cast %1521 : vector<8x8xf32> to vector<1x8x8xf32>
    %1537 = arith.truncf %1536 : vector<1x8x8xf32> to vector<1x8x8xbf16>
    %1538 = vector.shape_cast %1528 : vector<8x8xf32> to vector<1x8x8xf32>
    %1539 = arith.truncf %1538 : vector<1x8x8xf32> to vector<1x8x8xbf16>
    %1540 = vector.shape_cast %1535 : vector<8x8xf32> to vector<1x8x8xf32>
    %1541 = arith.truncf %1540 : vector<1x8x8xf32> to vector<1x8x8xbf16>
    "tpu.trace_start"() <{level = 10 : i32, message = "bqd,bkd->bqk"}> : () -> ()
    %cst_802 = arith.constant dense<0.000000e+00> : vector<1x8x8xf32>
    %1542 = tpu.matmul %1537, %1539, %cst_802 {dimension_numbers = #tpu.dot_dimension_numbers<[2], [2], [1], [1], [0, 0, 0, 1, 1, 1], [0], [0]>} : vector<1x8x8xbf16>, vector<1x8x8xbf16>, vector<1x8x8xf32> -> vector<1x8x8xf32>
    "tpu.trace_stop"() : () -> ()
    %cst_803 = arith.constant 0.353553385 : f32
    %1543 = vector.broadcast %cst_803 : f32 to vector<1x8x8xf32>
    %1544 = arith.mulf %1542, %1543 : vector<1x8x8xf32>
    %cst_804 = arith.constant -1.000000e+30 : f32
    %1545 = vector.shape_cast %2 : vector<8x8xi1> to vector<1x8x8xi1>
    %1546 = vector.broadcast %cst_804 : f32 to vector<1x8x8xf32>
    %1547 = arith.select %1545, %1546, %1544 : vector<1x8x8xi1>, vector<1x8x8xf32>
    %cst_805 = arith.constant dense<0xFF800000> : vector<1x8xf32>
    %1548 = vector.multi_reduction <maximumf>, %1547, %cst_805 [2] : vector<1x8x8xf32> to vector<1x8xf32>
    %1549 = vector.shape_cast %1548 : vector<1x8xf32> to vector<1x8x1xf32>
    %1550 = vector.broadcast %1549 : vector<1x8x1xf32> to vector<1x8x8xf32>
    %1551 = arith.subf %1547, %1550 : vector<1x8x8xf32>
    %1552 = math.exp %1551 : vector<1x8x8xf32>
    %cst_806 = arith.constant dense<0.000000e+00> : vector<1x8xf32>
    %1553 = vector.multi_reduction <add>, %1552, %cst_806 [2] : vector<1x8x8xf32> to vector<1x8xf32>
    %1554 = vector.shape_cast %1553 : vector<1x8xf32> to vector<1x8x1xf32>
    %1555 = tpu.reciprocal %1554 : vector<1x8x1xf32> -> vector<1x8x1xf32>
    %1556 = vector.broadcast %1555 : vector<1x8x1xf32> to vector<1x8x8xf32>
    %1557 = arith.mulf %1552, %1556 : vector<1x8x8xf32>
    %1558 = arith.truncf %1557 : vector<1x8x8xf32> to vector<1x8x8xbf16>
    "tpu.trace_start"() <{level = 10 : i32, message = "bqk,bkd->bqd"}> : () -> ()
    %cst_807 = arith.constant dense<0.000000e+00> : vector<1x8x8xf32>
    %1559 = tpu.matmul %1558, %1541, %cst_807 {dimension_numbers = #tpu.dot_dimension_numbers<[2], [1], [1], [2], [0, 0, 0, 1, 1, 2], [0], [0]>} : vector<1x8x8xbf16>, vector<1x8x8xbf16>, vector<1x8x8xf32> -> vector<1x8x8xf32>
    "tpu.trace_stop"() : () -> ()
    %1560 = vector.shape_cast %1559 : vector<1x8x8xf32> to vector<8x8xf32>
    %1561 = arith.truncf %1560 : vector<8x8xf32> to vector<8x8xbf16>
    %c15_808 = arith.constant 15 : index
    %c0_809 = arith.constant 0 : index
    %c0_810 = arith.constant 0 : index
    %1562 = vector.load %arg17[%c15_808, %c0_809, %c0_810] : memref<16x8x32xbf16, #tpu.memory_space<vmem>>, vector<1x8x32xbf16>
    %1563 = vector.shape_cast %1562 : vector<1x8x32xbf16> to vector<8x32xbf16>
    %cst_811 = arith.constant dense<0.000000e+00> : vector<8x32xf32>
    %1564 = tpu.matmul %1561, %1563, %cst_811 {dimension_numbers = #tpu.dot_dimension_numbers<[1], [0], [0], [1], [0, 0, 1, 1], [], []>} : vector<8x8xbf16>, vector<8x32xbf16>, vector<8x32xf32> -> vector<8x32xf32>
    %1565 = arith.addf %1514, %1564 : vector<8x32xf32>
    %1566 = vector.broadcast %1123 : vector<1x32xf32> to vector<8x32xf32>
    %1567 = arith.addf %1565, %1566 : vector<8x32xf32>
    %1568 = arith.addf %1358, %1567 : vector<8x32xf32>
    %cst_812 = arith.constant dense<0.000000e+00> : vector<8xf32>
    %1569 = vector.multi_reduction <add>, %1568, %cst_812 [1] : vector<8x32xf32> to vector<8xf32>
    %1570 = vector.shape_cast %1569 : vector<8xf32> to vector<8x1xf32>
    %cst_813 = arith.constant 3.200000e+01 : f32
    %1571 = vector.broadcast %cst_813 : f32 to vector<8x1xf32>
    %1572 = arith.divf %1570, %1571 : vector<8x1xf32>
    %1573 = vector.broadcast %1572 : vector<8x1xf32> to vector<8x32xf32>
    %1574 = arith.subf %1568, %1573 : vector<8x32xf32>
    %1575 = arith.mulf %1574, %1574 : vector<8x32xf32>
    %cst_814 = arith.constant dense<0.000000e+00> : vector<8xf32>
    %1576 = vector.multi_reduction <add>, %1575, %cst_814 [1] : vector<8x32xf32> to vector<8xf32>
    %1577 = vector.shape_cast %1576 : vector<8xf32> to vector<8x1xf32>
    %cst_815 = arith.constant 3.200000e+01 : f32
    %1578 = vector.broadcast %cst_815 : f32 to vector<8x1xf32>
    %1579 = arith.divf %1577, %1578 : vector<8x1xf32>
    %cst_816 = arith.constant 9.99999974E-6 : f32
    %1580 = vector.broadcast %cst_816 : f32 to vector<8x1xf32>
    %1581 = arith.addf %1579, %1580 : vector<8x1xf32>
    %1582 = math.rsqrt %1581 : vector<8x1xf32>
    %1583 = vector.broadcast %1582 : vector<8x1xf32> to vector<8x32xf32>
    %1584 = arith.mulf %1574, %1583 : vector<8x32xf32>
    %1585 = vector.broadcast %1124 : vector<1x32xf32> to vector<8x32xf32>
    %1586 = arith.mulf %1584, %1585 : vector<8x32xf32>
    %1587 = vector.broadcast %1125 : vector<1x32xf32> to vector<8x32xf32>
    %1588 = arith.addf %1586, %1587 : vector<8x32xf32>
    %1589 = arith.truncf %1588 : vector<8x32xf32> to vector<8x32xbf16>
    %c1_817 = arith.constant 1 : index
    %c0_818 = arith.constant 0 : index
    %c0_819 = arith.constant 0 : index
    %1590 = vector.load %arg18[%c1_817, %c0_818, %c0_819] : memref<2x32x32xbf16, #tpu.memory_space<vmem>>, vector<1x32x32xbf16>
    %1591 = vector.shape_cast %1590 : vector<1x32x32xbf16> to vector<32x32xbf16>
    %cst_820 = arith.constant dense<0.000000e+00> : vector<8x32xf32>
    %1592 = tpu.matmul %1589, %1591, %cst_820 {dimension_numbers = #tpu.dot_dimension_numbers<[1], [0], [0], [1], [0, 0, 1, 1], [], []>} : vector<8x32xbf16>, vector<32x32xbf16>, vector<8x32xf32> -> vector<8x32xf32>
    %c1_821 = arith.constant 1 : index
    %c0_822 = arith.constant 0 : index
    %c0_823 = arith.constant 0 : index
    %1593 = vector.load %arg19[%c1_821, %c0_822, %c0_823] : memref<2x1x32xf32, #tpu.memory_space<vmem>>, vector<1x1x32xf32>
    %1594 = vector.shape_cast %1593 : vector<1x1x32xf32> to vector<1x32xf32>
    %1595 = vector.broadcast %1594 : vector<1x32xf32> to vector<8x32xf32>
    %1596 = arith.addf %1592, %1595 : vector<8x32xf32>
    %cst_824 = arith.constant 0.000000e+00 : f32
    %1597 = vector.broadcast %cst_824 : f32 to vector<8x32xf32>
    %1598 = arith.maximumf %1596, %1597 : vector<8x32xf32>
    %1599 = arith.truncf %1598 : vector<8x32xf32> to vector<8x32xbf16>
    %c1_825 = arith.constant 1 : index
    %c0_826 = arith.constant 0 : index
    %c0_827 = arith.constant 0 : index
    %1600 = vector.load %arg20[%c1_825, %c0_826, %c0_827] : memref<2x32x32xbf16, #tpu.memory_space<vmem>>, vector<1x32x32xbf16>
    %1601 = vector.shape_cast %1600 : vector<1x32x32xbf16> to vector<32x32xbf16>
    %cst_828 = arith.constant dense<0.000000e+00> : vector<8x32xf32>
    %1602 = tpu.matmul %1599, %1601, %cst_828 {dimension_numbers = #tpu.dot_dimension_numbers<[1], [0], [0], [1], [0, 0, 1, 1], [], []>} : vector<8x32xbf16>, vector<32x32xbf16>, vector<8x32xf32> -> vector<8x32xf32>
    %1603 = vector.broadcast %1126 : vector<1x32xf32> to vector<8x32xf32>
    %1604 = arith.addf %1602, %1603 : vector<8x32xf32>
    %1605 = arith.addf %1588, %1604 : vector<8x32xf32>
    %cst_829 = arith.constant dense<0.000000e+00> : vector<8xf32>
    %1606 = vector.multi_reduction <add>, %1605, %cst_829 [1] : vector<8x32xf32> to vector<8xf32>
    %1607 = vector.shape_cast %1606 : vector<8xf32> to vector<8x1xf32>
    %cst_830 = arith.constant 3.200000e+01 : f32
    %1608 = vector.broadcast %cst_830 : f32 to vector<8x1xf32>
    %1609 = arith.divf %1607, %1608 : vector<8x1xf32>
    %1610 = vector.broadcast %1609 : vector<8x1xf32> to vector<8x32xf32>
    %1611 = arith.subf %1605, %1610 : vector<8x32xf32>
    %1612 = arith.mulf %1611, %1611 : vector<8x32xf32>
    %cst_831 = arith.constant dense<0.000000e+00> : vector<8xf32>
    %1613 = vector.multi_reduction <add>, %1612, %cst_831 [1] : vector<8x32xf32> to vector<8xf32>
    %1614 = vector.shape_cast %1613 : vector<8xf32> to vector<8x1xf32>
    %cst_832 = arith.constant 3.200000e+01 : f32
    %1615 = vector.broadcast %cst_832 : f32 to vector<8x1xf32>
    %1616 = arith.divf %1614, %1615 : vector<8x1xf32>
    %cst_833 = arith.constant 9.99999974E-6 : f32
    %1617 = vector.broadcast %cst_833 : f32 to vector<8x1xf32>
    %1618 = arith.addf %1616, %1617 : vector<8x1xf32>
    %1619 = math.rsqrt %1618 : vector<8x1xf32>
    %1620 = vector.broadcast %1619 : vector<8x1xf32> to vector<8x32xf32>
    %1621 = arith.mulf %1611, %1620 : vector<8x32xf32>
    %1622 = vector.broadcast %1127 : vector<1x32xf32> to vector<8x32xf32>
    %1623 = arith.mulf %1621, %1622 : vector<8x32xf32>
    %1624 = vector.broadcast %1128 : vector<1x32xf32> to vector<8x32xf32>
    %1625 = arith.addf %1623, %1624 : vector<8x32xf32>
    %cst_834 = arith.constant dense<0.000000e+00> : vector<8xf32>
    %1626 = vector.multi_reduction <add>, %1625, %cst_834 [1] : vector<8x32xf32> to vector<8xf32>
    %1627 = vector.shape_cast %1626 : vector<8xf32> to vector<8x1xf32>
    %cst_835 = arith.constant 3.200000e+01 : f32
    %1628 = vector.broadcast %cst_835 : f32 to vector<8x1xf32>
    %1629 = arith.divf %1627, %1628 : vector<8x1xf32>
    %1630 = vector.broadcast %1629 : vector<8x1xf32> to vector<8x32xf32>
    %1631 = arith.subf %1625, %1630 : vector<8x32xf32>
    %1632 = arith.mulf %1631, %1631 : vector<8x32xf32>
    %cst_836 = arith.constant dense<0.000000e+00> : vector<8xf32>
    %1633 = vector.multi_reduction <add>, %1632, %cst_836 [1] : vector<8x32xf32> to vector<8xf32>
    %1634 = vector.shape_cast %1633 : vector<8xf32> to vector<8x1xf32>
    %cst_837 = arith.constant 3.200000e+01 : f32
    %1635 = vector.broadcast %cst_837 : f32 to vector<8x1xf32>
    %1636 = arith.divf %1634, %1635 : vector<8x1xf32>
    %cst_838 = arith.constant 9.99999974E-6 : f32
    %1637 = vector.broadcast %cst_838 : f32 to vector<8x1xf32>
    %1638 = arith.addf %1636, %1637 : vector<8x1xf32>
    %1639 = math.rsqrt %1638 : vector<8x1xf32>
    %1640 = vector.broadcast %1639 : vector<8x1xf32> to vector<8x32xf32>
    %1641 = arith.mulf %1631, %1640 : vector<8x32xf32>
    %1642 = vector.broadcast %8 : vector<1x32xf32> to vector<8x32xf32>
    %1643 = arith.mulf %1641, %1642 : vector<8x32xf32>
    %1644 = vector.broadcast %9 : vector<1x32xf32> to vector<8x32xf32>
    %1645 = arith.addf %1643, %1644 : vector<8x32xf32>
    %1646 = vector.shape_cast %1645 : vector<8x32xf32> to vector<1x8x32xf32>
    %1647 = vector.shape_cast %10 : vector<1x32xf32> to vector<1x1x32xf32>
    %1648 = vector.broadcast %1647 : vector<1x1x32xf32> to vector<1x8x32xf32>
    %1649 = arith.mulf %1646, %1648 : vector<1x8x32xf32>
    %cst_839 = arith.constant dense<0.000000e+00> : vector<1x8xf32>
    %1650 = vector.multi_reduction <add>, %1649, %cst_839 [2] : vector<1x8x32xf32> to vector<1x8xf32>
    %c2_840 = arith.constant 2 : index
    %1651 = memref.load %arg1[%c2_840] : memref<3xf32, #tpu.memory_space<smem>>
    %1652 = vector.broadcast %1651 : f32 to vector<1x8xf32>
    %1653 = arith.addf %1650, %1652 : vector<1x8xf32>
    %1654 = math.absf %1653 : vector<1x8xf32>
    %cst_841 = arith.constant 0.000000e+00 : f32
    %1655 = vector.broadcast %cst_841 : f32 to vector<1x8xf32>
    %1656 = arith.subf %1655, %1654 : vector<1x8xf32>
    %1657 = math.exp %1656 : vector<1x8xf32>
    %cst_842 = arith.constant 0.000000e+00 : f32
    %1658 = vector.broadcast %cst_842 : f32 to vector<1x8xf32>
    %1659 = arith.cmpf oge, %1653, %1658 : vector<1x8xf32>
    %cst_843 = arith.constant 1.000000e+00 : f32
    %1660 = vector.broadcast %cst_843 : f32 to vector<1x8xf32>
    %1661 = arith.addf %1660, %1657 : vector<1x8xf32>
    %cst_844 = arith.constant 1.000000e+00 : f32
    %1662 = vector.broadcast %cst_844 : f32 to vector<1x8xf32>
    %1663 = arith.divf %1662, %1661 : vector<1x8xf32>
    %cst_845 = arith.constant 1.000000e+00 : f32
    %1664 = vector.broadcast %cst_845 : f32 to vector<1x8xf32>
    %1665 = arith.addf %1664, %1657 : vector<1x8xf32>
    %1666 = arith.divf %1657, %1665 : vector<1x8xf32>
    %1667 = arith.select %1659, %1663, %1666 : vector<1x8xi1>, vector<1x8xf32>
    %c0_846 = arith.constant 0 : index
    %c0_847 = arith.constant 0 : index
    %c0_848 = arith.constant 0 : index
    %1668 = vector.load %arg22[%c0_846, %c0_847, %c0_848] : memref<1x1x8xf32, #tpu.memory_space<vmem>>, vector<1x1x8xf32>
    %1669 = vector.shape_cast %1668 : vector<1x1x8xf32> to vector<1x8xf32>
    %1670 = vector.shape_cast %1667 : vector<1x8xf32> to vector<1x1x8xf32>
    tpu.vector_store %arg22[%c0_846, %c0_847, %c0_848], %1670 {strides = array<i32>} : memref<1x1x8xf32, #tpu.memory_space<vmem>>, vector<1x1x8xf32>,
    return
  }
  func.func @transform_0(%arg0: i32) -> i32 {
    %c0_i32 = arith.constant 0 : i32
    %c0_i32_0 = arith.constant 0 : i32
    return %c0_i32 : i32
  }
  func.func @transform_1(%arg0: i32) -> (i32, i32, i32) {
    %c0_i32 = arith.constant 0 : i32
    %c0_i32_0 = arith.constant 0 : i32
    %c0_i32_1 = arith.constant 0 : i32
    return %arg0, %c0_i32, %c0_i32_0 : i32, i32, i32
  }
  func.func @transform_2(%arg0: i32) -> (i32, i32, i32) {
    %c0_i32 = arith.constant 0 : i32
    %c0_i32_0 = arith.constant 0 : i32
    %c0_i32_1 = arith.constant 0 : i32
    return %arg0, %c0_i32, %c0_i32_0 : i32, i32, i32
  }
  func.func @transform_3(%arg0: i32) -> (i32, i32) {
    %c0_i32 = arith.constant 0 : i32
    %c0_i32_0 = arith.constant 0 : i32
    %c0_i32_1 = arith.constant 0 : i32
    return %c0_i32, %c0_i32_0 : i32, i32
  }
  func.func @transform_4(%arg0: i32) -> (i32, i32) {
    %c0_i32 = arith.constant 0 : i32
    %c0_i32_0 = arith.constant 0 : i32
    %c0_i32_1 = arith.constant 0 : i32
    return %c0_i32, %c0_i32_0 : i32, i32
  }
  func.func @transform_5(%arg0: i32) -> (i32, i32) {
    %c0_i32 = arith.constant 0 : i32
    %c0_i32_0 = arith.constant 0 : i32
    %c0_i32_1 = arith.constant 0 : i32
    return %c0_i32, %c0_i32_0 : i32, i32
  }
  func.func @transform_6(%arg0: i32) -> (i32, i32) {
    %c0_i32 = arith.constant 0 : i32
    %c0_i32_0 = arith.constant 0 : i32
    %c0_i32_1 = arith.constant 0 : i32
    return %c0_i32, %c0_i32_0 : i32, i32
  }
  func.func @transform_7(%arg0: i32) -> (i32, i32, i32) {
    %c0_i32 = arith.constant 0 : i32
    %c0_i32_0 = arith.constant 0 : i32
    %c0_i32_1 = arith.constant 0 : i32
    %c0_i32_2 = arith.constant 0 : i32
    return %c0_i32, %c0_i32_0, %c0_i32_1 : i32, i32, i32
  }
  func.func @transform_8(%arg0: i32) -> (i32, i32, i32) {
    %c0_i32 = arith.constant 0 : i32
    %c0_i32_0 = arith.constant 0 : i32
    %c0_i32_1 = arith.constant 0 : i32
    %c0_i32_2 = arith.constant 0 : i32
    return %c0_i32, %c0_i32_0, %c0_i32_1 : i32, i32, i32
  }
  func.func @transform_9(%arg0: i32) -> (i32, i32, i32) {
    %c0_i32 = arith.constant 0 : i32
    %c0_i32_0 = arith.constant 0 : i32
    %c0_i32_1 = arith.constant 0 : i32
    %c0_i32_2 = arith.constant 0 : i32
    return %c0_i32, %c0_i32_0, %c0_i32_1 : i32, i32, i32
  }
  func.func @transform_10(%arg0: i32) -> (i32, i32, i32) {
    %c0_i32 = arith.constant 0 : i32
    %c0_i32_0 = arith.constant 0 : i32
    %c0_i32_1 = arith.constant 0 : i32
    %c0_i32_2 = arith.constant 0 : i32
    return %c0_i32, %c0_i32_0, %c0_i32_1 : i32, i32, i32
  }
  func.func @transform_11(%arg0: i32) -> (i32, i32, i32) {
    %c0_i32 = arith.constant 0 : i32
    %c0_i32_0 = arith.constant 0 : i32
    %c0_i32_1 = arith.constant 0 : i32
    %c0_i32_2 = arith.constant 0 : i32
    return %c0_i32, %c0_i32_0, %c0_i32_1 : i32, i32, i32
  }
  func.func @transform_12(%arg0: i32) -> (i32, i32, i32) {
    %c0_i32 = arith.constant 0 : i32
    %c0_i32_0 = arith.constant 0 : i32
    %c0_i32_1 = arith.constant 0 : i32
    %c0_i32_2 = arith.constant 0 : i32
    return %c0_i32, %c0_i32_0, %c0_i32_1 : i32, i32, i32
  }
  func.func @transform_13(%arg0: i32) -> (i32, i32, i32) {
    %c0_i32 = arith.constant 0 : i32
    %c0_i32_0 = arith.constant 0 : i32
    %c0_i32_1 = arith.constant 0 : i32
    %c0_i32_2 = arith.constant 0 : i32
    return %c0_i32, %c0_i32_0, %c0_i32_1 : i32, i32, i32
  }
  func.func @transform_14(%arg0: i32) -> (i32, i32, i32) {
    %c0_i32 = arith.constant 0 : i32
    %c0_i32_0 = arith.constant 0 : i32
    %c0_i32_1 = arith.constant 0 : i32
    %c0_i32_2 = arith.constant 0 : i32
    return %c0_i32, %c0_i32_0, %c0_i32_1 : i32, i32, i32
  }
  func.func @transform_15(%arg0: i32) -> (i32, i32, i32) {
    %c0_i32 = arith.constant 0 : i32
    %c0_i32_0 = arith.constant 0 : i32
    %c0_i32_1 = arith.constant 0 : i32
    %c0_i32_2 = arith.constant 0 : i32
    return %c0_i32, %c0_i32_0, %c0_i32_1 : i32, i32, i32
  }
  func.func @transform_16(%arg0: i32) -> (i32, i32, i32) {
    %c0_i32 = arith.constant 0 : i32
    %c0_i32_0 = arith.constant 0 : i32
    %c0_i32_1 = arith.constant 0 : i32
    %c0_i32_2 = arith.constant 0 : i32
    return %c0_i32, %c0_i32_0, %c0_i32_1 : i32, i32, i32
  }
  func.func @transform_17(%arg0: i32) -> (i32, i32, i32) {
    %c0_i32 = arith.constant 0 : i32
    %c0_i32_0 = arith.constant 0 : i32
    %c0_i32_1 = arith.constant 0 : i32
    %c0_i32_2 = arith.constant 0 : i32
    return %c0_i32, %c0_i32_0, %c0_i32_1 : i32, i32, i32
  }
  func.func @transform_18(%arg0: i32) -> (i32, i32, i32) {
    %c0_i32 = arith.constant 0 : i32
    %c0_i32_0 = arith.constant 0 : i32
    %c0_i32_1 = arith.constant 0 : i32
    %c0_i32_2 = arith.constant 0 : i32
    return %c0_i32, %c0_i32_0, %c0_i32_1 : i32, i32, i32
  }
  func.func @transform_19(%arg0: i32) -> (i32, i32, i32) {
    %c0_i32 = arith.constant 0 : i32
    %c0_i32_0 = arith.constant 0 : i32
    %c0_i32_1 = arith.constant 0 : i32
    %c0_i32_2 = arith.constant 0 : i32
    return %c0_i32, %c0_i32_0, %c0_i32_1 : i32, i32, i32
  }
  func.func @transform_20(%arg0: i32) -> (i32, i32, i32) {
    %c0_i32 = arith.constant 0 : i32
    %c0_i32_0 = arith.constant 0 : i32
    %c0_i32_1 = arith.constant 0 : i32
    %c0_i32_2 = arith.constant 0 : i32
    return %c0_i32, %c0_i32_0, %c0_i32_1 : i32, i32, i32
  }
  func.func @transform_21(%arg0: i32) -> (i32, i32, i32) {
    %c0_i32 = arith.constant 0 : i32
    %c0_i32_0 = arith.constant 0 : i32
    %c0_i32_1 = arith.constant 0 : i32
    return %arg0, %c0_i32, %c0_i32_0 : i32, i32, i32
  }
}

</mosaic_0001>

<bundles_post_ra>
// kernel: saint_forward.1
= control target key start
LH: loop header
LB: loop body
LE: loop exit
PB: predicated region body
PF: predicated region fallthrough
CT: control target
= control target key end

     0   :  { %s15278_s0 = inlined_call_operand.vmem [shape: f32[3], index: 0, kind: input, shape index: {}]   ;;  %s15279_s1 = inlined_call_operand.vmem [shape: f32[2,8,40], index: 1, kind: input, shape index: {}]   ;;  %s15280_s2 = inlined_call_operand.vmem [shape: f32[2,8,50], index: 2, kind: input, shape index: {}]   ;;  %s15281_s3 = inlined_call_operand.vmem [shape: f32[8,32], index: 3, kind: input, shape index: {}]   ;;  %s15282_s4 = inlined_call_operand.vmem [shape: bf16[40,32], index: 4, kind: input, shape index: {}]   ;;  %s15283_s5 = inlined_call_operand.vmem [shape: bf16[50,32], index: 5, kind: input, shape index: {}]   ;;  %s15284_s6 = inlined_call_operand.vmem [shape: f32[8,32], index: 6, kind: input, shape index: {}]   ;;  %s15285_s7 = inlined_call_operand.vmem [shape: bf16[24,32,8], index: 7, kind: input, shape index: {}]   ;;  %s15286_s8 = inlined_call_operand.vmem [shape: f32[24,1,8], index: 8, kind: input, shape index: {}]   ;;  %s15287_s9 = inlined_call_operand.vmem [shape: bf16[8,8,32], index: 9, kind: input, shape index: {}]   ;;  %s15288_s10 = inlined_call_operand.vmem [shape: bf16[2,32,32], index: 10, kind: input, shape index: {}]   ;;  %s15289_s11 = inlined_call_operand.vmem [shape: f32[2,1,32], index: 11, kind: input, shape index: {}]   ;;  %s15290_s12 = inlined_call_operand.vmem [shape: bf16[2,32,32], index: 12, kind: input, shape index: {}]   ;;  %s15291_s13 = inlined_call_operand.vmem [shape: f32[2,6,32], index: 13, kind: input, shape index: {}]   ;;  %s15292_s14 = inlined_call_operand.vmem [shape: bf16[48,32,8], index: 14, kind: input, shape index: {}]   ;;  %s15293_s15 = inlined_call_operand.vmem [shape: f32[48,1,8], index: 15, kind: input, shape index: {}]   ;;  %s15294_s16 = inlined_call_operand.vmem [shape: bf16[16,8,32], index: 16, kind: input, shape index: {}]   ;;  %s15295_s17 = inlined_call_operand.vmem [shape: bf16[2,32,32], index: 17, kind: input, shape index: {}]   ;;  %s15296_s18 = inlined_call_operand.vmem [shape: f32[2,1,32], index: 18, kind: input, shape index: {}]   ;;  %s15297_s19 = inlined_call_operand.vmem [shape: bf16[2,32,32], index: 19, kind: input, shape index: {}]   ;;  %s15298_s20 = inlined_call_operand.vmem [shape: f32[2,9,32], index: 20, kind: input, shape index: {}]   ;;  %s15299_s21 = inlined_call_operand.hbm [shape: f32[2,1,8], index: 21, kind: output, shape index: {}]  }
   0x1   :  { %15312 = sst [smem:[#allocation15_spill]] %s15278_s0 }
   0x2   :  { %15313 = sst [smem:[#allocation16_spill]] %s15279_s1 }
   0x3   :  { %15314 = sst [smem:[#allocation17_spill]] %s15280_s2 }
   0x4   :  { %15315 = sst [smem:[#allocation18_spill]] %s15281_s3 }
   0x5   :  { %15316 = sst [smem:[#allocation19_spill]] %s15282_s4 }
   0x6   :  { %15317 = sst [smem:[#allocation20_spill]] %s15283_s5 }
   0x7   :  { %15318 = sst [smem:[#allocation21_spill]] %s15299_s21 }
   0x8   :  { %26 = vsyncpa [#allocation4], 0 }
   0x9   :  { %27 = vsyncpa [#allocation3], 0 }
   0xa   :  { %29 = vsyncpa [#allocation3 + $0x1], 0  ;;  %s13176_s2 = smov 0   ;;  %s13178_s25 = smov 0  }
   0xb   :  { %s13180_s26 = smov 0   ;;  %s13182_s27 = smov 0  }
   0xc LB: > { %15319 = sst [smem:[#allocation8_spill]] %s13048_s2  ;;  %s13197_s3 = sadd.s32 4294967295, %s13060_s27   ;;  %s13060_s27 = sphi %s13182_s27, %s15343_s27   ;;  %s13056_s26 = sphi %s13180_s26, %s15345_s26   ;;  %s13052_s25 = sphi %s13178_s25, %s15347_s25   ;;  %s13048_s2 = sphi %s13176_s2, %s15346_s2  }
   0xd   : > { %15320 = sst [smem:[#allocation9_spill]] %s13056_s26  ;;  %s10342_s28 = sadd.s32 4294967294, %s13060_s27  }
   0xe   : > { %15321 = sst [smem:[#allocation10_spill]] %s13060_s27  ;;  %s13201_s29 = sadd.s32 1, %s13060_s27  }
   0xf   : > { %15322 = sst [smem:[#allocation11_spill]] %s13201_s29  ;;  %s493_s0 = sadd.s32 1, %s13056_s26 }
  0x10   : > { %s490_s4 = ssub.s32 %s13060_s27, %s13201_s29  ;;  %p503_p0 = scmp.ne.s32.totalorder %s13056_s26, %s13052_s25 }
  0x11   : > { %p491_p1 = scmp.eq.s32.totalorder %s490_s4, 0  ;;  %p504_p2 = scmp.eq.s32.totalorder %s13197_s3, 1 }
  0x12   : > { %p509_p3 = scmp.ne.s32.totalorder %s13052_s25, %s13048_s2  ;;  %p510_p4 = scmp.eq.s32.totalorder %s10342_s28, 1 }
  0x13   : > { %s13212_s30 = scalar_select %p491_p1, %s13056_s26, %s493_s0  }
  0x14   : > { %p13214_p5 = por %p504_p2, %p503_p0  ;;  %p13218_p6 = por %p510_p4, %p509_p3 }
  0x15   : > { %15323 = sst [smem:[#allocation12_spill]] %s13212_s30  ;;  %p10343_p7 = scmp.ge.s32.totalorder %s13060_s27, 1 }
  0x16   : > { %s15324_s5 = scalar_select %p13214_p5, 1, 0 }
  0x17   : > { %s15326_s22 = scalar_select %p13218_p6, 1, 0 }
  0x18   : > { %15325 = sst [smem:[#allocation13_spill]] %s15324_s5  ;;  %p517_p8 = scmp.lt.s32.totalorder %s13060_s27, 3 }
  0x19   : > { %15327 = sst [smem:[#allocation14_spill]] %s15326_s22  ;;  %p12648_p9 = scmp.eq.s32.totalorder %s13197_s3, 0 }
  0x1a   : > { %p13225_p10 = pnand %p10343_p7, %p517_p8  ;;  %s15329_s28 = sld [smem:[#allocation15_spill]] }
  0x1c   : > { %p12640_p11 = pneg %p13225_p10 }
  0x1e   : > { %p12641_p12 = pnand %p12648_p9, %p12640_p11 }
  0x20   : > { %s530_s0 = sshll.u32 %s15329_s28, 4  ;;  %p12981_p0 = pneg %p12641_p12  ;;  %s531_s0 = int_to_ptr.vmem [resolvable:$true] %s530_s0 }
  0x21   : > { %s12979_s4 = scalar_lea.vmem %s531_s0, 16  ;;  %p12987_p3 = scmp.lt.s32.totalorder %s531_s0, %s531_s0 }
  0x22   : > { %p12980_p13 = scmp.ne.s32.totalorder %s531_s0, %s12979_s4  ;;  %p12988_p4 = scmp.lt.s32.totalorder %s12979_s4, %s12979_s4 }
  0x24   : > { %p12982_p1 = pnand %p12981_p0, %p12980_p13  ;;  %p12989_p7 = por %p12988_p4, %p12987_p3 }
  0x26   : > { %p12983_p2 = pneg %p12982_p1 }
  0x28   : > { %p12990_p8 = pnand %p12989_p7, %p12983_p2 }
  0x2a   : > { %12993 = shalt.err (!%p12990_p8)
}
  0x2b   : > { %s13062_s30 = smov [#allocation2]   ;;  %611 = sbr.rel (%p13225_p10) target bundleno = 28519 (0x6f67), region = 104 }
  0x2c   : > { %12643 = dma.vmem_to_smem (!%p12641_p12), %s531_s0, 16, %s13062_s30, [#allocation4]  }
  0x32   : > { %13039 = dma.done.wait (%p12648_p9), [#allocation4], 16  }
  0x33   : > { %13041 = vsyncadd (%p12648_p9), [#allocation4], 4294967280 }
  0x34   : > { %617 = sfence }
  0x35   : > { %s15330_s28 = sld [smem:[#allocation19_spill]]  ;;  %v13063_v1 = vmov 0.0   ;;  %p674_p9 = scmp.lt.s32.totalorder %s13197_s3, 1  ;;  %vm13064_vm0 = vmmov 0   ;;  %vm720_vm1 = vcmask 1043456   ;;  %vm806_vm2 = vcmask 1040384  }
  0x36   : > { %11540 = vmatprep.subr.bf16.mxu0 %v13063_v1  ;;  %11550 = vmatprep.subr.bf16.mxu1 %v13063_v1  ;;  %s15331_s26 = sld [smem:[#allocation20_spill]]  ;;  %s15333_s24 = sld [smem:[#allocation16_spill]]  ;;  %vm716_vm3 = vcmask 326656   ;;  %vm802_vm4 = vcmask 408576   ;;  %v12693_v14 = vld [vmem:[%s15285_s7] sm:$0xff]   ;;  %v12695_v16 = vld [vmem:[%s15285_s7 + $0x8] sm:$0xff]   ;;  %v683_v18 = vlaneseq }
  0x37   : > { %11546 = vmatprep.mubr.msk.bf16.mxu0 %vm13064_vm0, %v13063_v1  ;;  %s675_s30 = scalar_select %p674_p9, %s13197_s3, 1  ;;  %11558 = vmatprep.mubr.msk.bf16.mxu1 %vm13064_vm0, %v13063_v1  ;;  %v12694_v15 = vld [vmem:[%s15285_s7 + $0x40] sm:$0xff]   ;;  %v12696_v17 = vld [vmem:[%s15285_s7 + $0x48] sm:$0xff]   ;;  %vm879_vm5 = vcmask 261120   ;;  %vm1056_vm6 = vcmask 64512   ;;  %vm10248_vm9 = vcmask 57344  }
  0x38   : > { %s15334_s21 = sld [smem:[#allocation17_spill]]  ;;  %s764_s1 = sld [smem:[#allocation2]]  ;;  %v13306_v19 = vshrl.u32 %v683_v18, 7  ;;  %v688_v21 = vld [vmem:[%s15284_s6] sm:$0xff]  ;;  %v12698_v39 = vld [vmem:[%s15285_s7 + $0x88] sm:$0xff]  }
  0x39   : > { %s10348_s4 = sshll.u32 %s675_s30, 3  ;;  %s10359_s23 = sld [smem:[#allocation2 + $0x1]]  ;;  %v12697_v34 = vld [vmem:[%s15285_s7 + $0x80] sm:$0xff]   ;;  %v10378_v58 = vld [vmem:[%s15286_s8 + $0x8] ss:$0 sm:$0xff] }
  0x3a   : > { %v13309_v20 = vsub.s32 0, %v13306_v19  ;;  %s15335_s2 = sld [smem:[#allocation18_spill]]  ;;  %v13319_v27 = vsub.s32 1, %v13306_v19  ;;  %v10369_v45 = vld [vmem:[%s15286_s8 + $0x4] ss:$0 sm:$0xff]  ;;  %s11143_s0 = sld [smem:[#allocation2 + $0x2]] }
  0x3b   : > { %v12686_v0 = vld [vmem:[%s15330_s28] sm:$0xff]   ;;  %v12687_v2 = vld [vmem:[%s15330_s28 + $0x8] sm:$0xff]   ;;  %v12688_v3 = vld [vmem:[%s15330_s28 + $0x10] ss:$0 sps:$4 sm:$0xff]  }
  0x3c   : > { %11541 = vmatpush3.bf16.msra.mxu0 %v12686_v0  ;;  %s15332_s29 = smov %s15331_s26  ;;  %v12689_v4 = vld [vmem:[%s15331_s26] sm:$0xff]   ;;  %v722_v6 = vsel %vm720_vm1, %v12688_v3, 0  ;;  %s677_s28 = scalar_lea.vmem %s15333_s24, %s10348_s4  ;;  %v700_v24 = vrot.slane %v688_v21, %v13309_v20  ;;  %v780_v35 = vrot.slane %v688_v21, %v13319_v27  ;;  %v12699_v0 = vld [vmem:[%s15285_s7 + $0x10] sm:$0xff]  }
  0x3d   : > { %11542 = vmatprep.subr.bf16.mxu0 %v13063_v1  ;;  %11551 = vmatpush3.bf16.msra.mxu1 %v12689_v4  ;;  %v12690_v5 = vld [vmem:[%s15332_s29 + $0x8] sm:$0xff]   ;;  %v12692_v7 = vld [vmem:[%s15332_s29 + $0x18] ss:$0 sps:$4 sm:$0x11]   ;;  %v690_v8 = vld [vmem:[%s677_s28] sm:$0xff]  ;;  %s15339_s28 = sld [smem:[#allocation21_spill]] }
  0x3e   : > { %11552 = vmatprep.subr.bf16.mxu1 %v13063_v1  ;;  %v12691_v9 = vld [vmem:[%s15332_s29 + $0x10] sm:$0xff]   ;;  %s681_s5 = scalar_lea.vmem %s15334_s21, %s10348_s4  ;;  %v691_v10 = vpack.c.bf16 %v690_v8, %v690_v8  ;;  %v808_v11 = vsel %vm806_vm2, %v12692_v7, 0  ;;  %v765_v23 = vstv %s764_s1  ;;  %v10360_v56 = vld [vmem:[%s15286_s8] ss:$0 sm:$0xff]  ;;  %v12702_v8 = vld [vmem:[%s15285_s7 + $0x98] sm:$0xff]   ;;  %s11144_s21 = sshll.u32 %s13197_s3, 4 }
  0x3f   : > { %v768_v12 = vld [vmem:[%s681_s5] sm:$0xff]  ;;  %v851_v33 = vstv %s10359_s23  ;;  %v12701_v7 = vld [vmem:[%s15285_s7 + $0x90] sm:$0xff]   ;;  %s672_s23 = sand.u32 1, %s13052_s25   ;;  %s13065_s3 = smov [#allocation5]  }
  0x40   : > { %11543 = vmatpush3.bf16.msra.mxu0 %v12687_v2  ;;  %v769_v13 = vpack.c.bf16 %v768_v12, %v768_v12  ;;  %v689_v22 = vld [vmem:[%s15335_s2] sm:$0xff]  ;;  %s673_s2 = scalar_lea.vmem [#allocation5], %s672_s23  ;;  %s10251_s26 = scalar_lea.sflag [#allocation3], %s672_s23 }
  0x41   : > { %11544 = vmatprep.subr.bf16.mxu0 %v13063_v1  ;;  %11553 = vmatpush3.bf16.msra.mxu1 %v12690_v5  ;;  %v766_v25 = vmul.f32 %v765_v23, %v689_v22  ;;  %v852_v37 = vmul.f32 %v851_v33, %v689_v22  ;;  %s10263_s27 = sshll.u32 %s673_s2, 4  ;;  %s12998_s24 = sshll.u32 %s13065_s3, 4  ;;  %s15238_s27 = int_to_ptr.vmem [resolvable:$true] %s10263_s27  ;;  %s12999_s24 = int_to_ptr.vmem [resolvable:$false] %s12998_s24 }
  0x42   : > { %11554 = vmatprep.subr.bf16.mxu1 %v13063_v1  ;;  %s12994_s1 = scalar_lea.vmem %s15238_s27, 16  ;;  %p13001_p13 = scmp.lt.s32.totalorder %s15238_s27, %s12999_s24 }
  0x43   : > { %s15236_s4 = scalar_lea.hbm %s15339_s28, %s11144_s21  ;;  %p12995_p10 = scmp.ne.s32.totalorder %s15238_s27, %s12994_s1 }
  0x44   : > { %11545 = vmatpush3.bf16.msra.mxu0 %v722_v6  ;;  %v12700_v6 = vld [vmem:[%s15285_s7 + $0x18] sm:$0xff]  }
  0x45   : > { %11562 = vmatprep.subr.bf16.mxu0 %v13063_v1  ;;  %11555 = vmatpush3.bf16.msra.mxu1 %v12691_v9  ;;  %v13391_v9 = vand.u32 127, %v683_v18  ;;  %p12996_p11 = pnand %p12995_p10, %p13214_p5 }
  0x46   : > { %11556 = vmatprep.subr.bf16.mxu1 %v13063_v1 }
  0x47   : > { %11547 = vmatmul.mubr.msk.bf16.vlgmr.msra.gmra.mrb[0].mxu0 %vm716_vm3, %v691_v10  ;;  %vm13395_vm7 = vcmp.gt.s32.totalorder %v13391_v9, %v13306_v19  ;;  %p12997_p12 = pneg %p12996_p11 }
  0x48   : > { %11566 = vmatprep.mubr.msk.bf16.mxu0 %vm13064_vm0, %v13063_v1  ;;  %11563 = vmatpush3.bf16.msra.mxu0 %v12693_v14 }
  0x49   : > { %11557 = vmatpush3.bf16.msra.mxu1 %v808_v11  ;;  %11564 = vmatprep.subr.bf16.mxu0 %v13063_v1 }
  0x4a   : > { %11570 = vmatprep.subr.bf16.mxu1 %v13063_v1 }
  0x4c   : > { %11559 = vmatmul.mubr.msk.bf16.vlgmr.msra.gmra.mrb[0].mxu1 %vm802_vm4, %v769_v13  ;;  %11565 = vmatpush3.bf16.msra.mxu0 %v12695_v16 }
  0x4d   : > { %11574 = vmatprep.mubr.msk.bf16.mxu1 %vm13064_vm0, %v13063_v1  ;;  %11571 = vmatpush3.bf16.msra.mxu1 %v12694_v15 }
  0x4e   : > { %11572 = vmatprep.subr.bf16.mxu1 %v13063_v1  ;;  %11578 = vmatprep.subr.bf16.mxu0 %v13063_v1 }
  0x51   : > { %11573 = vmatpush3.bf16.msra.mxu1 %v12696_v17 }
  0x52   : > { %11586 = vmatprep.subr.bf16.mxu1 %v13063_v1 }
 0x11a   : > { %v758_v26 = vpop.f32.mrb[0].mxu0 }
 0x11b   : > { %v759_v28 = vadd.f32 %v758_v26, %v700_v24  ;;  %v11548_v29 = vpop.f32.mrb[1].mxu0  ;;  %v10407_v24 = vld [vmem:[%s15286_s8 + $0x9] ss:$0 sm:$0xff] }
 0x11c   : > { %v761_v30 = vpop.f32.mrb[2].mxu0 }
 0x11d   : > { %v13321_v31 = vadd.f32 %v766_v25, %v759_v28  ;;  %v11549_v32 = vpop.f32.mrb[3].mxu0 }
 0x11f   : > { %v13329_v36 = vpack.c.bf16 %v13321_v31, %v13321_v31  ;;  %v844_v38 = vpop.f32.mrb[0].mxu1 }
 0x120   : > { %v845_v40 = vadd.f32 %v844_v38, %v780_v35  ;;  %v11560_v41 = vpop.f32.mrb[1].mxu1 }
 0x121   : > { %11567 = vmatmul.mubr.msk.bf16.vlgmr.msra.gmra.mrb[4].mxu0 %vm879_vm5, %v13329_v36  ;;  %11575 = vmatmul.mubr.msk.bf16.vlgmr.msra.gmra.mrb[4].mxu1 %vm879_vm5, %v13329_v36  ;;  %v847_v42 = vpop.f32.mrb[2].mxu1 }
 0x122   : > { %11579 = vmatpush3.bf16.msra.mxu0 %v12697_v34  ;;  %11582 = vmatprep.mubr.msk.bf16.mxu0 %vm13064_vm0, %v13063_v1  ;;  %v13343_v43 = vadd.f32 %v852_v37, %v845_v40  ;;  %v11561_v44 = vpop.f32.mrb[3].mxu1 }
 0x123   : > { %11580 = vmatprep.subr.bf16.mxu0 %v13063_v1  ;;  %11588 = vmatprep.mubr.msk.bf16.mxu1 %vm13064_vm0, %v13063_v1  ;;  %v12703_v44 = vld [vmem:[%s15285_s7 + $0x50] sm:$0xff]  }
 0x126   : > { %11581 = vmatpush3.bf16.msra.mxu0 %v12698_v39 }
 0x127   : > { %11592 = vmatprep.subr.bf16.mxu0 %v13063_v1 }
 0x129   : > { %11583 = vmatmul.mubr.msk.bf16.vlgmr.msra.gmra.mrb[8].mxu0 %vm879_vm5, %v13329_v36 }
 0x12a   : > { %11594 = vmatprep.mubr.msk.bf16.mxu0 %vm13064_vm0, %v13063_v1 }
 0x1f4   : > { %v917_v46 = vpop.f32.mrb[4].mxu0  ;;  %v982_v47 = vpop.f32.mrb[4].mxu1 }
 0x1f5   : > { %v983_v48 = vadd.f32 %v10369_v45, %v982_v47  ;;  %v11568_v49 = vpop.f32.mrb[5].mxu0  ;;  %v11576_v50 = vpop.f32.mrb[5].mxu1  ;;  %v918_v59 = vadd.f32 %v10360_v56, %v917_v46  ;;  %v12704_v46 = vld [vmem:[%s15285_s7 + $0x58] sm:$0xff]  }
 0x1f6   : > { %v920_v51 = vpop.f32.mrb[6].mxu0  ;;  %v985_v52 = vpop.f32.mrb[6].mxu1 }
 0x1f7   : > { %v1054_v53 = vpack.c.bf16 %v983_v48, %v983_v48  ;;  %v11569_v54 = vpop.f32.mrb[7].mxu0  ;;  %v11577_v55 = vpop.f32.mrb[7].mxu1  ;;  %v1053_v2 = vpack.c.bf16 %v918_v59, %v918_v59  ;;  %v10398_v51 = vld [vmem:[%s15286_s8 + $0x5] ss:$0 sm:$0xff] }
 0x1f9   : > { %v1061_v57 = vsel %vm1056_vm6, %v1054_v53, 0 }
 0x1fa   : > { %11587 = vmatpush3.bf16.xpose.msra.mxu1 %v1061_v57 }
 0x1fb   : > { %11598 = vmatprep.subr.bf16.mxu1 %v13063_v1 }
 0x1fc   : > { %v1047_v60 = vpop.f32.mrb[8].mxu0 }
 0x1fd   : > { %v1048_v61 = vadd.f32 %v10378_v58, %v1047_v60  ;;  %v11584_v62 = vpop.f32.mrb[9].mxu0  ;;  %v10389_v58 = vld [vmem:[%s15286_s8 + $0x1] ss:$0 sm:$0xff] }
 0x1fe   : > { %v1050_v63 = vpop.f32.mrb[10].mxu0 }
 0x1ff   : > { %v1055_v3 = vpack.c.bf16 %v1048_v61, %v1048_v61  ;;  %v11585_v4 = vpop.f32.mrb[11].mxu0 }
 0x201   : > { %11589 = vmatmul.mubr.msk.bf16.vlgmr.msra.gmra.mrb[8].mxu1 %vm1056_vm6, %v1053_v2  ;;  %v1121_v5 = vsel %vm720_vm1, %v1055_v3, 0 }
 0x202   : > { %11593 = vmatpush3.bf16.msra.mxu0 %v1121_v5  ;;  %11599 = vmatpush3.bf16.msra.mxu1 %v12699_v0 }
 0x203   : > { %11600 = vmatprep.subr.bf16.mxu1 %v13063_v1  ;;  %11602 = vmatprep.mubr.msk.bf16.mxu1 %vm13064_vm0, %v13063_v1 }
 0x204   : > { %11606 = vmatprep.subr.bf16.mxu0 %v13063_v1 }
 0x206   : > { %11601 = vmatpush3.bf16.msra.mxu1 %v12700_v6 }
 0x207   : > { %11614 = vmatprep.subr.bf16.mxu1 %v13063_v1 }
 0x209   : > { %11603 = vmatmul.mubr.msk.bf16.vlgmr.msra.gmra.mrb[12].mxu1 %vm879_vm5, %v13329_v36 }
 0x20a   : > { %11615 = vmatpush3.bf16.msra.mxu1 %v12701_v7  ;;  %11618 = vmatprep.mubr.msk.bf16.mxu1 %vm13064_vm0, %v13063_v1 }
 0x20b   : > { %11616 = vmatprep.subr.bf16.mxu1 %v13063_v1 }
 0x20e   : > { %11617 = vmatpush3.bf16.msra.mxu1 %v12702_v8 }
 0x20f   : > { %11628 = vmatprep.subr.bf16.mxu1 %v13063_v1 }
 0x211   : > { %11619 = vmatmul.mubr.msk.bf16.vlgmr.msra.gmra.mrb[16].mxu1 %vm879_vm5, %v13329_v36 }
 0x212   : > { %11630 = vmatprep.mubr.msk.bf16.mxu1 %vm13064_vm0, %v13063_v1 }
 0x2d4   : > { %v1097_v11 = vpop.f32.mrb[8].mxu1 }
 0x2d5   : > { %v11590_v12 = vpop.f32.mrb[9].mxu1  ;;  %v1103_v13 = vmul.f32 0.35355338, %v1097_v11 }
 0x2d6   : > { %v1100_v14 = vpop.f32.mrb[10].mxu1 }
 0x2d7   : > { %v11591_v15 = vpop.f32.mrb[11].mxu1  ;;  %v1104_v16 = vsel %vm13395_vm7, -1e+30, %v1103_v13  ;;  %v10413_v13 = vld [vmem:[%s15287_s9 + $0x4] sm:$0xf] }
 0x2d8   : > { %v1105_v17 = vsel %vm1056_vm6, %v1104_v16, -inf  ;;  %v1476_v14 = vsel %vm720_vm1, %v10413_v13, 0 }
 0x2d9   : > { %1106 = vmax.xlane.f32.xlu0 %v1105_v17  ;;  %v1164_v17 = vld [vmem:[%s15287_s9] sm:$0xf] }
 0x2dc   : > { %v1224_v21 = vpop.f32.mrb[12].mxu1 }
 0x2dd   : > { %v11604_v18 = vpop.f32.mrb[13].mxu1  ;;  %v1225_v60 = vadd.f32 %v10389_v58, %v1224_v21 }
 0x2de   : > { %v1227_v22 = vpop.f32.mrb[14].mxu1 }
 0x2df   : > { %v11605_v23 = vpop.f32.mrb[15].mxu1  ;;  %v1360_v61 = vpack.c.bf16 %v1225_v60, %v1225_v60  ;;  %v1522_v22 = vsel %vm720_vm1, %v1164_v17, 0 }
 0x2e0   : > { %v12705_v23 = vld [vmem:[%s15285_s7 + $0x60] sm:$0xff]  }
 0x2e4   : > { %v1354_v25 = vpop.f32.mrb[16].mxu1 }
 0x2e5   : > { %v1355_v26 = vadd.f32 %v10407_v24, %v1354_v25  ;;  %v11620_v28 = vpop.f32.mrb[17].mxu1  ;;  %v12706_v25 = vld [vmem:[%s15285_s7 + $0x68] sm:$0xff]  }
 0x2e6   : > { %v1357_v29 = vpop.f32.mrb[18].mxu1  ;;  %v12707_v28 = vld [vmem:[%s15285_s7 + $0x20] sm:$0xff]  }
 0x2e7   : > { %v1362_v30 = vpack.c.bf16 %v1355_v26, %v1355_v26  ;;  %v11621_v32 = vpop.f32.mrb[19].mxu1 }
 0x2e9   : > { %v1427_v33 = vsel %vm720_vm1, %v1362_v30, 0 }
 0x2ea   : > { %11629 = vmatpush3.bf16.msra.mxu1 %v1427_v33 }
 0x2eb   : > { %11640 = vmatprep.subr.bf16.mxu1 %v13063_v1 }
 0x366   : > { %v1107_v34 = vpop.xlane.xlu0 %1106 }
 0x367   : > { %v1108_v35 = vsub.f32 %v1104_v16, %v1107_v34  ;;  %v12708_v34 = vld [vmem:[%s15285_s7 + $0x28] sm:$0xff]  }
 0x369   : > { %v1109_v37 = vmul.f32 1.442695, %v1108_v35 }
 0x36b   : > { %12853 = vpow2.f32 %v1109_v37  ;;  %v12709_v37 = vld [vmem:[%s15285_s7 + $0xa0] sm:$0xff]  }
 0x375   : > { %v12854_v38 = vpop.eup %12853 }
 0x376   : > { %v1111_v39 = vsel %vm1056_vm6, %v12854_v38, 0.0 }
 0x377   : > { %1112 = vadd.xlane.f32.xlu0 %v1111_v39 }
 0x404   : > { %v1113_v40 = vpop.xlane.xlu0 %1112 }
 0x405   : > { %12855 = vrcp.f32 %v1113_v40 }
 0x40f   : > { %v12856_v41 = vpop.eup %12855 }
 0x410   : > { %v1115_v42 = vmul.f32 %v12856_v41, %v12854_v38  ;;  %v12710_v41 = vld [vmem:[%s15285_s7 + $0xa8] sm:$0xff]  }
 0x412   : > { %v1116_v45 = vpack.c.bf16 %v1115_v42, %v1115_v42  ;;  %v10430_v42 = vld [vmem:[%s15286_s8 + $0x6] ss:$0 sm:$0xff] }
 0x414   : > { %11595 = vmatmul.mubr.msk.bf16.vlgmr.msra.gmra.mrb[12].mxu0 %vm1056_vm6, %v1116_v45 }
 0x415   : > { %11607 = vmatpush3.bf16.msra.mxu0 %v12703_v44  ;;  %11610 = vmatprep.mubr.msk.bf16.mxu0 %vm13064_vm0, %v13063_v1 }
 0x416   : > { %11608 = vmatprep.subr.bf16.mxu0 %v13063_v1 }
 0x419   : > { %11609 = vmatpush3.bf16.msra.mxu0 %v12704_v46 }
 0x41a   : > { %11622 = vmatprep.subr.bf16.mxu0 %v13063_v1 }
 0x41c   : > { %11611 = vmatmul.mubr.msk.bf16.vlgmr.msra.gmra.mrb[16].mxu0 %vm879_vm5, %v13329_v36 }
 0x41d   : > { %11624 = vmatprep.mubr.msk.bf16.mxu0 %vm13064_vm0, %v13063_v1 }
 0x4e7   : > { %v1157_v47 = vpop.f32.mrb[12].mxu0 }
 0x4e8   : > { %v11596_v48 = vpop.f32.mrb[13].mxu0  ;;  %v1163_v24 = vpack.c.bf16 %v1157_v47, %v1157_v47 }
 0x4e9   : > { %v1160_v49 = vpop.f32.mrb[14].mxu0 }
 0x4ea   : > { %v11597_v50 = vpop.f32.mrb[15].mxu0 }
 0x4ef   : > { %v1289_v52 = vpop.f32.mrb[16].mxu0 }
 0x4f0   : > { %v1290_v53 = vadd.f32 %v10398_v51, %v1289_v52  ;;  %v11612_v54 = vpop.f32.mrb[17].mxu0 }
 0x4f1   : > { %v1292_v55 = vpop.f32.mrb[18].mxu0 }
 0x4f2   : > { %v1361_v56 = vpack.c.bf16 %v1290_v53, %v1290_v53  ;;  %v11613_v57 = vpop.f32.mrb[19].mxu0 }
 0x4f4   : > { %v1367_v59 = vsel %vm1056_vm6, %v1361_v56, 0  ;;  %v10421_v56 = vld [vmem:[%s15286_s8 + $0x2] ss:$0 sm:$0xff] }
 0x4f5   : > { %11623 = vmatpush3.bf16.xpose.msra.mxu0 %v1367_v59 }
 0x4f6   : > { %11634 = vmatprep.subr.bf16.mxu0 %v13063_v1 }
 0x4fc   : > { %11625 = vmatmul.mubr.msk.bf16.vlgmr.msra.gmra.mrb[20].mxu0 %vm1056_vm6, %v1360_v61 }
 0x4fd   : > { %11636 = vmatprep.mubr.msk.bf16.mxu0 %vm13064_vm0, %v13063_v1  ;;  %11635 = vmatpush3.bf16.msra.mxu0 %v1476_v14 }
 0x4fe   : > { %11646 = vmatprep.subr.bf16.mxu0 %v13063_v1 }
 0x5cf   : > { %v1403_v62 = vpop.f32.mrb[20].mxu0 }
 0x5d0   : > { %v11626_v63 = vpop.f32.mrb[21].mxu0  ;;  %v1409_v0 = vmul.f32 0.35355338, %v1403_v62 }
 0x5d1   : > { %v1406_v2 = vpop.f32.mrb[22].mxu0  ;;  %v10439_v63 = vld [vmem:[%s15286_s8 + $0xa] ss:$0 sm:$0xff] }
 0x5d2   : > { %v11627_v3 = vpop.f32.mrb[23].mxu0  ;;  %v1410_v4 = vsel %vm13395_vm7, -1e+30, %v1409_v0 }
 0x5d3   : > { %v1411_v5 = vsel %vm1056_vm6, %v1410_v4, -inf }
 0x5d4   : > { %1412 = vmax.xlane.f32.xlu1 %v1411_v5 }
 0x661   : > { %v1413_v6 = vpop.xlane.xlu1 %1412 }
 0x662   : > { %v1414_v7 = vsub.f32 %v1410_v4, %v1413_v6 }
 0x664   : > { %v1415_v8 = vmul.f32 1.442695, %v1414_v7 }
 0x666   : > { %12857 = vpow2.f32 %v1415_v8 }
 0x670   : > { %v12858_v11 = vpop.eup %12857 }
 0x671   : > { %v1417_v12 = vsel %vm1056_vm6, %v12858_v11, 0.0 }
 0x672   : > { %1418 = vadd.xlane.f32.xlu1 %v1417_v12 }
 0x6ff   : > { %v1419_v15 = vpop.xlane.xlu1 %1418 }
 0x700   : > { %12859 = vrcp.f32 %v1419_v15 }
 0x70a   : > { %v12860_v16 = vpop.eup %12859 }
 0x70b   : > { %v1421_v21 = vmul.f32 %v12860_v16, %v12858_v11 }
 0x70d   : > { %v1422_v18 = vpack.c.bf16 %v1421_v21, %v1421_v21 }
 0x70f   : > { %11631 = vmatmul.mubr.msk.bf16.vlgmr.msra.gmra.mrb[20].mxu1 %vm1056_vm6, %v1422_v18 }
 0x710   : > { %11641 = vmatpush3.bf16.msra.mxu1 %v1522_v22  ;;  %11642 = vmatprep.mubr.msk.bf16.mxu1 %vm13064_vm0, %v13063_v1 }
 0x711   : > { %11654 = vmatprep.subr.bf16.mxu1 %v13063_v1 }
 0x717   : > { %11643 = vmatmul.mubr.msk.bf16.vlgmr.msra.gmra.mrb[24].mxu1 %vm1056_vm6, %v1163_v24  ;;  %v10445_v24 = vld [vmem:[%s15287_s9 + $0x8] sm:$0xf] }
 0x718   : > { %11655 = vmatpush3.bf16.msra.mxu1 %v12705_v23  ;;  %11658 = vmatprep.mubr.msk.bf16.mxu1 %vm13064_vm0, %v13063_v1 }
 0x719   : > { %11656 = vmatprep.subr.bf16.mxu1 %v13063_v1 }
 0x71c   : > { %11657 = vmatpush3.bf16.msra.mxu1 %v12706_v25  ;;  %v1875_v25 = vsel %vm720_vm1, %v10445_v24, 0 }
 0x71d   : > { %11670 = vmatprep.subr.bf16.mxu1 %v13063_v1 }
 0x71f   : > { %11659 = vmatmul.mubr.msk.bf16.vlgmr.msra.gmra.mrb[28].mxu1 %vm879_vm5, %v13329_v36 }
 0x720   : > { %11672 = vmatprep.mubr.msk.bf16.mxu1 %vm13064_vm0, %v13063_v1 }
 0x7e2   : > { %v1463_v26 = vpop.f32.mrb[20].mxu1 }
 0x7e3   : > { %v1469_v29 = vpack.c.bf16 %v1463_v26, %v1463_v26  ;;  %v11632_v30 = vpop.f32.mrb[21].mxu1 }
 0x7e4   : > { %v1466_v32 = vpop.f32.mrb[22].mxu1  ;;  %v12711_v30 = vld [vmem:[%s15285_s7 + $0x30] sm:$0xff]  }
 0x7e5   : > { %v11633_v33 = vpop.f32.mrb[23].mxu1  ;;  %11637 = vmatmul.mubr.msk.bf16.vlgmr.msra.gmra.mrb[24].mxu0 %vm1056_vm6, %v1469_v29 }
 0x7e6   : > { %11647 = vmatpush3.bf16.msra.mxu0 %v12707_v28  ;;  %11650 = vmatprep.mubr.msk.bf16.mxu0 %vm13064_vm0, %v13063_v1  ;;  %v12712_v33 = vld [vmem:[%s15285_s7 + $0x38] sm:$0xff]  }
 0x7e7   : > { %11648 = vmatprep.subr.bf16.mxu0 %v13063_v1 }
 0x7ea   : > { %v1558_v35 = vpop.f32.mrb[24].mxu1  ;;  %11649 = vmatpush3.bf16.msra.mxu0 %v12708_v34  ;;  %v12713_v34 = vld [vmem:[%s15285_s7 + $0xb0] sm:$0xff]  }
 0x7eb   : > { %v11644_v38 = vpop.f32.mrb[25].mxu1  ;;  %11662 = vmatprep.subr.bf16.mxu0 %v13063_v1 }
 0x7ec   : > { %v1561_v39 = vpop.f32.mrb[26].mxu1  ;;  %v12715_v38 = vld [vmem:[%s15285_s7 + $0x70] sm:$0xff]  }
 0x7ed   : > { %v11645_v40 = vpop.f32.mrb[27].mxu1  ;;  %11651 = vmatmul.mubr.msk.bf16.vlgmr.msra.gmra.mrb[28].mxu0 %vm879_vm5, %v13329_v36 }
 0x7ee   : > { %11663 = vmatpush3.bf16.msra.mxu0 %v12709_v37  ;;  %11666 = vmatprep.mubr.msk.bf16.mxu0 %vm13064_vm0, %v13063_v1 }
 0x7ef   : > { %11664 = vmatprep.subr.bf16.mxu0 %v13063_v1 }
 0x7f2   : > { %v1688_v44 = vpop.f32.mrb[28].mxu1  ;;  %11665 = vmatpush3.bf16.msra.mxu0 %v12710_v41 }
 0x7f3   : > { %v1689_v45 = vadd.f32 %v10430_v42, %v1688_v44  ;;  %v11660_v46 = vpop.f32.mrb[29].mxu1  ;;  %11676 = vmatprep.subr.bf16.mxu0 %v13063_v1  ;;  %v12716_v44 = vld [vmem:[%s15285_s7 + $0x78] sm:$0xff]  }
 0x7f4   : > { %v1691_v47 = vpop.f32.mrb[30].mxu1 }
 0x7f5   : > { %v1760_v48 = vpack.c.bf16 %v1689_v45, %v1689_v45  ;;  %v11661_v49 = vpop.f32.mrb[31].mxu1  ;;  %11667 = vmatmul.mubr.msk.bf16.vlgmr.msra.gmra.mrb[32].mxu0 %vm879_vm5, %v13329_v36 }
 0x7f6   : > { %11678 = vmatprep.mubr.msk.bf16.mxu0 %vm13064_vm0, %v13063_v1  ;;  %v10470_v49 = vld [vmem:[%s15286_s8 + $0xb] ss:$0 sm:$0xff] }
 0x7f7   : > { %v1766_v50 = vsel %vm1056_vm6, %v1760_v48, 0 }
 0x7f8   : > { %11671 = vmatpush3.bf16.xpose.msra.mxu1 %v1766_v50 }
 0x7f9   : > { %11682 = vmatprep.subr.bf16.mxu1 %v13063_v1 }
 0x8b8   : > { %v1512_v51 = vpop.f32.mrb[24].mxu0 }
 0x8b9   : > { %v13498_v52 = vadd.f32 %v1558_v35, %v1512_v51  ;;  %v11638_v53 = vpop.f32.mrb[25].mxu0  ;;  %v12714_v35 = vld [vmem:[%s15285_s7 + $0xb8] sm:$0xff]  }
 0x8ba   : > { %v1515_v54 = vpop.f32.mrb[26].mxu0 }
 0x8bb   : > { %v11639_v55 = vpop.f32.mrb[27].mxu0 }
 0x8c0   : > { %v1623_v57 = vpop.f32.mrb[28].mxu0 }
 0x8c1   : > { %v1624_v58 = vadd.f32 %v10421_v56, %v1623_v57  ;;  %v11652_v59 = vpop.f32.mrb[29].mxu0 }
 0x8c2   : > { %v1626_v60 = vpop.f32.mrb[30].mxu0 }
 0x8c3   : > { %v1759_v61 = vpack.c.bf16 %v1624_v58, %v1624_v58  ;;  %v11653_v62 = vpop.f32.mrb[31].mxu0 }
 0x8c4   : > { %v10461_v62 = vld [vmem:[%s15286_s8 + $0x7] ss:$0 sm:$0xff] }
 0x8c5   : > { %11673 = vmatmul.mubr.msk.bf16.vlgmr.msra.gmra.mrb[32].mxu1 %vm1056_vm6, %v1759_v61 }
 0x8c6   : > { %11684 = vmatprep.mubr.msk.bf16.mxu1 %vm13064_vm0, %v13063_v1  ;;  %11683 = vmatpush3.bf16.msra.mxu1 %v1875_v25  ;;  %v10476_v25 = vld [vmem:[%s15287_s9 + $0xc] sm:$0xf] }
 0x8c7   : > { %11696 = vmatprep.subr.bf16.mxu1 %v13063_v1 }
 0x8c8   : > { %v1753_v0 = vpop.f32.mrb[32].mxu0 }
 0x8c9   : > { %v1754_v2 = vadd.f32 %v10439_v63, %v1753_v0  ;;  %v11668_v3 = vpop.f32.mrb[33].mxu0 }
 0x8ca   : > { %v1756_v4 = vpop.f32.mrb[34].mxu0 }
 0x8cb   : > { %v1761_v5 = vpack.c.bf16 %v1754_v2, %v1754_v2  ;;  %v11669_v6 = vpop.f32.mrb[35].mxu0 }
 0x8cc   : > { %v10452_v6 = vld [vmem:[%s15286_s8 + $0x3] ss:$0 sm:$0xff] }
 0x8cd   : > { %v1826_v7 = vsel %vm720_vm1, %v1761_v5, 0 }
 0x8ce   : > { %11677 = vmatpush3.bf16.msra.mxu0 %v1826_v7 }
 0x8cf   : > { %11688 = vmatprep.subr.bf16.mxu0 %v13063_v1 }
 0x998   : > { %v1802_v8 = vpop.f32.mrb[32].mxu1 }
 0x999   : > { %v11674_v11 = vpop.f32.mrb[33].mxu1  ;;  %v1808_v12 = vmul.f32 0.35355338, %v1802_v8 }
 0x99a   : > { %v1805_v13 = vpop.f32.mrb[34].mxu1 }
 0x99b   : > { %v11675_v14 = vpop.f32.mrb[35].mxu1  ;;  %v1809_v15 = vsel %vm13395_vm7, -1e+30, %v1808_v12 }
 0x99c   : > { %v1810_v16 = vsel %vm1056_vm6, %v1809_v15, -inf }
 0x99d   : > { %1811 = vmax.xlane.f32.xlu0 %v1810_v16 }
 0xa2a   : > { %v1812_v17 = vpop.xlane.xlu0 %1811 }
 0xa2b   : > { %v1813_v21 = vsub.f32 %v1809_v15, %v1812_v17 }
 0xa2d   : > { %v1814_v18 = vmul.f32 1.442695, %v1813_v21 }
 0xa2f   : > { %12861 = vpow2.f32 %v1814_v18 }
 0xa39   : > { %v12862_v22 = vpop.eup %12861 }
 0xa3a   : > { %v1816_v23 = vsel %vm1056_vm6, %v12862_v22, 0.0 }
 0xa3b   : > { %1817 = vadd.xlane.f32.xlu1 %v1816_v23 }
 0xac8   : > { %v1818_v26 = vpop.xlane.xlu1 %1817 }
 0xac9   : > { %12863 = vrcp.f32 %v1818_v26  ;;  %v2229_v26 = vsel %vm720_vm1, %v10476_v25, 0 }
 0xad3   : > { %v12864_v28 = vpop.eup %12863 }
 0xad4   : > { %v1820_v29 = vmul.f32 %v12864_v28, %v12862_v22 }
 0xad6   : > { %v1821_v32 = vpack.c.bf16 %v1820_v29, %v1820_v29 }
 0xad8   : > { %11679 = vmatmul.mubr.msk.bf16.vlgmr.msra.gmra.mrb[36].mxu0 %vm1056_vm6, %v1821_v32 }
 0xad9   : > { %11689 = vmatpush3.bf16.msra.mxu0 %v12711_v30  ;;  %11692 = vmatprep.mubr.msk.bf16.mxu0 %vm13064_vm0, %v13063_v1 }
 0xada   : > { %11690 = vmatprep.subr.bf16.mxu0 %v13063_v1 }
 0xadd   : > { %11691 = vmatpush3.bf16.msra.mxu0 %v12712_v33 }
 0xade   : > { %11704 = vmatprep.subr.bf16.mxu0 %v13063_v1 }
 0xae0   : > { %11693 = vmatmul.mubr.msk.bf16.vlgmr.msra.gmra.mrb[40].mxu0 %vm879_vm5, %v13329_v36 }
 0xae1   : > { %11705 = vmatpush3.bf16.msra.mxu0 %v12713_v34  ;;  %11708 = vmatprep.mubr.msk.bf16.mxu0 %vm13064_vm0, %v13063_v1 }
 0xae2   : > { %11706 = vmatprep.subr.bf16.mxu0 %v13063_v1 }
 0xae5   : > { %11707 = vmatpush3.bf16.msra.mxu0 %v12714_v35 }
 0xae6   : > { %11718 = vmatprep.subr.bf16.mxu0 %v13063_v1 }
 0xae8   : > { %11709 = vmatmul.mubr.msk.bf16.vlgmr.msra.gmra.mrb[44].mxu0 %vm879_vm5, %v13329_v36 }
 0xae9   : > { %11720 = vmatprep.mubr.msk.bf16.mxu0 %vm13064_vm0, %v13063_v1 }
 0xbab   : > { %v1862_v37 = vpop.f32.mrb[36].mxu0 }
 0xbac   : > { %v1868_v39 = vpack.c.bf16 %v1862_v37, %v1862_v37  ;;  %v11680_v40 = vpop.f32.mrb[37].mxu0 }
 0xbad   : > { %v1865_v41 = vpop.f32.mrb[38].mxu0 }
 0xbae   : > { %v11681_v42 = vpop.f32.mrb[39].mxu0  ;;  %11685 = vmatmul.mubr.msk.bf16.vlgmr.msra.gmra.mrb[36].mxu1 %vm1056_vm6, %v1868_v39  ;;  %v13597_v39 = vld [vmem:[%s15291_s13] sm:$0x3f] }
 0xbaf   : > { %11697 = vmatpush3.bf16.msra.mxu1 %v12715_v38  ;;  %11700 = vmatprep.mubr.msk.bf16.mxu1 %vm13064_vm0, %v13063_v1  ;;  %v2275_v40 = vrot.slane %v13597_v39, %v13309_v20 }
 0xbb0   : > { %11698 = vmatprep.subr.bf16.mxu1 %v13063_v1 }
 0xbb3   : > { %v1977_v45 = vpop.f32.mrb[40].mxu0  ;;  %11699 = vmatpush3.bf16.msra.mxu1 %v12716_v44 }
 0xbb4   : > { %v11694_v46 = vpop.f32.mrb[41].mxu0  ;;  %11712 = vmatprep.subr.bf16.mxu1 %v13063_v1 }
 0xbb5   : > { %v1980_v47 = vpop.f32.mrb[42].mxu0 }
 0xbb6   : > { %v11695_v48 = vpop.f32.mrb[43].mxu0  ;;  %11701 = vmatmul.mubr.msk.bf16.vlgmr.msra.gmra.mrb[40].mxu1 %vm879_vm5, %v13329_v36 }
 0xbb7   : > { %11714 = vmatprep.mubr.msk.bf16.mxu1 %vm13064_vm0, %v13063_v1 }
 0xbbb   : > { %v2107_v50 = vpop.f32.mrb[44].mxu0 }
 0xbbc   : > { %v2108_v51 = vadd.f32 %v10470_v49, %v2107_v50  ;;  %v11710_v53 = vpop.f32.mrb[45].mxu0 }
 0xbbd   : > { %v2110_v54 = vpop.f32.mrb[46].mxu0 }
 0xbbe   : > { %v2115_v55 = vpack.c.bf16 %v2108_v51, %v2108_v51  ;;  %v11711_v56 = vpop.f32.mrb[47].mxu0 }
 0xbbf   : > { %v12717_v56 = vld [vmem:[%s15288_s10] sm:$0xff]  }
 0xbc0   : > { %v2180_v57 = vsel %vm720_vm1, %v2115_v55, 0 }
 0xbc1   : > { %11719 = vmatpush3.bf16.msra.mxu0 %v2180_v57 }
 0xbc2   : > { %11730 = vmatprep.subr.bf16.mxu0 %v13063_v1 }
 0xc81   : > { %v1911_v58 = vpop.f32.mrb[36].mxu1 }
 0xc82   : > { %v1917_v36 = vadd.f32 %v1911_v58, %v13498_v52  ;;  %v11686_v59 = vpop.f32.mrb[37].mxu1  ;;  %v1978_v52 = vadd.f32 %v10452_v6, %v1977_v45  ;;  %v10478_v6 = vld [vmem:[%s15289_s11] ss:$0 sm:$0xff] }
 0xc83   : > { %v1914_v60 = vpop.f32.mrb[38].mxu1  ;;  %v13613_v59 = vsub.s32 2, %v13306_v19 }
 0xc84   : > { %v11687_v61 = vpop.f32.mrb[39].mxu1  ;;  %v2113_v8 = vpack.c.bf16 %v1978_v52, %v1978_v52  ;;  %v2295_v60 = vrot.slane %v13597_v39, %v13319_v27 }
 0xc89   : > { %v2042_v63 = vpop.f32.mrb[40].mxu1 }
 0xc8a   : > { %v2043_v0 = vadd.f32 %v10461_v62, %v2042_v63  ;;  %v11702_v2 = vpop.f32.mrb[41].mxu1  ;;  %v2300_v63 = vrot.slane %v13597_v39, %v13613_v59 }
 0xc8b   : > { %v2045_v3 = vpop.f32.mrb[42].mxu1 }
 0xc8c   : > { %v2114_v4 = vpack.c.bf16 %v2043_v0, %v2043_v0  ;;  %v11703_v5 = vpop.f32.mrb[43].mxu1 }
 0xc8d   : > { %v12720_v5 = vld [vmem:[%s15290_s12 + $0x8] sm:$0xff]  }
 0xc8e   : > { %v2120_v7 = vsel %vm1056_vm6, %v2114_v4, 0  ;;  %v12719_v4 = vld [vmem:[%s15290_s12] sm:$0xff]  }
 0xc8f   : > { %11713 = vmatpush3.bf16.xpose.msra.mxu1 %v2120_v7 }
 0xc90   : > { %11724 = vmatprep.subr.bf16.mxu1 %v13063_v1 }
 0xc96   : > { %11715 = vmatmul.mubr.msk.bf16.vlgmr.msra.gmra.mrb[44].mxu1 %vm1056_vm6, %v2113_v8 }
 0xc97   : > { %11726 = vmatprep.mubr.msk.bf16.mxu1 %vm13064_vm0, %v13063_v1  ;;  %11725 = vmatpush3.bf16.msra.mxu1 %v2229_v26 }
 0xc98   : > { %11738 = vmatprep.subr.bf16.mxu1 %v13063_v1 }
 0xd69   : > { %v2156_v11 = vpop.f32.mrb[44].mxu1 }
 0xd6a   : > { %v11716_v12 = vpop.f32.mrb[45].mxu1  ;;  %v2162_v13 = vmul.f32 0.35355338, %v2156_v11 }
 0xd6b   : > { %v2159_v14 = vpop.f32.mrb[46].mxu1 }
 0xd6c   : > { %v11717_v15 = vpop.f32.mrb[47].mxu1  ;;  %v2163_v16 = vsel %vm13395_vm7, -1e+30, %v2162_v13 }
 0xd6d   : > { %v2164_v17 = vsel %vm1056_vm6, %v2163_v16, -inf  ;;  %v13637_v15 = vsub.s32 3, %v13306_v19 }
 0xd6e   : > { %2165 = vmax.xlane.f32.xlu0 %v2164_v17 }
 0xdfb   : > { %v2166_v21 = vpop.xlane.xlu0 %2165 }
 0xdfc   : > { %v2167_v18 = vsub.f32 %v2163_v16, %v2166_v21  ;;  %v2378_v16 = vrot.slane %v13597_v39, %v13637_v15 }
 0xdfe   : > { %v2168_v22 = vmul.f32 1.442695, %v2167_v18 }
 0xe00   : > { %12865 = vpow2.f32 %v2168_v22 }
 0xe0a   : > { %v12866_v23 = vpop.eup %12865 }
 0xe0b   : > { %v2170_v24 = vsel %vm1056_vm6, %v12866_v23, 0.0 }
 0xe0c   : > { %2171 = vadd.xlane.f32.xlu1 %v2170_v24 }
 0xe99   : > { %v2172_v28 = vpop.xlane.xlu1 %2171 }
 0xe9a   : > { %12867 = vrcp.f32 %v2172_v28 }
 0xea4   : > { %v12868_v29 = vpop.eup %12867 }
 0xea5   : > { %v2174_v30 = vmul.f32 %v12868_v29, %v12866_v23 }
 0xea7   : > { %v2175_v32 = vpack.c.bf16 %v2174_v30, %v2174_v30 }
 0xea9   : > { %11721 = vmatmul.mubr.msk.bf16.vlgmr.msra.gmra.mrb[48].mxu0 %vm1056_vm6, %v2175_v32 }
 0xeaa   : > { %11734 = vmatprep.mubr.msk.bf16.mxu0 %vm13064_vm0, %v13063_v1  ;;  %11731 = vmatpush3.bf16.msra.mxu0 %v12717_v56 }
 0xeab   : > { %11732 = vmatprep.subr.bf16.mxu0 %v13063_v1 }
 0xf7c   : > { %v2216_v33 = vpop.f32.mrb[48].mxu0 }
 0xf7d   : > { %v2222_v34 = vpack.c.bf16 %v2216_v33, %v2216_v33  ;;  %v11722_v35 = vpop.f32.mrb[49].mxu0  ;;  %v12721_v33 = vld [vmem:[%s15285_s7 + $0xc0] sm:$0xff]  }
 0xf7e   : > { %v2219_v37 = vpop.f32.mrb[50].mxu0  ;;  %v12723_v35 = vld [vmem:[%s15285_s7 + $0xc8] sm:$0xff]  }
 0xf7f   : > { %v11723_v38 = vpop.f32.mrb[51].mxu0  ;;  %11727 = vmatmul.mubr.msk.bf16.vlgmr.msra.gmra.mrb[48].mxu1 %vm1056_vm6, %v2222_v34  ;;  %v12722_v34 = vld [vmem:[%s15285_s7 + $0x100] sm:$0xff]   ;;  %v12724_v37 = vld [vmem:[%s15285_s7 + $0x108] sm:$0xff]  }
 0xf80   : > { %11742 = vmatprep.mubr.msk.bf16.mxu1 %vm13064_vm0, %v13063_v1  ;;  %11739 = vmatpush3.bf16.msra.mxu1 %v12719_v4 }
 0xf81   : > { %11740 = vmatprep.subr.bf16.mxu1 %v13063_v1 }
 0xf84   : > { %11741 = vmatpush3.bf16.msra.mxu1 %v12720_v5 }
 0xf85   : > { %11754 = vmatprep.subr.bf16.mxu1 %v13063_v1 }
0x1052   : > { %v2265_v41 = vpop.f32.mrb[48].mxu1 }
0x1053   : > { %v2271_v42 = vadd.f32 %v2265_v41, %v1917_v36  ;;  %v11728_v44 = vpop.f32.mrb[49].mxu1 }
0x1054   : > { %v2268_v45 = vpop.f32.mrb[50].mxu1  ;;  %v13663_v44 = vsub.s32 5, %v13306_v19 }
0x1055   : > { %v11729_v46 = vpop.f32.mrb[51].mxu1  ;;  %v2276_v47 = vadd.f32 %v2275_v40, %v2271_v42  ;;  %v13660_v42 = vsub.s32 4, %v13306_v19 }
0x1057   : > { %v2277_v48 = vadd.f32 %v2276_v47, %v13321_v31  ;;  %v12718_v31 = vld [vmem:[%s15288_s10 + $0x8] sm:$0xff]   ;;  %v2451_v45 = vrot.slane %v13597_v39, %v13660_v42  ;;  %v2456_v47 = vrot.slane %v13597_v39, %v13663_v44 }
0x1058   : > { %11733 = vmatpush3.bf16.msra.mxu0 %v12718_v31  ;;  %v12726_v39 = vld [vmem:[%s15285_s7 + $0x148] sm:$0xff]  }
0x1059   : > { %v2278_v49 = vsel %vm879_vm5, %v2277_v48, 0.0  ;;  %11746 = vmatprep.subr.bf16.mxu0 %v13063_v1 }
0x105a   : > { %2279 = vadd.xlane.f32.xlu0 %v2278_v49 }
0x10e7   : > { %v2280_v50 = vpop.xlane.xlu0 %2279 }
0x10e8   : > { %v2282_v51 = vmul.f32 0.03125, %v2280_v50 }
0x10ea   : > { %v2283_v53 = vsub.f32 %v2277_v48, %v2282_v51  ;;  %v12725_v51 = vld [vmem:[%s15285_s7 + $0x140] sm:$0xff]  }
0x10ec   : > { %v2284_v54 = vmul.f32 %v2283_v53, %v2283_v53 }
0x10ee   : > { %v2285_v55 = vsel %vm879_vm5, %v2284_v54, 0.0  ;;  %v10500_v54 = vld [vmem:[%s15286_s8 + $0x10] ss:$0 sm:$0xff] }
0x10ef   : > { %2286 = vadd.xlane.f32.xlu1 %v2285_v55 }
0x117c   : > { %v2287_v57 = vpop.xlane.xlu1 %2286 }
0x117d   : > { %v2288_v58 = vmul.f32 0.03125, %v2287_v57 }
0x117f   : > { %v2289_v36 = vadd.f32 1e-05, %v2288_v58 }
0x1181   : > { %12869 = vrsqrt.f32 %v2289_v36 }
0x118b   : > { %v12870_v61 = vpop.eup %12869 }
0x118c   : > { %v2291_v62 = vmul.f32 %v12870_v61, %v2283_v53 }
0x118e   : > { %v2296_v0 = vmul.f32 %v2295_v60, %v2291_v62 }
0x1190   : > { %v2301_v2 = vadd.f32 %v2300_v63, %v2296_v0  ;;  %v10491_v0 = vld [vmem:[%s15286_s8 + $0xc] ss:$0 sm:$0xff] }
0x1192   : > { %v2302_v3 = vpack.c.bf16 %v2301_v2, %v2301_v2 }
0x1194   : > { %11735 = vmatmul.mubr.msk.bf16.vlgmr.msra.gmra.mrb[52].mxu0 %vm879_vm5, %v2302_v3  ;;  %v10509_v3 = vld [vmem:[%s15286_s8 + $0x14] ss:$0 sm:$0xff] }
0x1195   : > { %11750 = vmatprep.mubr.msk.bf16.mxu0 %vm13064_vm0, %v13063_v1  ;;  %11747 = vmatpush3.bf16.msra.mxu0 %v12721_v33 }
0x1196   : > { %11748 = vmatprep.subr.bf16.mxu0 %v13063_v1 }
0x1199   : > { %11749 = vmatpush3.bf16.msra.mxu0 %v12723_v35 }
0x119a   : > { %11762 = vmatprep.subr.bf16.mxu0 %v13063_v1 }
0x1267   : > { %v2363_v7 = vpop.f32.mrb[52].mxu0 }
0x1268   : > { %v2364_v52 = vadd.f32 %v10478_v6, %v2363_v7  ;;  %v11736_v8 = vpop.f32.mrb[53].mxu0 }
0x1269   : > { %v2366_v11 = vpop.f32.mrb[54].mxu0  ;;  %v12727_v8 = vld [vmem:[%s15285_s7 + $0xd0] sm:$0xff]  }
0x126a   : > { %v2369_v12 = vmax.f32 %v2364_v52, 0.0  ;;  %v11737_v13 = vpop.f32.mrb[55].mxu0 }
0x126c   : > { %v2370_v14 = vpack.c.bf16 %v2369_v12, %v2369_v12 }
0x126e   : > { %11743 = vmatmul.mubr.msk.bf16.vlgmr.msra.gmra.mrb[52].mxu1 %vm879_vm5, %v2370_v14 }
0x126f   : > { %11758 = vmatprep.mubr.msk.bf16.mxu1 %vm13064_vm0, %v13063_v1  ;;  %11755 = vmatpush3.bf16.msra.mxu1 %v12722_v34  ;;  %v10539_v34 = vld [vmem:[%s15286_s8 + $0x15] ss:$0 sm:$0xff] }
0x1270   : > { %11756 = vmatprep.subr.bf16.mxu1 %v13063_v1 }
0x1273   : > { %11757 = vmatpush3.bf16.msra.mxu1 %v12724_v37 }
0x1274   : > { %11770 = vmatprep.subr.bf16.mxu1 %v13063_v1 }
0x1341   : > { %v2428_v17 = vpop.f32.mrb[52].mxu1 }
0x1342   : > { %v2429_v21 = vadd.f32 %v2428_v17, %v2378_v16  ;;  %v11744_v18 = vpop.f32.mrb[53].mxu1  ;;  %v12728_v16 = vld [vmem:[%s15285_s7 + $0xd8] sm:$0xff]   ;;  %v12729_v17 = vld [vmem:[%s15285_s7 + $0x150] sm:$0xff]  }
0x1343   : > { %v2431_v22 = vpop.f32.mrb[54].mxu1 }
0x1344   : > { %v11745_v23 = vpop.f32.mrb[55].mxu1  ;;  %v2434_v24 = vadd.f32 %v2429_v21, %v2301_v2  ;;  %v12730_v21 = vld [vmem:[%s15285_s7 + $0x158] sm:$0xff]  }
0x1346   : > { %v2435_v25 = vsel %vm879_vm5, %v2434_v24, 0.0 }
0x1347   : > { %2436 = vadd.xlane.f32.xlu0 %v2435_v25 }
0x13d4   : > { %v2437_v26 = vpop.xlane.xlu0 %2436 }
0x13d5   : > { %v2438_v28 = vmul.f32 0.03125, %v2437_v26 }
0x13d7   : > { %v2439_v29 = vsub.f32 %v2434_v24, %v2438_v28 }
0x13d9   : > { %v2440_v30 = vmul.f32 %v2439_v29, %v2439_v29 }
0x13db   : > { %v2441_v32 = vsel %vm879_vm5, %v2440_v30, 0.0 }
0x13dc   : > { %2442 = vadd.xlane.f32.xlu1 %v2441_v32 }
0x1469   : > { %v2443_v38 = vpop.xlane.xlu1 %2442 }
0x146a   : > { %v2444_v40 = vmul.f32 0.03125, %v2443_v38 }
0x146c   : > { %v2445_v41 = vadd.f32 1e-05, %v2444_v40 }
0x146e   : > { %12871 = vrsqrt.f32 %v2445_v41 }
0x1478   : > { %v12872_v46 = vpop.eup %12871 }
0x1479   : > { %v2447_v48 = vmul.f32 %v12872_v46, %v2439_v29 }
0x147b   : > { %v2452_v49 = vmul.f32 %v2451_v45, %v2447_v48 }
0x147d   : > { %v13669_v50 = vadd.f32 %v2456_v47, %v2452_v49 }
0x147f   : > { %v13676_v53 = vpack.c.bf16 %v13669_v50, %v13669_v50 }
0x1481   : > { %11751 = vmatmul.mubr.msk.bf16.vlgmr.msra.gmra.mrb[56].mxu0 %vm879_vm5, %v13676_v53  ;;  %11759 = vmatmul.mubr.msk.bf16.vlgmr.msra.gmra.mrb[56].mxu1 %vm879_vm5, %v13676_v53 }
0x1482   : > { %11763 = vmatpush3.bf16.msra.mxu0 %v12725_v51  ;;  %11766 = vmatprep.mubr.msk.bf16.mxu0 %vm13064_vm0, %v13063_v1 }
0x1483   : > { %11764 = vmatprep.subr.bf16.mxu0 %v13063_v1  ;;  %11772 = vmatprep.mubr.msk.bf16.mxu1 %vm13064_vm0, %v13063_v1 }
0x1486   : > { %11765 = vmatpush3.bf16.msra.mxu0 %v12726_v39 }
0x1487   : > { %11776 = vmatprep.subr.bf16.mxu0 %v13063_v1 }
0x1489   : > { %11767 = vmatmul.mubr.msk.bf16.vlgmr.msra.gmra.mrb[60].mxu0 %vm879_vm5, %v13676_v53 }
0x148a   : > { %11778 = vmatprep.mubr.msk.bf16.mxu0 %vm13064_vm0, %v13063_v1 }
0x1554   : > { %v2523_v55 = vpop.f32.mrb[56].mxu0  ;;  %v2588_v56 = vpop.f32.mrb[56].mxu1 }
0x1555   : > { %v2589_v31 = vadd.f32 %v10500_v54, %v2588_v56  ;;  %v11752_v57 = vpop.f32.mrb[57].mxu0  ;;  %v11760_v58 = vpop.f32.mrb[57].mxu1  ;;  %v2524_v4 = vadd.f32 %v10491_v0, %v2523_v55 }
0x1556   : > { %v2526_v36 = vpop.f32.mrb[58].mxu0  ;;  %v2591_v60 = vpop.f32.mrb[58].mxu1  ;;  %v12732_v58 = vld [vmem:[%s15285_s7 + $0x118] sm:$0xff]  }
0x1557   : > { %v2660_v61 = vpack.c.bf16 %v2589_v31, %v2589_v31  ;;  %v11753_v62 = vpop.f32.mrb[59].mxu0  ;;  %v11761_v63 = vpop.f32.mrb[59].mxu1  ;;  %v2659_v11 = vpack.c.bf16 %v2524_v4, %v2524_v4  ;;  %v12731_v31 = vld [vmem:[%s15285_s7 + $0x110] sm:$0xff]  }
0x1558   : > { %v10530_v63 = vld [vmem:[%s15286_s8 + $0x11] ss:$0 sm:$0xff] }
0x1559   : > { %v2666_v2 = vsel %vm1056_vm6, %v2660_v61, 0 }
0x155a   : > { %11771 = vmatpush3.bf16.xpose.msra.mxu1 %v2666_v2 }
0x155b   : > { %11782 = vmatprep.subr.bf16.mxu1 %v13063_v1 }
0x155c   : > { %v2653_v5 = vpop.f32.mrb[60].mxu0 }
0x155d   : > { %v2654_v6 = vadd.f32 %v10509_v3, %v2653_v5  ;;  %v11768_v7 = vpop.f32.mrb[61].mxu0 }
0x155e   : > { %v2656_v52 = vpop.f32.mrb[62].mxu0  ;;  %v10521_v7 = vld [vmem:[%s15286_s8 + $0xd] ss:$0 sm:$0xff] }
0x155f   : > { %v2661_v12 = vpack.c.bf16 %v2654_v6, %v2654_v6  ;;  %v11769_v13 = vpop.f32.mrb[63].mxu0 }
0x1561   : > { %v2726_v14 = vsel %vm720_vm1, %v2661_v12, 0  ;;  %11773 = vmatmul.mubr.msk.bf16.vlgmr.msra.gmra.mrb[60].mxu1 %vm1056_vm6, %v2659_v11 }
0x1562   : > { %11777 = vmatpush3.bf16.msra.mxu0 %v2726_v14  ;;  %11783 = vmatpush3.bf16.msra.mxu1 %v12727_v8 }
0x1563   : > { %11784 = vmatprep.subr.bf16.mxu1 %v13063_v1  ;;  %11786 = vmatprep.mubr.msk.bf16.mxu1 %vm13064_vm0, %v13063_v1 }
0x1564   : > { %11790 = vmatprep.subr.bf16.mxu0 %v13063_v1 }
0x1566   : > { %11785 = vmatpush3.bf16.msra.mxu1 %v12728_v16 }
0x1567   : > { %11798 = vmatprep.subr.bf16.mxu1 %v13063_v1 }
0x1569   : > { %11787 = vmatmul.mubr.msk.bf16.vlgmr.msra.gmra.mrb[64].mxu1 %vm879_vm5, %v13676_v53 }
0x156a   : > { %11799 = vmatpush3.bf16.msra.mxu1 %v12729_v17  ;;  %11802 = vmatprep.mubr.msk.bf16.mxu1 %vm13064_vm0, %v13063_v1 }
0x156b   : > { %11800 = vmatprep.subr.bf16.mxu1 %v13063_v1 }
0x156e   : > { %11801 = vmatpush3.bf16.msra.mxu1 %v12730_v21 }
0x156f   : > { %11812 = vmatprep.subr.bf16.mxu1 %v13063_v1 }
0x1571   : > { %11803 = vmatmul.mubr.msk.bf16.vlgmr.msra.gmra.mrb[68].mxu1 %vm879_vm5, %v13676_v53 }
0x1572   : > { %11814 = vmatprep.mubr.msk.bf16.mxu1 %vm13064_vm0, %v13063_v1 }
0x1634   : > { %v2702_v18 = vpop.f32.mrb[60].mxu1 }
0x1635   : > { %v2708_v22 = vmul.f32 0.35355338, %v2702_v18  ;;  %v11774_v23 = vpop.f32.mrb[61].mxu1 }
0x1636   : > { %v2705_v24 = vpop.f32.mrb[62].mxu1 }
0x1637   : > { %v11775_v25 = vpop.f32.mrb[63].mxu1  ;;  %v2709_v26 = vsel %vm13395_vm7, -1e+30, %v2708_v22 }
0x1638   : > { %v2710_v28 = vsel %vm1056_vm6, %v2709_v26, -inf }
0x1639   : > { %2711 = vmax.xlane.f32.xlu0 %v2710_v28  ;;  %v10545_v28 = vld [vmem:[%s15287_s9 + $0x14] sm:$0xf] }
0x163c   : > { %v2830_v29 = vpop.f32.mrb[64].mxu1 }
0x163d   : > { %v11788_v30 = vpop.f32.mrb[65].mxu1  ;;  %v2831_v8 = vadd.f32 %v10521_v7, %v2830_v29  ;;  %v3082_v29 = vsel %vm720_vm1, %v10545_v28, 0 }
0x163e   : > { %v2833_v32 = vpop.f32.mrb[66].mxu1 }
0x163f   : > { %v11789_v33 = vpop.f32.mrb[67].mxu1  ;;  %v2966_v11 = vpack.c.bf16 %v2831_v8, %v2831_v8  ;;  %v10553_v8 = vld [vmem:[%s15286_s8 + $0xe] ss:$0 sm:$0xff] }
0x1640   : > { %v10515_v33 = vld [vmem:[%s15287_s9 + $0x10] sm:$0xf] }
0x1644   : > { %v2960_v35 = vpop.f32.mrb[68].mxu1 }
0x1645   : > { %v2961_v37 = vadd.f32 %v10539_v34, %v2960_v35  ;;  %v11804_v38 = vpop.f32.mrb[69].mxu1 }
0x1646   : > { %v2963_v40 = vpop.f32.mrb[70].mxu1  ;;  %v12733_v38 = vld [vmem:[%s15285_s7 + $0x120] sm:$0xff]  }
0x1647   : > { %v2968_v41 = vpack.c.bf16 %v2961_v37, %v2961_v37  ;;  %v11805_v45 = vpop.f32.mrb[71].mxu1  ;;  %v3128_v37 = vsel %vm720_vm1, %v10515_v33, 0 }
0x1649   : > { %v3033_v46 = vsel %vm720_vm1, %v2968_v41, 0  ;;  %v12734_v41 = vld [vmem:[%s15285_s7 + $0x128] sm:$0xff]  }
0x164a   : > { %11813 = vmatpush3.bf16.msra.mxu1 %v3033_v46  ;;  %v12735_v46 = vld [vmem:[%s15285_s7 + $0xe0] sm:$0xff]  }
0x164b   : > { %11824 = vmatprep.subr.bf16.mxu1 %v13063_v1 }
0x16c6   : > { %v2712_v47 = vpop.xlane.xlu0 %2711 }
0x16c7   : > { %v2713_v48 = vsub.f32 %v2709_v26, %v2712_v47 }
0x16c9   : > { %v2714_v49 = vmul.f32 1.442695, %v2713_v48 }
0x16cb   : > { %12873 = vpow2.f32 %v2714_v49 }
0x16d5   : > { %v12874_v51 = vpop.eup %12873 }
0x16d6   : > { %v2716_v39 = vsel %vm1056_vm6, %v12874_v51, 0.0 }
0x16d7   : > { %2717 = vadd.xlane.f32.xlu1 %v2716_v39  ;;  %v12736_v39 = vld [vmem:[%s15285_s7 + $0xe8] sm:$0xff]  }
0x1764   : > { %v2718_v54 = vpop.xlane.xlu1 %2717 }
0x1765   : > { %12875 = vrcp.f32 %v2718_v54 }
0x176f   : > { %v12876_v55 = vpop.eup %12875 }
0x1770   : > { %v2720_v56 = vmul.f32 %v12876_v55, %v12874_v51  ;;  %v12737_v55 = vld [vmem:[%s15285_s7 + $0x160] sm:$0xff]  }
0x1772   : > { %v2721_v57 = vpack.c.bf16 %v2720_v56, %v2720_v56 }
0x1774   : > { %11779 = vmatmul.mubr.msk.bf16.vlgmr.msra.gmra.mrb[64].mxu0 %vm1056_vm6, %v2721_v57 }
0x1775   : > { %11791 = vmatpush3.bf16.msra.mxu0 %v12731_v31  ;;  %11794 = vmatprep.mubr.msk.bf16.mxu0 %vm13064_vm0, %v13063_v1 }
0x1776   : > { %11792 = vmatprep.subr.bf16.mxu0 %v13063_v1 }
0x1779   : > { %11793 = vmatpush3.bf16.msra.mxu0 %v12732_v58  ;;  %v12738_v58 = vld [vmem:[%s15285_s7 + $0x168] sm:$0xff]  }
0x177a   : > { %11806 = vmatprep.subr.bf16.mxu0 %v13063_v1 }
0x177c   : > { %11795 = vmatmul.mubr.msk.bf16.vlgmr.msra.gmra.mrb[68].mxu0 %vm879_vm5, %v13676_v53 }
0x177d   : > { %11808 = vmatprep.mubr.msk.bf16.mxu0 %vm13064_vm0, %v13063_v1 }
0x1847   : > { %v2762_v36 = vpop.f32.mrb[64].mxu0 }
0x1848   : > { %v11780_v60 = vpop.f32.mrb[65].mxu0  ;;  %v2768_v40 = vpack.c.bf16 %v2762_v36, %v2762_v36  ;;  %v10562_v36 = vld [vmem:[%s15286_s8 + $0x12] ss:$0 sm:$0xff] }
0x1849   : > { %v2765_v61 = vpop.f32.mrb[66].mxu0 }
0x184a   : > { %v11781_v62 = vpop.f32.mrb[67].mxu0 }
0x184f   : > { %v2895_v0 = vpop.f32.mrb[68].mxu0 }
0x1850   : > { %v2896_v2 = vadd.f32 %v10530_v63, %v2895_v0  ;;  %v11796_v3 = vpop.f32.mrb[69].mxu0 }
0x1851   : > { %v2898_v4 = vpop.f32.mrb[70].mxu0 }
0x1852   : > { %v2967_v5 = vpack.c.bf16 %v2896_v2, %v2896_v2  ;;  %v11797_v6 = vpop.f32.mrb[71].mxu0 }
0x1854   : > { %v2973_v52 = vsel %vm1056_vm6, %v2967_v5, 0 }
0x1855   : > { %11807 = vmatpush3.bf16.xpose.msra.mxu0 %v2973_v52 }
0x1856   : > { %11818 = vmatprep.subr.bf16.mxu0 %v13063_v1 }
0x185c   : > { %11809 = vmatmul.mubr.msk.bf16.vlgmr.msra.gmra.mrb[72].mxu0 %vm1056_vm6, %v2966_v11 }
0x185d   : > { %11820 = vmatprep.mubr.msk.bf16.mxu0 %vm13064_vm0, %v13063_v1  ;;  %11819 = vmatpush3.bf16.msra.mxu0 %v3082_v29 }
0x185e   : > { %11830 = vmatprep.subr.bf16.mxu0 %v13063_v1 }
0x192f   : > { %v3009_v12 = vpop.f32.mrb[72].mxu0 }
0x1930   : > { %v3015_v13 = vmul.f32 0.35355338, %v3009_v12  ;;  %v11810_v14 = vpop.f32.mrb[73].mxu0 }
0x1931   : > { %v3012_v16 = vpop.f32.mrb[74].mxu0 }
0x1932   : > { %v11811_v17 = vpop.f32.mrb[75].mxu0  ;;  %v3016_v21 = vsel %vm13395_vm7, -1e+30, %v3015_v13 }
0x1933   : > { %v3017_v18 = vsel %vm1056_vm6, %v3016_v21, -inf }
0x1934   : > { %3018 = vmax.xlane.f32.xlu0 %v3017_v18 }
0x19c1   : > { %v3019_v22 = vpop.xlane.xlu0 %3018 }
0x19c2   : > { %v3020_v23 = vsub.f32 %v3016_v21, %v3019_v22  ;;  %v10571_v21 = vld [vmem:[%s15286_s8 + $0x16] ss:$0 sm:$0xff] }
0x19c4   : > { %v3021_v24 = vmul.f32 1.442695, %v3020_v23 }
0x19c6   : > { %12877 = vpow2.f32 %v3021_v24 }
0x19d0   : > { %v12878_v25 = vpop.eup %12877 }
0x19d1   : > { %v3023_v26 = vsel %vm1056_vm6, %v12878_v25, 0.0 }
0x19d2   : > { %3024 = vadd.xlane.f32.xlu1 %v3023_v26 }
0x1a5f   : > { %v3025_v30 = vpop.xlane.xlu1 %3024 }
0x1a60   : > { %12879 = vrcp.f32 %v3025_v30 }
0x1a6a   : > { %v12880_v32 = vpop.eup %12879 }
0x1a6b   : > { %v3027_v34 = vmul.f32 %v12880_v32, %v12878_v25 }
0x1a6d   : > { %v3028_v35 = vpack.c.bf16 %v3027_v34, %v3027_v34 }
0x1a6f   : > { %11815 = vmatmul.mubr.msk.bf16.vlgmr.msra.gmra.mrb[72].mxu1 %vm1056_vm6, %v3028_v35 }
0x1a70   : > { %11825 = vmatpush3.bf16.msra.mxu1 %v3128_v37  ;;  %11826 = vmatprep.mubr.msk.bf16.mxu1 %vm13064_vm0, %v13063_v1 }
0x1a71   : > { %11838 = vmatprep.subr.bf16.mxu1 %v13063_v1 }
0x1a77   : > { %11827 = vmatmul.mubr.msk.bf16.vlgmr.msra.gmra.mrb[76].mxu1 %vm1056_vm6, %v2768_v40 }
0x1a78   : > { %11839 = vmatpush3.bf16.msra.mxu1 %v12733_v38  ;;  %11842 = vmatprep.mubr.msk.bf16.mxu1 %vm13064_vm0, %v13063_v1 }
0x1a79   : > { %11840 = vmatprep.subr.bf16.mxu1 %v13063_v1 }
0x1a7c   : > { %11841 = vmatpush3.bf16.msra.mxu1 %v12734_v41 }
0x1a7d   : > { %11854 = vmatprep.subr.bf16.mxu1 %v13063_v1 }
0x1a7f   : > { %11843 = vmatmul.mubr.msk.bf16.vlgmr.msra.gmra.mrb[80].mxu1 %vm879_vm5, %v13676_v53 }
0x1a80   : > { %11856 = vmatprep.mubr.msk.bf16.mxu1 %vm13064_vm0, %v13063_v1 }
0x1b42   : > { %v3069_v45 = vpop.f32.mrb[72].mxu1 }
0x1b43   : > { %v3075_v47 = vpack.c.bf16 %v3069_v45, %v3069_v45  ;;  %v11816_v48 = vpop.f32.mrb[73].mxu1 }
0x1b44   : > { %v3072_v49 = vpop.f32.mrb[74].mxu1 }
0x1b45   : > { %v11817_v51 = vpop.f32.mrb[75].mxu1  ;;  %11821 = vmatmul.mubr.msk.bf16.vlgmr.msra.gmra.mrb[76].mxu0 %vm1056_vm6, %v3075_v47  ;;  %v10577_v47 = vld [vmem:[%s15287_s9 + $0x18] sm:$0xf] }
0x1b46   : > { %11831 = vmatpush3.bf16.msra.mxu0 %v12735_v46  ;;  %11834 = vmatprep.mubr.msk.bf16.mxu0 %vm13064_vm0, %v13063_v1  ;;  %v3481_v48 = vsel %vm720_vm1, %v10577_v47, 0 }
0x1b47   : > { %11832 = vmatprep.subr.bf16.mxu0 %v13063_v1 }
0x1b4a   : > { %v3164_v54 = vpop.f32.mrb[76].mxu1  ;;  %11833 = vmatpush3.bf16.msra.mxu0 %v12736_v39 }
0x1b4b   : > { %v11828_v56 = vpop.f32.mrb[77].mxu1  ;;  %11846 = vmatprep.subr.bf16.mxu0 %v13063_v1 }
0x1b4c   : > { %v3167_v31 = vpop.f32.mrb[78].mxu1  ;;  %v12740_v56 = vld [vmem:[%s15285_s7 + $0xf8] sm:$0xff]  }
0x1b4d   : > { %v11829_v57 = vpop.f32.mrb[79].mxu1  ;;  %11835 = vmatmul.mubr.msk.bf16.vlgmr.msra.gmra.mrb[80].mxu0 %vm879_vm5, %v13676_v53  ;;  %v12741_v31 = vld [vmem:[%s15285_s7 + $0x170] sm:$0xff]  }
0x1b4e   : > { %11847 = vmatpush3.bf16.msra.mxu0 %v12737_v55  ;;  %11850 = vmatprep.mubr.msk.bf16.mxu0 %vm13064_vm0, %v13063_v1  ;;  %v12742_v57 = vld [vmem:[%s15285_s7 + $0x178] sm:$0xff]  }
0x1b4f   : > { %11848 = vmatprep.subr.bf16.mxu0 %v13063_v1 }
0x1b52   : > { %v3294_v60 = vpop.f32.mrb[80].mxu1  ;;  %11849 = vmatpush3.bf16.msra.mxu0 %v12738_v58 }
0x1b53   : > { %v3295_v61 = vadd.f32 %v10562_v36, %v3294_v60  ;;  %v11844_v62 = vpop.f32.mrb[81].mxu1  ;;  %11860 = vmatprep.subr.bf16.mxu0 %v13063_v1  ;;  %v12743_v36 = vld [vmem:[%s15285_s7 + $0x130] sm:$0xff]  }
0x1b54   : > { %v3297_v63 = vpop.f32.mrb[82].mxu1 }
0x1b55   : > { %v3366_v0 = vpack.c.bf16 %v3295_v61, %v3295_v61  ;;  %v11845_v2 = vpop.f32.mrb[83].mxu1  ;;  %11851 = vmatmul.mubr.msk.bf16.vlgmr.msra.gmra.mrb[84].mxu0 %vm879_vm5, %v13676_v53 }
0x1b56   : > { %11862 = vmatprep.mubr.msk.bf16.mxu0 %vm13064_vm0, %v13063_v1 }
0x1b57   : > { %v3372_v3 = vsel %vm1056_vm6, %v3366_v0, 0  ;;  %v12744_v0 = vld [vmem:[%s15285_s7 + $0x138] sm:$0xff]  }
0x1b58   : > { %11855 = vmatpush3.bf16.xpose.msra.mxu1 %v3372_v3 }
0x1b59   : > { %11866 = vmatprep.subr.bf16.mxu1 %v13063_v1 }
0x1c18   : > { %v3118_v4 = vpop.f32.mrb[76].mxu0 }
0x1c19   : > { %v13834_v5 = vadd.f32 %v3164_v54, %v3118_v4  ;;  %v11822_v6 = vpop.f32.mrb[77].mxu0  ;;  %v12739_v54 = vld [vmem:[%s15285_s7 + $0xf0] sm:$0xff]  }
0x1c1a   : > { %v3121_v7 = vpop.f32.mrb[78].mxu0 }
0x1c1b   : > { %v11823_v52 = vpop.f32.mrb[79].mxu0  ;;  %v10602_v7 = vld [vmem:[%s15286_s8 + $0x17] ss:$0 sm:$0xff] }
0x1c20   : > { %v3229_v11 = vpop.f32.mrb[80].mxu0 }
0x1c21   : > { %v3230_v12 = vadd.f32 %v10553_v8, %v3229_v11  ;;  %v11836_v13 = vpop.f32.mrb[81].mxu0 }
0x1c22   : > { %v3232_v14 = vpop.f32.mrb[82].mxu0 }
0x1c23   : > { %v3365_v16 = vpack.c.bf16 %v3230_v12, %v3230_v12  ;;  %v11837_v17 = vpop.f32.mrb[83].mxu0 }
0x1c25   : > { %11857 = vmatmul.mubr.msk.bf16.vlgmr.msra.gmra.mrb[84].mxu1 %vm1056_vm6, %v3365_v16 }
0x1c26   : > { %11868 = vmatprep.mubr.msk.bf16.mxu1 %vm13064_vm0, %v13063_v1  ;;  %11867 = vmatpush3.bf16.msra.mxu1 %v3481_v48 }
0x1c27   : > { %11880 = vmatprep.subr.bf16.mxu1 %v13063_v1 }
0x1c28   : > { %v3359_v18 = vpop.f32.mrb[84].mxu0 }
0x1c29   : > { %v3360_v22 = vadd.f32 %v10571_v21, %v3359_v18  ;;  %v11852_v23 = vpop.f32.mrb[85].mxu0 }
0x1c2a   : > { %v3362_v24 = vpop.f32.mrb[86].mxu0  ;;  %v10593_v23 = vld [vmem:[%s15286_s8 + $0x13] ss:$0 sm:$0xff] }
0x1c2b   : > { %v3367_v25 = vpack.c.bf16 %v3360_v22, %v3360_v22  ;;  %v11853_v26 = vpop.f32.mrb[87].mxu0 }
0x1c2d   : > { %v3432_v28 = vsel %vm720_vm1, %v3367_v25, 0 }
0x1c2e   : > { %11861 = vmatpush3.bf16.msra.mxu0 %v3432_v28 }
0x1c2f   : > { %11872 = vmatprep.subr.bf16.mxu0 %v13063_v1 }
0x1cf8   : > { %v3408_v29 = vpop.f32.mrb[84].mxu1 }
0x1cf9   : > { %v3414_v30 = vmul.f32 0.35355338, %v3408_v29  ;;  %v11858_v32 = vpop.f32.mrb[85].mxu1 }
0x1cfa   : > { %v3411_v33 = vpop.f32.mrb[86].mxu1  ;;  %v10584_v32 = vld [vmem:[%s15286_s8 + $0xf] ss:$0 sm:$0xff] }
0x1cfb   : > { %v11859_v34 = vpop.f32.mrb[87].mxu1  ;;  %v3415_v35 = vsel %vm13395_vm7, -1e+30, %v3414_v30 }
0x1cfc   : > { %v3416_v37 = vsel %vm1056_vm6, %v3415_v35, -inf }
0x1cfd   : > { %3417 = vmax.xlane.f32.xlu0 %v3416_v37 }
0x1d8a   : > { %v3418_v38 = vpop.xlane.xlu0 %3417 }
0x1d8b   : > { %v3419_v40 = vsub.f32 %v3415_v35, %v3418_v38 }
0x1d8d   : > { %v3420_v41 = vmul.f32 1.442695, %v3419_v40 }
0x1d8f   : > { %12881 = vpow2.f32 %v3420_v41 }
0x1d99   : > { %v12882_v45 = vpop.eup %12881 }
0x1d9a   : > { %v3422_v46 = vsel %vm1056_vm6, %v12882_v45, 0.0 }
0x1d9b   : > { %3423 = vadd.xlane.f32.xlu1 %v3422_v46 }
0x1e28   : > { %v3424_v49 = vpop.xlane.xlu1 %3423 }
0x1e29   : > { %12883 = vrcp.f32 %v3424_v49 }
0x1e33   : > { %v12884_v51 = vpop.eup %12883 }
0x1e34   : > { %v3426_v39 = vmul.f32 %v12884_v51, %v12882_v45 }
0x1e36   : > { %v3427_v55 = vpack.c.bf16 %v3426_v39, %v3426_v39 }
0x1e38   : > { %11863 = vmatmul.mubr.msk.bf16.vlgmr.msra.gmra.mrb[88].mxu0 %vm1056_vm6, %v3427_v55 }
0x1e39   : > { %11873 = vmatpush3.bf16.msra.mxu0 %v12739_v54  ;;  %11876 = vmatprep.mubr.msk.bf16.mxu0 %vm13064_vm0, %v13063_v1  ;;  %v10608_v54 = vld [vmem:[%s15287_s9 + $0x1c] sm:$0xf] }
0x1e3a   : > { %11874 = vmatprep.subr.bf16.mxu0 %v13063_v1  ;;  %v3835_v55 = vsel %vm720_vm1, %v10608_v54, 0 }
0x1e3d   : > { %11875 = vmatpush3.bf16.msra.mxu0 %v12740_v56 }
0x1e3e   : > { %11888 = vmatprep.subr.bf16.mxu0 %v13063_v1 }
0x1e40   : > { %11877 = vmatmul.mubr.msk.bf16.vlgmr.msra.gmra.mrb[92].mxu0 %vm879_vm5, %v13676_v53 }
0x1e41   : > { %11889 = vmatpush3.bf16.msra.mxu0 %v12741_v31  ;;  %11892 = vmatprep.mubr.msk.bf16.mxu0 %vm13064_vm0, %v13063_v1 }
0x1e42   : > { %11890 = vmatprep.subr.bf16.mxu0 %v13063_v1 }
0x1e45   : > { %11891 = vmatpush3.bf16.msra.mxu0 %v12742_v57 }
0x1e46   : > { %11902 = vmatprep.subr.bf16.mxu0 %v13063_v1 }
0x1e48   : > { %11893 = vmatmul.mubr.msk.bf16.vlgmr.msra.gmra.mrb[96].mxu0 %vm879_vm5, %v13676_v53 }
0x1e49   : > { %11904 = vmatprep.mubr.msk.bf16.mxu0 %vm13064_vm0, %v13063_v1 }
0x1f0b   : > { %v3468_v58 = vpop.f32.mrb[88].mxu0 }
0x1f0c   : > { %v3474_v60 = vpack.c.bf16 %v3468_v58, %v3468_v58  ;;  %v11864_v61 = vpop.f32.mrb[89].mxu0 }
0x1f0d   : > { %v3471_v62 = vpop.f32.mrb[90].mxu0 }
0x1f0e   : > { %v11865_v63 = vpop.f32.mrb[91].mxu0  ;;  %11869 = vmatmul.mubr.msk.bf16.vlgmr.msra.gmra.mrb[88].mxu1 %vm1056_vm6, %v3474_v60 }
0x1f0f   : > { %11881 = vmatpush3.bf16.msra.mxu1 %v12743_v36  ;;  %11884 = vmatprep.mubr.msk.bf16.mxu1 %vm13064_vm0, %v13063_v1 }
0x1f10   : > { %11882 = vmatprep.subr.bf16.mxu1 %v13063_v1 }
0x1f13   : > { %v3583_v2 = vpop.f32.mrb[92].mxu0  ;;  %11883 = vmatpush3.bf16.msra.mxu1 %v12744_v0  ;;  %v13933_v0 = vld [vmem:[%s15291_s13 + $0x8] sm:$0x3f] }
0x1f14   : > { %v11878_v3 = vpop.f32.mrb[93].mxu0  ;;  %11896 = vmatprep.subr.bf16.mxu1 %v13063_v1 }
0x1f15   : > { %v3586_v4 = vpop.f32.mrb[94].mxu0 }
0x1f16   : > { %v11879_v6 = vpop.f32.mrb[95].mxu0  ;;  %11885 = vmatmul.mubr.msk.bf16.vlgmr.msra.gmra.mrb[92].mxu1 %vm879_vm5, %v13676_v53 }
0x1f17   : > { %11898 = vmatprep.mubr.msk.bf16.mxu1 %vm13064_vm0, %v13063_v1 }
0x1f1b   : > { %v3713_v52 = vpop.f32.mrb[96].mxu0 }
0x1f1c   : > { %v3714_v8 = vadd.f32 %v10602_v7, %v3713_v52  ;;  %v11894_v11 = vpop.f32.mrb[97].mxu0 }
0x1f1d   : > { %v3716_v12 = vpop.f32.mrb[98].mxu0 }
0x1f1e   : > { %v3721_v13 = vpack.c.bf16 %v3714_v8, %v3714_v8  ;;  %v11895_v14 = vpop.f32.mrb[99].mxu0 }
0x1f20   : > { %v3786_v16 = vsel %vm720_vm1, %v3721_v13, 0 }
0x1f21   : > { %11903 = vmatpush3.bf16.msra.mxu0 %v3786_v16 }
0x1f22   : > { %11914 = vmatprep.subr.bf16.mxu0 %v13063_v1 }
0x1fe1   : > { %v3517_v17 = vpop.f32.mrb[88].mxu1 }
0x1fe2   : > { %v3523_v53 = vadd.f32 %v3517_v17, %v13834_v5  ;;  %v11870_v21 = vpop.f32.mrb[89].mxu1  ;;  %v3584_v5 = vadd.f32 %v10584_v32, %v3583_v2  ;;  %v3881_v2 = vrot.slane %v13933_v0, %v13309_v20  ;;  %v12747_v32 = vld [vmem:[%s15292_s14] sm:$0xff]  }
0x1fe3   : > { %v3520_v18 = vpop.f32.mrb[90].mxu1 }
0x1fe4   : > { %v11871_v22 = vpop.f32.mrb[91].mxu1  ;;  %v3719_v34 = vpack.c.bf16 %v3584_v5, %v3584_v5  ;;  %v12748_v5 = vld [vmem:[%s15292_s14 + $0x8] sm:$0xff]  }
0x1fe9   : > { %v3648_v24 = vpop.f32.mrb[92].mxu1 }
0x1fea   : > { %v3649_v25 = vadd.f32 %v10593_v23, %v3648_v24  ;;  %v11886_v26 = vpop.f32.mrb[93].mxu1  ;;  %v3900_v24 = vrot.slane %v13933_v0, %v13319_v27 }
0x1feb   : > { %v3651_v28 = vpop.f32.mrb[94].mxu1 }
0x1fec   : > { %v3720_v29 = vpack.c.bf16 %v3649_v25, %v3649_v25  ;;  %v11887_v30 = vpop.f32.mrb[95].mxu1  ;;  %v3905_v28 = vrot.slane %v13933_v0, %v13613_v59 }
0x1fee   : > { %v3726_v33 = vsel %vm1056_vm6, %v3720_v29, 0 }
0x1fef   : > { %11897 = vmatpush3.bf16.xpose.msra.mxu1 %v3726_v33 }
0x1ff0   : > { %11908 = vmatprep.subr.bf16.mxu1 %v13063_v1 }
0x1ff6   : > { %11899 = vmatmul.mubr.msk.bf16.vlgmr.msra.gmra.mrb[96].mxu1 %vm1056_vm6, %v3719_v34  ;;  %v12749_v34 = vld [vmem:[%s15292_s14 + $0x80] sm:$0xff]  }
0x1ff7   : > { %11910 = vmatprep.mubr.msk.bf16.mxu1 %vm13064_vm0, %v13063_v1  ;;  %11909 = vmatpush3.bf16.msra.mxu1 %v3835_v55 }
0x1ff8   : > { %11922 = vmatprep.subr.bf16.mxu1 %v13063_v1 }
0x20c9   : > { %v3762_v35 = vpop.f32.mrb[96].mxu1 }
0x20ca   : > { %v3768_v37 = vmul.f32 0.35355338, %v3762_v35  ;;  %v11900_v38 = vpop.f32.mrb[97].mxu1  ;;  %v13971_v35 = vpack.c.bf16 %v13343_v43, %v13343_v43 }
0x20cb   : > { %v3765_v40 = vpop.f32.mrb[98].mxu1  ;;  %v12751_v38 = vld [vmem:[%s15290_s12 + $0x10] sm:$0xff]  }
0x20cc   : > { %v11901_v41 = vpop.f32.mrb[99].mxu1  ;;  %v3769_v45 = vsel %vm13395_vm7, -1e+30, %v3768_v37  ;;  %v12750_v37 = vld [vmem:[%s15292_s14 + $0x88] sm:$0xff]   ;;  %v12752_v40 = vld [vmem:[%s15290_s12 + $0x18] sm:$0xff]  }
0x20cd   : > { %v3770_v46 = vsel %vm1056_vm6, %v3769_v45, -inf  ;;  %v10615_v41 = vld [vmem:[%s15289_s11 + $0x1] ss:$0 sm:$0xff] }
0x20ce   : > { %3771 = vmax.xlane.f32.xlu0 %v3770_v46 }
0x215b   : > { %v3772_v47 = vpop.xlane.xlu0 %3771 }
0x215c   : > { %v3773_v48 = vsub.f32 %v3769_v45, %v3772_v47 }
0x215e   : > { %v3774_v49 = vmul.f32 1.442695, %v3773_v48 }
0x2160   : > { %12885 = vpow2.f32 %v3774_v49 }
0x216a   : > { %v12886_v51 = vpop.eup %12885 }
0x216b   : > { %v3776_v39 = vsel %vm1056_vm6, %v12886_v51, 0.0 }
0x216c   : > { %3777 = vadd.xlane.f32.xlu1 %v3776_v39  ;;  %v12753_v39 = vld [vmem:[%s15292_s14 + $0x40] sm:$0xff]  }
0x21f9   : > { %v3778_v56 = vpop.xlane.xlu1 %3777 }
0x21fa   : > { %12887 = vrcp.f32 %v3778_v56  ;;  %v12754_v56 = vld [vmem:[%s15292_s14 + $0x48] sm:$0xff]  }
0x2204   : > { %v12888_v31 = vpop.eup %12887 }
0x2205   : > { %v3780_v57 = vmul.f32 %v12888_v31, %v12886_v51 }
0x2207   : > { %v3781_v58 = vpack.c.bf16 %v3780_v57, %v3780_v57 }
0x2209   : > { %11905 = vmatmul.mubr.msk.bf16.vlgmr.msra.gmra.mrb[100].mxu0 %vm1056_vm6, %v3781_v58 }
0x220a   : > { %11918 = vmatprep.mubr.msk.bf16.mxu0 %vm13064_vm0, %v13063_v1 }
0x22dc   : > { %v3822_v36 = vpop.f32.mrb[100].mxu0 }
0x22dd   : > { %v3828_v60 = vpack.c.bf16 %v3822_v36, %v3822_v36  ;;  %v11906_v61 = vpop.f32.mrb[101].mxu0  ;;  %v10644_v36 = vld [vmem:[%s15293_s15 + $0x8] ss:$0 sm:$0xff] }
0x22de   : > { %v3825_v62 = vpop.f32.mrb[102].mxu0 }
0x22df   : > { %v11907_v63 = vpop.f32.mrb[103].mxu0  ;;  %11911 = vmatmul.mubr.msk.bf16.vlgmr.msra.gmra.mrb[100].mxu1 %vm1056_vm6, %v3828_v60 }
0x22e0   : > { %11926 = vmatprep.mubr.msk.bf16.mxu1 %vm13064_vm0, %v13063_v1  ;;  %11923 = vmatpush3.bf16.msra.mxu1 %v12751_v38 }
0x22e1   : > { %11924 = vmatprep.subr.bf16.mxu1 %v13063_v1 }
0x22e4   : > { %11925 = vmatpush3.bf16.msra.mxu1 %v12752_v40 }
0x22e5   : > { %11938 = vmatprep.subr.bf16.mxu1 %v13063_v1 }
0x23b2   : > { %v3871_v3 = vpop.f32.mrb[100].mxu1 }
0x23b3   : > { %v3877_v4 = vadd.f32 %v3871_v3, %v3523_v53  ;;  %v11912_v6 = vpop.f32.mrb[101].mxu1  ;;  %v12745_v53 = vld [vmem:[%s15288_s10 + $0x10] sm:$0xff]  }
0x23b4   : > { %v3874_v7 = vpop.f32.mrb[102].mxu1  ;;  %11915 = vmatpush3.bf16.msra.mxu0 %v12745_v53  ;;  %v10626_v53 = vld [vmem:[%s15293_s15] ss:$0 sm:$0xff] }
0x23b5   : > { %v3882_v52 = vadd.f32 %v3881_v2, %v3877_v4  ;;  %v11913_v8 = vpop.f32.mrb[103].mxu1  ;;  %11916 = vmatprep.subr.bf16.mxu0 %v13063_v1 }
0x23b7   : > { %v3883_v11 = vadd.f32 %v3882_v52, %v13669_v50  ;;  %v12746_v50 = vld [vmem:[%s15288_s10 + $0x18] sm:$0xff]  }
0x23b8   : > { %11917 = vmatpush3.bf16.msra.mxu0 %v12746_v50 }
0x23b9   : > { %v3884_v12 = vsel %vm879_vm5, %v3883_v11, 0.0  ;;  %11930 = vmatprep.subr.bf16.mxu0 %v13063_v1 }
0x23ba   : > { %3885 = vadd.xlane.f32.xlu0 %v3884_v12 }
0x2447   : > { %v3886_v13 = vpop.xlane.xlu0 %3885 }
0x2448   : > { %v3887_v14 = vmul.f32 0.03125, %v3886_v13 }
0x244a   : > { %v3888_v16 = vsub.f32 %v3883_v11, %v3887_v14  ;;  %v10635_v11 = vld [vmem:[%s15293_s15 + $0x4] ss:$0 sm:$0xff] }
0x244c   : > { %v3889_v17 = vmul.f32 %v3888_v16, %v3888_v16 }
0x244e   : > { %v3890_v21 = vsel %vm879_vm5, %v3889_v17, 0.0 }
0x244f   : > { %3891 = vadd.xlane.f32.xlu1 %v3890_v21 }
0x24dc   : > { %v3892_v18 = vpop.xlane.xlu1 %3891 }
0x24dd   : > { %v3893_v22 = vmul.f32 0.03125, %v3892_v18 }
0x24df   : > { %v3894_v23 = vadd.f32 1e-05, %v3893_v22  ;;  %v12755_v22 = vld [vmem:[%s15292_s14 + $0x10] sm:$0xff]  }
0x24e1   : > { %12889 = vrsqrt.f32 %v3894_v23 }
0x24eb   : > { %v12890_v25 = vpop.eup %12889 }
0x24ec   : > { %v3896_v26 = vmul.f32 %v12890_v25, %v3888_v16  ;;  %v12757_v25 = vld [vmem:[%s15292_s14 + $0x90] sm:$0xff]  }
0x24ee   : > { %v3901_v29 = vmul.f32 %v3900_v24, %v3896_v26  ;;  %v12756_v24 = vld [vmem:[%s15292_s14 + $0x18] sm:$0xff]  }
0x24ef   : > { %v12758_v26 = vld [vmem:[%s15292_s14 + $0x98] sm:$0xff]  }
0x24f0   : > { %v13952_v30 = vadd.f32 %v3905_v28, %v3901_v29 }
0x24f2   : > { %v3907_v33 = vpack.c.bf16 %v13952_v30, %v13952_v30 }
0x24f4   : > { %11919 = vmatmul.mubr.msk.bf16.vlgmr.msra.gmra.mrb[104].mxu0 %vm879_vm5, %v3907_v33 }
0x24f5   : > { %11931 = vmatpush3.bf16.msra.mxu0 %v12747_v32  ;;  %11934 = vmatprep.mubr.msk.bf16.mxu0 %vm13064_vm0, %v13063_v1 }
0x24f6   : > { %11932 = vmatprep.subr.bf16.mxu0 %v13063_v1 }
0x24f9   : > { %11933 = vmatpush3.bf16.msra.mxu0 %v12748_v5 }
0x24fa   : > { %11946 = vmatprep.subr.bf16.mxu0 %v13063_v1 }
0x24fc   : > { %11935 = vmatmul.mubr.msk.bf16.vlgmr.msra.gmra.mrb[108].mxu0 %vm879_vm5, %v13971_v35 }
0x24fd   : > { %11947 = vmatpush3.bf16.msra.mxu0 %v12749_v34  ;;  %11950 = vmatprep.mubr.msk.bf16.mxu0 %vm13064_vm0, %v13063_v1 }
0x24fe   : > { %11948 = vmatprep.subr.bf16.mxu0 %v13063_v1 }
0x2501   : > { %11949 = vmatpush3.bf16.msra.mxu0 %v12750_v37 }
0x2502   : > { %11960 = vmatprep.subr.bf16.mxu0 %v13063_v1 }
0x2504   : > { %11951 = vmatmul.mubr.msk.bf16.vlgmr.msra.gmra.mrb[112].mxu0 %vm879_vm5, %v13971_v35 }
0x2505   : > { %11962 = vmatprep.mubr.msk.bf16.mxu0 %vm13064_vm0, %v13063_v1 }
0x25c7   : > { %v3970_v45 = vpop.f32.mrb[104].mxu0 }
0x25c8   : > { %v3971_v46 = vadd.f32 %v10615_v41, %v3970_v45  ;;  %v11920_v47 = vpop.f32.mrb[105].mxu0 }
0x25c9   : > { %v3973_v48 = vpop.f32.mrb[106].mxu0 }
0x25ca   : > { %v3976_v49 = vmax.f32 %v3971_v46, 0.0  ;;  %v11921_v51 = vpop.f32.mrb[107].mxu0  ;;  %v10673_v46 = vld [vmem:[%s15293_s15 + $0x9] ss:$0 sm:$0xff] }
0x25cc   : > { %v3977_v54 = vpack.c.bf16 %v3976_v49, %v3976_v49 }
0x25ce   : > { %11927 = vmatmul.mubr.msk.bf16.vlgmr.msra.gmra.mrb[104].mxu1 %vm879_vm5, %v3977_v54 }
0x25cf   : > { %v4152_v55 = vpop.f32.mrb[108].mxu0  ;;  %11939 = vmatpush3.bf16.msra.mxu1 %v12753_v39  ;;  %11942 = vmatprep.mubr.msk.bf16.mxu1 %vm13064_vm0, %v13063_v1 }
0x25d0   : > { %v11936_v31 = vpop.f32.mrb[109].mxu0  ;;  %11940 = vmatprep.subr.bf16.mxu1 %v13063_v1  ;;  %v4153_v18 = vadd.f32 %v10626_v53, %v4152_v55  ;;  %v10655_v53 = vld [vmem:[%s15293_s15 + $0x1] ss:$0 sm:$0xff] }
0x25d1   : > { %v4155_v57 = vpop.f32.mrb[110].mxu0 }
0x25d2   : > { %v11937_v58 = vpop.f32.mrb[111].mxu0  ;;  %v4288_v23 = vpack.c.bf16 %v4153_v18, %v4153_v18 }
0x25d3   : > { %11941 = vmatpush3.bf16.msra.mxu1 %v12754_v56 }
0x25d4   : > { %11954 = vmatprep.subr.bf16.mxu1 %v13063_v1 }
0x25d6   : > { %11943 = vmatmul.mubr.msk.bf16.vlgmr.msra.gmra.mrb[108].mxu1 %vm879_vm5, %v13971_v35 }
0x25d7   : > { %v4282_v60 = vpop.f32.mrb[112].mxu0  ;;  %11956 = vmatprep.mubr.msk.bf16.mxu1 %vm13064_vm0, %v13063_v1 }
0x25d8   : > { %v4283_v61 = vadd.f32 %v10644_v36, %v4282_v60  ;;  %v11952_v62 = vpop.f32.mrb[113].mxu0 }
0x25d9   : > { %v4285_v63 = vpop.f32.mrb[114].mxu0 }
0x25da   : > { %v4290_v2 = vpack.c.bf16 %v4283_v61, %v4283_v61  ;;  %v11953_v3 = vpop.f32.mrb[115].mxu0  ;;  %v12759_v63 = vld [vmem:[%s15292_s14 + $0x50] sm:$0xff]  }
0x25db   : > { %v12760_v3 = vld [vmem:[%s15292_s14 + $0x58] sm:$0xff]  }
0x25dc   : > { %v4355_v4 = vsel %vm720_vm1, %v4290_v2, 0 }
0x25dd   : > { %11961 = vmatpush3.bf16.msra.mxu0 %v4355_v4 }
0x25de   : > { %11974 = vmatprep.subr.bf16.mxu0 %v13063_v1 }
0x26a1   : > { %v14018_v6 = vpop.f32.mrb[104].mxu1 }
0x26a2   : > { %v11928_v7 = vpop.f32.mrb[105].mxu1 }
0x26a3   : > { %v4039_v52 = vpop.f32.mrb[106].mxu1 }
0x26a4   : > { %v11929_v8 = vpop.f32.mrb[107].mxu1 }
0x26a9   : > { %v4217_v12 = vpop.f32.mrb[108].mxu1 }
0x26aa   : > { %v4218_v13 = vadd.f32 %v10635_v11, %v4217_v12  ;;  %v11944_v14 = vpop.f32.mrb[109].mxu1  ;;  %v10664_v11 = vld [vmem:[%s15293_s15 + $0x5] ss:$0 sm:$0xff] }
0x26ab   : > { %v4220_v16 = vpop.f32.mrb[110].mxu1 }
0x26ac   : > { %v4289_v17 = vpack.c.bf16 %v4218_v13, %v4218_v13  ;;  %v11945_v21 = vpop.f32.mrb[111].mxu1 }
0x26ae   : > { %v4295_v50 = vsel %vm1056_vm6, %v4289_v17, 0 }
0x26af   : > { %11955 = vmatpush3.bf16.xpose.msra.mxu1 %v4295_v50 }
0x26b0   : > { %11966 = vmatprep.subr.bf16.mxu1 %v13063_v1 }
0x26b6   : > { %11957 = vmatmul.mubr.msk.bf16.vlgmr.msra.gmra.mrb[112].mxu1 %vm1056_vm6, %v4288_v23 }
0x26b7   : > { %11967 = vmatpush3.bf16.msra.mxu1 %v12755_v22  ;;  %11970 = vmatprep.mubr.msk.bf16.mxu1 %vm13064_vm0, %v13063_v1 }
0x26b8   : > { %11968 = vmatprep.subr.bf16.mxu1 %v13063_v1 }
0x26bb   : > { %11969 = vmatpush3.bf16.msra.mxu1 %v12756_v24 }
0x26bc   : > { %11982 = vmatprep.subr.bf16.mxu1 %v13063_v1 }
0x26be   : > { %11971 = vmatmul.mubr.msk.bf16.vlgmr.msra.gmra.mrb[116].mxu1 %vm879_vm5, %v13971_v35 }
0x26bf   : > { %11983 = vmatpush3.bf16.msra.mxu1 %v12757_v25  ;;  %11986 = vmatprep.mubr.msk.bf16.mxu1 %vm13064_vm0, %v13063_v1 }
0x26c0   : > { %11984 = vmatprep.subr.bf16.mxu1 %v13063_v1 }
0x26c3   : > { %11985 = vmatpush3.bf16.msra.mxu1 %v12758_v26 }
0x26c4   : > { %11996 = vmatprep.subr.bf16.mxu1 %v13063_v1 }
0x26c6   : > { %11987 = vmatmul.mubr.msk.bf16.vlgmr.msra.gmra.mrb[120].mxu1 %vm879_vm5, %v13971_v35 }
0x26c7   : > { %11998 = vmatprep.mubr.msk.bf16.mxu1 %vm13064_vm0, %v13063_v1 }
0x2789   : > { %v4331_v28 = vpop.f32.mrb[112].mxu1 }
0x278a   : > { %v4337_v29 = vmul.f32 0.35355338, %v4331_v28  ;;  %v11958_v32 = vpop.f32.mrb[113].mxu1 }
0x278b   : > { %v4334_v33 = vpop.f32.mrb[114].mxu1 }
0x278c   : > { %v11959_v5 = vpop.f32.mrb[115].mxu1  ;;  %v4338_v34 = vsel %vm13395_vm7, -1e+30, %v4337_v29 }
0x278d   : > { %v4339_v37 = vsel %vm1056_vm6, %v4338_v34, -inf }
0x278e   : > { %4340 = vmax.xlane.f32.xlu0 %v4339_v37 }
0x2791   : > { %v4458_v38 = vpop.f32.mrb[116].mxu1 }
0x2792   : > { %v11972_v40 = vpop.f32.mrb[117].mxu1  ;;  %v4459_v18 = vadd.f32 %v10655_v53, %v4458_v38 }
0x2793   : > { %v4461_v41 = vpop.f32.mrb[118].mxu1  ;;  %v10679_v40 = vld [vmem:[%s15294_s16 + $0x4] sm:$0xf] }
0x2794   : > { %v11973_v45 = vpop.f32.mrb[119].mxu1  ;;  %v4594_v22 = vpack.c.bf16 %v4459_v18, %v4459_v18  ;;  %v4710_v41 = vsel %vm720_vm1, %v10679_v40, 0 }
0x2799   : > { %v4588_v47 = vpop.f32.mrb[120].mxu1 }
0x279a   : > { %v4589_v48 = vadd.f32 %v10673_v46, %v4588_v47  ;;  %v11988_v49 = vpop.f32.mrb[121].mxu1  ;;  %v4398_v47 = vld [vmem:[%s15294_s16] sm:$0xf] }
0x279b   : > { %v4591_v51 = vpop.f32.mrb[122].mxu1 }
0x279c   : > { %v4596_v39 = vpack.c.bf16 %v4589_v48, %v4589_v48  ;;  %v11989_v54 = vpop.f32.mrb[123].mxu1  ;;  %v4756_v51 = vsel %vm720_vm1, %v4398_v47, 0 }
0x279e   : > { %v4661_v55 = vsel %vm720_vm1, %v4596_v39, 0  ;;  %v12761_v39 = vld [vmem:[%s15292_s14 + $0x60] sm:$0xff]  }
0x279f   : > { %11997 = vmatpush3.bf16.msra.mxu1 %v4661_v55  ;;  %v12762_v55 = vld [vmem:[%s15292_s14 + $0x68] sm:$0xff]  }
0x27a0   : > { %12008 = vmatprep.subr.bf16.mxu1 %v13063_v1 }
0x281b   : > { %v4341_v56 = vpop.xlane.xlu0 %4340 }
0x281c   : > { %v4342_v31 = vsub.f32 %v4338_v34, %v4341_v56 }
0x281e   : > { %v4343_v57 = vmul.f32 1.442695, %v4342_v31  ;;  %v12763_v31 = vld [vmem:[%s15292_s14 + $0x20] sm:$0xff]  }
0x2820   : > { %12891 = vpow2.f32 %v4343_v57 }
0x282a   : > { %v12892_v58 = vpop.eup %12891 }
0x282b   : > { %v4345_v36 = vsel %vm1056_vm6, %v12892_v58, 0.0 }
0x282c   : > { %4346 = vadd.xlane.f32.xlu1 %v4345_v36 }
0x28b9   : > { %v4347_v60 = vpop.xlane.xlu1 %4346 }
0x28ba   : > { %12893 = vrcp.f32 %v4347_v60 }
0x28c4   : > { %v12894_v61 = vpop.eup %12893 }
0x28c5   : > { %v4349_v62 = vmul.f32 %v12894_v61, %v12892_v58  ;;  %v12764_v61 = vld [vmem:[%s15292_s14 + $0x28] sm:$0xff]  }
0x28c7   : > { %v4350_v2 = vpack.c.bf16 %v4349_v62, %v4349_v62 }
0x28c9   : > { %11963 = vmatmul.mubr.msk.bf16.vlgmr.msra.gmra.mrb[116].mxu0 %vm1056_vm6, %v4350_v2 }
0x28ca   : > { %11975 = vmatpush3.bf16.msra.mxu0 %v12759_v63  ;;  %11978 = vmatprep.mubr.msk.bf16.mxu0 %vm13064_vm0, %v13063_v1  ;;  %v12765_v63 = vld [vmem:[%s15292_s14 + $0xa0] sm:$0xff]  }
0x28cb   : > { %11976 = vmatprep.subr.bf16.mxu0 %v13063_v1 }
0x28ce   : > { %11977 = vmatpush3.bf16.msra.mxu0 %v12760_v3 }
0x28cf   : > { %11990 = vmatprep.subr.bf16.mxu0 %v13063_v1 }
0x28d1   : > { %11979 = vmatmul.mubr.msk.bf16.vlgmr.msra.gmra.mrb[120].mxu0 %vm879_vm5, %v13971_v35 }
0x28d2   : > { %11992 = vmatprep.mubr.msk.bf16.mxu0 %vm13064_vm0, %v13063_v1 }
0x299c   : > { %v4391_v4 = vpop.f32.mrb[116].mxu0 }
0x299d   : > { %v11964_v7 = vpop.f32.mrb[117].mxu0  ;;  %v4397_v54 = vpack.c.bf16 %v4391_v4, %v4391_v4 }
0x299e   : > { %v4394_v52 = vpop.f32.mrb[118].mxu0  ;;  %v12766_v7 = vld [vmem:[%s15292_s14 + $0xa8] sm:$0xff]  }
0x299f   : > { %v11965_v8 = vpop.f32.mrb[119].mxu0  ;;  %v10696_v52 = vld [vmem:[%s15293_s15 + $0x6] ss:$0 sm:$0xff] }
0x29a4   : > { %v4523_v12 = vpop.f32.mrb[120].mxu0 }
0x29a5   : > { %v4524_v13 = vadd.f32 %v10664_v11, %v4523_v12  ;;  %v11980_v14 = vpop.f32.mrb[121].mxu0 }
0x29a6   : > { %v4526_v16 = vpop.f32.mrb[122].mxu0 }
0x29a7   : > { %v4595_v17 = vpack.c.bf16 %v4524_v13, %v4524_v13  ;;  %v11981_v21 = vpop.f32.mrb[123].mxu0 }
0x29a9   : > { %v4601_v50 = vsel %vm1056_vm6, %v4595_v17, 0 }
0x29aa   : > { %11991 = vmatpush3.bf16.xpose.msra.mxu0 %v4601_v50 }
0x29ab   : > { %12002 = vmatprep.subr.bf16.mxu0 %v13063_v1 }
0x29b1   : > { %11993 = vmatmul.mubr.msk.bf16.vlgmr.msra.gmra.mrb[124].mxu0 %vm1056_vm6, %v4594_v22 }
0x29b2   : > { %12004 = vmatprep.mubr.msk.bf16.mxu0 %vm13064_vm0, %v13063_v1  ;;  %12003 = vmatpush3.bf16.msra.mxu0 %v4710_v41 }
0x29b3   : > { %12014 = vmatprep.subr.bf16.mxu0 %v13063_v1 }
0x2a84   : > { %v4637_v23 = vpop.f32.mrb[124].mxu0 }
0x2a85   : > { %v4643_v24 = vmul.f32 0.35355338, %v4637_v23  ;;  %v11994_v25 = vpop.f32.mrb[125].mxu0  ;;  %v10687_v23 = vld [vmem:[%s15293_s15 + $0x2] ss:$0 sm:$0xff] }
0x2a86   : > { %v4640_v26 = vpop.f32.mrb[126].mxu0 }
0x2a87   : > { %v11995_v28 = vpop.f32.mrb[127].mxu0  ;;  %v4644_v29 = vsel %vm13395_vm7, -1e+30, %v4643_v24 }
0x2a88   : > { %v4645_v32 = vsel %vm1056_vm6, %v4644_v29, -inf }
0x2a89   : > { %4646 = vmax.xlane.f32.xlu0 %v4645_v32 }
0x2b16   : > { %v4647_v33 = vpop.xlane.xlu0 %4646 }
0x2b17   : > { %v4648_v5 = vsub.f32 %v4644_v29, %v4647_v33  ;;  %v10705_v33 = vld [vmem:[%s15293_s15 + $0xa] ss:$0 sm:$0xff] }
0x2b19   : > { %v4649_v34 = vmul.f32 1.442695, %v4648_v5 }
0x2b1b   : > { %12895 = vpow2.f32 %v4649_v34 }
0x2b25   : > { %v12896_v37 = vpop.eup %12895 }
0x2b26   : > { %v4651_v38 = vsel %vm1056_vm6, %v12896_v37, 0.0 }
0x2b27   : > { %4652 = vadd.xlane.f32.xlu1 %v4651_v38 }
0x2bb4   : > { %v4653_v45 = vpop.xlane.xlu1 %4652 }
0x2bb5   : > { %12897 = vrcp.f32 %v4653_v45 }
0x2bbf   : > { %v12898_v46 = vpop.eup %12897 }
0x2bc0   : > { %v4655_v48 = vmul.f32 %v12898_v46, %v12896_v37 }
0x2bc2   : > { %v4656_v49 = vpack.c.bf16 %v4655_v48, %v4655_v48 }
0x2bc4   : > { %11999 = vmatmul.mubr.msk.bf16.vlgmr.msra.gmra.mrb[124].mxu1 %vm1056_vm6, %v4656_v49 }
0x2bc5   : > { %12009 = vmatpush3.bf16.msra.mxu1 %v4756_v51  ;;  %12010 = vmatprep.mubr.msk.bf16.mxu1 %vm13064_vm0, %v13063_v1 }
0x2bc6   : > { %12022 = vmatprep.subr.bf16.mxu1 %v13063_v1 }
0x2bcc   : > { %12011 = vmatmul.mubr.msk.bf16.vlgmr.msra.gmra.mrb[128].mxu1 %vm1056_vm6, %v4397_v54 }
0x2bcd   : > { %12023 = vmatpush3.bf16.msra.mxu1 %v12761_v39  ;;  %12026 = vmatprep.mubr.msk.bf16.mxu1 %vm13064_vm0, %v13063_v1 }
0x2bce   : > { %12024 = vmatprep.subr.bf16.mxu1 %v13063_v1 }
0x2bd1   : > { %12025 = vmatpush3.bf16.msra.mxu1 %v12762_v55 }
0x2bd2   : > { %12038 = vmatprep.subr.bf16.mxu1 %v13063_v1 }
0x2bd4   : > { %12027 = vmatmul.mubr.msk.bf16.vlgmr.msra.gmra.mrb[132].mxu1 %vm879_vm5, %v13971_v35 }
0x2bd5   : > { %12040 = vmatprep.mubr.msk.bf16.mxu1 %vm13064_vm0, %v13063_v1 }
0x2c97   : > { %v4697_v56 = vpop.f32.mrb[124].mxu1 }
0x2c98   : > { %v4703_v57 = vpack.c.bf16 %v4697_v56, %v4697_v56  ;;  %v12000_v58 = vpop.f32.mrb[125].mxu1 }
0x2c99   : > { %v4700_v36 = vpop.f32.mrb[126].mxu1 }
0x2c9a   : > { %v12001_v60 = vpop.f32.mrb[127].mxu1  ;;  %12005 = vmatmul.mubr.msk.bf16.vlgmr.msra.gmra.mrb[128].mxu0 %vm1056_vm6, %v4703_v57  ;;  %v10711_v36 = vld [vmem:[%s15294_s16 + $0x8] sm:$0xf] }
0x2c9b   : > { %12015 = vmatpush3.bf16.msra.mxu0 %v12763_v31  ;;  %12018 = vmatprep.mubr.msk.bf16.mxu0 %vm13064_vm0, %v13063_v1  ;;  %v5109_v60 = vsel %vm720_vm1, %v10711_v36, 0 }
0x2c9c   : > { %12016 = vmatprep.subr.bf16.mxu0 %v13063_v1 }
0x2c9f   : > { %v4792_v62 = vpop.f32.mrb[128].mxu1  ;;  %12017 = vmatpush3.bf16.msra.mxu0 %v12764_v61 }
0x2ca0   : > { %v12012_v2 = vpop.f32.mrb[129].mxu1  ;;  %12030 = vmatprep.subr.bf16.mxu0 %v13063_v1 }
0x2ca1   : > { %v4795_v3 = vpop.f32.mrb[130].mxu1  ;;  %v12767_v2 = vld [vmem:[%s15292_s14 + $0x30] sm:$0xff]  }
0x2ca2   : > { %v12013_v4 = vpop.f32.mrb[131].mxu1  ;;  %12019 = vmatmul.mubr.msk.bf16.vlgmr.msra.gmra.mrb[132].mxu0 %vm879_vm5, %v13971_v35 }
0x2ca3   : > { %12031 = vmatpush3.bf16.msra.mxu0 %v12765_v63  ;;  %12034 = vmatprep.mubr.msk.bf16.mxu0 %vm13064_vm0, %v13063_v1  ;;  %v12768_v4 = vld [vmem:[%s15292_s14 + $0x38] sm:$0xff]  }
0x2ca4   : > { %12032 = vmatprep.subr.bf16.mxu0 %v13063_v1 }
0x2ca7   : > { %v4922_v8 = vpop.f32.mrb[132].mxu1  ;;  %12033 = vmatpush3.bf16.msra.mxu0 %v12766_v7  ;;  %v12769_v7 = vld [vmem:[%s15292_s14 + $0xb0] sm:$0xff]  }
0x2ca8   : > { %v4923_v11 = vadd.f32 %v10696_v52, %v4922_v8  ;;  %v12028_v12 = vpop.f32.mrb[133].mxu1  ;;  %12044 = vmatprep.subr.bf16.mxu0 %v13063_v1  ;;  %v12770_v52 = vld [vmem:[%s15292_s14 + $0xb8] sm:$0xff]  }
0x2ca9   : > { %v4925_v13 = vpop.f32.mrb[134].mxu1 }
0x2caa   : > { %v4994_v14 = vpack.c.bf16 %v4923_v11, %v4923_v11  ;;  %v12029_v16 = vpop.f32.mrb[135].mxu1  ;;  %12035 = vmatmul.mubr.msk.bf16.vlgmr.msra.gmra.mrb[136].mxu0 %vm879_vm5, %v13971_v35  ;;  %v12771_v11 = vld [vmem:[%s15292_s14 + $0x70] sm:$0xff]  }
0x2cab   : > { %12046 = vmatprep.mubr.msk.bf16.mxu0 %vm13064_vm0, %v13063_v1 }
0x2cac   : > { %v5000_v17 = vsel %vm1056_vm6, %v4994_v14, 0 }
0x2cad   : > { %12039 = vmatpush3.bf16.xpose.msra.mxu1 %v5000_v17  ;;  %v12772_v17 = vld [vmem:[%s15292_s14 + $0x78] sm:$0xff]  }
0x2cae   : > { %12050 = vmatprep.subr.bf16.mxu1 %v13063_v1 }
0x2d6d   : > { %v4746_v21 = vpop.f32.mrb[128].mxu0 }
0x2d6e   : > { %v14154_v53 = vadd.f32 %v4792_v62, %v4746_v21  ;;  %v12006_v50 = vpop.f32.mrb[129].mxu0 }
0x2d6f   : > { %v4749_v18 = vpop.f32.mrb[130].mxu0 }
0x2d70   : > { %v12007_v22 = vpop.f32.mrb[131].mxu0 }
0x2d75   : > { %v4857_v24 = vpop.f32.mrb[132].mxu0 }
0x2d76   : > { %v4858_v25 = vadd.f32 %v10687_v23, %v4857_v24  ;;  %v12020_v26 = vpop.f32.mrb[133].mxu0  ;;  %v10736_v23 = vld [vmem:[%s15293_s15 + $0xb] ss:$0 sm:$0xff] }
0x2d77   : > { %v4860_v28 = vpop.f32.mrb[134].mxu0 }
0x2d78   : > { %v4993_v29 = vpack.c.bf16 %v4858_v25, %v4858_v25  ;;  %v12021_v32 = vpop.f32.mrb[135].mxu0 }
0x2d7a   : > { %12041 = vmatmul.mubr.msk.bf16.vlgmr.msra.gmra.mrb[136].mxu1 %vm1056_vm6, %v4993_v29 }
0x2d7b   : > { %12052 = vmatprep.mubr.msk.bf16.mxu1 %vm13064_vm0, %v13063_v1  ;;  %12051 = vmatpush3.bf16.msra.mxu1 %v5109_v60 }
0x2d7c   : > { %12064 = vmatprep.subr.bf16.mxu1 %v13063_v1 }
0x2d7d   : > { %v4987_v5 = vpop.f32.mrb[136].mxu0 }
0x2d7e   : > { %v4988_v34 = vadd.f32 %v10705_v33, %v4987_v5  ;;  %v12036_v37 = vpop.f32.mrb[137].mxu0 }
0x2d7f   : > { %v4990_v38 = vpop.f32.mrb[138].mxu0 }
0x2d80   : > { %v4995_v40 = vpack.c.bf16 %v4988_v34, %v4988_v34  ;;  %v12037_v41 = vpop.f32.mrb[139].mxu0 }
0x2d82   : > { %v5060_v45 = vsel %vm720_vm1, %v4995_v40, 0  ;;  %v10727_v40 = vld [vmem:[%s15293_s15 + $0x7] ss:$0 sm:$0xff] }
0x2d83   : > { %12045 = vmatpush3.bf16.msra.mxu0 %v5060_v45 }
0x2d84   : > { %12056 = vmatprep.subr.bf16.mxu0 %v13063_v1 }
0x2e4d   : > { %v5036_v46 = vpop.f32.mrb[136].mxu1 }
0x2e4e   : > { %v5042_v47 = vmul.f32 0.35355338, %v5036_v46  ;;  %v12042_v48 = vpop.f32.mrb[137].mxu1 }
0x2e4f   : > { %v5039_v49 = vpop.f32.mrb[138].mxu1 }
0x2e50   : > { %v12043_v51 = vpop.f32.mrb[139].mxu1  ;;  %v5043_v39 = vsel %vm13395_vm7, -1e+30, %v5042_v47 }
0x2e51   : > { %v5044_v54 = vsel %vm1056_vm6, %v5043_v39, -inf  ;;  %v10718_v51 = vld [vmem:[%s15293_s15 + $0x3] ss:$0 sm:$0xff] }
0x2e52   : > { %5045 = vmax.xlane.f32.xlu0 %v5044_v54 }
0x2edf   : > { %v5046_v55 = vpop.xlane.xlu0 %5045 }
0x2ee0   : > { %v5047_v56 = vsub.f32 %v5043_v39, %v5046_v55  ;;  %v3986_v55 = vrot.slane %v13933_v0, %v13637_v15 }
0x2ee2   : > { %v5048_v31 = vmul.f32 1.442695, %v5047_v56  ;;  %v4037_v56 = vadd.f32 %v14018_v6, %v3986_v55  ;;  %v12977_v55 = vld [vmem:[%s15284_s6] sm:$0xff] }
0x2ee4   : > { %12899 = vpow2.f32 %v5048_v31 }
0x2eee   : > { %v12900_v57 = vpop.eup %12899 }
0x2eef   : > { %v5050_v58 = vsel %vm1056_vm6, %v12900_v57, 0.0 }
0x2ef0   : > { %5051 = vadd.xlane.f32.xlu1 %v5050_v58 }
0x2f7d   : > { %v5052_v61 = vpop.xlane.xlu1 %5051 }
0x2f7e   : > { %12901 = vrcp.f32 %v5052_v61 }
0x2f88   : > { %v12902_v62 = vpop.eup %12901 }
0x2f89   : > { %v5054_v63 = vmul.f32 %v12902_v62, %v12900_v57 }
0x2f8b   : > { %v5055_v3 = vpack.c.bf16 %v5054_v63, %v5054_v63  ;;  %v4042_v63 = vadd.f32 %v4037_v56, %v13952_v30  ;;  %v4082_v56 = vrot.slane %v12977_v55, %v13613_v59 }
0x2f8d   : > { %12047 = vmatmul.mubr.msk.bf16.vlgmr.msra.gmra.mrb[140].mxu0 %vm1056_vm6, %v5055_v3 }
0x2f8e   : > { %12057 = vmatpush3.bf16.msra.mxu0 %v12767_v2  ;;  %12060 = vmatprep.mubr.msk.bf16.mxu0 %vm13064_vm0, %v13063_v1  ;;  %v4043_v2 = vsel %vm879_vm5, %v4042_v63, 0.0 }
0x2f8f   : > { %12058 = vmatprep.subr.bf16.mxu0 %v13063_v1 }
0x2f92   : > { %12059 = vmatpush3.bf16.msra.mxu0 %v12768_v4 }
0x2f93   : > { %12072 = vmatprep.subr.bf16.mxu0 %v13063_v1 }
0x2f95   : > { %12061 = vmatmul.mubr.msk.bf16.vlgmr.msra.gmra.mrb[144].mxu0 %vm879_vm5, %v13971_v35 }
0x2f96   : > { %12073 = vmatpush3.bf16.msra.mxu0 %v12769_v7  ;;  %12076 = vmatprep.mubr.msk.bf16.mxu0 %vm13064_vm0, %v13063_v1 }
0x2f97   : > { %12074 = vmatprep.subr.bf16.mxu0 %v13063_v1 }
0x2f9a   : > { %12075 = vmatpush3.bf16.msra.mxu0 %v12770_v52 }
0x2f9b   : > { %12086 = vmatprep.subr.bf16.mxu0 %v13063_v1 }
0x2f9d   : > { %12077 = vmatmul.mubr.msk.bf16.vlgmr.msra.gmra.mrb[148].mxu0 %vm879_vm5, %v13971_v35 }
0x2f9e   : > { %12088 = vmatprep.mubr.msk.bf16.mxu0 %vm13064_vm0, %v13063_v1 }
0x3060   : > { %v5096_v8 = vpop.f32.mrb[140].mxu0 }
0x3061   : > { %v5102_v12 = vpack.c.bf16 %v5096_v8, %v5096_v8  ;;  %v12048_v13 = vpop.f32.mrb[141].mxu0 }
0x3062   : > { %v5099_v14 = vpop.f32.mrb[142].mxu0 }
0x3063   : > { %v12049_v16 = vpop.f32.mrb[143].mxu0  ;;  %12053 = vmatmul.mubr.msk.bf16.vlgmr.msra.gmra.mrb[140].mxu1 %vm1056_vm6, %v5102_v12 }
0x3064   : > { %12065 = vmatpush3.bf16.msra.mxu1 %v12771_v11  ;;  %12068 = vmatprep.mubr.msk.bf16.mxu1 %vm13064_vm0, %v13063_v1 }
0x3065   : > { %12066 = vmatprep.subr.bf16.mxu1 %v13063_v1 }
0x3068   : > { %v5211_v21 = vpop.f32.mrb[144].mxu0  ;;  %12067 = vmatpush3.bf16.msra.mxu1 %v12772_v17 }
0x3069   : > { %v12062_v50 = vpop.f32.mrb[145].mxu0  ;;  %12080 = vmatprep.subr.bf16.mxu1 %v13063_v1  ;;  %v5212_v39 = vadd.f32 %v10718_v51, %v5211_v21  ;;  %v12774_v51 = vld [vmem:[%s15292_s14 + $0x108] sm:$0xff]  }
0x306a   : > { %v5214_v18 = vpop.f32.mrb[146].mxu0 }
0x306b   : > { %v12063_v22 = vpop.f32.mrb[147].mxu0  ;;  %12069 = vmatmul.mubr.msk.bf16.vlgmr.msra.gmra.mrb[144].mxu1 %vm879_vm5, %v13971_v35  ;;  %v5347_v54 = vpack.c.bf16 %v5212_v39, %v5212_v39 }
0x306c   : > { %12082 = vmatprep.mubr.msk.bf16.mxu1 %vm13064_vm0, %v13063_v1 }
0x3070   : > { %v5341_v24 = vpop.f32.mrb[148].mxu0 }
0x3071   : > { %v5342_v25 = vadd.f32 %v10736_v23, %v5341_v24  ;;  %v12078_v26 = vpop.f32.mrb[149].mxu0  ;;  %v4059_v23 = vrot.slane %v13933_v0, %v13660_v42 }
0x3072   : > { %v5344_v28 = vpop.f32.mrb[150].mxu0  ;;  %v4064_v26 = vrot.slane %v13933_v0, %v13663_v44 }
0x3073   : > { %v5349_v29 = vpack.c.bf16 %v5342_v25, %v5342_v25  ;;  %v12079_v32 = vpop.f32.mrb[151].mxu0 }
0x3075   : > { %v5414_v33 = vsel %vm720_vm1, %v5349_v29, 0 }
0x3076   : > { %12087 = vmatpush3.bf16.msra.mxu0 %v5414_v33  ;;  %v10742_v33 = vld [vmem:[%s15294_s16 + $0xc] sm:$0xf] }
0x3077   : > { %12098 = vmatprep.subr.bf16.mxu0 %v13063_v1 }
0x3136   : > { %v5145_v5 = vpop.f32.mrb[140].mxu1 }
0x3137   : > { %v14224_v35 = vadd.f32 %v5145_v5, %v14154_v53  ;;  %v12054_v34 = vpop.f32.mrb[141].mxu1  ;;  %v5463_v5 = vsel %vm720_vm1, %v10742_v33, 0 }
0x3138   : > { %v5148_v37 = vpop.f32.mrb[142].mxu1 }
0x3139   : > { %v12055_v38 = vpop.f32.mrb[143].mxu1 }
0x313e   : > { %v5276_v41 = vpop.f32.mrb[144].mxu1 }
0x313f   : > { %v5277_v45 = vadd.f32 %v10727_v40, %v5276_v41  ;;  %v12070_v46 = vpop.f32.mrb[145].mxu1 }
0x3140   : > { %v5279_v47 = vpop.f32.mrb[146].mxu1 }
0x3141   : > { %v5348_v48 = vpack.c.bf16 %v5277_v45, %v5277_v45  ;;  %v12071_v49 = vpop.f32.mrb[147].mxu1  ;;  %v12773_v45 = vld [vmem:[%s15292_s14 + $0x100] sm:$0xff]  }
0x3143   : > { %v5354_v53 = vsel %vm1056_vm6, %v5348_v48, 0 }
0x3144   : > { %12081 = vmatpush3.bf16.xpose.msra.mxu1 %v5354_v53 }
0x3145   : > { %12092 = vmatprep.subr.bf16.mxu1 %v13063_v1 }
0x314b   : > { %12083 = vmatmul.mubr.msk.bf16.vlgmr.msra.gmra.mrb[148].mxu1 %vm1056_vm6, %v5347_v54 }
0x314c   : > { %12094 = vmatprep.mubr.msk.bf16.mxu1 %vm13064_vm0, %v13063_v1  ;;  %12093 = vmatpush3.bf16.msra.mxu1 %v5463_v5 }
0x314d   : > { %12106 = vmatprep.subr.bf16.mxu1 %v13063_v1 }
0x321e   : > { %v5390_v31 = vpop.f32.mrb[148].mxu1 }
0x321f   : > { %v5396_v57 = vmul.f32 0.35355338, %v5390_v31  ;;  %v12084_v58 = vpop.f32.mrb[149].mxu1 }
0x3220   : > { %v5393_v36 = vpop.f32.mrb[150].mxu1 }
0x3221   : > { %v12085_v60 = vpop.f32.mrb[151].mxu1  ;;  %v5397_v61 = vsel %vm13395_vm7, -1e+30, %v5396_v57  ;;  %v4087_v57 = vrot.slane %v12977_v55, %v13637_v15  ;;  %v12780_v55 = vld [vmem:[%s15292_s14 + $0xd8] sm:$0xff]  }
0x3222   : > { %v5398_v62 = vsel %vm1056_vm6, %v5397_v61, -inf }
0x3223   : > { %5399 = vmax.xlane.f32.xlu0 %v5398_v62  ;;  %v14286_v62 = vld [vmem:[%s15298_s20] sm:$0xff] }
0x3227   : > { %4044 = vadd.xlane.f32.xlu0 %v4043_v2 }
0x32b0   : > { %v5400_v3 = vpop.xlane.xlu0 %5399 }
0x32b1   : > { %v5401_v4 = vsub.f32 %v5397_v61, %v5400_v3 }
0x32b3   : > { %v5402_v7 = vmul.f32 1.442695, %v5401_v4 }
0x32b4   : > { %v4045_v6 = vpop.xlane.xlu0 %4044 }
0x32b5   : > { %12903 = vpow2.f32 %v5402_v7  ;;  %v4046_v52 = vmul.f32 0.03125, %v4045_v6 }
0x32b7   : > { %v4047_v8 = vsub.f32 %v4042_v63, %v4046_v52  ;;  %v5509_v63 = vrot.slane %v14286_v62, %v13309_v20 }
0x32b9   : > { %v4048_v13 = vmul.f32 %v4047_v8, %v4047_v8 }
0x32bb   : > { %v4049_v14 = vsel %vm879_vm5, %v4048_v13, 0.0 }
0x32bf   : > { %v12904_v11 = vpop.eup %12903 }
0x32c0   : > { %v5404_v12 = vsel %vm1056_vm6, %v12904_v11, 0.0 }
0x32c1   : > { %5405 = vadd.xlane.f32.xlu1 %v5404_v12  ;;  %v10758_v12 = vld [vmem:[%s15293_s15 + $0x10] ss:$0 sm:$0xff] }
0x32c5   : > { %4050 = vadd.xlane.f32.xlu1 %v4049_v14 }
0x334e   : > { %v5406_v30 = vpop.xlane.xlu1 %5405 }
0x334f   : > { %12905 = vrcp.f32 %v5406_v30 }
0x3352   : > { %v4051_v16 = vpop.xlane.xlu1 %4050 }
0x3353   : > { %v4052_v17 = vmul.f32 0.03125, %v4051_v16 }
0x3355   : > { %v4053_v21 = vadd.f32 1e-05, %v4052_v17 }
0x3357   : > { %12907 = vrsqrt.f32 %v4053_v21 }
0x3359   : > { %v12906_v50 = vpop.eup %12905 }
0x335a   : > { %v5408_v18 = vmul.f32 %v12906_v50, %v12904_v11 }
0x335c   : > { %v5409_v22 = vpack.c.bf16 %v5408_v18, %v5408_v18 }
0x335e   : > { %12089 = vmatmul.mubr.msk.bf16.vlgmr.msra.gmra.mrb[152].mxu0 %vm1056_vm6, %v5409_v22 }
0x335f   : > { %12102 = vmatprep.mubr.msk.bf16.mxu0 %vm13064_vm0, %v13063_v1 }
0x3361   : > { %v12908_v24 = vpop.eup %12907 }
0x3362   : > { %v4055_v25 = vmul.f32 %v12908_v24, %v4047_v8  ;;  %v12775_v24 = vld [vmem:[%s15292_s14 + $0xc0] sm:$0xff]  }
0x3363   : > { %12099 = vmatpush3.bf16.msra.mxu0 %v12775_v24 }
0x3364   : > { %v4060_v28 = vmul.f32 %v4059_v23, %v4055_v25  ;;  %12100 = vmatprep.subr.bf16.mxu0 %v13063_v1  ;;  %v12776_v25 = vld [vmem:[%s15292_s14 + $0xc8] sm:$0xff]  }
0x3366   : > { %v4065_v29 = vadd.f32 %v4064_v26, %v4060_v28 }
0x3367   : > { %12101 = vmatpush3.bf16.msra.mxu0 %v12776_v25 }
0x3368   : > { %v4066_v32 = vsel %vm879_vm5, %v4065_v29, 0.0  ;;  %12114 = vmatprep.subr.bf16.mxu0 %v13063_v1 }
0x3369   : > { %4067 = vadd.xlane.f32.xlu0 %v4066_v32  ;;  %v5528_v32 = vrot.slane %v14286_v62, %v13319_v27 }
0x33f6   : > { %v4068_v34 = vpop.xlane.xlu0 %4067 }
0x33f7   : > { %v4069_v37 = vmul.f32 0.03125, %v4068_v34  ;;  %v5533_v34 = vrot.slane %v14286_v62, %v13613_v59 }
0x33f9   : > { %v4070_v38 = vsub.f32 %v4065_v29, %v4069_v37 }
0x33fb   : > { %v4071_v40 = vmul.f32 %v4070_v38, %v4070_v38 }
0x33fd   : > { %v4072_v0 = vsel %vm879_vm5, %v4071_v40, 0.0  ;;  %v12777_v40 = vld [vmem:[%s15292_s14 + $0x140] sm:$0xff]  }
0x33fe   : > { %4073 = vadd.xlane.f32.xlu0 %v4072_v0 }
0x3431   : > { %v5450_v41 = vpop.f32.mrb[152].mxu0 }
0x3432   : > { %v5456_v46 = vpack.c.bf16 %v5450_v41, %v5450_v41  ;;  %v12090_v47 = vpop.f32.mrb[153].mxu0  ;;  %v12778_v41 = vld [vmem:[%s15292_s14 + $0x148] sm:$0xff]  }
0x3433   : > { %v5453_v48 = vpop.f32.mrb[154].mxu0 }
0x3434   : > { %v12091_v49 = vpop.f32.mrb[155].mxu0  ;;  %12095 = vmatmul.mubr.msk.bf16.vlgmr.msra.gmra.mrb[152].mxu1 %vm1056_vm6, %v5456_v46 }
0x3435   : > { %12107 = vmatpush3.bf16.msra.mxu1 %v12773_v45  ;;  %12110 = vmatprep.mubr.msk.bf16.mxu1 %vm13064_vm0, %v13063_v1  ;;  %v10749_v45 = vld [vmem:[%s15293_s15 + $0xc] ss:$0 sm:$0xff] }
0x3436   : > { %12108 = vmatprep.subr.bf16.mxu1 %v13063_v1 }
0x3439   : > { %12109 = vmatpush3.bf16.msra.mxu1 %v12774_v51  ;;  %v12779_v51 = vld [vmem:[%s15292_s14 + $0xd0] sm:$0xff]  }
0x343a   : > { %12122 = vmatprep.subr.bf16.mxu1 %v13063_v1 }
0x348b   : > { %v4074_v53 = vpop.xlane.xlu0 %4073 }
0x348c   : > { %v4075_v39 = vmul.f32 0.03125, %v4074_v53 }
0x348e   : > { %v4076_v54 = vadd.f32 1e-05, %v4075_v39 }
0x3490   : > { %12909 = vrsqrt.f32 %v4076_v54  ;;  %v10767_v54 = vld [vmem:[%s15293_s15 + $0x14] ss:$0 sm:$0xff] }
0x349a   : > { %v12910_v31 = vpop.eup %12909 }
0x349b   : > { %v4078_v58 = vmul.f32 %v12910_v31, %v4070_v38 }
0x349d   : > { %v4083_v36 = vmul.f32 %v4082_v56, %v4078_v58 }
0x349f   : > { %v4088_v60 = vadd.f32 %v4087_v57, %v4083_v36  ;;  %v12781_v36 = vld [vmem:[%s15292_s14 + $0x150] sm:$0xff]  }
0x34a1   : > { %v14277_v61 = vpack.c.bf16 %v4088_v60, %v4088_v60 }
0x34a3   : > { %12111 = vmatmul.mubr.msk.bf16.vlgmr.msra.gmra.mrb[156].mxu1 %vm879_vm5, %v14277_v61 }
0x34a4   : > { %12124 = vmatprep.mubr.msk.bf16.mxu1 %vm13064_vm0, %v13063_v1 }
0x3507   : > { %v5499_v2 = vpop.f32.mrb[152].mxu1 }
0x3508   : > { %v5505_v3 = vadd.f32 %v5499_v2, %v14224_v35  ;;  %v12096_v4 = vpop.f32.mrb[153].mxu1 }
0x3509   : > { %v5502_v7 = vpop.f32.mrb[154].mxu1 }
0x350a   : > { %v5510_v6 = vadd.f32 %v5509_v63, %v5505_v3  ;;  %v12097_v52 = vpop.f32.mrb[155].mxu1  ;;  %v12782_v3 = vld [vmem:[%s15292_s14 + $0x158] sm:$0xff]  }
0x350c   : > { %v5511_v8 = vadd.f32 %v5510_v6, %v13343_v43 }
0x350e   : > { %v5512_v11 = vsel %vm879_vm5, %v5511_v8, 0.0 }
0x350f   : > { %5513 = vadd.xlane.f32.xlu1 %v5512_v11 }
0x3576   : > { %v5667_v13 = vpop.f32.mrb[156].mxu1 }
0x3577   : > { %v5668_v14 = vadd.f32 %v10758_v12, %v5667_v13  ;;  %v12112_v30 = vpop.f32.mrb[157].mxu1 }
0x3578   : > { %v5670_v16 = vpop.f32.mrb[158].mxu1 }
0x3579   : > { %v5739_v17 = vpack.c.bf16 %v5668_v14, %v5668_v14  ;;  %v12113_v21 = vpop.f32.mrb[159].mxu1 }
0x357b   : > { %v5745_v35 = vsel %vm1056_vm6, %v5739_v17, 0  ;;  %v10797_v17 = vld [vmem:[%s15293_s15 + $0x15] ss:$0 sm:$0xff] }
0x357c   : > { %12123 = vmatpush3.bf16.xpose.msra.mxu1 %v5745_v35 }
0x357d   : > { %12134 = vmatprep.subr.bf16.mxu1 %v13063_v1 }
0x359c   : > { %v5514_v50 = vpop.xlane.xlu1 %5513 }
0x359d   : > { %v5515_v43 = vmul.f32 0.03125, %v5514_v50 }
0x359f   : > { %v5516_v18 = vsub.f32 %v5511_v8, %v5515_v43 }
0x35a1   : > { %v5517_v22 = vmul.f32 %v5516_v18, %v5516_v18 }
0x35a3   : > { %v5518_v23 = vsel %vm879_vm5, %v5517_v22, 0.0 }
0x35a4   : > { %5519 = vadd.xlane.f32.xlu1 %v5518_v23 }
0x3631   : > { %v5520_v26 = vpop.xlane.xlu1 %5519 }
0x3632   : > { %v5521_v28 = vmul.f32 0.03125, %v5520_v26 }
0x3634   : > { %v5522_v29 = vadd.f32 1e-05, %v5521_v28 }
0x3636   : > { %12911 = vrsqrt.f32 %v5522_v29 }
0x3640   : > { %v12912_v33 = vpop.eup %12911 }
0x3641   : > { %v5524_v5 = vmul.f32 %v12912_v33, %v5516_v18 }
0x3643   : > { %v5529_v37 = vmul.f32 %v5528_v32, %v5524_v5 }
0x3645   : > { %v14311_v38 = vadd.f32 %v5533_v34, %v5529_v37  ;;  %v12783_v34 = vld [vmem:[%s15292_s14 + $0x110] sm:$0xff]  }
0x3647   : > { %v14318_v0 = vpack.c.bf16 %v14311_v38, %v14311_v38 }
0x3649   : > { %12103 = vmatmul.mubr.msk.bf16.vlgmr.msra.gmra.mrb[156].mxu0 %vm879_vm5, %v14318_v0 }
0x364a   : > { %12115 = vmatpush3.bf16.msra.mxu0 %v12777_v40  ;;  %12118 = vmatprep.mubr.msk.bf16.mxu0 %vm13064_vm0, %v13063_v1  ;;  %v12784_v40 = vld [vmem:[%s15292_s14 + $0x118] sm:$0xff]  }
0x364b   : > { %12116 = vmatprep.subr.bf16.mxu0 %v13063_v1 }
0x364e   : > { %12117 = vmatpush3.bf16.msra.mxu0 %v12778_v41 }
0x364f   : > { %12128 = vmatprep.subr.bf16.mxu0 %v13063_v1 }
0x3651   : > { %12119 = vmatmul.mubr.msk.bf16.vlgmr.msra.gmra.mrb[160].mxu0 %vm879_vm5, %v14277_v61 }
0x3652   : > { %12130 = vmatprep.mubr.msk.bf16.mxu0 %vm13064_vm0, %v13063_v1 }
0x371c   : > { %v5599_v46 = vpop.f32.mrb[156].mxu0 }
0x371d   : > { %v5600_v47 = vadd.f32 %v10749_v45, %v5599_v46  ;;  %v12104_v48 = vpop.f32.mrb[157].mxu0 }
0x371e   : > { %v5602_v49 = vpop.f32.mrb[158].mxu0  ;;  %v10788_v48 = vld [vmem:[%s15293_s15 + $0x11] ss:$0 sm:$0xff] }
0x371f   : > { %v5738_v53 = vpack.c.bf16 %v5600_v47, %v5600_v47  ;;  %v12105_v39 = vpop.f32.mrb[159].mxu0 }
0x3721   : > { %12125 = vmatmul.mubr.msk.bf16.vlgmr.msra.gmra.mrb[160].mxu1 %vm1056_vm6, %v5738_v53 }
0x3722   : > { %12135 = vmatpush3.bf16.msra.mxu1 %v12779_v51  ;;  %12138 = vmatprep.mubr.msk.bf16.mxu1 %vm13064_vm0, %v13063_v1 }
0x3723   : > { %12136 = vmatprep.subr.bf16.mxu1 %v13063_v1 }
0x3724   : > { %v5732_v56 = vpop.f32.mrb[160].mxu0 }
0x3725   : > { %v5733_v31 = vadd.f32 %v10767_v54, %v5732_v56  ;;  %v12120_v57 = vpop.f32.mrb[161].mxu0  ;;  %v10779_v56 = vld [vmem:[%s15293_s15 + $0xd] ss:$0 sm:$0xff] }
0x3726   : > { %v5735_v58 = vpop.f32.mrb[162].mxu0  ;;  %12137 = vmatpush3.bf16.msra.mxu1 %v12780_v55 }
0x3727   : > { %v5740_v60 = vpack.c.bf16 %v5733_v31, %v5733_v31  ;;  %v12121_v63 = vpop.f32.mrb[163].mxu0  ;;  %12150 = vmatprep.subr.bf16.mxu1 %v13063_v1 }
0x3729   : > { %v5805_v2 = vsel %vm720_vm1, %v5740_v60, 0  ;;  %12139 = vmatmul.mubr.msk.bf16.vlgmr.msra.gmra.mrb[164].mxu1 %vm879_vm5, %v14318_v0 }
0x372a   : > { %12129 = vmatpush3.bf16.msra.mxu0 %v5805_v2  ;;  %12151 = vmatpush3.bf16.msra.mxu1 %v12781_v36 }
0x372b   : > { %12152 = vmatprep.subr.bf16.mxu1 %v13063_v1  ;;  %12154 = vmatprep.mubr.msk.bf16.mxu1 %vm13064_vm0, %v13063_v1 }
0x372c   : > { %12142 = vmatprep.subr.bf16.mxu0 %v13063_v1 }
0x372e   : > { %12153 = vmatpush3.bf16.msra.mxu1 %v12782_v3 }
0x372f   : > { %12164 = vmatprep.subr.bf16.mxu1 %v13063_v1 }
0x3731   : > { %12155 = vmatmul.mubr.msk.bf16.vlgmr.msra.gmra.mrb[168].mxu1 %vm879_vm5, %v14277_v61 }
0x3732   : > { %12166 = vmatprep.mubr.msk.bf16.mxu1 %vm13064_vm0, %v13063_v1 }
0x37f4   : > { %v5781_v4 = vpop.f32.mrb[160].mxu1 }
0x37f5   : > { %v5787_v7 = vmul.f32 0.35355338, %v5781_v4  ;;  %v12126_v6 = vpop.f32.mrb[161].mxu1 }
0x37f6   : > { %v5784_v52 = vpop.f32.mrb[162].mxu1 }
0x37f7   : > { %v12127_v8 = vpop.f32.mrb[163].mxu1  ;;  %v5788_v11 = vsel %vm13395_vm7, -1e+30, %v5787_v7 }
0x37f8   : > { %v5789_v12 = vsel %vm1056_vm6, %v5788_v11, -inf }
0x37f9   : > { %5790 = vmax.xlane.f32.xlu0 %v5789_v12 }
0x37fc   : > { %v5909_v13 = vpop.f32.mrb[164].mxu1 }
0x37fd   : > { %v12140_v14 = vpop.f32.mrb[165].mxu1  ;;  %v5910_v57 = vadd.f32 %v10779_v56, %v5909_v13  ;;  %v10803_v13 = vld [vmem:[%s15294_s16 + $0x14] sm:$0xf] }
0x37fe   : > { %v5912_v30 = vpop.f32.mrb[166].mxu1  ;;  %v6161_v14 = vsel %vm720_vm1, %v10803_v13, 0 }
0x37ff   : > { %v12141_v16 = vpop.f32.mrb[167].mxu1  ;;  %v6045_v58 = vpack.c.bf16 %v5910_v57, %v5910_v57 }
0x3804   : > { %v6039_v21 = vpop.f32.mrb[168].mxu1 }
0x3805   : > { %v6040_v35 = vadd.f32 %v10797_v17, %v6039_v21  ;;  %v12156_v50 = vpop.f32.mrb[169].mxu1  ;;  %v10773_v17 = vld [vmem:[%s15294_s16 + $0x10] sm:$0xf] }
0x3806   : > { %v6042_v43 = vpop.f32.mrb[170].mxu1  ;;  %v6207_v50 = vsel %vm720_vm1, %v10773_v17, 0 }
0x3807   : > { %v6047_v18 = vpack.c.bf16 %v6040_v35, %v6040_v35  ;;  %v12157_v22 = vpop.f32.mrb[171].mxu1  ;;  %v12785_v43 = vld [vmem:[%s15292_s14 + $0x120] sm:$0xff]  }
0x3808   : > { %v12786_v22 = vld [vmem:[%s15292_s14 + $0x128] sm:$0xff]  }
0x3809   : > { %v6112_v23 = vsel %vm720_vm1, %v6047_v18, 0 }
0x380a   : > { %12165 = vmatpush3.bf16.msra.mxu1 %v6112_v23 }
0x380b   : > { %12176 = vmatprep.subr.bf16.mxu1 %v13063_v1 }
0x3886   : > { %v5791_v24 = vpop.xlane.xlu0 %5790 }
0x3887   : > { %v5792_v25 = vsub.f32 %v5788_v11, %v5791_v24  ;;  %v12787_v24 = vld [vmem:[%s15292_s14 + $0xe0] sm:$0xff]  }
0x3889   : > { %v5793_v26 = vmul.f32 1.442695, %v5792_v25 }
0x388b   : > { %12913 = vpow2.f32 %v5793_v26 }
0x3895   : > { %v12914_v28 = vpop.eup %12913 }
0x3896   : > { %v5795_v29 = vsel %vm1056_vm6, %v12914_v28, 0.0 }
0x3897   : > { %5796 = vadd.xlane.f32.xlu1 %v5795_v29 }
0x3924   : > { %v5797_v32 = vpop.xlane.xlu1 %5796 }
0x3925   : > { %12915 = vrcp.f32 %v5797_v32  ;;  %v12788_v32 = vld [vmem:[%s15292_s14 + $0xe8] sm:$0xff]  }
0x392f   : > { %v12916_v33 = vpop.eup %12915 }
0x3930   : > { %v5799_v5 = vmul.f32 %v12916_v33, %v12914_v28 }
0x3932   : > { %v5800_v37 = vpack.c.bf16 %v5799_v5, %v5799_v5  ;;  %v12789_v5 = vld [vmem:[%s15292_s14 + $0x160] sm:$0xff]  }
0x3934   : > { %12131 = vmatmul.mubr.msk.bf16.vlgmr.msra.gmra.mrb[164].mxu0 %vm1056_vm6, %v5800_v37 }
0x3935   : > { %12143 = vmatpush3.bf16.msra.mxu0 %v12783_v34  ;;  %12146 = vmatprep.mubr.msk.bf16.mxu0 %vm13064_vm0, %v13063_v1 }
0x3936   : > { %12144 = vmatprep.subr.bf16.mxu0 %v13063_v1 }
0x3939   : > { %12145 = vmatpush3.bf16.msra.mxu0 %v12784_v40 }
0x393a   : > { %12158 = vmatprep.subr.bf16.mxu0 %v13063_v1 }
0x393c   : > { %12147 = vmatmul.mubr.msk.bf16.vlgmr.msra.gmra.mrb[168].mxu0 %vm879_vm5, %v14277_v61 }
0x393d   : > { %12160 = vmatprep.mubr.msk.bf16.mxu0 %vm13064_vm0, %v13063_v1 }
0x3a07   : > { %v5841_v41 = vpop.f32.mrb[164].mxu0 }
0x3a08   : > { %v12132_v45 = vpop.f32.mrb[165].mxu0  ;;  %v5847_v18 = vpack.c.bf16 %v5841_v41, %v5841_v41  ;;  %v12790_v41 = vld [vmem:[%s15292_s14 + $0x168] sm:$0xff]  }
0x3a09   : > { %v5844_v46 = vpop.f32.mrb[166].mxu0  ;;  %v10820_v45 = vld [vmem:[%s15293_s15 + $0x12] ss:$0 sm:$0xff] }
0x3a0a   : > { %v12133_v47 = vpop.f32.mrb[167].mxu0 }
0x3a0f   : > { %v5974_v49 = vpop.f32.mrb[168].mxu0 }
0x3a10   : > { %v5975_v51 = vadd.f32 %v10788_v48, %v5974_v49  ;;  %v12148_v53 = vpop.f32.mrb[169].mxu0 }
0x3a11   : > { %v5977_v39 = vpop.f32.mrb[170].mxu0 }
0x3a12   : > { %v6046_v54 = vpack.c.bf16 %v5975_v51, %v5975_v51  ;;  %v12149_v55 = vpop.f32.mrb[171].mxu0 }
0x3a14   : > { %v6052_v31 = vsel %vm1056_vm6, %v6046_v54, 0 }
0x3a15   : > { %12159 = vmatpush3.bf16.xpose.msra.mxu0 %v6052_v31 }
0x3a16   : > { %12170 = vmatprep.subr.bf16.mxu0 %v13063_v1 }
0x3a1c   : > { %12161 = vmatmul.mubr.msk.bf16.vlgmr.msra.gmra.mrb[172].mxu0 %vm1056_vm6, %v6045_v58  ;;  %v10811_v58 = vld [vmem:[%s15293_s15 + $0xe] ss:$0 sm:$0xff] }
0x3a1d   : > { %12172 = vmatprep.mubr.msk.bf16.mxu0 %vm13064_vm0, %v13063_v1  ;;  %12171 = vmatpush3.bf16.msra.mxu0 %v6161_v14 }
0x3a1e   : > { %12182 = vmatprep.subr.bf16.mxu0 %v13063_v1 }
0x3aef   : > { %v6088_v36 = vpop.f32.mrb[172].mxu0 }
0x3af0   : > { %v6094_v60 = vmul.f32 0.35355338, %v6088_v36  ;;  %v12162_v63 = vpop.f32.mrb[173].mxu0 }
0x3af1   : > { %v6091_v2 = vpop.f32.mrb[174].mxu0 }
0x3af2   : > { %v12163_v3 = vpop.f32.mrb[175].mxu0  ;;  %v6095_v4 = vsel %vm13395_vm7, -1e+30, %v6094_v60 }
0x3af3   : > { %v6096_v7 = vsel %vm1056_vm6, %v6095_v4, -inf }
0x3af4   : > { %6097 = vmax.xlane.f32.xlu0 %v6096_v7  ;;  %v10829_v7 = vld [vmem:[%s15293_s15 + $0x16] ss:$0 sm:$0xff] }
0x3b81   : > { %v6098_v6 = vpop.xlane.xlu0 %6097 }
0x3b82   : > { %v6099_v52 = vsub.f32 %v6095_v4, %v6098_v6 }
0x3b84   : > { %v6100_v8 = vmul.f32 1.442695, %v6099_v52 }
0x3b86   : > { %12917 = vpow2.f32 %v6100_v8 }
0x3b90   : > { %v12918_v11 = vpop.eup %12917 }
0x3b91   : > { %v6102_v12 = vsel %vm1056_vm6, %v12918_v11, 0.0 }
0x3b92   : > { %6103 = vadd.xlane.f32.xlu1 %v6102_v12 }
0x3c1f   : > { %v6104_v30 = vpop.xlane.xlu1 %6103 }
0x3c20   : > { %12919 = vrcp.f32 %v6104_v30 }
0x3c2a   : > { %v12920_v16 = vpop.eup %12919 }
0x3c2b   : > { %v6106_v21 = vmul.f32 %v12920_v16, %v12918_v11 }
0x3c2d   : > { %v6107_v35 = vpack.c.bf16 %v6106_v21, %v6106_v21 }
0x3c2f   : > { %12167 = vmatmul.mubr.msk.bf16.vlgmr.msra.gmra.mrb[172].mxu1 %vm1056_vm6, %v6107_v35 }
0x3c30   : > { %12177 = vmatpush3.bf16.msra.mxu1 %v6207_v50  ;;  %12178 = vmatprep.mubr.msk.bf16.mxu1 %vm13064_vm0, %v13063_v1 }
0x3c31   : > { %12190 = vmatprep.subr.bf16.mxu1 %v13063_v1 }
0x3c37   : > { %12179 = vmatmul.mubr.msk.bf16.vlgmr.msra.gmra.mrb[176].mxu1 %vm1056_vm6, %v5847_v18 }
0x3c38   : > { %12191 = vmatpush3.bf16.msra.mxu1 %v12785_v43  ;;  %12194 = vmatprep.mubr.msk.bf16.mxu1 %vm13064_vm0, %v13063_v1 }
0x3c39   : > { %12192 = vmatprep.subr.bf16.mxu1 %v13063_v1 }
0x3c3c   : > { %12193 = vmatpush3.bf16.msra.mxu1 %v12786_v22 }
0x3c3d   : > { %12206 = vmatprep.subr.bf16.mxu1 %v13063_v1 }
0x3c3f   : > { %12195 = vmatmul.mubr.msk.bf16.vlgmr.msra.gmra.mrb[180].mxu1 %vm879_vm5, %v14277_v61 }
0x3c40   : > { %12208 = vmatprep.mubr.msk.bf16.mxu1 %vm13064_vm0, %v13063_v1 }
0x3d02   : > { %v6148_v23 = vpop.f32.mrb[172].mxu1 }
0x3d03   : > { %v6154_v25 = vpack.c.bf16 %v6148_v23, %v6148_v23  ;;  %v12168_v26 = vpop.f32.mrb[173].mxu1 }
0x3d04   : > { %v6151_v28 = vpop.f32.mrb[174].mxu1  ;;  %v10835_v26 = vld [vmem:[%s15294_s16 + $0x18] sm:$0xf] }
0x3d05   : > { %v12169_v29 = vpop.f32.mrb[175].mxu1  ;;  %12173 = vmatmul.mubr.msk.bf16.vlgmr.msra.gmra.mrb[176].mxu0 %vm1056_vm6, %v6154_v25  ;;  %v6560_v28 = vsel %vm720_vm1, %v10835_v26, 0 }
0x3d06   : > { %12183 = vmatpush3.bf16.msra.mxu0 %v12787_v24  ;;  %12186 = vmatprep.mubr.msk.bf16.mxu0 %vm13064_vm0, %v13063_v1 }
0x3d07   : > { %12184 = vmatprep.subr.bf16.mxu0 %v13063_v1 }
0x3d0a   : > { %v6243_v33 = vpop.f32.mrb[176].mxu1  ;;  %12185 = vmatpush3.bf16.msra.mxu0 %v12788_v32 }
0x3d0b   : > { %v12180_v34 = vpop.f32.mrb[177].mxu1  ;;  %12198 = vmatprep.subr.bf16.mxu0 %v13063_v1 }
0x3d0c   : > { %v6246_v37 = vpop.f32.mrb[178].mxu1 }
0x3d0d   : > { %v12181_v40 = vpop.f32.mrb[179].mxu1  ;;  %12187 = vmatmul.mubr.msk.bf16.vlgmr.msra.gmra.mrb[180].mxu0 %vm879_vm5, %v14318_v0  ;;  %v12792_v37 = vld [vmem:[%s15292_s14 + $0xf8] sm:$0xff]  }
0x3d0e   : > { %12199 = vmatpush3.bf16.msra.mxu0 %v12789_v5  ;;  %12202 = vmatprep.mubr.msk.bf16.mxu0 %vm13064_vm0, %v13063_v1  ;;  %v12791_v5 = vld [vmem:[%s15292_s14 + $0xf0] sm:$0xff]  }
0x3d0f   : > { %12200 = vmatprep.subr.bf16.mxu0 %v13063_v1  ;;  %v12793_v40 = vld [vmem:[%s15292_s14 + $0x170] sm:$0xff]  }
0x3d12   : > { %v6373_v46 = vpop.f32.mrb[180].mxu1  ;;  %12201 = vmatpush3.bf16.msra.mxu0 %v12790_v41  ;;  %v12794_v41 = vld [vmem:[%s15292_s14 + $0x178] sm:$0xff]  }
0x3d13   : > { %v6374_v47 = vadd.f32 %v10820_v45, %v6373_v46  ;;  %v12196_v48 = vpop.f32.mrb[181].mxu1  ;;  %12212 = vmatprep.subr.bf16.mxu0 %v13063_v1  ;;  %v12795_v45 = vld [vmem:[%s15292_s14 + $0x130] sm:$0xff]  }
0x3d14   : > { %v6376_v49 = vpop.f32.mrb[182].mxu1 }
0x3d15   : > { %v6445_v51 = vpack.c.bf16 %v6374_v47, %v6374_v47  ;;  %v12197_v53 = vpop.f32.mrb[183].mxu1  ;;  %12203 = vmatmul.mubr.msk.bf16.vlgmr.msra.gmra.mrb[184].mxu0 %vm879_vm5, %v14277_v61 }
0x3d16   : > { %12214 = vmatprep.mubr.msk.bf16.mxu0 %vm13064_vm0, %v13063_v1 }
0x3d17   : > { %v6451_v39 = vsel %vm1056_vm6, %v6445_v51, 0  ;;  %v12796_v51 = vld [vmem:[%s15292_s14 + $0x138] sm:$0xff]  }
0x3d18   : > { %12207 = vmatpush3.bf16.xpose.msra.mxu1 %v6451_v39 }
0x3d19   : > { %12218 = vmatprep.subr.bf16.mxu1 %v13063_v1 }
0x3dd8   : > { %v6197_v54 = vpop.f32.mrb[176].mxu0 }
0x3dd9   : > { %v14467_v55 = vadd.f32 %v6243_v33, %v6197_v54  ;;  %v12174_v56 = vpop.f32.mrb[177].mxu0 }
0x3dda   : > { %v6200_v31 = vpop.f32.mrb[178].mxu0 }
0x3ddb   : > { %v12175_v57 = vpop.f32.mrb[179].mxu0  ;;  %v10860_v31 = vld [vmem:[%s15293_s15 + $0x17] ss:$0 sm:$0xff] }
0x3de0   : > { %v6308_v36 = vpop.f32.mrb[180].mxu0 }
0x3de1   : > { %v6309_v60 = vadd.f32 %v10811_v58, %v6308_v36  ;;  %v12188_v63 = vpop.f32.mrb[181].mxu0 }
0x3de2   : > { %v6311_v2 = vpop.f32.mrb[182].mxu0 }
0x3de3   : > { %v6444_v3 = vpack.c.bf16 %v6309_v60, %v6309_v60  ;;  %v12189_v4 = vpop.f32.mrb[183].mxu0 }
0x3de5   : > { %12209 = vmatmul.mubr.msk.bf16.vlgmr.msra.gmra.mrb[184].mxu1 %vm1056_vm6, %v6444_v3 }
0x3de6   : > { %12220 = vmatprep.mubr.msk.bf16.mxu1 %vm13064_vm0, %v13063_v1  ;;  %12219 = vmatpush3.bf16.msra.mxu1 %v6560_v28 }
0x3de7   : > { %12232 = vmatprep.subr.bf16.mxu1 %v13063_v1 }
0x3de8   : > { %v6438_v6 = vpop.f32.mrb[184].mxu0 }
0x3de9   : > { %v6439_v52 = vadd.f32 %v10829_v7, %v6438_v6  ;;  %v12204_v8 = vpop.f32.mrb[185].mxu0 }
0x3dea   : > { %v6441_v11 = vpop.f32.mrb[186].mxu0 }
0x3deb   : > { %v6446_v12 = vpack.c.bf16 %v6439_v52, %v6439_v52  ;;  %v12205_v13 = vpop.f32.mrb[187].mxu0  ;;  %v10851_v11 = vld [vmem:[%s15293_s15 + $0x13] ss:$0 sm:$0xff] }
0x3ded   : > { %v6511_v14 = vsel %vm720_vm1, %v6446_v12, 0 }
0x3dee   : > { %12213 = vmatpush3.bf16.msra.mxu0 %v6511_v14 }
0x3def   : > { %12224 = vmatprep.subr.bf16.mxu0 %v13063_v1 }
0x3eb8   : > { %v6487_v30 = vpop.f32.mrb[184].mxu1 }
0x3eb9   : > { %v6493_v16 = vmul.f32 0.35355338, %v6487_v30  ;;  %v12210_v17 = vpop.f32.mrb[185].mxu1 }
0x3eba   : > { %v6490_v21 = vpop.f32.mrb[186].mxu1 }
0x3ebb   : > { %v12211_v35 = vpop.f32.mrb[187].mxu1  ;;  %v6494_v50 = vsel %vm13395_vm7, -1e+30, %v6493_v16  ;;  %v10842_v21 = vld [vmem:[%s15293_s15 + $0xf] ss:$0 sm:$0xff] }
0x3ebc   : > { %v6495_v43 = vsel %vm1056_vm6, %v6494_v50, -inf }
0x3ebd   : > { %6496 = vmax.xlane.f32.xlu0 %v6495_v43 }
0x3f4a   : > { %v6497_v18 = vpop.xlane.xlu0 %6496 }
0x3f4b   : > { %v6498_v22 = vsub.f32 %v6494_v50, %v6497_v18 }
0x3f4d   : > { %v6499_v23 = vmul.f32 1.442695, %v6498_v22 }
0x3f4f   : > { %12921 = vpow2.f32 %v6499_v23 }
0x3f59   : > { %v12922_v24 = vpop.eup %12921 }
0x3f5a   : > { %v6501_v25 = vsel %vm1056_vm6, %v12922_v24, 0.0 }
0x3f5b   : > { %6502 = vadd.xlane.f32.xlu1 %v6501_v25 }
0x3fe8   : > { %v6503_v29 = vpop.xlane.xlu1 %6502 }
0x3fe9   : > { %12923 = vrcp.f32 %v6503_v29 }
0x3ff3   : > { %v12924_v32 = vpop.eup %12923 }
0x3ff4   : > { %v6505_v33 = vmul.f32 %v12924_v32, %v12922_v24 }
0x3ff6   : > { %v6506_v34 = vpack.c.bf16 %v6505_v33, %v6505_v33 }
0x3ff8   : > { %12215 = vmatmul.mubr.msk.bf16.vlgmr.msra.gmra.mrb[188].mxu0 %vm1056_vm6, %v6506_v34  ;;  %v10866_v34 = vld [vmem:[%s15294_s16 + $0x1c] sm:$0xf] }
0x3ff9   : > { %12225 = vmatpush3.bf16.msra.mxu0 %v12791_v5  ;;  %12228 = vmatprep.mubr.msk.bf16.mxu0 %vm13064_vm0, %v13063_v1 }
0x3ffa   : > { %12226 = vmatprep.subr.bf16.mxu0 %v13063_v1 }
0x3ffd   : > { %12227 = vmatpush3.bf16.msra.mxu0 %v12792_v37  ;;  %v6914_v37 = vsel %vm720_vm1, %v10866_v34, 0 }
0x3ffe   : > { %12240 = vmatprep.subr.bf16.mxu0 %v13063_v1 }
0x4000   : > { %12229 = vmatmul.mubr.msk.bf16.vlgmr.msra.gmra.mrb[192].mxu0 %vm879_vm5, %v14318_v0 }
0x4001   : > { %12241 = vmatpush3.bf16.msra.mxu0 %v12793_v40  ;;  %12244 = vmatprep.mubr.msk.bf16.mxu0 %vm13064_vm0, %v13063_v1 }
0x4002   : > { %12242 = vmatprep.subr.bf16.mxu0 %v13063_v1 }
0x4005   : > { %12243 = vmatpush3.bf16.msra.mxu0 %v12794_v41 }
0x4006   : > { %12254 = vmatprep.subr.bf16.mxu0 %v13063_v1 }
0x4008   : > { %12245 = vmatmul.mubr.msk.bf16.vlgmr.msra.gmra.mrb[196].mxu0 %vm879_vm5, %v14277_v61 }
0x4009   : > { %12256 = vmatprep.mubr.msk.bf16.mxu0 %vm13064_vm0, %v13063_v1 }
0x40cb   : > { %v6547_v0 = vpop.f32.mrb[188].mxu0 }
0x40cc   : > { %v6553_v46 = vpack.c.bf16 %v6547_v0, %v6547_v0  ;;  %v12216_v47 = vpop.f32.mrb[189].mxu0 }
0x40cd   : > { %v6550_v48 = vpop.f32.mrb[190].mxu0 }
0x40ce   : > { %v12217_v49 = vpop.f32.mrb[191].mxu0  ;;  %12221 = vmatmul.mubr.msk.bf16.vlgmr.msra.gmra.mrb[188].mxu1 %vm1056_vm6, %v6553_v46 }
0x40cf   : > { %12233 = vmatpush3.bf16.msra.mxu1 %v12795_v45  ;;  %12236 = vmatprep.mubr.msk.bf16.mxu1 %vm13064_vm0, %v13063_v1 }
0x40d0   : > { %12234 = vmatprep.subr.bf16.mxu1 %v13063_v1 }
0x40d3   : > { %v6662_v53 = vpop.f32.mrb[192].mxu0  ;;  %12235 = vmatpush3.bf16.msra.mxu1 %v12796_v51 }
0x40d4   : > { %v12230_v39 = vpop.f32.mrb[193].mxu0  ;;  %12248 = vmatprep.subr.bf16.mxu1 %v13063_v1 }
0x40d5   : > { %v6665_v54 = vpop.f32.mrb[194].mxu0 }
0x40d6   : > { %v12231_v56 = vpop.f32.mrb[195].mxu0  ;;  %12237 = vmatmul.mubr.msk.bf16.vlgmr.msra.gmra.mrb[192].mxu1 %vm879_vm5, %v14277_v61 }
0x40d7   : > { %12250 = vmatprep.mubr.msk.bf16.mxu1 %vm13064_vm0, %v13063_v1 }
0x40db   : > { %v6792_v57 = vpop.f32.mrb[196].mxu0 }
0x40dc   : > { %v6793_v58 = vadd.f32 %v10860_v31, %v6792_v57  ;;  %v12246_v36 = vpop.f32.mrb[197].mxu0 }
0x40dd   : > { %v6795_v60 = vpop.f32.mrb[198].mxu0 }
0x40de   : > { %v6800_v63 = vpack.c.bf16 %v6793_v58, %v6793_v58  ;;  %v12247_v2 = vpop.f32.mrb[199].mxu0 }
0x40e0   : > { %v6865_v3 = vsel %vm720_vm1, %v6800_v63, 0 }
0x40e1   : > { %12255 = vmatpush3.bf16.msra.mxu0 %v6865_v3 }
0x40e2   : > { %12266 = vmatprep.subr.bf16.mxu0 %v13063_v1 }
0x41a1   : > { %v6596_v4 = vpop.f32.mrb[188].mxu1 }
0x41a2   : > { %v6602_v7 = vadd.f32 %v6596_v4, %v14467_v55  ;;  %v12222_v6 = vpop.f32.mrb[189].mxu1  ;;  %v6663_v55 = vadd.f32 %v10842_v21, %v6662_v53  ;;  %v6960_v53 = vrot.slane %v14286_v62, %v13637_v15 }
0x41a3   : > { %v6599_v52 = vpop.f32.mrb[190].mxu1 }
0x41a4   : > { %v12223_v8 = vpop.f32.mrb[191].mxu1  ;;  %v6798_v50 = vpack.c.bf16 %v6663_v55, %v6663_v55  ;;  %v12800_v55 = vld [vmem:[%s15297_s19 + $0x8] sm:$0xff]  }
0x41a9   : > { %v6727_v12 = vpop.f32.mrb[192].mxu1 }
0x41aa   : > { %v6728_v13 = vadd.f32 %v10851_v11, %v6727_v12  ;;  %v12238_v14 = vpop.f32.mrb[193].mxu1  ;;  %v6979_v12 = vrot.slane %v14286_v62, %v13660_v42 }
0x41ab   : > { %v6730_v30 = vpop.f32.mrb[194].mxu1 }
0x41ac   : > { %v6799_v16 = vpack.c.bf16 %v6728_v13, %v6728_v13  ;;  %v12239_v17 = vpop.f32.mrb[195].mxu1  ;;  %v6984_v30 = vrot.slane %v14286_v62, %v13663_v44 }
0x41ae   : > { %v6805_v35 = vsel %vm1056_vm6, %v6799_v16, 0 }
0x41af   : > { %12249 = vmatpush3.bf16.xpose.msra.mxu1 %v6805_v35  ;;  %v12799_v35 = vld [vmem:[%s15297_s19] sm:$0xff]  }
0x41b0   : > { %12260 = vmatprep.subr.bf16.mxu1 %v13063_v1 }
0x41b6   : > { %12251 = vmatmul.mubr.msk.bf16.vlgmr.msra.gmra.mrb[196].mxu1 %vm1056_vm6, %v6798_v50  ;;  %v10868_v50 = vld [vmem:[%s15296_s18] ss:$0 sm:$0xff] }
0x41b7   : > { %12262 = vmatprep.mubr.msk.bf16.mxu1 %vm13064_vm0, %v13063_v1  ;;  %12261 = vmatpush3.bf16.msra.mxu1 %v6914_v37 }
0x41b8   : > { %12274 = vmatprep.subr.bf16.mxu1 %v13063_v1 }
0x4289   : > { %v6841_v43 = vpop.f32.mrb[196].mxu1 }
0x428a   : > { %v6847_v18 = vmul.f32 0.35355338, %v6841_v43  ;;  %v12252_v22 = vpop.f32.mrb[197].mxu1 }
0x428b   : > { %v6844_v23 = vpop.f32.mrb[198].mxu1 }
0x428c   : > { %v12253_v24 = vpop.f32.mrb[199].mxu1  ;;  %v6848_v25 = vsel %vm13395_vm7, -1e+30, %v6847_v18 }
0x428d   : > { %v6849_v26 = vsel %vm1056_vm6, %v6848_v25, -inf }
0x428e   : > { %6850 = vmax.xlane.f32.xlu0 %v6849_v26 }
0x431b   : > { %v6851_v28 = vpop.xlane.xlu0 %6850 }
0x431c   : > { %v6852_v29 = vsub.f32 %v6848_v25, %v6851_v28  ;;  %v14598_v28 = vsub.s32 6, %v13306_v19 }
0x431e   : > { %v6853_v32 = vmul.f32 1.442695, %v6852_v29  ;;  %v7062_v29 = vrot.slane %v14286_v62, %v14598_v28 }
0x4320   : > { %12925 = vpow2.f32 %v6853_v32 }
0x432a   : > { %v12926_v33 = vpop.eup %12925 }
0x432b   : > { %v6855_v5 = vsel %vm1056_vm6, %v12926_v33, 0.0 }
0x432c   : > { %6856 = vadd.xlane.f32.xlu1 %v6855_v5 }
0x43b9   : > { %v6857_v40 = vpop.xlane.xlu1 %6856 }
0x43ba   : > { %12927 = vrcp.f32 %v6857_v40 }
0x43c4   : > { %v12928_v41 = vpop.eup %12927 }
0x43c5   : > { %v6859_v0 = vmul.f32 %v12928_v41, %v12926_v33 }
0x43c7   : > { %v6860_v45 = vpack.c.bf16 %v6859_v0, %v6859_v0 }
0x43c9   : > { %12257 = vmatmul.mubr.msk.bf16.vlgmr.msra.gmra.mrb[200].mxu0 %vm1056_vm6, %v6860_v45 }
0x43ca   : > { %12270 = vmatprep.mubr.msk.bf16.mxu0 %vm13064_vm0, %v13063_v1 }
0x449c   : > { %v6901_v46 = vpop.f32.mrb[200].mxu0 }
0x449d   : > { %v6907_v47 = vpack.c.bf16 %v6901_v46, %v6901_v46  ;;  %v12258_v48 = vpop.f32.mrb[201].mxu0 }
0x449e   : > { %v6904_v49 = vpop.f32.mrb[202].mxu0 }
0x449f   : > { %v12259_v51 = vpop.f32.mrb[203].mxu0  ;;  %12263 = vmatmul.mubr.msk.bf16.vlgmr.msra.gmra.mrb[200].mxu1 %vm1056_vm6, %v6907_v47  ;;  %v12801_v49 = vld [vmem:[%s15292_s14 + $0x180] sm:$0xff]  }
0x44a0   : > { %12278 = vmatprep.mubr.msk.bf16.mxu1 %vm13064_vm0, %v13063_v1  ;;  %12275 = vmatpush3.bf16.msra.mxu1 %v12799_v35  ;;  %v12802_v51 = vld [vmem:[%s15292_s14 + $0x1c0] sm:$0xff]  }
0x44a1   : > { %12276 = vmatprep.subr.bf16.mxu1 %v13063_v1 }
0x44a4   : > { %12277 = vmatpush3.bf16.msra.mxu1 %v12800_v55  ;;  %v10901_v55 = vld [vmem:[%s15293_s15 + $0x20] ss:$0 sm:$0xff] }
0x44a5   : > { %12290 = vmatprep.subr.bf16.mxu1 %v13063_v1 }
0x4572   : > { %v6950_v39 = vpop.f32.mrb[200].mxu1 }
0x4573   : > { %v6956_v54 = vadd.f32 %v6950_v39, %v6602_v7  ;;  %v12264_v56 = vpop.f32.mrb[201].mxu1  ;;  %v12797_v7 = vld [vmem:[%s15295_s17] sm:$0xff]   ;;  %v12804_v39 = vld [vmem:[%s15292_s14 + $0x1c8] sm:$0xff]  }
0x4574   : > { %v6953_v31 = vpop.f32.mrb[202].mxu1  ;;  %12267 = vmatpush3.bf16.msra.mxu0 %v12797_v7  ;;  %v10892_v7 = vld [vmem:[%s15293_s15 + $0x1c] ss:$0 sm:$0xff] }
0x4575   : > { %v6961_v57 = vadd.f32 %v6960_v53, %v6956_v54  ;;  %v12265_v58 = vpop.f32.mrb[203].mxu1  ;;  %12268 = vmatprep.subr.bf16.mxu0 %v13063_v1  ;;  %v12803_v53 = vld [vmem:[%s15292_s14 + $0x188] sm:$0xff]  }
0x4577   : > { %v6962_v36 = vadd.f32 %v6961_v57, %v14311_v38  ;;  %v12798_v38 = vld [vmem:[%s15295_s17 + $0x8] sm:$0xff]   ;;  %v7134_v57 = vsub.s32 7, %v13306_v19 }
0x4578   : > { %12269 = vmatpush3.bf16.msra.mxu0 %v12798_v38 }
0x4579   : > { %v6963_v60 = vsel %vm879_vm5, %v6962_v36, 0.0  ;;  %12282 = vmatprep.subr.bf16.mxu0 %v13063_v1  ;;  %v7135_v58 = vrot.slane %v14286_v62, %v7134_v57  ;;  %v12806_v62 = vld [vmem:[%s15292_s14 + $0x208] sm:$0xff]  }
0x457a   : > { %6964 = vadd.xlane.f32.xlu0 %v6963_v60 }
0x4607   : > { %v6965_v63 = vpop.xlane.xlu0 %6964 }
0x4608   : > { %v6966_v2 = vmul.f32 0.03125, %v6965_v63  ;;  %v10875_v63 = vld [vmem:[%s15298_s20 + $0x8] ss:$0 sm:$0xff] }
0x460a   : > { %v6967_v3 = vsub.f32 %v6962_v36, %v6966_v2 }
0x460c   : > { %v6968_v4 = vmul.f32 %v6967_v3, %v6967_v3 }
0x460e   : > { %v6969_v6 = vsel %vm879_vm5, %v6968_v4, 0.0  ;;  %v12805_v4 = vld [vmem:[%s15292_s14 + $0x200] sm:$0xff]  }
0x460f   : > { %6970 = vadd.xlane.f32.xlu1 %v6969_v6 }
0x469c   : > { %v6971_v52 = vpop.xlane.xlu1 %6970 }
0x469d   : > { %v6972_v8 = vmul.f32 0.03125, %v6971_v52 }
0x469f   : > { %v6973_v11 = vadd.f32 1e-05, %v6972_v8 }
0x46a1   : > { %12929 = vrsqrt.f32 %v6973_v11 }
0x46ab   : > { %v12930_v13 = vpop.eup %12929 }
0x46ac   : > { %v6975_v14 = vmul.f32 %v12930_v13, %v6967_v3 }
0x46ae   : > { %v6980_v16 = vmul.f32 %v6979_v12, %v6975_v14 }
0x46b0   : > { %v6985_v17 = vadd.f32 %v6984_v30, %v6980_v16 }
0x46b2   : > { %v6986_v21 = vpack.c.bf16 %v6985_v17, %v6985_v17 }
0x46b4   : > { %12271 = vmatmul.mubr.msk.bf16.vlgmr.msra.gmra.mrb[204].mxu0 %vm879_vm5, %v6986_v21  ;;  %v10883_v21 = vld [vmem:[%s15293_s15 + $0x18] ss:$0 sm:$0xff] }
0x46b5   : > { %12286 = vmatprep.mubr.msk.bf16.mxu0 %vm13064_vm0, %v13063_v1  ;;  %12283 = vmatpush3.bf16.msra.mxu0 %v12801_v49 }
0x46b6   : > { %12284 = vmatprep.subr.bf16.mxu0 %v13063_v1 }
0x46b9   : > { %12285 = vmatpush3.bf16.msra.mxu0 %v12803_v53 }
0x46ba   : > { %12298 = vmatprep.subr.bf16.mxu0 %v13063_v1 }
0x4787   : > { %v7047_v43 = vpop.f32.mrb[204].mxu0 }
0x4788   : > { %v7048_v18 = vadd.f32 %v10868_v50, %v7047_v43  ;;  %v12272_v22 = vpop.f32.mrb[205].mxu0 }
0x4789   : > { %v7050_v23 = vpop.f32.mrb[206].mxu0 }
0x478a   : > { %v7053_v24 = vmax.f32 %v7048_v18, 0.0  ;;  %v12273_v25 = vpop.f32.mrb[207].mxu0 }
0x478c   : > { %v7054_v26 = vpack.c.bf16 %v7053_v24, %v7053_v24  ;;  %v12807_v24 = vld [vmem:[%s15292_s14 + $0x190] sm:$0xff]  }
0x478e   : > { %12279 = vmatmul.mubr.msk.bf16.vlgmr.msra.gmra.mrb[204].mxu1 %vm879_vm5, %v7054_v26 }
0x478f   : > { %12294 = vmatprep.mubr.msk.bf16.mxu1 %vm13064_vm0, %v13063_v1  ;;  %12291 = vmatpush3.bf16.msra.mxu1 %v12802_v51 }
0x4790   : > { %12292 = vmatprep.subr.bf16.mxu1 %v13063_v1 }
0x4793   : > { %12293 = vmatpush3.bf16.msra.mxu1 %v12804_v39  ;;  %v10931_v39 = vld [vmem:[%s15293_s15 + $0x21] ss:$0 sm:$0xff] }
0x4794   : > { %12306 = vmatprep.subr.bf16.mxu1 %v13063_v1 }
0x4861   : > { %v7112_v32 = vpop.f32.mrb[204].mxu1 }
0x4862   : > { %v7113_v33 = vadd.f32 %v7112_v32, %v7062_v29  ;;  %v12280_v5 = vpop.f32.mrb[205].mxu1 }
0x4863   : > { %v7115_v34 = vpop.f32.mrb[206].mxu1  ;;  %v12809_v5 = vld [vmem:[%s15292_s14 + $0x210] sm:$0xff]  }
0x4864   : > { %v12281_v37 = vpop.f32.mrb[207].mxu1  ;;  %v7118_v40 = vadd.f32 %v7113_v33, %v6985_v17  ;;  %v12808_v33 = vld [vmem:[%s15292_s14 + $0x198] sm:$0xff]  }
0x4865   : > { %v12810_v34 = vld [vmem:[%s15292_s14 + $0x218] sm:$0xff]  }
0x4866   : > { %v7119_v41 = vsel %vm879_vm5, %v7118_v40, 0.0 }
0x4867   : > { %7120 = vadd.xlane.f32.xlu0 %v7119_v41 }
0x48f4   : > { %v7121_v0 = vpop.xlane.xlu0 %7120 }
0x48f5   : > { %v7122_v45 = vmul.f32 0.03125, %v7121_v0 }
0x48f7   : > { %v7123_v46 = vsub.f32 %v7118_v40, %v7122_v45 }
0x48f9   : > { %v7124_v47 = vmul.f32 %v7123_v46, %v7123_v46 }
0x48fb   : > { %v7125_v48 = vsel %vm879_vm5, %v7124_v47, 0.0 }
0x48fc   : > { %7126 = vadd.xlane.f32.xlu1 %v7125_v48 }
0x4989   : > { %v7127_v54 = vpop.xlane.xlu1 %7126 }
0x498a   : > { %v7128_v56 = vmul.f32 0.03125, %v7127_v54 }
0x498c   : > { %v7129_v31 = vadd.f32 1e-05, %v7128_v56 }
0x498e   : > { %12931 = vrsqrt.f32 %v7129_v31 }
0x4998   : > { %v12932_v36 = vpop.eup %12931 }
0x4999   : > { %v7131_v60 = vmul.f32 %v12932_v36, %v7123_v46 }
0x499b   : > { %v7136_v2 = vmul.f32 %v7135_v58, %v7131_v60 }
0x499d   : > { %v14627_v3 = vadd.f32 %v10875_v63, %v7136_v2 }
0x499f   : > { %v14634_v6 = vpack.c.bf16 %v14627_v3, %v14627_v3 }
0x49a1   : > { %12287 = vmatmul.mubr.msk.bf16.vlgmr.msra.gmra.mrb[208].mxu0 %vm879_vm5, %v14634_v6  ;;  %12295 = vmatmul.mubr.msk.bf16.vlgmr.msra.gmra.mrb[208].mxu1 %vm879_vm5, %v14634_v6 }
0x49a2   : > { %12299 = vmatpush3.bf16.msra.mxu0 %v12805_v4  ;;  %12302 = vmatprep.mubr.msk.bf16.mxu0 %vm13064_vm0, %v13063_v1 }
0x49a3   : > { %12300 = vmatprep.subr.bf16.mxu0 %v13063_v1  ;;  %12308 = vmatprep.mubr.msk.bf16.mxu1 %vm13064_vm0, %v13063_v1 }
0x49a6   : > { %12301 = vmatpush3.bf16.msra.mxu0 %v12806_v62 }
0x49a7   : > { %12312 = vmatprep.subr.bf16.mxu0 %v13063_v1 }
0x49a9   : > { %12303 = vmatmul.mubr.msk.bf16.vlgmr.msra.gmra.mrb[212].mxu0 %vm879_vm5, %v14634_v6 }
0x49aa   : > { %12314 = vmatprep.mubr.msk.bf16.mxu0 %vm13064_vm0, %v13063_v1 }
0x4a74   : > { %v7208_v38 = vpop.f32.mrb[208].mxu0  ;;  %v7273_v52 = vpop.f32.mrb[208].mxu1 }
0x4a75   : > { %v7274_v8 = vadd.f32 %v10892_v7, %v7273_v52  ;;  %v12288_v11 = vpop.f32.mrb[209].mxu0  ;;  %v12296_v12 = vpop.f32.mrb[209].mxu1  ;;  %v7209_v50 = vadd.f32 %v10883_v21, %v7208_v38 }
0x4a76   : > { %v7211_v13 = vpop.f32.mrb[210].mxu0  ;;  %v7276_v14 = vpop.f32.mrb[210].mxu1  ;;  %v12811_v12 = vld [vmem:[%s15292_s14 + $0x1d0] sm:$0xff]  }
0x4a77   : > { %v7345_v30 = vpack.c.bf16 %v7274_v8, %v7274_v8  ;;  %v12289_v16 = vpop.f32.mrb[211].mxu0  ;;  %v12297_v17 = vpop.f32.mrb[211].mxu1  ;;  %v7344_v25 = vpack.c.bf16 %v7209_v50, %v7209_v50  ;;  %v12812_v14 = vld [vmem:[%s15292_s14 + $0x1d8] sm:$0xff]  }
0x4a79   : > { %v7351_v35 = vsel %vm1056_vm6, %v7345_v30, 0 }
0x4a7a   : > { %12307 = vmatpush3.bf16.xpose.msra.mxu1 %v7351_v35  ;;  %v10922_v35 = vld [vmem:[%s15293_s15 + $0x1d] ss:$0 sm:$0xff] }
0x4a7b   : > { %12318 = vmatprep.subr.bf16.mxu1 %v13063_v1 }
0x4a7c   : > { %v7338_v43 = vpop.f32.mrb[212].mxu0 }
0x4a7d   : > { %v7339_v18 = vadd.f32 %v10901_v55, %v7338_v43  ;;  %v12304_v22 = vpop.f32.mrb[213].mxu0 }
0x4a7e   : > { %v7341_v23 = vpop.f32.mrb[214].mxu0 }
0x4a7f   : > { %v7346_v26 = vpack.c.bf16 %v7339_v18, %v7339_v18  ;;  %v12305_v29 = vpop.f32.mrb[215].mxu0 }
0x4a81   : > { %v7411_v32 = vsel %vm720_vm1, %v7346_v26, 0  ;;  %12309 = vmatmul.mubr.msk.bf16.vlgmr.msra.gmra.mrb[212].mxu1 %vm1056_vm6, %v7344_v25 }
0x4a82   : > { %12313 = vmatpush3.bf16.msra.mxu0 %v7411_v32  ;;  %12319 = vmatpush3.bf16.msra.mxu1 %v12807_v24  ;;  %v10913_v24 = vld [vmem:[%s15293_s15 + $0x19] ss:$0 sm:$0xff] }
0x4a83   : > { %12320 = vmatprep.subr.bf16.mxu1 %v13063_v1  ;;  %12322 = vmatprep.mubr.msk.bf16.mxu1 %vm13064_vm0, %v13063_v1 }
0x4a84   : > { %12326 = vmatprep.subr.bf16.mxu0 %v13063_v1 }
0x4a86   : > { %12321 = vmatpush3.bf16.msra.mxu1 %v12808_v33 }
0x4a87   : > { %12334 = vmatprep.subr.bf16.mxu1 %v13063_v1 }
0x4a89   : > { %12323 = vmatmul.mubr.msk.bf16.vlgmr.msra.gmra.mrb[216].mxu1 %vm879_vm5, %v14634_v6 }
0x4a8a   : > { %12335 = vmatpush3.bf16.msra.mxu1 %v12809_v5  ;;  %12338 = vmatprep.mubr.msk.bf16.mxu1 %vm13064_vm0, %v13063_v1 }
0x4a8b   : > { %12336 = vmatprep.subr.bf16.mxu1 %v13063_v1 }
0x4a8e   : > { %12337 = vmatpush3.bf16.msra.mxu1 %v12810_v34 }
0x4a8f   : > { %12348 = vmatprep.subr.bf16.mxu1 %v13063_v1 }
0x4a91   : > { %12339 = vmatmul.mubr.msk.bf16.vlgmr.msra.gmra.mrb[220].mxu1 %vm879_vm5, %v14634_v6 }
0x4a92   : > { %12350 = vmatprep.mubr.msk.bf16.mxu1 %vm13064_vm0, %v13063_v1 }
0x4b54   : > { %v7387_v37 = vpop.f32.mrb[212].mxu1 }
0x4b55   : > { %v7393_v40 = vmul.f32 0.35355338, %v7387_v37  ;;  %v12310_v41 = vpop.f32.mrb[213].mxu1 }
0x4b56   : > { %v7390_v0 = vpop.f32.mrb[214].mxu1 }
0x4b57   : > { %v12311_v45 = vpop.f32.mrb[215].mxu1  ;;  %v7394_v46 = vsel %vm13395_vm7, -1e+30, %v7393_v40 }
0x4b58   : > { %v7395_v47 = vsel %vm1056_vm6, %v7394_v46, -inf }
0x4b59   : > { %7396 = vmax.xlane.f32.xlu0 %v7395_v47 }
0x4b5c   : > { %v7515_v48 = vpop.f32.mrb[216].mxu1 }
0x4b5d   : > { %v12324_v49 = vpop.f32.mrb[217].mxu1  ;;  %v7516_v26 = vadd.f32 %v10913_v24, %v7515_v48 }
0x4b5e   : > { %v7518_v51 = vpop.f32.mrb[218].mxu1  ;;  %v10937_v49 = vld [vmem:[%s15294_s16 + $0x24] sm:$0xf] }
0x4b5f   : > { %v12325_v53 = vpop.f32.mrb[219].mxu1  ;;  %v7651_v29 = vpack.c.bf16 %v7516_v26, %v7516_v26  ;;  %v7767_v51 = vsel %vm720_vm1, %v10937_v49, 0 }
0x4b64   : > { %v7645_v54 = vpop.f32.mrb[220].mxu1 }
0x4b65   : > { %v7646_v56 = vadd.f32 %v10931_v39, %v7645_v54  ;;  %v12340_v31 = vpop.f32.mrb[221].mxu1  ;;  %v10907_v54 = vld [vmem:[%s15294_s16 + $0x20] sm:$0xf] }
0x4b66   : > { %v7648_v58 = vpop.f32.mrb[222].mxu1 }
0x4b67   : > { %v7653_v36 = vpack.c.bf16 %v7646_v56, %v7646_v56  ;;  %v12341_v60 = vpop.f32.mrb[223].mxu1  ;;  %v7813_v58 = vsel %vm720_vm1, %v10907_v54, 0 }
0x4b69   : > { %v7718_v63 = vsel %vm720_vm1, %v7653_v36, 0  ;;  %v12813_v36 = vld [vmem:[%s15292_s14 + $0x1e0] sm:$0xff]  }
0x4b6a   : > { %12349 = vmatpush3.bf16.msra.mxu1 %v7718_v63  ;;  %v12814_v63 = vld [vmem:[%s15292_s14 + $0x1e8] sm:$0xff]  }
0x4b6b   : > { %12360 = vmatprep.subr.bf16.mxu1 %v13063_v1 }
0x4be6   : > { %v7397_v2 = vpop.xlane.xlu0 %7396 }
0x4be7   : > { %v7398_v4 = vsub.f32 %v7394_v46, %v7397_v2 }
0x4be9   : > { %v7399_v62 = vmul.f32 1.442695, %v7398_v4  ;;  %v12815_v4 = vld [vmem:[%s15292_s14 + $0x1a0] sm:$0xff]  }
0x4beb   : > { %12933 = vpow2.f32 %v7399_v62 }
0x4bf5   : > { %v12934_v7 = vpop.eup %12933 }
0x4bf6   : > { %v7401_v38 = vsel %vm1056_vm6, %v12934_v7, 0.0 }
0x4bf7   : > { %7402 = vadd.xlane.f32.xlu1 %v7401_v38 }
0x4c84   : > { %v7403_v52 = vpop.xlane.xlu1 %7402 }
0x4c85   : > { %12935 = vrcp.f32 %v7403_v52 }
0x4c8f   : > { %v12936_v8 = vpop.eup %12935 }
0x4c90   : > { %v7405_v11 = vmul.f32 %v12936_v8, %v12934_v7  ;;  %v12816_v8 = vld [vmem:[%s15292_s14 + $0x1a8] sm:$0xff]  }
0x4c92   : > { %v7406_v13 = vpack.c.bf16 %v7405_v11, %v7405_v11 }
0x4c94   : > { %12315 = vmatmul.mubr.msk.bf16.vlgmr.msra.gmra.mrb[216].mxu0 %vm1056_vm6, %v7406_v13 }
0x4c95   : > { %12327 = vmatpush3.bf16.msra.mxu0 %v12811_v12  ;;  %12330 = vmatprep.mubr.msk.bf16.mxu0 %vm13064_vm0, %v13063_v1  ;;  %v12817_v12 = vld [vmem:[%s15292_s14 + $0x220] sm:$0xff]  }
0x4c96   : > { %12328 = vmatprep.subr.bf16.mxu0 %v13063_v1 }
0x4c99   : > { %12329 = vmatpush3.bf16.msra.mxu0 %v12812_v14 }
0x4c9a   : > { %12342 = vmatprep.subr.bf16.mxu0 %v13063_v1 }
0x4c9c   : > { %12331 = vmatmul.mubr.msk.bf16.vlgmr.msra.gmra.mrb[220].mxu0 %vm879_vm5, %v14634_v6 }
0x4c9d   : > { %12344 = vmatprep.mubr.msk.bf16.mxu0 %vm13064_vm0, %v13063_v1 }
0x4d67   : > { %v7447_v30 = vpop.f32.mrb[216].mxu0 }
0x4d68   : > { %v12316_v16 = vpop.f32.mrb[217].mxu0  ;;  %v7453_v60 = vpack.c.bf16 %v7447_v30, %v7447_v30 }
0x4d69   : > { %v7450_v17 = vpop.f32.mrb[218].mxu0  ;;  %v12818_v16 = vld [vmem:[%s15292_s14 + $0x228] sm:$0xff]  }
0x4d6a   : > { %v12317_v21 = vpop.f32.mrb[219].mxu0  ;;  %v10954_v17 = vld [vmem:[%s15293_s15 + $0x1e] ss:$0 sm:$0xff] }
0x4d6f   : > { %v7580_v55 = vpop.f32.mrb[220].mxu0 }
0x4d70   : > { %v7581_v50 = vadd.f32 %v10922_v35, %v7580_v55  ;;  %v12332_v43 = vpop.f32.mrb[221].mxu0 }
0x4d71   : > { %v7583_v18 = vpop.f32.mrb[222].mxu0 }
0x4d72   : > { %v7652_v22 = vpack.c.bf16 %v7581_v50, %v7581_v50  ;;  %v12333_v23 = vpop.f32.mrb[223].mxu0 }
0x4d74   : > { %v7658_v25 = vsel %vm1056_vm6, %v7652_v22, 0 }
0x4d75   : > { %12343 = vmatpush3.bf16.xpose.msra.mxu0 %v7658_v25 }
0x4d76   : > { %12354 = vmatprep.subr.bf16.mxu0 %v13063_v1 }
0x4d7c   : > { %12345 = vmatmul.mubr.msk.bf16.vlgmr.msra.gmra.mrb[224].mxu0 %vm1056_vm6, %v7651_v29 }
0x4d7d   : > { %12356 = vmatprep.mubr.msk.bf16.mxu0 %vm13064_vm0, %v13063_v1  ;;  %12355 = vmatpush3.bf16.msra.mxu0 %v7767_v51 }
0x4d7e   : > { %12366 = vmatprep.subr.bf16.mxu0 %v13063_v1 }
0x4e4f   : > { %v7694_v32 = vpop.f32.mrb[224].mxu0 }
0x4e50   : > { %v7700_v33 = vmul.f32 0.35355338, %v7694_v32  ;;  %v12346_v5 = vpop.f32.mrb[225].mxu0  ;;  %v10945_v32 = vld [vmem:[%s15293_s15 + $0x1a] ss:$0 sm:$0xff] }
0x4e51   : > { %v7697_v34 = vpop.f32.mrb[226].mxu0 }
0x4e52   : > { %v12347_v37 = vpop.f32.mrb[227].mxu0  ;;  %v7701_v40 = vsel %vm13395_vm7, -1e+30, %v7700_v33 }
0x4e53   : > { %v7702_v41 = vsel %vm1056_vm6, %v7701_v40, -inf }
0x4e54   : > { %7703 = vmax.xlane.f32.xlu0 %v7702_v41 }
0x4ee1   : > { %v7704_v0 = vpop.xlane.xlu0 %7703 }
0x4ee2   : > { %v7705_v45 = vsub.f32 %v7701_v40, %v7704_v0  ;;  %v10963_v0 = vld [vmem:[%s15293_s15 + $0x22] ss:$0 sm:$0xff] }
0x4ee4   : > { %v7706_v46 = vmul.f32 1.442695, %v7705_v45 }
0x4ee6   : > { %12937 = vpow2.f32 %v7706_v46 }
0x4ef0   : > { %v12938_v47 = vpop.eup %12937 }
0x4ef1   : > { %v7708_v48 = vsel %vm1056_vm6, %v12938_v47, 0.0 }
0x4ef2   : > { %7709 = vadd.xlane.f32.xlu1 %v7708_v48 }
0x4f7f   : > { %v7710_v53 = vpop.xlane.xlu1 %7709 }
0x4f80   : > { %12939 = vrcp.f32 %v7710_v53 }
0x4f8a   : > { %v12940_v39 = vpop.eup %12939 }
0x4f8b   : > { %v7712_v56 = vmul.f32 %v12940_v39, %v12938_v47 }
0x4f8d   : > { %v7713_v31 = vpack.c.bf16 %v7712_v56, %v7712_v56 }
0x4f8f   : > { %12351 = vmatmul.mubr.msk.bf16.vlgmr.msra.gmra.mrb[224].mxu1 %vm1056_vm6, %v7713_v31 }
0x4f90   : > { %12361 = vmatpush3.bf16.msra.mxu1 %v7813_v58  ;;  %12362 = vmatprep.mubr.msk.bf16.mxu1 %vm13064_vm0, %v13063_v1 }
0x4f91   : > { %12374 = vmatprep.subr.bf16.mxu1 %v13063_v1 }
0x4f97   : > { %12363 = vmatmul.mubr.msk.bf16.vlgmr.msra.gmra.mrb[228].mxu1 %vm1056_vm6, %v7453_v60 }
0x4f98   : > { %12375 = vmatpush3.bf16.msra.mxu1 %v12813_v36  ;;  %12378 = vmatprep.mubr.msk.bf16.mxu1 %vm13064_vm0, %v13063_v1 }
0x4f99   : > { %12376 = vmatprep.subr.bf16.mxu1 %v13063_v1 }
0x4f9c   : > { %12377 = vmatpush3.bf16.msra.mxu1 %v12814_v63 }
0x4f9d   : > { %12390 = vmatprep.subr.bf16.mxu1 %v13063_v1 }
0x4f9f   : > { %12379 = vmatmul.mubr.msk.bf16.vlgmr.msra.gmra.mrb[232].mxu1 %vm879_vm5, %v14634_v6 }
0x4fa0   : > { %12392 = vmatprep.mubr.msk.bf16.mxu1 %vm13064_vm0, %v13063_v1 }
0x5062   : > { %v7754_v2 = vpop.f32.mrb[224].mxu1 }
0x5063   : > { %v7760_v62 = vpack.c.bf16 %v7754_v2, %v7754_v2  ;;  %v12352_v7 = vpop.f32.mrb[225].mxu1 }
0x5064   : > { %v7757_v38 = vpop.f32.mrb[226].mxu1 }
0x5065   : > { %v12353_v52 = vpop.f32.mrb[227].mxu1  ;;  %12357 = vmatmul.mubr.msk.bf16.vlgmr.msra.gmra.mrb[228].mxu0 %vm1056_vm6, %v7760_v62  ;;  %v10969_v38 = vld [vmem:[%s15294_s16 + $0x28] sm:$0xf] }
0x5066   : > { %12367 = vmatpush3.bf16.msra.mxu0 %v12815_v4  ;;  %12370 = vmatprep.mubr.msk.bf16.mxu0 %vm13064_vm0, %v13063_v1  ;;  %v8166_v52 = vsel %vm720_vm1, %v10969_v38, 0 }
0x5067   : > { %12368 = vmatprep.subr.bf16.mxu0 %v13063_v1 }
0x506a   : > { %v7849_v11 = vpop.f32.mrb[228].mxu1  ;;  %12369 = vmatpush3.bf16.msra.mxu0 %v12816_v8 }
0x506b   : > { %v12364_v13 = vpop.f32.mrb[229].mxu1  ;;  %12382 = vmatprep.subr.bf16.mxu0 %v13063_v1 }
0x506c   : > { %v7852_v14 = vpop.f32.mrb[230].mxu1  ;;  %v12819_v13 = vld [vmem:[%s15292_s14 + $0x1b0] sm:$0xff]  }
0x506d   : > { %v12365_v30 = vpop.f32.mrb[231].mxu1  ;;  %12371 = vmatmul.mubr.msk.bf16.vlgmr.msra.gmra.mrb[232].mxu0 %vm879_vm5, %v14634_v6 }
0x506e   : > { %12383 = vmatpush3.bf16.msra.mxu0 %v12817_v12  ;;  %12386 = vmatprep.mubr.msk.bf16.mxu0 %vm13064_vm0, %v13063_v1  ;;  %v12820_v30 = vld [vmem:[%s15292_s14 + $0x1b8] sm:$0xff]  }
0x506f   : > { %12384 = vmatprep.subr.bf16.mxu0 %v13063_v1 }
0x5072   : > { %v7979_v21 = vpop.f32.mrb[232].mxu1  ;;  %12385 = vmatpush3.bf16.msra.mxu0 %v12818_v16  ;;  %v12821_v16 = vld [vmem:[%s15292_s14 + $0x230] sm:$0xff]  }
0x5073   : > { %v7980_v35 = vadd.f32 %v10954_v17, %v7979_v21  ;;  %v12380_v55 = vpop.f32.mrb[233].mxu1  ;;  %12396 = vmatprep.subr.bf16.mxu0 %v13063_v1  ;;  %v12822_v17 = vld [vmem:[%s15292_s14 + $0x238] sm:$0xff]  }
0x5074   : > { %v7982_v50 = vpop.f32.mrb[234].mxu1 }
0x5075   : > { %v8051_v43 = vpack.c.bf16 %v7980_v35, %v7980_v35  ;;  %v12381_v18 = vpop.f32.mrb[235].mxu1  ;;  %12387 = vmatmul.mubr.msk.bf16.vlgmr.msra.gmra.mrb[236].mxu0 %vm879_vm5, %v14634_v6  ;;  %v12823_v35 = vld [vmem:[%s15292_s14 + $0x1f0] sm:$0xff]  }
0x5076   : > { %12398 = vmatprep.mubr.msk.bf16.mxu0 %vm13064_vm0, %v13063_v1 }
0x5077   : > { %v8057_v22 = vsel %vm1056_vm6, %v8051_v43, 0 }
0x5078   : > { %12391 = vmatpush3.bf16.xpose.msra.mxu1 %v8057_v22  ;;  %v12824_v22 = vld [vmem:[%s15292_s14 + $0x1f8] sm:$0xff]  }
0x5079   : > { %12402 = vmatprep.subr.bf16.mxu1 %v13063_v1 }
0x5138   : > { %v7803_v23 = vpop.f32.mrb[228].mxu0 }
0x5139   : > { %v14792_v24 = vadd.f32 %v7849_v11, %v7803_v23  ;;  %v12358_v25 = vpop.f32.mrb[229].mxu0 }
0x513a   : > { %v7806_v26 = vpop.f32.mrb[230].mxu0 }
0x513b   : > { %v12359_v29 = vpop.f32.mrb[231].mxu0 }
0x5140   : > { %v7914_v33 = vpop.f32.mrb[232].mxu0 }
0x5141   : > { %v7915_v5 = vadd.f32 %v10945_v32, %v7914_v33  ;;  %v12372_v34 = vpop.f32.mrb[233].mxu0  ;;  %v10994_v32 = vld [vmem:[%s15293_s15 + $0x23] ss:$0 sm:$0xff] }
0x5142   : > { %v7917_v37 = vpop.f32.mrb[234].mxu0 }
0x5143   : > { %v8050_v40 = vpack.c.bf16 %v7915_v5, %v7915_v5  ;;  %v12373_v41 = vpop.f32.mrb[235].mxu0 }
0x5145   : > { %12393 = vmatmul.mubr.msk.bf16.vlgmr.msra.gmra.mrb[236].mxu1 %vm1056_vm6, %v8050_v40 }
0x5146   : > { %12404 = vmatprep.mubr.msk.bf16.mxu1 %vm13064_vm0, %v13063_v1  ;;  %12403 = vmatpush3.bf16.msra.mxu1 %v8166_v52 }
0x5147   : > { %12416 = vmatprep.subr.bf16.mxu1 %v13063_v1 }
0x5148   : > { %v8044_v45 = vpop.f32.mrb[236].mxu0 }
0x5149   : > { %v8045_v46 = vadd.f32 %v10963_v0, %v8044_v45  ;;  %v12388_v47 = vpop.f32.mrb[237].mxu0 }
0x514a   : > { %v8047_v48 = vpop.f32.mrb[238].mxu0 }
0x514b   : > { %v8052_v49 = vpack.c.bf16 %v8045_v46, %v8045_v46  ;;  %v12389_v51 = vpop.f32.mrb[239].mxu0 }
0x514d   : > { %v8117_v53 = vsel %vm720_vm1, %v8052_v49, 0  ;;  %v10985_v49 = vld [vmem:[%s15293_s15 + $0x1f] ss:$0 sm:$0xff] }
0x514e   : > { %12397 = vmatpush3.bf16.msra.mxu0 %v8117_v53 }
0x514f   : > { %12408 = vmatprep.subr.bf16.mxu0 %v13063_v1 }
0x5218   : > { %v8093_v39 = vpop.f32.mrb[236].mxu1 }
0x5219   : > { %v8099_v54 = vmul.f32 0.35355338, %v8093_v39  ;;  %v12394_v56 = vpop.f32.mrb[237].mxu1 }
0x521a   : > { %v8096_v31 = vpop.f32.mrb[238].mxu1 }
0x521b   : > { %v12395_v58 = vpop.f32.mrb[239].mxu1  ;;  %v8100_v36 = vsel %vm13395_vm7, -1e+30, %v8099_v54 }
0x521c   : > { %v8101_v60 = vsel %vm1056_vm6, %v8100_v36, -inf  ;;  %v10976_v58 = vld [vmem:[%s15293_s15 + $0x1b] ss:$0 sm:$0xff] }
0x521d   : > { %8102 = vmax.xlane.f32.xlu0 %v8101_v60 }
0x52aa   : > { %v8103_v63 = vpop.xlane.xlu0 %8102 }
0x52ab   : > { %v8104_v2 = vsub.f32 %v8100_v36, %v8103_v63 }
0x52ad   : > { %v8105_v4 = vmul.f32 1.442695, %v8104_v2 }
0x52af   : > { %12941 = vpow2.f32 %v8105_v4 }
0x52b9   : > { %v12942_v62 = vpop.eup %12941 }
0x52ba   : > { %v8107_v7 = vsel %vm1056_vm6, %v12942_v62, 0.0 }
0x52bb   : > { %8108 = vadd.xlane.f32.xlu1 %v8107_v7 }
0x5348   : > { %v8109_v8 = vpop.xlane.xlu1 %8108 }
0x5349   : > { %12943 = vrcp.f32 %v8109_v8 }
0x5353   : > { %v12944_v11 = vpop.eup %12943 }
0x5354   : > { %v8111_v12 = vmul.f32 %v12944_v11, %v12942_v62 }
0x5356   : > { %v8112_v14 = vpack.c.bf16 %v8111_v12, %v8111_v12 }
0x5358   : > { %12399 = vmatmul.mubr.msk.bf16.vlgmr.msra.gmra.mrb[240].mxu0 %vm1056_vm6, %v8112_v14 }
0x5359   : > { %12409 = vmatpush3.bf16.msra.mxu0 %v12819_v13  ;;  %12412 = vmatprep.mubr.msk.bf16.mxu0 %vm13064_vm0, %v13063_v1 }
0x535a   : > { %12410 = vmatprep.subr.bf16.mxu0 %v13063_v1 }
0x535d   : > { %12411 = vmatpush3.bf16.msra.mxu0 %v12820_v30  ;;  %v11000_v30 = vld [vmem:[%s15294_s16 + $0x2c] sm:$0xf] }
0x535e   : > { %12424 = vmatprep.subr.bf16.mxu0 %v13063_v1 }
0x5360   : > { %12413 = vmatmul.mubr.msk.bf16.vlgmr.msra.gmra.mrb[244].mxu0 %vm879_vm5, %v14634_v6 }
0x5361   : > { %12425 = vmatpush3.bf16.msra.mxu0 %v12821_v16  ;;  %12428 = vmatprep.mubr.msk.bf16.mxu0 %vm13064_vm0, %v13063_v1  ;;  %v8520_v16 = vsel %vm720_vm1, %v11000_v30, 0 }
0x5362   : > { %12426 = vmatprep.subr.bf16.mxu0 %v13063_v1 }
0x5365   : > { %12427 = vmatpush3.bf16.msra.mxu0 %v12822_v17 }
0x5366   : > { %12438 = vmatprep.subr.bf16.mxu0 %v13063_v1 }
0x5368   : > { %12429 = vmatmul.mubr.msk.bf16.vlgmr.msra.gmra.mrb[248].mxu0 %vm879_vm5, %v14634_v6 }
0x5369   : > { %12440 = vmatprep.mubr.msk.bf16.mxu0 %vm13064_vm0, %v13063_v1 }
0x542b   : > { %v8153_v21 = vpop.f32.mrb[240].mxu0 }
0x542c   : > { %v8159_v55 = vpack.c.bf16 %v8153_v21, %v8153_v21  ;;  %v12400_v50 = vpop.f32.mrb[241].mxu0 }
0x542d   : > { %v8156_v43 = vpop.f32.mrb[242].mxu0 }
0x542e   : > { %v12401_v18 = vpop.f32.mrb[243].mxu0  ;;  %12405 = vmatmul.mubr.msk.bf16.vlgmr.msra.gmra.mrb[240].mxu1 %vm1056_vm6, %v8159_v55  ;;  %v12825_v43 = vld [vmem:[%s15292_s14 + $0x280] sm:$0xff]  }
0x542f   : > { %12417 = vmatpush3.bf16.msra.mxu1 %v12823_v35  ;;  %12420 = vmatprep.mubr.msk.bf16.mxu1 %vm13064_vm0, %v13063_v1 }
0x5430   : > { %12418 = vmatprep.subr.bf16.mxu1 %v13063_v1 }
0x5433   : > { %v8268_v23 = vpop.f32.mrb[244].mxu0  ;;  %12419 = vmatpush3.bf16.msra.mxu1 %v12824_v22 }
0x5434   : > { %v12414_v25 = vpop.f32.mrb[245].mxu0  ;;  %12432 = vmatprep.subr.bf16.mxu1 %v13063_v1  ;;  %v8269_v36 = vadd.f32 %v10976_v58, %v8268_v23  ;;  %v12827_v58 = vld [vmem:[%s15292_s14 + $0x240] sm:$0xff]  }
0x5435   : > { %v8271_v26 = vpop.f32.mrb[246].mxu0 }
0x5436   : > { %v12415_v29 = vpop.f32.mrb[247].mxu0  ;;  %12421 = vmatmul.mubr.msk.bf16.vlgmr.msra.gmra.mrb[244].mxu1 %vm879_vm5, %v14634_v6  ;;  %v8404_v60 = vpack.c.bf16 %v8269_v36, %v8269_v36  ;;  %v12826_v26 = vld [vmem:[%s15292_s14 + $0x288] sm:$0xff]  }
0x5437   : > { %12434 = vmatprep.mubr.msk.bf16.mxu1 %vm13064_vm0, %v13063_v1  ;;  %v14905_v29 = vld [vmem:[%s15298_s20 + $0x10] sm:$0xff] }
0x543b   : > { %v8398_v33 = vpop.f32.mrb[248].mxu0 }
0x543c   : > { %v8399_v5 = vadd.f32 %v10994_v32, %v8398_v33  ;;  %v12430_v34 = vpop.f32.mrb[249].mxu0  ;;  %v8566_v32 = vrot.slane %v14905_v29, %v13309_v20 }
0x543d   : > { %v8401_v37 = vpop.f32.mrb[250].mxu0 }
0x543e   : > { %v8406_v40 = vpack.c.bf16 %v8399_v5, %v8399_v5  ;;  %v12431_v41 = vpop.f32.mrb[251].mxu0 }
0x5440   : > { %v8471_v0 = vsel %vm720_vm1, %v8406_v40, 0 }
0x5441   : > { %12439 = vmatpush3.bf16.msra.mxu0 %v8471_v0 }
0x5442   : > { %12450 = vmatprep.subr.bf16.mxu0 %v13063_v1 }
0x5501   : > { %v8202_v45 = vpop.f32.mrb[240].mxu1 }
0x5502   : > { %v14862_v6 = vadd.f32 %v8202_v45, %v14792_v24  ;;  %v12406_v46 = vpop.f32.mrb[241].mxu1  ;;  %v11016_v45 = vld [vmem:[%s15293_s15 + $0x28] ss:$0 sm:$0xff] }
0x5503   : > { %v8205_v47 = vpop.f32.mrb[242].mxu1 }
0x5504   : > { %v12407_v48 = vpop.f32.mrb[243].mxu1 }
0x5509   : > { %v8333_v51 = vpop.f32.mrb[244].mxu1 }
0x550a   : > { %v8334_v53 = vadd.f32 %v10985_v49, %v8333_v51  ;;  %v12422_v39 = vpop.f32.mrb[245].mxu1 }
0x550b   : > { %v8336_v54 = vpop.f32.mrb[246].mxu1 }
0x550c   : > { %v8405_v56 = vpack.c.bf16 %v8334_v53, %v8334_v53  ;;  %v12423_v31 = vpop.f32.mrb[247].mxu1 }
0x550e   : > { %v8411_v24 = vsel %vm1056_vm6, %v8405_v56, 0 }
0x550f   : > { %12433 = vmatpush3.bf16.xpose.msra.mxu1 %v8411_v24  ;;  %v12828_v24 = vld [vmem:[%s15292_s14 + $0x248] sm:$0xff]  }
0x5510   : > { %12444 = vmatprep.subr.bf16.mxu1 %v13063_v1 }
0x5516   : > { %12435 = vmatmul.mubr.msk.bf16.vlgmr.msra.gmra.mrb[248].mxu1 %vm1056_vm6, %v8404_v60 }
0x5517   : > { %12446 = vmatprep.mubr.msk.bf16.mxu1 %vm13064_vm0, %v13063_v1  ;;  %12445 = vmatpush3.bf16.msra.mxu1 %v8520_v16  ;;  %v12831_v16 = vld [vmem:[%s15292_s14 + $0x250] sm:$0xff]  }
0x5518   : > { %12458 = vmatprep.subr.bf16.mxu1 %v13063_v1 }
0x55e9   : > { %v8447_v63 = vpop.f32.mrb[248].mxu1 }
0x55ea   : > { %v8453_v2 = vmul.f32 0.35355338, %v8447_v63  ;;  %v12436_v4 = vpop.f32.mrb[249].mxu1 }
0x55eb   : > { %v8450_v62 = vpop.f32.mrb[250].mxu1 }
0x55ec   : > { %v12437_v7 = vpop.f32.mrb[251].mxu1  ;;  %v8454_v38 = vsel %vm13395_vm7, -1e+30, %v8453_v2  ;;  %v8585_v2 = vrot.slane %v14905_v29, %v13319_v27  ;;  %v8590_v62 = vrot.slane %v14905_v29, %v13613_v59  ;;  %v12830_v27 = vld [vmem:[%s15292_s14 + $0x2c8] sm:$0xff]   ;;  %v11007_v59 = vld [vmem:[%s15293_s15 + $0x24] ss:$0 sm:$0xff] }
0x55ed   : > { %v8455_v52 = vsel %vm1056_vm6, %v8454_v38, -inf }
0x55ee   : > { %8456 = vmax.xlane.f32.xlu0 %v8455_v52 }
0x567b   : > { %v8457_v8 = vpop.xlane.xlu0 %8456 }
0x567c   : > { %v8458_v11 = vsub.f32 %v8454_v38, %v8457_v8  ;;  %v12829_v8 = vld [vmem:[%s15292_s14 + $0x2c0] sm:$0xff]  }
0x567e   : > { %v8459_v12 = vmul.f32 1.442695, %v8458_v11 }
0x5680   : > { %12945 = vpow2.f32 %v8459_v12 }
0x568a   : > { %v12946_v13 = vpop.eup %12945 }
0x568b   : > { %v8461_v14 = vsel %vm1056_vm6, %v12946_v13, 0.0 }
0x568c   : > { %8462 = vadd.xlane.f32.xlu1 %v8461_v14 }
0x5719   : > { %v8463_v17 = vpop.xlane.xlu1 %8462 }
0x571a   : > { %12947 = vrcp.f32 %v8463_v17 }
0x5724   : > { %v12948_v21 = vpop.eup %12947 }
0x5725   : > { %v8465_v35 = vmul.f32 %v12948_v21, %v12946_v13 }
0x5727   : > { %v8466_v55 = vpack.c.bf16 %v8465_v35, %v8465_v35  ;;  %v11025_v35 = vld [vmem:[%s15293_s15 + $0x2c] ss:$0 sm:$0xff] }
0x5729   : > { %12441 = vmatmul.mubr.msk.bf16.vlgmr.msra.gmra.mrb[252].mxu0 %vm1056_vm6, %v8466_v55  ;;  %v12832_v55 = vld [vmem:[%s15292_s14 + $0x258] sm:$0xff]  }
0x572a   : > { %12454 = vmatprep.mubr.msk.bf16.mxu0 %vm13064_vm0, %v13063_v1  ;;  %12451 = vmatpush3.bf16.msra.mxu0 %v12827_v58 }
0x572b   : > { %12452 = vmatprep.subr.bf16.mxu0 %v13063_v1 }
0x572e   : > { %12453 = vmatpush3.bf16.msra.mxu0 %v12828_v24 }
0x572f   : > { %12466 = vmatprep.subr.bf16.mxu0 %v13063_v1 }
0x57fc   : > { %v8507_v50 = vpop.f32.mrb[252].mxu0 }
0x57fd   : > { %v8513_v18 = vpack.c.bf16 %v8507_v50, %v8507_v50  ;;  %v12442_v22 = vpop.f32.mrb[253].mxu0 }
0x57fe   : > { %v8510_v23 = vpop.f32.mrb[254].mxu0 }
0x57ff   : > { %v12443_v25 = vpop.f32.mrb[255].mxu0  ;;  %12447 = vmatmul.mubr.msk.bf16.vlgmr.msra.gmra.mrb[252].mxu1 %vm1056_vm6, %v8513_v18  ;;  %v12833_v23 = vld [vmem:[%s15292_s14 + $0x2d0] sm:$0xff]  }
0x5800   : > { %12459 = vmatpush3.bf16.msra.mxu1 %v12825_v43  ;;  %12462 = vmatprep.mubr.msk.bf16.mxu1 %vm13064_vm0, %v13063_v1 }
0x5801   : > { %12460 = vmatprep.subr.bf16.mxu1 %v13063_v1 }
0x5804   : > { %12461 = vmatpush3.bf16.msra.mxu1 %v12826_v26 }
0x5805   : > { %12474 = vmatprep.subr.bf16.mxu1 %v13063_v1 }
0x5807   : > { %12463 = vmatmul.mubr.msk.bf16.vlgmr.msra.gmra.mrb[0].mxu1 %vm879_vm5, %v14277_v61 }
0x5808   : > { %12476 = vmatprep.mubr.msk.bf16.mxu1 %vm13064_vm0, %v13063_v1 }
0x58d2   : > { %v8556_v33 = vpop.f32.mrb[252].mxu1 }
0x58d3   : > { %v8562_v5 = vadd.f32 %v8556_v33, %v14862_v6  ;;  %v12448_v34 = vpop.f32.mrb[253].mxu1  ;;  %v12834_v33 = vld [vmem:[%s15292_s14 + $0x2d8] sm:$0xff]  }
0x58d4   : > { %v8559_v37 = vpop.f32.mrb[254].mxu1 }
0x58d5   : > { %v8567_v40 = vadd.f32 %v8566_v32, %v8562_v5  ;;  %v12449_v41 = vpop.f32.mrb[255].mxu1 }
0x58d7   : > { %v8568_v0 = vadd.f32 %v8567_v40, %v14627_v3 }
0x58d9   : > { %v8569_v46 = vsel %vm879_vm5, %v8568_v0, 0.0 }
0x58da   : > { %8570 = vadd.xlane.f32.xlu0 %v8569_v46  ;;  %v8720_v47 = vpop.f32.mrb[0].mxu1 }
0x58db   : > { %v8721_v48 = vadd.f32 %v11016_v45, %v8720_v47  ;;  %v12464_v49 = vpop.f32.mrb[1].mxu1 }
0x58dc   : > { %v8723_v20 = vpop.f32.mrb[2].mxu1 }
0x58dd   : > { %v8792_v51 = vpack.c.bf16 %v8721_v48, %v8721_v48  ;;  %v12465_v53 = vpop.f32.mrb[3].mxu1  ;;  %v11055_v20 = vld [vmem:[%s15293_s15 + $0x2d] ss:$0 sm:$0xff] }
0x58df   : > { %v8798_v6 = vsel %vm1056_vm6, %v8792_v51, 0 }
0x58e0   : > { %12475 = vmatpush3.bf16.xpose.msra.mxu1 %v8798_v6 }
0x58e1   : > { %12486 = vmatprep.subr.bf16.mxu1 %v13063_v1 }
0x5967   : > { %v8571_v39 = vpop.xlane.xlu0 %8570 }
0x5968   : > { %v8572_v3 = vmul.f32 0.03125, %v8571_v39 }
0x596a   : > { %v8573_v54 = vsub.f32 %v8568_v0, %v8572_v3 }
0x596c   : > { %v8574_v56 = vmul.f32 %v8573_v54, %v8573_v54 }
0x596e   : > { %v8575_v31 = vsel %vm879_vm5, %v8574_v56, 0.0 }
0x596f   : > { %8576 = vadd.xlane.f32.xlu1 %v8575_v31 }
0x59fc   : > { %v8577_v36 = vpop.xlane.xlu1 %8576 }
0x59fd   : > { %v8578_v60 = vmul.f32 0.03125, %v8577_v36 }
0x59ff   : > { %v8579_v63 = vadd.f32 1e-05, %v8578_v60 }
0x5a01   : > { %12949 = vrsqrt.f32 %v8579_v63 }
0x5a0b   : > { %v12950_v4 = vpop.eup %12949 }
0x5a0c   : > { %v8581_v7 = vmul.f32 %v12950_v4, %v8573_v54 }
0x5a0e   : > { %v8586_v38 = vmul.f32 %v8585_v2, %v8581_v7 }
0x5a10   : > { %v14930_v52 = vadd.f32 %v8590_v62, %v8586_v38  ;;  %v12835_v62 = vld [vmem:[%s15292_s14 + $0x290] sm:$0xff]   ;;  %v12836_v38 = vld [vmem:[%s15292_s14 + $0x298] sm:$0xff]  }
0x5a12   : > { %v14937_v11 = vpack.c.bf16 %v14930_v52, %v14930_v52 }
0x5a14   : > { %12455 = vmatmul.mubr.msk.bf16.vlgmr.msra.gmra.mrb[0].mxu0 %vm879_vm5, %v14937_v11 }
0x5a15   : > { %12467 = vmatpush3.bf16.msra.mxu0 %v12829_v8  ;;  %12470 = vmatprep.mubr.msk.bf16.mxu0 %vm13064_vm0, %v13063_v1 }
0x5a16   : > { %12468 = vmatprep.subr.bf16.mxu0 %v13063_v1 }
0x5a19   : > { %12469 = vmatpush3.bf16.msra.mxu0 %v12830_v27 }
0x5a1a   : > { %12480 = vmatprep.subr.bf16.mxu0 %v13063_v1 }
0x5a1c   : > { %12471 = vmatmul.mubr.msk.bf16.vlgmr.msra.gmra.mrb[4].mxu0 %vm879_vm5, %v14277_v61 }
0x5a1d   : > { %12482 = vmatprep.mubr.msk.bf16.mxu0 %vm13064_vm0, %v13063_v1 }
0x5ae7   : > { %v8655_v12 = vpop.f32.mrb[0].mxu0 }
0x5ae8   : > { %v8656_v13 = vadd.f32 %v11007_v59, %v8655_v12  ;;  %v12456_v14 = vpop.f32.mrb[1].mxu0 }
0x5ae9   : > { %v8658_v30 = vpop.f32.mrb[2].mxu0 }
0x5aea   : > { %v8791_v17 = vpack.c.bf16 %v8656_v13, %v8656_v13  ;;  %v12457_v21 = vpop.f32.mrb[3].mxu0  ;;  %v11046_v13 = vld [vmem:[%s15293_s15 + $0x29] ss:$0 sm:$0xff] }
0x5aec   : > { %12477 = vmatmul.mubr.msk.bf16.vlgmr.msra.gmra.mrb[4].mxu1 %vm1056_vm6, %v8791_v17 }
0x5aed   : > { %12487 = vmatpush3.bf16.msra.mxu1 %v12831_v16  ;;  %12490 = vmatprep.mubr.msk.bf16.mxu1 %vm13064_vm0, %v13063_v1 }
0x5aee   : > { %12488 = vmatprep.subr.bf16.mxu1 %v13063_v1 }
0x5aef   : > { %v8785_v50 = vpop.f32.mrb[4].mxu0 }
0x5af0   : > { %v8786_v43 = vadd.f32 %v11025_v35, %v8785_v50  ;;  %v12472_v18 = vpop.f32.mrb[5].mxu0 }
0x5af1   : > { %v8788_v22 = vpop.f32.mrb[6].mxu0  ;;  %12489 = vmatpush3.bf16.msra.mxu1 %v12832_v55  ;;  %v11037_v55 = vld [vmem:[%s15293_s15 + $0x25] ss:$0 sm:$0xff] }
0x5af2   : > { %v8793_v25 = vpack.c.bf16 %v8786_v43, %v8786_v43  ;;  %v12473_v26 = vpop.f32.mrb[7].mxu0  ;;  %12502 = vmatprep.subr.bf16.mxu1 %v13063_v1 }
0x5af4   : > { %v8858_v32 = vsel %vm720_vm1, %v8793_v25, 0  ;;  %12491 = vmatmul.mubr.msk.bf16.vlgmr.msra.gmra.mrb[8].mxu1 %vm879_vm5, %v14937_v11 }
0x5af5   : > { %12481 = vmatpush3.bf16.msra.mxu0 %v8858_v32  ;;  %12503 = vmatpush3.bf16.msra.mxu1 %v12833_v23 }
0x5af6   : > { %12504 = vmatprep.subr.bf16.mxu1 %v13063_v1  ;;  %12506 = vmatprep.mubr.msk.bf16.mxu1 %vm13064_vm0, %v13063_v1 }
0x5af7   : > { %12494 = vmatprep.subr.bf16.mxu0 %v13063_v1 }
0x5af9   : > { %12505 = vmatpush3.bf16.msra.mxu1 %v12834_v33 }
0x5afa   : > { %12516 = vmatprep.subr.bf16.mxu1 %v13063_v1 }
0x5afc   : > { %12507 = vmatmul.mubr.msk.bf16.vlgmr.msra.gmra.mrb[12].mxu1 %vm879_vm5, %v14277_v61 }
0x5afd   : > { %12518 = vmatprep.mubr.msk.bf16.mxu1 %vm13064_vm0, %v13063_v1 }
0x5bbf   : > { %v8834_v5 = vpop.f32.mrb[4].mxu1 }
0x5bc0   : > { %v8840_v34 = vmul.f32 0.35355338, %v8834_v5  ;;  %v12478_v37 = vpop.f32.mrb[5].mxu1 }
0x5bc1   : > { %v8837_v40 = vpop.f32.mrb[6].mxu1 }
0x5bc2   : > { %v12479_v41 = vpop.f32.mrb[7].mxu1  ;;  %v8841_v0 = vsel %vm13395_vm7, -1e+30, %v8840_v34 }
0x5bc3   : > { %v8842_v45 = vsel %vm1056_vm6, %v8841_v0, -inf }
0x5bc4   : > { %8843 = vmax.xlane.f32.xlu0 %v8842_v45  ;;  %v11061_v45 = vld [vmem:[%s15294_s16 + $0x34] sm:$0xf] }
0x5bc7   : > { %v8962_v46 = vpop.f32.mrb[8].mxu1 }
0x5bc8   : > { %v12492_v47 = vpop.f32.mrb[9].mxu1  ;;  %v8963_v43 = vadd.f32 %v11037_v55, %v8962_v46  ;;  %v9214_v46 = vsel %vm720_vm1, %v11061_v45, 0 }
0x5bc9   : > { %v8965_v48 = vpop.f32.mrb[10].mxu1 }
0x5bca   : > { %v12493_v49 = vpop.f32.mrb[11].mxu1  ;;  %v9098_v18 = vpack.c.bf16 %v8963_v43, %v8963_v43  ;;  %v11069_v43 = vld [vmem:[%s15293_s15 + $0x26] ss:$0 sm:$0xff] }
0x5bcb   : > { %v11031_v49 = vld [vmem:[%s15294_s16 + $0x30] sm:$0xf] }
0x5bcf   : > { %v9092_v51 = vpop.f32.mrb[12].mxu1 }
0x5bd0   : > { %v9093_v53 = vadd.f32 %v11055_v20, %v9092_v51  ;;  %v12508_v6 = vpop.f32.mrb[13].mxu1 }
0x5bd1   : > { %v9095_v39 = vpop.f32.mrb[14].mxu1  ;;  %v12837_v6 = vld [vmem:[%s15292_s14 + $0x2a0] sm:$0xff]  }
0x5bd2   : > { %v9100_v3 = vpack.c.bf16 %v9093_v53, %v9093_v53  ;;  %v12509_v54 = vpop.f32.mrb[15].mxu1  ;;  %v9260_v53 = vsel %vm720_vm1, %v11031_v49, 0 }
0x5bd4   : > { %v9165_v56 = vsel %vm720_vm1, %v9100_v3, 0  ;;  %v12838_v3 = vld [vmem:[%s15292_s14 + $0x2a8] sm:$0xff]  }
0x5bd5   : > { %12517 = vmatpush3.bf16.msra.mxu1 %v9165_v56  ;;  %v12839_v56 = vld [vmem:[%s15292_s14 + $0x260] sm:$0xff]  }
0x5bd6   : > { %12528 = vmatprep.subr.bf16.mxu1 %v13063_v1 }
0x5c51   : > { %v8844_v31 = vpop.xlane.xlu0 %8843 }
0x5c52   : > { %v8845_v58 = vsub.f32 %v8841_v0, %v8844_v31 }
0x5c54   : > { %v8846_v24 = vmul.f32 1.442695, %v8845_v58 }
0x5c56   : > { %12951 = vpow2.f32 %v8846_v24 }
0x5c60   : > { %v12952_v36 = vpop.eup %12951 }
0x5c61   : > { %v8848_v60 = vsel %vm1056_vm6, %v12952_v36, 0.0 }
0x5c62   : > { %8849 = vadd.xlane.f32.xlu1 %v8848_v60  ;;  %v12840_v60 = vld [vmem:[%s15292_s14 + $0x268] sm:$0xff]  }
0x5cef   : > { %v8850_v63 = vpop.xlane.xlu1 %8849 }
0x5cf0   : > { %12953 = vrcp.f32 %v8850_v63 }
0x5cfa   : > { %v12954_v2 = vpop.eup %12953 }
0x5cfb   : > { %v8852_v4 = vmul.f32 %v12954_v2, %v12952_v36  ;;  %v12841_v2 = vld [vmem:[%s15292_s14 + $0x2e0] sm:$0xff]  }
0x5cfd   : > { %v8853_v7 = vpack.c.bf16 %v8852_v4, %v8852_v4 }
0x5cff   : > { %12483 = vmatmul.mubr.msk.bf16.vlgmr.msra.gmra.mrb[8].mxu0 %vm1056_vm6, %v8853_v7 }
0x5d00   : > { %12495 = vmatpush3.bf16.msra.mxu0 %v12835_v62  ;;  %12498 = vmatprep.mubr.msk.bf16.mxu0 %vm13064_vm0, %v13063_v1 }
0x5d01   : > { %12496 = vmatprep.subr.bf16.mxu0 %v13063_v1 }
0x5d04   : > { %12497 = vmatpush3.bf16.msra.mxu0 %v12836_v38  ;;  %v12842_v38 = vld [vmem:[%s15292_s14 + $0x2e8] sm:$0xff]  }
0x5d05   : > { %12510 = vmatprep.subr.bf16.mxu0 %v13063_v1 }
0x5d07   : > { %12499 = vmatmul.mubr.msk.bf16.vlgmr.msra.gmra.mrb[12].mxu0 %vm879_vm5, %v14277_v61 }
0x5d08   : > { %12512 = vmatprep.mubr.msk.bf16.mxu0 %vm13064_vm0, %v13063_v1 }
0x5dd2   : > { %v8894_v8 = vpop.f32.mrb[8].mxu0 }
0x5dd3   : > { %v12484_v27 = vpop.f32.mrb[9].mxu0  ;;  %v8900_v39 = vpack.c.bf16 %v8894_v8, %v8894_v8  ;;  %v11078_v8 = vld [vmem:[%s15293_s15 + $0x2a] ss:$0 sm:$0xff] }
0x5dd4   : > { %v8897_v59 = vpop.f32.mrb[10].mxu0 }
0x5dd5   : > { %v12485_v12 = vpop.f32.mrb[11].mxu0 }
0x5dda   : > { %v9027_v14 = vpop.f32.mrb[12].mxu0 }
0x5ddb   : > { %v9028_v30 = vadd.f32 %v11046_v13, %v9027_v14  ;;  %v12500_v16 = vpop.f32.mrb[13].mxu0 }
0x5ddc   : > { %v9030_v17 = vpop.f32.mrb[14].mxu0 }
0x5ddd   : > { %v9099_v21 = vpack.c.bf16 %v9028_v30, %v9028_v30  ;;  %v12501_v35 = vpop.f32.mrb[15].mxu0 }
0x5ddf   : > { %v9105_v50 = vsel %vm1056_vm6, %v9099_v21, 0 }
0x5de0   : > { %12511 = vmatpush3.bf16.xpose.msra.mxu0 %v9105_v50 }
0x5de1   : > { %12522 = vmatprep.subr.bf16.mxu0 %v13063_v1 }
0x5de7   : > { %12513 = vmatmul.mubr.msk.bf16.vlgmr.msra.gmra.mrb[16].mxu0 %vm1056_vm6, %v9098_v18 }
0x5de8   : > { %12524 = vmatprep.mubr.msk.bf16.mxu0 %vm13064_vm0, %v13063_v1  ;;  %12523 = vmatpush3.bf16.msra.mxu0 %v9214_v46 }
0x5de9   : > { %12534 = vmatprep.subr.bf16.mxu0 %v13063_v1 }
0x5eba   : > { %v9141_v22 = vpop.f32.mrb[16].mxu0 }
0x5ebb   : > { %v9147_v23 = vmul.f32 0.35355338, %v9141_v22  ;;  %v12514_v25 = vpop.f32.mrb[17].mxu0 }
0x5ebc   : > { %v9144_v26 = vpop.f32.mrb[18].mxu0 }
0x5ebd   : > { %v12515_v32 = vpop.f32.mrb[19].mxu0  ;;  %v9148_v33 = vsel %vm13395_vm7, -1e+30, %v9147_v23 }
0x5ebe   : > { %v9149_v5 = vsel %vm1056_vm6, %v9148_v33, -inf }
0x5ebf   : > { %9150 = vmax.xlane.f32.xlu0 %v9149_v5 }
0x5f4c   : > { %v9151_v34 = vpop.xlane.xlu0 %9150 }
0x5f4d   : > { %v9152_v37 = vsub.f32 %v9148_v33, %v9151_v34  ;;  %v11087_v33 = vld [vmem:[%s15293_s15 + $0x2e] ss:$0 sm:$0xff] }
0x5f4f   : > { %v9153_v40 = vmul.f32 1.442695, %v9152_v37 }
0x5f51   : > { %12955 = vpow2.f32 %v9153_v40 }
0x5f5b   : > { %v12956_v41 = vpop.eup %12955 }
0x5f5c   : > { %v9155_v0 = vsel %vm1056_vm6, %v12956_v41, 0.0 }
0x5f5d   : > { %9156 = vadd.xlane.f32.xlu1 %v9155_v0 }
0x5fea   : > { %v9157_v47 = vpop.xlane.xlu1 %9156 }
0x5feb   : > { %12957 = vrcp.f32 %v9157_v47 }
0x5ff5   : > { %v12958_v48 = vpop.eup %12957 }
0x5ff6   : > { %v9159_v20 = vmul.f32 %v12958_v48, %v12956_v41 }
0x5ff8   : > { %v9160_v51 = vpack.c.bf16 %v9159_v20, %v9159_v20 }
0x5ffa   : > { %12519 = vmatmul.mubr.msk.bf16.vlgmr.msra.gmra.mrb[16].mxu1 %vm1056_vm6, %v9160_v51 }
0x5ffb   : > { %12529 = vmatpush3.bf16.msra.mxu1 %v9260_v53  ;;  %12530 = vmatprep.mubr.msk.bf16.mxu1 %vm13064_vm0, %v13063_v1 }
0x5ffc   : > { %12542 = vmatprep.subr.bf16.mxu1 %v13063_v1 }
0x6002   : > { %12531 = vmatmul.mubr.msk.bf16.vlgmr.msra.gmra.mrb[20].mxu1 %vm1056_vm6, %v8900_v39 }
0x6003   : > { %12543 = vmatpush3.bf16.msra.mxu1 %v12837_v6  ;;  %12546 = vmatprep.mubr.msk.bf16.mxu1 %vm13064_vm0, %v13063_v1 }
0x6004   : > { %12544 = vmatprep.subr.bf16.mxu1 %v13063_v1 }
0x6007   : > { %12545 = vmatpush3.bf16.msra.mxu1 %v12838_v3 }
0x6008   : > { %12558 = vmatprep.subr.bf16.mxu1 %v13063_v1 }
0x600a   : > { %12547 = vmatmul.mubr.msk.bf16.vlgmr.msra.gmra.mrb[24].mxu1 %vm879_vm5, %v14277_v61 }
0x600b   : > { %12560 = vmatprep.mubr.msk.bf16.mxu1 %vm13064_vm0, %v13063_v1 }
0x60cd   : > { %v9201_v54 = vpop.f32.mrb[16].mxu1 }
0x60ce   : > { %v9207_v31 = vpack.c.bf16 %v9201_v54, %v9201_v54  ;;  %v12520_v58 = vpop.f32.mrb[17].mxu1 }
0x60cf   : > { %v9204_v24 = vpop.f32.mrb[18].mxu1 }
0x60d0   : > { %v12521_v36 = vpop.f32.mrb[19].mxu1  ;;  %12525 = vmatmul.mubr.msk.bf16.vlgmr.msra.gmra.mrb[20].mxu0 %vm1056_vm6, %v9207_v31  ;;  %v11093_v31 = vld [vmem:[%s15294_s16 + $0x38] sm:$0xf] }
0x60d1   : > { %12535 = vmatpush3.bf16.msra.mxu0 %v12839_v56  ;;  %12538 = vmatprep.mubr.msk.bf16.mxu0 %vm13064_vm0, %v13063_v1  ;;  %v9613_v58 = vsel %vm720_vm1, %v11093_v31, 0 }
0x60d2   : > { %12536 = vmatprep.subr.bf16.mxu0 %v13063_v1 }
0x60d5   : > { %v9296_v63 = vpop.f32.mrb[20].mxu1  ;;  %12537 = vmatpush3.bf16.msra.mxu0 %v12840_v60 }
0x60d6   : > { %v12532_v4 = vpop.f32.mrb[21].mxu1  ;;  %12550 = vmatprep.subr.bf16.mxu0 %v13063_v1 }
0x60d7   : > { %v9299_v62 = vpop.f32.mrb[22].mxu1  ;;  %v12844_v4 = vld [vmem:[%s15292_s14 + $0x278] sm:$0xff]  }
0x60d8   : > { %v12533_v7 = vpop.f32.mrb[23].mxu1  ;;  %12539 = vmatmul.mubr.msk.bf16.vlgmr.msra.gmra.mrb[24].mxu0 %vm879_vm5, %v14937_v11  ;;  %v12845_v62 = vld [vmem:[%s15292_s14 + $0x2f0] sm:$0xff]  }
0x60d9   : > { %12551 = vmatpush3.bf16.msra.mxu0 %v12841_v2  ;;  %12554 = vmatprep.mubr.msk.bf16.mxu0 %vm13064_vm0, %v13063_v1  ;;  %v12846_v7 = vld [vmem:[%s15292_s14 + $0x2f8] sm:$0xff]  }
0x60da   : > { %12552 = vmatprep.subr.bf16.mxu0 %v13063_v1 }
0x60dd   : > { %v9426_v27 = vpop.f32.mrb[24].mxu1  ;;  %12553 = vmatpush3.bf16.msra.mxu0 %v12842_v38  ;;  %v12847_v38 = vld [vmem:[%s15292_s14 + $0x2b0] sm:$0xff]  }
0x60de   : > { %v9427_v59 = vadd.f32 %v11078_v8, %v9426_v27  ;;  %v12548_v12 = vpop.f32.mrb[25].mxu1  ;;  %12564 = vmatprep.subr.bf16.mxu0 %v13063_v1 }
0x60df   : > { %v9429_v13 = vpop.f32.mrb[26].mxu1 }
0x60e0   : > { %v9498_v14 = vpack.c.bf16 %v9427_v59, %v9427_v59  ;;  %v12549_v30 = vpop.f32.mrb[27].mxu1  ;;  %12555 = vmatmul.mubr.msk.bf16.vlgmr.msra.gmra.mrb[28].mxu0 %vm879_vm5, %v14277_v61  ;;  %v12848_v13 = vld [vmem:[%s15292_s14 + $0x2b8] sm:$0xff]  }
0x60e1   : > { %12566 = vmatprep.mubr.msk.bf16.mxu0 %vm13064_vm0, %v13063_v1 }
0x60e2   : > { %v9504_v16 = vsel %vm1056_vm6, %v9498_v14, 0 }
0x60e3   : > { %12559 = vmatpush3.bf16.xpose.msra.mxu1 %v9504_v16 }
0x60e4   : > { %12570 = vmatprep.subr.bf16.mxu1 %v13063_v1 }
0x61a3   : > { %v9250_v17 = vpop.f32.mrb[20].mxu0 }
0x61a4   : > { %v15086_v21 = vadd.f32 %v9296_v63, %v9250_v17  ;;  %v12526_v35 = vpop.f32.mrb[21].mxu0  ;;  %v12843_v63 = vld [vmem:[%s15292_s14 + $0x270] sm:$0xff]  }
0x61a5   : > { %v9253_v55 = vpop.f32.mrb[22].mxu0  ;;  %v11118_v35 = vld [vmem:[%s15293_s15 + $0x2f] ss:$0 sm:$0xff] }
0x61a6   : > { %v12527_v50 = vpop.f32.mrb[23].mxu0 }
0x61ab   : > { %v9361_v18 = vpop.f32.mrb[24].mxu0 }
0x61ac   : > { %v9362_v22 = vadd.f32 %v11069_v43, %v9361_v18  ;;  %v12540_v23 = vpop.f32.mrb[25].mxu0 }
0x61ad   : > { %v9364_v25 = vpop.f32.mrb[26].mxu0 }
0x61ae   : > { %v9497_v26 = vpack.c.bf16 %v9362_v22, %v9362_v22  ;;  %v12541_v32 = vpop.f32.mrb[27].mxu0 }
0x61b0   : > { %12561 = vmatmul.mubr.msk.bf16.vlgmr.msra.gmra.mrb[28].mxu1 %vm1056_vm6, %v9497_v26 }
0x61b1   : > { %12572 = vmatprep.mubr.msk.bf16.mxu1 %vm13064_vm0, %v13063_v1  ;;  %12571 = vmatpush3.bf16.msra.mxu1 %v9613_v58 }
0x61b2   : > { %12584 = vmatprep.subr.bf16.mxu1 %v13063_v1 }
0x61b3   : > { %v9491_v5 = vpop.f32.mrb[28].mxu0 }
0x61b4   : > { %v9492_v34 = vadd.f32 %v11087_v33, %v9491_v5  ;;  %v12556_v37 = vpop.f32.mrb[29].mxu0 }
0x61b5   : > { %v9494_v40 = vpop.f32.mrb[30].mxu0 }
0x61b6   : > { %v9499_v41 = vpack.c.bf16 %v9492_v34, %v9492_v34  ;;  %v12557_v0 = vpop.f32.mrb[31].mxu0  ;;  %v11109_v34 = vld [vmem:[%s15293_s15 + $0x2b] ss:$0 sm:$0xff] }
0x61b8   : > { %v9564_v45 = vsel %vm720_vm1, %v9499_v41, 0 }
0x61b9   : > { %12565 = vmatpush3.bf16.msra.mxu0 %v9564_v45 }
0x61ba   : > { %12576 = vmatprep.subr.bf16.mxu0 %v13063_v1 }
0x6283   : > { %v9540_v46 = vpop.f32.mrb[28].mxu1 }
0x6284   : > { %v9546_v47 = vmul.f32 0.35355338, %v9540_v46  ;;  %v12562_v48 = vpop.f32.mrb[29].mxu1 }
0x6285   : > { %v9543_v49 = vpop.f32.mrb[30].mxu1 }
0x6286   : > { %v12563_v20 = vpop.f32.mrb[31].mxu1  ;;  %v9547_v51 = vsel %vm13395_vm7, -1e+30, %v9546_v47  ;;  %v11100_v47 = vld [vmem:[%s15293_s15 + $0x27] ss:$0 sm:$0xff] }
0x6287   : > { %v9548_v53 = vsel %vm1056_vm6, %v9547_v51, -inf }
0x6288   : > { %9549 = vmax.xlane.f32.xlu0 %v9548_v53 }
0x6315   : > { %v9550_v6 = vpop.xlane.xlu0 %9549 }
0x6316   : > { %v9551_v39 = vsub.f32 %v9547_v51, %v9550_v6 }
0x6318   : > { %v9552_v3 = vmul.f32 1.442695, %v9551_v39 }
0x631a   : > { %12959 = vpow2.f32 %v9552_v3 }
0x6324   : > { %v12960_v54 = vpop.eup %12959 }
0x6325   : > { %v9554_v56 = vsel %vm1056_vm6, %v12960_v54, 0.0 }
0x6326   : > { %9555 = vadd.xlane.f32.xlu1 %v9554_v56 }
0x63b3   : > { %v9556_v24 = vpop.xlane.xlu1 %9555 }
0x63b4   : > { %12961 = vrcp.f32 %v9556_v24 }
0x63be   : > { %v12962_v36 = vpop.eup %12961 }
0x63bf   : > { %v9558_v60 = vmul.f32 %v12962_v36, %v12960_v54 }
0x63c1   : > { %v9559_v2 = vpack.c.bf16 %v9558_v60, %v9558_v60  ;;  %v11124_v60 = vld [vmem:[%s15294_s16 + $0x3c] sm:$0xf] }
0x63c3   : > { %12567 = vmatmul.mubr.msk.bf16.vlgmr.msra.gmra.mrb[32].mxu0 %vm1056_vm6, %v9559_v2 }
0x63c4   : > { %12577 = vmatpush3.bf16.msra.mxu0 %v12843_v63  ;;  %12580 = vmatprep.mubr.msk.bf16.mxu0 %vm13064_vm0, %v13063_v1  ;;  %v9967_v63 = vsel %vm720_vm1, %v11124_v60, 0 }
0x63c5   : > { %12578 = vmatprep.subr.bf16.mxu0 %v13063_v1 }
0x63c8   : > { %12579 = vmatpush3.bf16.msra.mxu0 %v12844_v4 }
0x63c9   : > { %12592 = vmatprep.subr.bf16.mxu0 %v13063_v1 }
0x63cb   : > { %12581 = vmatmul.mubr.msk.bf16.vlgmr.msra.gmra.mrb[36].mxu0 %vm879_vm5, %v14937_v11 }
0x63cc   : > { %12593 = vmatpush3.bf16.msra.mxu0 %v12845_v62  ;;  %12596 = vmatprep.mubr.msk.bf16.mxu0 %vm13064_vm0, %v13063_v1 }
0x63cd   : > { %12594 = vmatprep.subr.bf16.mxu0 %v13063_v1 }
0x63d0   : > { %12595 = vmatpush3.bf16.msra.mxu0 %v12846_v7 }
0x63d1   : > { %12606 = vmatprep.subr.bf16.mxu0 %v13063_v1 }
0x63d3   : > { %12597 = vmatmul.mubr.msk.bf16.vlgmr.msra.gmra.mrb[40].mxu0 %vm879_vm5, %v14277_v61 }
0x63d4   : > { %12608 = vmatprep.mubr.msk.bf16.mxu0 %vm13064_vm0, %v13063_v1 }
0x6496   : > { %v9600_v11 = vpop.f32.mrb[32].mxu0 }
0x6497   : > { %v9606_v8 = vpack.c.bf16 %v9600_v11, %v9600_v11  ;;  %v12568_v27 = vpop.f32.mrb[33].mxu0 }
0x6498   : > { %v9603_v59 = vpop.f32.mrb[34].mxu0 }
0x6499   : > { %v12569_v12 = vpop.f32.mrb[35].mxu0  ;;  %12573 = vmatmul.mubr.msk.bf16.vlgmr.msra.gmra.mrb[32].mxu1 %vm1056_vm6, %v9606_v8  ;;  %v10013_v59 = vrot.slane %v14905_v29, %v13637_v15  ;;  %v12849_v15 = vld [vmem:[%s15295_s17 + $0x10] sm:$0xff]  }
0x649a   : > { %12585 = vmatpush3.bf16.msra.mxu1 %v12847_v38  ;;  %12588 = vmatprep.mubr.msk.bf16.mxu1 %vm13064_vm0, %v13063_v1 }
0x649b   : > { %12586 = vmatprep.subr.bf16.mxu1 %v13063_v1 }
0x649e   : > { %v9715_v14 = vpop.f32.mrb[36].mxu0  ;;  %12587 = vmatpush3.bf16.msra.mxu1 %v12848_v13 }
0x649f   : > { %v12582_v30 = vpop.f32.mrb[37].mxu0  ;;  %12600 = vmatprep.subr.bf16.mxu1 %v13063_v1 }
0x64a0   : > { %v9718_v16 = vpop.f32.mrb[38].mxu0 }
0x64a1   : > { %v12583_v17 = vpop.f32.mrb[39].mxu0  ;;  %12589 = vmatmul.mubr.msk.bf16.vlgmr.msra.gmra.mrb[36].mxu1 %vm879_vm5, %v14277_v61 }
0x64a2   : > { %12602 = vmatprep.mubr.msk.bf16.mxu1 %vm13064_vm0, %v13063_v1 }
0x64a6   : > { %v9845_v55 = vpop.f32.mrb[40].mxu0 }
0x64a7   : > { %v9846_v50 = vadd.f32 %v11118_v35, %v9845_v55  ;;  %v12598_v43 = vpop.f32.mrb[41].mxu0 }
0x64a8   : > { %v9848_v18 = vpop.f32.mrb[42].mxu0 }
0x64a9   : > { %v9853_v22 = vpack.c.bf16 %v9846_v50, %v9846_v50  ;;  %v12599_v23 = vpop.f32.mrb[43].mxu0 }
0x64ab   : > { %v9918_v25 = vsel %vm720_vm1, %v9853_v22, 0 }
0x64ac   : > { %12607 = vmatpush3.bf16.msra.mxu0 %v9918_v25 }
0x64ad   : > { %12618 = vmatprep.subr.bf16.mxu0 %v13063_v1 }
0x656c   : > { %v9649_v26 = vpop.f32.mrb[32].mxu1 }
0x656d   : > { %v9655_v61 = vadd.f32 %v9649_v26, %v15086_v21  ;;  %v12574_v32 = vpop.f32.mrb[33].mxu1  ;;  %v9716_v21 = vadd.f32 %v11100_v47, %v9715_v14 }
0x656e   : > { %v9652_v33 = vpop.f32.mrb[34].mxu1  ;;  %v10032_v32 = vrot.slane %v14905_v29, %v13660_v42 }
0x656f   : > { %v12575_v5 = vpop.f32.mrb[35].mxu1  ;;  %v9851_v49 = vpack.c.bf16 %v9716_v21, %v9716_v21 }
0x6570   : > { %v10037_v5 = vrot.slane %v14905_v29, %v13663_v44 }
0x6574   : > { %v9780_v37 = vpop.f32.mrb[36].mxu1 }
0x6575   : > { %v9781_v40 = vadd.f32 %v11109_v34, %v9780_v37  ;;  %v12590_v41 = vpop.f32.mrb[37].mxu1 }
0x6576   : > { %v9783_v0 = vpop.f32.mrb[38].mxu1 }
0x6577   : > { %v9852_v45 = vpack.c.bf16 %v9781_v40, %v9781_v40  ;;  %v12591_v46 = vpop.f32.mrb[39].mxu1  ;;  %v12851_v0 = vld [vmem:[%s15297_s19 + $0x10] sm:$0xff]  }
0x6578   : > { %v11131_v46 = vld [vmem:[%s15296_s18 + $0x1] ss:$0 sm:$0xff] }
0x6579   : > { %v9858_v48 = vsel %vm1056_vm6, %v9852_v45, 0  ;;  %v12852_v45 = vld [vmem:[%s15297_s19 + $0x18] sm:$0xff]  }
0x657a   : > { %12601 = vmatpush3.bf16.xpose.msra.mxu1 %v9858_v48 }
0x657b   : > { %12612 = vmatprep.subr.bf16.mxu1 %v13063_v1 }
0x6581   : > { %12603 = vmatmul.mubr.msk.bf16.vlgmr.msra.gmra.mrb[40].mxu1 %vm1056_vm6, %v9851_v49 }
0x6582   : > { %12614 = vmatprep.mubr.msk.bf16.mxu1 %vm13064_vm0, %v13063_v1  ;;  %12613 = vmatpush3.bf16.msra.mxu1 %v9967_v63 }
0x6583   : > { %12626 = vmatprep.subr.bf16.mxu1 %v13063_v1 }
0x6654   : > { %v9894_v20 = vpop.f32.mrb[40].mxu1 }
0x6655   : > { %v9900_v51 = vmul.f32 0.35355338, %v9894_v20  ;;  %v12604_v53 = vpop.f32.mrb[41].mxu1 }
0x6656   : > { %v9897_v6 = vpop.f32.mrb[42].mxu1 }
0x6657   : > { %v12605_v39 = vpop.f32.mrb[43].mxu1  ;;  %v9901_v3 = vsel %vm13395_vm7, -1e+30, %v9900_v51 }
0x6658   : > { %v9902_v54 = vsel %vm1056_vm6, %v9901_v3, -inf }
0x6659   : > { %9903 = vmax.xlane.f32.xlu0 %v9902_v54 }
0x66e6   : > { %v9904_v56 = vpop.xlane.xlu0 %9903 }
0x66e7   : > { %v9905_v31 = vsub.f32 %v9901_v3, %v9904_v56 }
0x66e9   : > { %v9906_v58 = vmul.f32 1.442695, %v9905_v31 }
0x66eb   : > { %12963 = vpow2.f32 %v9906_v58 }
0x66f5   : > { %v12964_v24 = vpop.eup %12963 }
0x66f6   : > { %v9908_v36 = vsel %vm1056_vm6, %v12964_v24, 0.0 }
0x66f7   : > { %9909 = vadd.xlane.f32.xlu1 %v9908_v36 }
0x6784   : > { %v9910_v10 = vpop.xlane.xlu1 %9909 }
0x6785   : > { %12965 = vrcp.f32 %v9910_v10 }
0x678f   : > { %v12966_v2 = vpop.eup %12965 }
0x6790   : > { %v9912_v4 = vmul.f32 %v12966_v2, %v12964_v24 }
0x6792   : > { %v9913_v62 = vpack.c.bf16 %v9912_v4, %v9912_v4 }
0x6794   : > { %12609 = vmatmul.mubr.msk.bf16.vlgmr.msra.gmra.mrb[44].mxu0 %vm1056_vm6, %v9913_v62 }
0x6795   : > { %12622 = vmatprep.mubr.msk.bf16.mxu0 %vm13064_vm0, %v13063_v1  ;;  %12619 = vmatpush3.bf16.msra.mxu0 %v12849_v15 }
0x6796   : > { %12620 = vmatprep.subr.bf16.mxu0 %v13063_v1 }
0x6867   : > { %v9954_v7 = vpop.f32.mrb[44].mxu0 }
0x6868   : > { %v9960_v11 = vpack.c.bf16 %v9954_v7, %v9954_v7  ;;  %v12610_v38 = vpop.f32.mrb[45].mxu0  ;;  %v10191_v7 = vrot.slane %v14905_v29, %v7134_v57 }
0x6869   : > { %v9957_v8 = vpop.f32.mrb[46].mxu0 }
0x686a   : > { %v12611_v27 = vpop.f32.mrb[47].mxu0  ;;  %12615 = vmatmul.mubr.msk.bf16.vlgmr.msra.gmra.mrb[44].mxu1 %vm1056_vm6, %v9960_v11  ;;  %v11142_v8 = vld [vmem:[%s15298_s20 + $0x18] ss:$0 sm:$0xff] }
0x686b   : > { %12630 = vmatprep.mubr.msk.bf16.mxu1 %vm13064_vm0, %v13063_v1  ;;  %12627 = vmatpush3.bf16.msra.mxu1 %v12851_v0 }
0x686c   : > { %12628 = vmatprep.subr.bf16.mxu1 %v13063_v1  ;;  %v10118_v1 = vrot.slane %v14905_v29, %v14598_v28 }
0x686f   : > { %12629 = vmatpush3.bf16.msra.mxu1 %v12852_v45 }
0x693d   : > { %v10003_v12 = vpop.f32.mrb[44].mxu1 }
0x693e   : > { %v10009_v13 = vadd.f32 %v10003_v12, %v9655_v61  ;;  %v12616_v14 = vpop.f32.mrb[45].mxu1 }
0x693f   : > { %v10006_v30 = vpop.f32.mrb[46].mxu1 }
0x6940   : > { %v10014_v16 = vadd.f32 %v10013_v59, %v10009_v13  ;;  %v12617_v17 = vpop.f32.mrb[47].mxu1 }
0x6942   : > { %v10015_v35 = vadd.f32 %v10014_v16, %v14930_v52  ;;  %v12850_v52 = vld [vmem:[%s15295_s17 + $0x18] sm:$0xff]  }
0x6943   : > { %12621 = vmatpush3.bf16.msra.mxu0 %v12850_v52 }
0x6944   : > { %v10016_v55 = vsel %vm879_vm5, %v10015_v35, 0.0 }
0x6945   : > { %10017 = vadd.xlane.f32.xlu0 %v10016_v55  ;;  %v12978_v55 = vld [vmem:[%s15284_s6] sm:$0xff] }
0x6946   : > { %v10224_v15 = vrot.slane %v12978_v55, %v14598_v28 }
0x69d2   : > { %v10018_v50 = vpop.xlane.xlu0 %10017 }
0x69d3   : > { %v10019_v43 = vmul.f32 0.03125, %v10018_v50  ;;  %v10214_v50 = vrot.slane %v12978_v55, %v13660_v42 }
0x69d5   : > { %v10020_v18 = vsub.f32 %v10015_v35, %v10019_v43 }
0x69d7   : > { %v10021_v22 = vmul.f32 %v10020_v18, %v10020_v18 }
0x69d9   : > { %v10022_v23 = vsel %vm879_vm5, %v10021_v22, 0.0  ;;  %v10219_v22 = vrot.slane %v12978_v55, %v13663_v44 }
0x69da   : > { %10023 = vadd.xlane.f32.xlu1 %v10022_v23 }
0x6a67   : > { %v10024_v25 = vpop.xlane.xlu1 %10023 }
0x6a68   : > { %v10025_v26 = vmul.f32 0.03125, %v10024_v25 }
0x6a6a   : > { %v10026_v61 = vadd.f32 1e-05, %v10025_v26 }
0x6a6c   : > { %12967 = vrsqrt.f32 %v10026_v61  ;;  %v10230_v61 = vstv %s11143_s0  ;;  %s13000_s0 = scalar_lea.vmem %s12999_s24, 32 }
0x6a6d   : > { %p13002_p0 = scmp.lt.s32.totalorder %s13000_s0, %s12994_s1 }
0x6a6f   : > { %p13003_p1 = por %p13002_p0, %p13001_p13 }
0x6a71   : > { %p13004_p2 = pnand %p13003_p1, %p12997_p12 }
0x6a76   : > { %v12968_v33 = vpop.eup %12967 }
0x6a77   : > { %v10028_v34 = vmul.f32 %v12968_v33, %v10020_v18 }
0x6a79   : > { %v10033_v37 = vmul.f32 %v10032_v32, %v10028_v34 }
0x6a7b   : > { %v10038_v40 = vadd.f32 %v10037_v5, %v10033_v37 }
0x6a7d   : > { %v10039_v41 = vpack.c.bf16 %v10038_v40, %v10038_v40 }
0x6a7f   : > { %12623 = vmatmul.mubr.msk.bf16.vlgmr.msra.gmra.mrb[48].mxu0 %vm879_vm5, %v10039_v41 }
0x6b52   : > { %v10102_v47 = vpop.f32.mrb[48].mxu0 }
0x6b53   : > { %v10103_v48 = vadd.f32 %v11131_v46, %v10102_v47  ;;  %v12624_v21 = vpop.f32.mrb[49].mxu0 }
0x6b54   : > { %v10105_v49 = vpop.f32.mrb[50].mxu0 }
0x6b55   : > { %v10108_v20 = vmax.f32 %v10103_v48, 0.0  ;;  %v12625_v51 = vpop.f32.mrb[51].mxu0 }
0x6b57   : > { %v10109_v53 = vpack.c.bf16 %v10108_v20, %v10108_v20 }
0x6b59   : > { %12631 = vmatmul.mubr.msk.bf16.vlgmr.msra.gmra.mrb[48].mxu1 %vm879_vm5, %v10109_v53 }
0x6c2c   : > { %v10168_v6 = vpop.f32.mrb[48].mxu1 }
0x6c2d   : > { %v10169_v39 = vadd.f32 %v10168_v6, %v10118_v1  ;;  %v12632_v3 = vpop.f32.mrb[49].mxu1 }
0x6c2e   : > { %v10171_v54 = vpop.f32.mrb[50].mxu1 }
0x6c2f   : > { %v12633_v56 = vpop.f32.mrb[51].mxu1  ;;  %v10174_v31 = vadd.f32 %v10169_v39, %v10038_v40  ;;  %v10245_v40 = vsub.s32 %v13391_v9, %v13306_v19 }
0x6c31   : > { %v10175_v58 = vsel %vm879_vm5, %v10174_v31, 0.0 }
0x6c32   : > { %10176 = vadd.xlane.f32.xlu0 %v10175_v58 }
0x6cbf   : > { %v10177_v24 = vpop.xlane.xlu0 %10176 }
0x6cc0   : > { %v10178_v36 = vmul.f32 0.03125, %v10177_v24 }
0x6cc2   : > { %v10179_v60 = vsub.f32 %v10174_v31, %v10178_v36 }
0x6cc4   : > { %v10180_v63 = vmul.f32 %v10179_v60, %v10179_v60 }
0x6cc6   : > { %v10181_v10 = vsel %vm879_vm5, %v10180_v63, 0.0 }
0x6cc7   : > { %10182 = vadd.xlane.f32.xlu1 %v10181_v10 }
0x6d54   : > { %v10183_v2 = vpop.xlane.xlu1 %10182 }
0x6d55   : > { %v10184_v4 = vmul.f32 0.03125, %v10183_v2 }
0x6d57   : > { %v10185_v62 = vadd.f32 1e-05, %v10184_v4 }
0x6d59   : > { %12969 = vrsqrt.f32 %v10185_v62 }
0x6d63   : > { %v12970_v11 = vpop.eup %12969 }
0x6d64   : > { %v10187_v38 = vmul.f32 %v12970_v11, %v10179_v60 }
0x6d66   : > { %v10192_v27 = vmul.f32 %v10191_v7, %v10187_v38 }
0x6d68   : > { %v10197_v59 = vadd.f32 %v11142_v8, %v10192_v27 }
0x6d6a   : > { %v10198_v12 = vsel %vm879_vm5, %v10197_v59, 0.0 }
0x6d6b   : > { %10199 = vadd.xlane.f32.xlu0 %v10198_v12 }
0x6df8   : > { %v10200_v13 = vpop.xlane.xlu0 %10199 }
0x6df9   : > { %v10201_v14 = vmul.f32 0.03125, %v10200_v13 }
0x6dfb   : > { %v10202_v30 = vsub.f32 %v10197_v59, %v10201_v14 }
0x6dfd   : > { %v10203_v16 = vmul.f32 %v10202_v30, %v10202_v30 }
0x6dff   : > { %v10204_v17 = vsel %vm879_vm5, %v10203_v16, 0.0 }
0x6e00   : > { %10205 = vadd.xlane.f32.xlu1 %v10204_v17 }
0x6e8d   : > { %v10206_v35 = vpop.xlane.xlu1 %10205 }
0x6e8e   : > { %v10207_v57 = vmul.f32 0.03125, %v10206_v35 }
0x6e90   : > { %v10208_v29 = vadd.f32 1e-05, %v10207_v57 }
0x6e92   : > { %12971 = vrsqrt.f32 %v10208_v29 }
0x6e9c   : > { %v12972_v43 = vpop.eup %12971 }
0x6e9d   : > { %v10210_v18 = vmul.f32 %v12972_v43, %v10202_v30 }
0x6e9f   : > { %v10215_v23 = vmul.f32 %v10214_v50, %v10210_v18 }
0x6ea1   : > { %v10220_v52 = vadd.f32 %v10219_v22, %v10215_v23 }
0x6ea3   : > { %v10225_v25 = vmul.f32 %v10224_v15, %v10220_v52 }
0x6ea5   : > { %v10226_v26 = vsel %vm879_vm5, %v10225_v25, 0.0 }
0x6ea6   : > { %10227 = vadd.xlane.f32.xlu0 %v10226_v26 }
0x6f33   : > { %v10228_v32 = vpop.xlane.xlu0 %10227 }
0x6f34   : > { %v10231_v33 = vadd.f32 %v10230_v61, %v10228_v32 }
0x6f36   : > { %v10232_v5 = vand.u32 2147483647, %v10231_v33  ;;  %vm10236_vm8 = vcmp.ge.f32.partialorder %v10231_v33, 0.0 }
0x6f38   : > { %v10233_v42 = vsub.f32 0.0, %v10232_v5 }
0x6f3a   : > { %v10234_v34 = vmul.f32 1.442695, %v10233_v42 }
0x6f3c   : > { %12973 = vpow2.f32 %v10234_v34 }
0x6f46   : > { %v12974_v37 = vpop.eup %12973 }
0x6f47   : > { %v10237_v44 = vadd.f32 1.0, %v12974_v37 }
0x6f49   : > { %12975 = vrcp.f32 %v10237_v44 }
0x6f53   : > { %v12976_v28 = vpop.eup %12975 }
0x6f54   : > { %v10240_v41 = vmul.f32 %v12976_v28, %v12974_v37 }
0x6f56   : > { %v10241_v0 = vsel %vm10236_vm8, %v12976_v28, %v10240_v41 }
0x6f57   : > { %v10246_v45 = vrot.slane %v10241_v0, %v10245_v40 }
0x6f59   : > { %10249 = vst.msk [vmem:[%s673_s2] sm:$0x1] %vm10248_vm9, %v10246_v45 }
0x6f5a   : > { %13007 = shalt.err (!%p13004_p2)
}
0x6f5b   : > { %s13008_s23 = scalar_lea.hbm %s15236_s4, 16  ;;  %s13012_s5 = scalar_lea.hbm %s15339_s28, 32 }
0x6f5c   : > { %p13009_p3 = scmp.ne.s32.totalorder %s15236_s4, %s13008_s23  ;;  %p13013_p8 = scmp.lt.u32.totalorder %s15236_s4, %s15339_s28 }
0x6f5d   : > { %p13014_p9 = scmp.lt.u32.totalorder %s13012_s5, %s13008_s23  ;;  %p13016_p11 = scmp.lt.u32.totalorder %s13008_s23, %s15236_s4 }
0x6f5e   : > { %p13010_p4 = pnand %p13009_p3, %p13214_p5 }
0x6f5f   : > { %p13015_p10 = por %p13014_p9, %p13013_p8 }
0x6f60   : > { %p13011_p7 = pneg %p13010_p4 }
0x6f61   : > { %p13017_p12 = por %p13016_p11, %p13015_p10 }
0x6f63   : > { %p13018_p13 = pnand %p13017_p12, %p13011_p7 }
0x6f65   : > { %13021 = shalt.err (!%p13018_p13)
}
0x6f66   : > { %12638 = dma.vmem_to_hbm [thread:$0]  (%p13214_p5), %s15238_s27, 16, %s15236_s4, %s10251_s26  }
0x6f67 PF: > { %s15340_s1 = sld [smem:[#allocation10_spill]]  ;;  %s15341_s24 = sld [smem:[#allocation8_spill]] }
0x6f6d   : > { %p12650_p0 = scmp.ge.s32.totalorder %s15340_s1, 2  ;;  %s10275_s21 = sand.u32 1, %s15341_s24  }
0x6f6e   : > { %s10276_s2 = scalar_lea.sflag [#allocation3], %s10275_s21 }
0x6f6f   : > { %p12645_p1 = pnand %p12650_p0, %p13218_p6 }
0x6f71   : > { %13043 = dma.done.wait (!%p12645_p1), %s10276_s2, 16  }
0x6f72   : > { %13045 = vsyncadd (!%p12645_p1), %s10276_s2, 4294967280  ;;  %s15343_s27 = sld [smem:[#allocation11_spill]]  ;;  %s15344_s23 = sld [smem:[#allocation9_spill]] }
0x6f73   : > { %s15345_s26 = sld [smem:[#allocation12_spill]]  ;;  %s15346_s2 = smov %s13052_s25 }
0x6f78   : > { %p32_p2 = scmp.ge.s32.totalorder %s15343_s27, 4   ;;  %s15347_s25 = smov %s15344_s23 }
0x6f7a   :  { %34 = sbr.rel (!%p32_p2) target bundleno = 12 (0xc), region = 317 }
0x6f81   :  { %10280 = vsyncpa [#allocation3], 1 }
0x6f82   :  { %10282 = vsyncpa [#allocation3 + $0x1], 1 }
0x6f83   :  { %10283 = vsyncpa [#allocation4], 1 }
0x6f84   :  { %10285 = vsyncpa [#allocation4 + $0x1], 1 }

</bundles_post_ra>
